<compile_context>
chip_gen: v7x
topology: tpu7x:2x2x1
jax: 0.10.0
libtpu: 0.0.40
codegen_flags: <defaults>
</compile_context>

<pallas_src>
import functools

import jax
import jax.numpy as jnp
from jax.experimental import pallas as pl
from jax.experimental.pallas import tpu as pltpu

LEAK = 0.2
BN_EPS = 1e-5


# ----------------------------- Pallas kernels ------------------------------

def _conv_act_kernel(p_ref, w_ref, o_ref, *, act):
    # bf16 patches [tm, K] @ bf16 weights [K, tn] on the MXU, f32 accumulate,
    # fused activation epilogue in f32.
    acc = jnp.dot(p_ref[...], w_ref[...], preferred_element_type=jnp.float32)
    if act == "leaky":
        acc = jnp.where(acc > 0, acc, LEAK * acc)
    elif act == "sigmoid":
        acc = pl.reciprocal(1.0 + jnp.exp(-acc), approx=True)
    o_ref[...] = acc


def _conv_bn_lrelu_kernel(p_ref, w_ref, g_ref, b_ref, o_ref, *, inv_m):
    # Conv matmul + fused training-mode BatchNorm + LeakyReLU.
    # The full M extent lives in this block, so per-channel batch statistics are
    # computed directly on the f32 accumulator (centered sum of squares -> no
    # E[x^2]-E[x]^2 cancellation), and the result is written to HBM exactly once.
    acc = jnp.dot(p_ref[...], w_ref[...], preferred_element_type=jnp.float32)  # (M, tn)
    mean = jnp.sum(acc, axis=0, keepdims=True) * inv_m                         # (1, tn)
    centered = acc - mean
    var = jnp.sum(centered * centered, axis=0, keepdims=True) * inv_m          # biased var
    scale = g_ref[...] * jax.lax.rsqrt(var + BN_EPS)
    y = centered * scale + b_ref[...]
    o_ref[...] = jnp.where(y > 0, y, LEAK * y)


# ----------------------------- Pallas wrappers ------------------------------

def _cout_tile(cout):
    return 128 if cout % 128 == 0 else cout


def _m_tile(m):
    if m <= 512:
        return m
    for t in (512, 256, 128, 64, 32, 16, 8):
        if m % t == 0:
            return t
    return m


def conv_matmul(patches, w_mat, act):
    M, K = patches.shape
    Cout = w_mat.shape[1]
    tn = _cout_tile(Cout)
    tm = _m_tile(M)
    return pl.pallas_call(
        functools.partial(_conv_act_kernel, act=act),
        out_shape=jax.ShapeDtypeStruct((M, Cout), jnp.float32),
        grid=(M // tm, Cout // tn),
        in_specs=[
            pl.BlockSpec((tm, K), lambda i, j: (i, 0)),
            pl.BlockSpec((K, tn), lambda i, j: (0, j)),
        ],
        out_specs=pl.BlockSpec((tm, tn), lambda i, j: (i, j)),
        compiler_params=pltpu.CompilerParams(
            dimension_semantics=("parallel", "parallel")),
    )(patches, w_mat)


def conv_bn_lrelu_matmul(patches, w_mat, gamma, beta):
    M, K = patches.shape
    Cout = w_mat.shape[1]
    tn = _cout_tile(Cout)
    # TODO(synk): M is kept as one block so BN stats fuse into the conv epilogue; for
    # very large batches (v7x 64 MiB VMEM) tile M with a reduction grid axis + pl.when
    # init/finalize (two-pass stats) instead.
    return pl.pallas_call(
        functools.partial(_conv_bn_lrelu_kernel, inv_m=1.0 / M),
        out_shape=jax.ShapeDtypeStruct((M, Cout), jnp.float32),
        grid=(Cout // tn,),
        in_specs=[
            pl.BlockSpec((M, K), lambda j: (0, 0)),
            pl.BlockSpec((K, tn), lambda j: (0, j)),
            pl.BlockSpec((1, tn), lambda j: (0, j)),
            pl.BlockSpec((1, tn), lambda j: (0, j)),
        ],
        out_specs=pl.BlockSpec((M, tn), lambda j: (0, j)),
        compiler_params=pltpu.CompilerParams(
            dimension_semantics=("parallel",)),
    )(patches, w_mat, gamma.reshape(1, -1), beta.reshape(1, -1))


# ----------------------------- JAX glue (im2col, NHWC) ----------------------

def im2col_nhwc(x, kh, kw, stride, pad):
    """x: (N, H, W, C)  ->  patches (N*Ho*Wo, kh*kw*C), K index = (i*kw + j)*C + c.

    No transposes: rows are already in (n, ho, wo) order and C stays lane-minor,
    matching w.transpose(2, 3, 1, 0).reshape(-1, Cout).
    """
    N, H, W, C = x.shape
    if pad:
        x = jnp.pad(x, ((0, 0), (pad, pad), (pad, pad), (0, 0)))
    Ho = (H + 2 * pad - kh) // stride + 1
    Wo = (W + 2 * pad - kw) // stride + 1
    taps = []
    for i in range(kh):
        for j in range(kw):
            taps.append(x[:, i:i + stride * Ho:stride, j:j + stride * Wo:stride, :])
    p = jnp.stack(taps, axis=3)                       # (N, Ho, Wo, kh*kw, C)
    p = p.reshape(N * Ho * Wo, kh * kw * C)
    return p, Ho, Wo
    # TODO(synk): longer-term, replace the XLA-side im2col materialization with
    # in-kernel tap accumulation (K grid axis over the 16 shifted slices).


def _w_to_mat(w):
    # PyTorch (Cout, Cin, kh, kw) -> (kh*kw*Cin, Cout), bf16 for the MXU.
    return w.transpose(2, 3, 1, 0).reshape(-1, w.shape[0]).astype(jnp.bfloat16)


# ----------------------------- Model -----------------------------

def conv_lrelu_block(x_nhwc, w, stride, pad):
    p, Ho, Wo = im2col_nhwc(x_nhwc.astype(jnp.bfloat16), 4, 4, stride, pad)
    out = conv_matmul(p, _w_to_mat(w), "leaky")
    return out.reshape(x_nhwc.shape[0], Ho, Wo, w.shape[0])


def conv_bn_lrelu_block(x_nhwc, w, gamma, beta, stride, pad):
    p, Ho, Wo = im2col_nhwc(x_nhwc.astype(jnp.bfloat16), 4, 4, stride, pad)
    out = conv_bn_lrelu_matmul(p, _w_to_mat(w), gamma, beta)
    return out.reshape(x_nhwc.shape[0], Ho, Wo, w.shape[0])


def discriminator_forward(x_nchw, params):
    x = jnp.transpose(x_nchw, (0, 2, 3, 1))                                     # NCHW -> NHWC once
    h = conv_lrelu_block(x, params["w1"], 2, 1)                                 # (N,16,16,128)
    h = conv_bn_lrelu_block(h, params["w2"], params["g2"], params["b2"], 2, 1)  # (N, 8, 8,256)
    h = conv_bn_lrelu_block(h, params["w3"], params["g3"], params["b3"], 2, 1)  # (N, 4, 4,512)
    # Final 4x4 valid conv, Cout=1: pad output channels to 128 lanes, slice col 0.
    p, _, _ = im2col_nhwc(h.astype(jnp.bfloat16), 4, 4, 1, 0)                   # (N, 8192)
    wm = _w_to_mat(params["w4"])                                                # (8192, 1)
    wm = jnp.pad(wm, ((0, 0), (0, 128 - wm.shape[1])))                          # (8192, 128)
    out = conv_matmul(p, wm, "sigmoid")                                         # (N, 128)
    return out[:, 0]                                                            # == .view(-1,1).squeeze(1)


def init_params(key):
    k1, k2, k3, k4 = jax.random.split(key, 4)
    return {
        "w1": 0.02 * jax.random.normal(k1, (128, 1, 4, 4), jnp.float32),
        "w2": 0.02 * jax.random.normal(k2, (256, 128, 4, 4), jnp.float32),
        "w3": 0.02 * jax.random.normal(k3, (512, 256, 4, 4), jnp.float32),
        "w4": 0.02 * jax.random.normal(k4, (1, 512, 4, 4), jnp.float32),
        "g2": jnp.ones((256,), jnp.float32),
        "b2": jnp.zeros((256,), jnp.float32),
        "g3": jnp.ones((512,), jnp.float32),
        "b3": jnp.zeros((512,), jnp.float32),
    }


if __name__ == "__main__":
    key = jax.random.PRNGKey(0)
    pkey, xkey = jax.random.split(key)
    params = init_params(pkey)
    # Input: NCHW, batch=2, channels=1, 32x32 (the stride pattern requires 32x32 -> 1x1).
    x = jax.random.normal(xkey, (2, 1, 32, 32), jnp.float32)

    fwd = jax.jit(discriminator_forward)
    out = jax.block_until_ready(fwd(x, params))

    assert out.shape == (2,), out.shape
    assert bool(jnp.all(jnp.isfinite(out)))
    assert bool(jnp.all((out >= 0.0) & (out <= 1.0 + 1e-3)))
    print("KERNEL_OK")
</pallas_src>

<mosaic_0001>
module attributes {stable_mosaic.version = 11 : i64} {
  func.func @_conv_act_kernel(%arg0: i32, %arg1: i32, %arg2: memref<512x16xbf16, #tpu.memory_space<vmem>>, %arg3: memref<16x128xbf16, #tpu.memory_space<vmem>>, %arg4: memref<512x128xf32, #tpu.memory_space<vmem>>) attributes {dimension_semantics = [#tpu.dimension_semantics<parallel>, #tpu.dimension_semantics<parallel>], iteration_bounds = array<i64: 1, 1>, scalar_prefetch = 0 : i64, scratch_operands = 0 : i64, tpu.core_type = #tpu.core_type<tc>, window_params = [{transform_indices = @transform_0, window_bounds = array<i64: 512, 16>}, {transform_indices = @transform_1, window_bounds = array<i64: 16, 128>}, {transform_indices = @transform_2, window_bounds = array<i64: 512, 128>}]} {
    %c0 = arith.constant 0 : index
    %c0_0 = arith.constant 0 : index
    %0 = vector.load %arg2[%c0, %c0_0] : memref<512x16xbf16, #tpu.memory_space<vmem>>, vector<512x16xbf16>
    %c0_1 = arith.constant 0 : index
    %c0_2 = arith.constant 0 : index
    %1 = vector.load %arg3[%c0_1, %c0_2] : memref<16x128xbf16, #tpu.memory_space<vmem>>, vector<16x128xbf16>
    %cst = arith.constant dense<0.000000e+00> : vector<512x128xf32>
    %2 = tpu.matmul %0, %1, %cst {dimension_numbers = #tpu.dot_dimension_numbers<[1], [0], [0], [1], [0, 0, 1, 1], [], []>} : vector<512x16xbf16>, vector<16x128xbf16>, vector<512x128xf32> -> vector<512x128xf32>
    %cst_3 = arith.constant 0.000000e+00 : f32
    %3 = vector.broadcast %cst_3 : f32 to vector<512x128xf32>
    %4 = arith.cmpf ogt, %2, %3 : vector<512x128xf32>
    %cst_4 = arith.constant 2.000000e-01 : f32
    %5 = vector.broadcast %cst_4 : f32 to vector<512x128xf32>
    %6 = arith.mulf %5, %2 : vector<512x128xf32>
    %7 = arith.select %4, %2, %6 : vector<512x128xi1>, vector<512x128xf32>
    %c0_5 = arith.constant 0 : index
    %c0_6 = arith.constant 0 : index
    %8 = vector.load %arg4[%c0_5, %c0_6] : memref<512x128xf32, #tpu.memory_space<vmem>>, vector<512x128xf32>
    tpu.vector_store %arg4[%c0_5, %c0_6], %7 {strides = array<i32>} : memref<512x128xf32, #tpu.memory_space<vmem>>, vector<512x128xf32>,
    return
  }
  func.func @transform_0(%arg0: i32, %arg1: i32) -> (i32, i32) {
    %c0_i32 = arith.constant 0 : i32
    %c0_i32_0 = arith.constant 0 : i32
    return %arg0, %c0_i32 : i32, i32
  }
  func.func @transform_1(%arg0: i32, %arg1: i32) -> (i32, i32) {
    %c0_i32 = arith.constant 0 : i32
    %c0_i32_0 = arith.constant 0 : i32
    return %c0_i32, %arg1 : i32, i32
  }
  func.func @transform_2(%arg0: i32, %arg1: i32) -> (i32, i32) {
    %c0_i32 = arith.constant 0 : i32
    return %arg0, %arg1 : i32, i32
  }
}

module attributes {stable_mosaic.version = 11 : i64} {
  func.func @_conv_bn_lrelu_kernel(%arg0: i32, %arg1: memref<128x2048xbf16, #tpu.memory_space<vmem>>, %arg2: memref<2048x128xbf16, #tpu.memory_space<vmem>>, %arg3: memref<1x128xf32, #tpu.memory_space<vmem>>, %arg4: memref<1x128xf32, #tpu.memory_space<vmem>>, %arg5: memref<128x128xf32, #tpu.memory_space<vmem>>) attributes {dimension_semantics = [#tpu.dimension_semantics<parallel>], iteration_bounds = array<i64: 2>, scalar_prefetch = 0 : i64, scratch_operands = 0 : i64, tpu.core_type = #tpu.core_type<tc>, window_params = [{pipeline_mode = #tpu.pipeline_mode<synchronous>, transform_indices = @transform_0, window_bounds = array<i64: 128, 2048>}, {transform_indices = @transform_1, window_bounds = array<i64: 2048, 128>}, {transform_indices = @transform_2, window_bounds = array<i64: 1, 128>}, {transform_indices = @transform_3, window_bounds = array<i64: 1, 128>}, {transform_indices = @transform_4, window_bounds = array<i64: 128, 128>}]} {
    %c0 = arith.constant 0 : index
    %c0_0 = arith.constant 0 : index
    %0 = vector.load %arg1[%c0, %c0_0] : memref<128x2048xbf16, #tpu.memory_space<vmem>>, vector<128x2048xbf16>
    %c0_1 = arith.constant 0 : index
    %c0_2 = arith.constant 0 : index
    %1 = vector.load %arg2[%c0_1, %c0_2] : memref<2048x128xbf16, #tpu.memory_space<vmem>>, vector<2048x128xbf16>
    %cst = arith.constant dense<0.000000e+00> : vector<128x128xf32>
    %2 = tpu.matmul %0, %1, %cst {dimension_numbers = #tpu.dot_dimension_numbers<[1], [0], [0], [1], [0, 0, 1, 1], [], []>} : vector<128x2048xbf16>, vector<2048x128xbf16>, vector<128x128xf32> -> vector<128x128xf32>
    %cst_3 = arith.constant dense<0.000000e+00> : vector<128xf32>
    %3 = vector.multi_reduction <add>, %2, %cst_3 [0] : vector<128x128xf32> to vector<128xf32>
    %4 = vector.shape_cast %3 : vector<128xf32> to vector<1x128xf32>
    %cst_4 = arith.constant 7.812500e-03 : f32
    %5 = vector.broadcast %cst_4 : f32 to vector<1x128xf32>
    %6 = arith.mulf %4, %5 : vector<1x128xf32>
    %7 = vector.broadcast %6 : vector<1x128xf32> to vector<128x128xf32>
    %8 = arith.subf %2, %7 : vector<128x128xf32>
    %9 = arith.mulf %8, %8 : vector<128x128xf32>
    %cst_5 = arith.constant dense<0.000000e+00> : vector<128xf32>
    %10 = vector.multi_reduction <add>, %9, %cst_5 [0] : vector<128x128xf32> to vector<128xf32>
    %11 = vector.shape_cast %10 : vector<128xf32> to vector<1x128xf32>
    %cst_6 = arith.constant 7.812500e-03 : f32
    %12 = vector.broadcast %cst_6 : f32 to vector<1x128xf32>
    %13 = arith.mulf %11, %12 : vector<1x128xf32>
    %c0_7 = arith.constant 0 : index
    %c0_8 = arith.constant 0 : index
    %14 = vector.load %arg3[%c0_7, %c0_8] : memref<1x128xf32, #tpu.memory_space<vmem>>, vector<1x128xf32>
    %cst_9 = arith.constant 9.99999974E-6 : f32
    %15 = vector.broadcast %cst_9 : f32 to vector<1x128xf32>
    %16 = arith.addf %13, %15 : vector<1x128xf32>
    %17 = math.rsqrt %16 : vector<1x128xf32>
    %18 = arith.mulf %14, %17 : vector<1x128xf32>
    %19 = vector.broadcast %18 : vector<1x128xf32> to vector<128x128xf32>
    %20 = arith.mulf %8, %19 : vector<128x128xf32>
    %c0_10 = arith.constant 0 : index
    %c0_11 = arith.constant 0 : index
    %21 = vector.load %arg4[%c0_10, %c0_11] : memref<1x128xf32, #tpu.memory_space<vmem>>, vector<1x128xf32>
    %22 = vector.broadcast %21 : vector<1x128xf32> to vector<128x128xf32>
    %23 = arith.addf %20, %22 : vector<128x128xf32>
    %cst_12 = arith.constant 0.000000e+00 : f32
    %24 = vector.broadcast %cst_12 : f32 to vector<128x128xf32>
    %25 = arith.cmpf ogt, %23, %24 : vector<128x128xf32>
    %cst_13 = arith.constant 2.000000e-01 : f32
    %26 = vector.broadcast %cst_13 : f32 to vector<128x128xf32>
    %27 = arith.mulf %26, %23 : vector<128x128xf32>
    %28 = arith.select %25, %23, %27 : vector<128x128xi1>, vector<128x128xf32>
    %c0_14 = arith.constant 0 : index
    %c0_15 = arith.constant 0 : index
    %29 = vector.load %arg5[%c0_14, %c0_15] : memref<128x128xf32, #tpu.memory_space<vmem>>, vector<128x128xf32>
    tpu.vector_store %arg5[%c0_14, %c0_15], %28 {strides = array<i32>} : memref<128x128xf32, #tpu.memory_space<vmem>>, vector<128x128xf32>,
    return
  }
  func.func @transform_0(%arg0: i32) -> (i32, i32) {
    %c0_i32 = arith.constant 0 : i32
    %c0_i32_0 = arith.constant 0 : i32
    %c0_i32_1 = arith.constant 0 : i32
    return %c0_i32, %c0_i32_0 : i32, i32
  }
  func.func @transform_1(%arg0: i32) -> (i32, i32) {
    %c0_i32 = arith.constant 0 : i32
    %c0_i32_0 = arith.constant 0 : i32
    return %c0_i32, %arg0 : i32, i32
  }
  func.func @transform_2(%arg0: i32) -> (i32, i32) {
    %c0_i32 = arith.constant 0 : i32
    %c0_i32_0 = arith.constant 0 : i32
    return %c0_i32, %arg0 : i32, i32
  }
  func.func @transform_3(%arg0: i32) -> (i32, i32) {
    %c0_i32 = arith.constant 0 : i32
    %c0_i32_0 = arith.constant 0 : i32
    return %c0_i32, %arg0 : i32, i32
  }
  func.func @transform_4(%arg0: i32) -> (i32, i32) {
    %c0_i32 = arith.constant 0 : i32
    %c0_i32_0 = arith.constant 0 : i32
    return %c0_i32, %arg0 : i32, i32
  }
}

module attributes {stable_mosaic.version = 11 : i64} {
  func.func @_conv_bn_lrelu_kernel(%arg0: i32, %arg1: memref<32x4096xbf16, #tpu.memory_space<vmem>>, %arg2: memref<4096x128xbf16, #tpu.memory_space<vmem>>, %arg3: memref<1x128xf32, #tpu.memory_space<vmem>>, %arg4: memref<1x128xf32, #tpu.memory_space<vmem>>, %arg5: memref<32x128xf32, #tpu.memory_space<vmem>>) attributes {dimension_semantics = [#tpu.dimension_semantics<parallel>], iteration_bounds = array<i64: 4>, scalar_prefetch = 0 : i64, scratch_operands = 0 : i64, tpu.core_type = #tpu.core_type<tc>, window_params = [{pipeline_mode = #tpu.pipeline_mode<synchronous>, transform_indices = @transform_0, window_bounds = array<i64: 32, 4096>}, {transform_indices = @transform_1, window_bounds = array<i64: 4096, 128>}, {transform_indices = @transform_2, window_bounds = array<i64: 1, 128>}, {transform_indices = @transform_3, window_bounds = array<i64: 1, 128>}, {transform_indices = @transform_4, window_bounds = array<i64: 32, 128>}]} {
    %c0 = arith.constant 0 : index
    %c0_0 = arith.constant 0 : index
    %0 = vector.load %arg1[%c0, %c0_0] : memref<32x4096xbf16, #tpu.memory_space<vmem>>, vector<32x4096xbf16>
    %c0_1 = arith.constant 0 : index
    %c0_2 = arith.constant 0 : index
    %1 = vector.load %arg2[%c0_1, %c0_2] : memref<4096x128xbf16, #tpu.memory_space<vmem>>, vector<4096x128xbf16>
    %cst = arith.constant dense<0.000000e+00> : vector<32x128xf32>
    %2 = tpu.matmul %0, %1, %cst {dimension_numbers = #tpu.dot_dimension_numbers<[1], [0], [0], [1], [0, 0, 1, 1], [], []>} : vector<32x4096xbf16>, vector<4096x128xbf16>, vector<32x128xf32> -> vector<32x128xf32>
    %cst_3 = arith.constant dense<0.000000e+00> : vector<128xf32>
    %3 = vector.multi_reduction <add>, %2, %cst_3 [0] : vector<32x128xf32> to vector<128xf32>
    %4 = vector.shape_cast %3 : vector<128xf32> to vector<1x128xf32>
    %cst_4 = arith.constant 3.125000e-02 : f32
    %5 = vector.broadcast %cst_4 : f32 to vector<1x128xf32>
    %6 = arith.mulf %4, %5 : vector<1x128xf32>
    %7 = vector.broadcast %6 : vector<1x128xf32> to vector<32x128xf32>
    %8 = arith.subf %2, %7 : vector<32x128xf32>
    %9 = arith.mulf %8, %8 : vector<32x128xf32>
    %cst_5 = arith.constant dense<0.000000e+00> : vector<128xf32>
    %10 = vector.multi_reduction <add>, %9, %cst_5 [0] : vector<32x128xf32> to vector<128xf32>
    %11 = vector.shape_cast %10 : vector<128xf32> to vector<1x128xf32>
    %cst_6 = arith.constant 3.125000e-02 : f32
    %12 = vector.broadcast %cst_6 : f32 to vector<1x128xf32>
    %13 = arith.mulf %11, %12 : vector<1x128xf32>
    %c0_7 = arith.constant 0 : index
    %c0_8 = arith.constant 0 : index
    %14 = vector.load %arg3[%c0_7, %c0_8] : memref<1x128xf32, #tpu.memory_space<vmem>>, vector<1x128xf32>
    %cst_9 = arith.constant 9.99999974E-6 : f32
    %15 = vector.broadcast %cst_9 : f32 to vector<1x128xf32>
    %16 = arith.addf %13, %15 : vector<1x128xf32>
    %17 = math.rsqrt %16 : vector<1x128xf32>
    %18 = arith.mulf %14, %17 : vector<1x128xf32>
    %19 = vector.broadcast %18 : vector<1x128xf32> to vector<32x128xf32>
    %20 = arith.mulf %8, %19 : vector<32x128xf32>
    %c0_10 = arith.constant 0 : index
    %c0_11 = arith.constant 0 : index
    %21 = vector.load %arg4[%c0_10, %c0_11] : memref<1x128xf32, #tpu.memory_space<vmem>>, vector<1x128xf32>
    %22 = vector.broadcast %21 : vector<1x128xf32> to vector<32x128xf32>
    %23 = arith.addf %20, %22 : vector<32x128xf32>
    %cst_12 = arith.constant 0.000000e+00 : f32
    %24 = vector.broadcast %cst_12 : f32 to vector<32x128xf32>
    %25 = arith.cmpf ogt, %23, %24 : vector<32x128xf32>
    %cst_13 = arith.constant 2.000000e-01 : f32
    %26 = vector.broadcast %cst_13 : f32 to vector<32x128xf32>
    %27 = arith.mulf %26, %23 : vector<32x128xf32>
    %28 = arith.select %25, %23, %27 : vector<32x128xi1>, vector<32x128xf32>
    %c0_14 = arith.constant 0 : index
    %c0_15 = arith.constant 0 : index
    %29 = vector.load %arg5[%c0_14, %c0_15] : memref<32x128xf32, #tpu.memory_space<vmem>>, vector<32x128xf32>
    tpu.vector_store %arg5[%c0_14, %c0_15], %28 {strides = array<i32>} : memref<32x128xf32, #tpu.memory_space<vmem>>, vector<32x128xf32>,
    return
  }
  func.func @transform_0(%arg0: i32) -> (i32, i32) {
    %c0_i32 = arith.constant 0 : i32
    %c0_i32_0 = arith.constant 0 : i32
    %c0_i32_1 = arith.constant 0 : i32
    return %c0_i32, %c0_i32_0 : i32, i32
  }
  func.func @transform_1(%arg0: i32) -> (i32, i32) {
    %c0_i32 = arith.constant 0 : i32
    %c0_i32_0 = arith.constant 0 : i32
    return %c0_i32, %arg0 : i32, i32
  }
  func.func @transform_2(%arg0: i32) -> (i32, i32) {
    %c0_i32 = arith.constant 0 : i32
    %c0_i32_0 = arith.constant 0 : i32
    return %c0_i32, %arg0 : i32, i32
  }
  func.func @transform_3(%arg0: i32) -> (i32, i32) {
    %c0_i32 = arith.constant 0 : i32
    %c0_i32_0 = arith.constant 0 : i32
    return %c0_i32, %arg0 : i32, i32
  }
  func.func @transform_4(%arg0: i32) -> (i32, i32) {
    %c0_i32 = arith.constant 0 : i32
    %c0_i32_0 = arith.constant 0 : i32
    return %c0_i32, %arg0 : i32, i32
  }
}

module attributes {stable_mosaic.version = 11 : i64} {
  func.func @_conv_act_kernel(%arg0: i32, %arg1: i32, %arg2: memref<2x8192xbf16, #tpu.memory_space<vmem>>, %arg3: memref<8192x128xbf16, #tpu.memory_space<vmem>>, %arg4: memref<2x128xf32, #tpu.memory_space<vmem>>) attributes {dimension_semantics = [#tpu.dimension_semantics<parallel>, #tpu.dimension_semantics<parallel>], iteration_bounds = array<i64: 1, 1>, scalar_prefetch = 0 : i64, scratch_operands = 0 : i64, tpu.core_type = #tpu.core_type<tc>, window_params = [{transform_indices = @transform_0, window_bounds = array<i64: 2, 8192>}, {transform_indices = @transform_1, window_bounds = array<i64: 8192, 128>}, {transform_indices = @transform_2, window_bounds = array<i64: 2, 128>}]} {
    %c0 = arith.constant 0 : index
    %c0_0 = arith.constant 0 : index
    %0 = vector.load %arg2[%c0, %c0_0] : memref<2x8192xbf16, #tpu.memory_space<vmem>>, vector<2x8192xbf16>
    %c0_1 = arith.constant 0 : index
    %c0_2 = arith.constant 0 : index
    %1 = vector.load %arg3[%c0_1, %c0_2] : memref<8192x128xbf16, #tpu.memory_space<vmem>>, vector<8192x128xbf16>
    %cst = arith.constant dense<0.000000e+00> : vector<2x128xf32>
    %2 = tpu.matmul %0, %1, %cst {dimension_numbers = #tpu.dot_dimension_numbers<[1], [0], [0], [1], [0, 0, 1, 1], [], []>} : vector<2x8192xbf16>, vector<8192x128xbf16>, vector<2x128xf32> -> vector<2x128xf32>
    %cst_3 = arith.constant 0.000000e+00 : f32
    %3 = vector.broadcast %cst_3 : f32 to vector<2x128xf32>
    %4 = arith.subf %3, %2 : vector<2x128xf32>
    %5 = math.exp %4 : vector<2x128xf32>
    %cst_4 = arith.constant 1.000000e+00 : f32
    %6 = vector.broadcast %cst_4 : f32 to vector<2x128xf32>
    %7 = arith.addf %6, %5 : vector<2x128xf32>
    %8 = tpu.reciprocal %7 {approx = true} : vector<2x128xf32> -> vector<2x128xf32>
    %c0_5 = arith.constant 0 : index
    %c0_6 = arith.constant 0 : index
    %9 = vector.load %arg4[%c0_5, %c0_6] : memref<2x128xf32, #tpu.memory_space<vmem>>, vector<2x128xf32>
    tpu.vector_store %arg4[%c0_5, %c0_6], %8 {strides = array<i32>} : memref<2x128xf32, #tpu.memory_space<vmem>>, vector<2x128xf32>,
    return
  }
  func.func @transform_0(%arg0: i32, %arg1: i32) -> (i32, i32) {
    %c0_i32 = arith.constant 0 : i32
    %c0_i32_0 = arith.constant 0 : i32
    return %arg0, %c0_i32 : i32, i32
  }
  func.func @transform_1(%arg0: i32, %arg1: i32) -> (i32, i32) {
    %c0_i32 = arith.constant 0 : i32
    %c0_i32_0 = arith.constant 0 : i32
    return %c0_i32, %arg1 : i32, i32
  }
  func.func @transform_2(%arg0: i32, %arg1: i32) -> (i32, i32) {
    %c0_i32 = arith.constant 0 : i32
    return %arg0, %arg1 : i32, i32
  }
}

</mosaic_0001>

<bundles_post_ra>
// kernel: discriminator_forward.4
= control target key start
LH: loop header
LB: loop body
LE: loop exit
PB: predicated region body
PF: predicated region fallthrough
CT: control target
= control target key end

     0   :  { %vm244_vm0 = vcmask 130048   ;;  %s1427_s1 = inlined_call_operand.vmem [shape: bf16[16,128], index: 1, kind: input, shape index: {}]   ;;  %s1428_s0 = inlined_call_operand.vmem [shape: bf16[512,16], index: 0, kind: input, shape index: {}]   ;;  %s1429_s2 = inlined_call_operand.vmem [shape: f32[512,128], index: 2, kind: output, shape index: {}]  }
   0x1   :  { %v1056_v0 = vld [vmem:[%s1427_s1] sm:$0xff]   ;;  %v1059_v3 = vld [vmem:[%s1428_s0 + $0x8] sm:$0xff]   ;;  %v1061_v5 = vld [vmem:[%s1428_s0 + $0x10] sm:$0xff]  }
   0x2   :  { %v1057_v1 = vld [vmem:[%s1428_s0] sm:$0xff]   ;;  %988 = vmatprep.subr.bf16.mxu0 %v1056_v0  ;;  %1054 = vmatprep.subr.bf16.mxu1 %v1056_v0  ;;  %v1060_v4 = vld [vmem:[%s1428_s0 + $0x88] sm:$0xff]   ;;  %v1062_v6 = vld [vmem:[%s1428_s0 + $0x90] sm:$0xff]  }
   0x3   :  { %v1058_v2 = vld [vmem:[%s1428_s0 + $0x80] sm:$0xff]   ;;  %989 = vmatpush3.bf16.msra.mxu0 %v1056_v0  ;;  %1055 = vmatpush3.bf16.msra.mxu1 %v1056_v0  ;;  %v1063_v7 = vld [vmem:[%s1428_s0 + $0x18] sm:$0xff]   ;;  %v1067_v11 = vld [vmem:[%s1428_s0 + $0x28] sm:$0xff]  }
   0x4   :  { %990 = vmatprep.mubr.msk.bf16.mxu0 %vm244_vm0, %v1057_v1  ;;  %1022 = vmatprep.mubr.msk.bf16.mxu1 %vm244_vm0, %v1058_v2  ;;  %v1064_v8 = vld [vmem:[%s1428_s0 + $0x98] sm:$0xff]   ;;  %v1065_v9 = vld [vmem:[%s1428_s0 + $0x20] sm:$0xff]   ;;  %v1068_v12 = vld [vmem:[%s1428_s0 + $0xa8] sm:$0xff]  }
   0x5   :  { %v1066_v10 = vld [vmem:[%s1428_s0 + $0xa0] sm:$0xff]   ;;  %v1069_v13 = vld [vmem:[%s1428_s0 + $0x30] sm:$0xff]   ;;  %v1071_v15 = vld [vmem:[%s1428_s0 + $0x38] sm:$0xff]  }
   0x6   :  { %991 = vmatmul.mubr.msk.bf16.vlgmr.msra.gmra.mrb[0].mxu0 %vm244_vm0, %v1059_v3  ;;  %1023 = vmatmul.mubr.msk.bf16.vlgmr.msra.gmra.mrb[0].mxu1 %vm244_vm0, %v1060_v4  ;;  %v1070_v14 = vld [vmem:[%s1428_s0 + $0xb0] sm:$0xff]   ;;  %v1072_v16 = vld [vmem:[%s1428_s0 + $0xb8] sm:$0xff]   ;;  %v1073_v17 = vld [vmem:[%s1428_s0 + $0x40] sm:$0xff]  }
   0x7   :  { %994 = vmatprep.mubr.msk.bf16.mxu0 %vm244_vm0, %v1061_v5  ;;  %1026 = vmatprep.mubr.msk.bf16.mxu1 %vm244_vm0, %v1062_v6  ;;  %v1074_v18 = vld [vmem:[%s1428_s0 + $0xc0] sm:$0xff]   ;;  %v1075_v19 = vld [vmem:[%s1428_s0 + $0x48] sm:$0xff]   ;;  %v1077_v21 = vld [vmem:[%s1428_s0 + $0x50] sm:$0xff]  }
   0x8   :  { %v1076_v20 = vld [vmem:[%s1428_s0 + $0xc8] sm:$0xff]   ;;  %v1078_v22 = vld [vmem:[%s1428_s0 + $0xd0] sm:$0xff]   ;;  %v1079_v23 = vld [vmem:[%s1428_s0 + $0x58] sm:$0xff]  }
   0x9   :  { %v1080_v24 = vld [vmem:[%s1428_s0 + $0xd8] sm:$0xff]   ;;  %v1081_v25 = vld [vmem:[%s1428_s0 + $0x60] sm:$0xff]   ;;  %v1083_v27 = vld [vmem:[%s1428_s0 + $0x68] sm:$0xff]  }
   0xa   :  { %v1082_v26 = vld [vmem:[%s1428_s0 + $0xe0] sm:$0xff]   ;;  %v1084_v28 = vld [vmem:[%s1428_s0 + $0xe8] sm:$0xff]   ;;  %v1085_v29 = vld [vmem:[%s1428_s0 + $0x70] sm:$0xff]  }
   0xb   :  { %v1086_v30 = vld [vmem:[%s1428_s0 + $0xf0] sm:$0xff]   ;;  %v1087_v31 = vld [vmem:[%s1428_s0 + $0x78] sm:$0xff]  }
   0xc   :  { %v1088_v32 = vld [vmem:[%s1428_s0 + $0xf8] sm:$0xff]  }
   0xe   :  { %995 = vmatmul.mubr.msk.bf16.gmra.mrb[4].mxu0 %vm244_vm0, %v1063_v7  ;;  %1027 = vmatmul.mubr.msk.bf16.gmra.mrb[4].mxu1 %vm244_vm0, %v1064_v8 }
   0xf   :  { %998 = vmatprep.mubr.msk.bf16.mxu0 %vm244_vm0, %v1065_v9  ;;  %1030 = vmatprep.mubr.msk.bf16.mxu1 %vm244_vm0, %v1066_v10 }
  0x16   :  { %999 = vmatmul.mubr.msk.bf16.gmra.mrb[8].mxu0 %vm244_vm0, %v1067_v11  ;;  %1031 = vmatmul.mubr.msk.bf16.gmra.mrb[8].mxu1 %vm244_vm0, %v1068_v12 }
  0x17   :  { %1002 = vmatprep.mubr.msk.bf16.mxu0 %vm244_vm0, %v1069_v13  ;;  %1034 = vmatprep.mubr.msk.bf16.mxu1 %vm244_vm0, %v1070_v14 }
  0x1e   :  { %1003 = vmatmul.mubr.msk.bf16.gmra.mrb[12].mxu0 %vm244_vm0, %v1071_v15  ;;  %1035 = vmatmul.mubr.msk.bf16.gmra.mrb[12].mxu1 %vm244_vm0, %v1072_v16 }
  0x1f   :  { %1006 = vmatprep.mubr.msk.bf16.mxu0 %vm244_vm0, %v1073_v17  ;;  %1038 = vmatprep.mubr.msk.bf16.mxu1 %vm244_vm0, %v1074_v18 }
  0x26   :  { %1007 = vmatmul.mubr.msk.bf16.gmra.mrb[16].mxu0 %vm244_vm0, %v1075_v19  ;;  %1039 = vmatmul.mubr.msk.bf16.gmra.mrb[16].mxu1 %vm244_vm0, %v1076_v20 }
  0x27   :  { %1010 = vmatprep.mubr.msk.bf16.mxu0 %vm244_vm0, %v1077_v21  ;;  %1042 = vmatprep.mubr.msk.bf16.mxu1 %vm244_vm0, %v1078_v22 }
  0x2e   :  { %1011 = vmatmul.mubr.msk.bf16.gmra.mrb[20].mxu0 %vm244_vm0, %v1079_v23  ;;  %1043 = vmatmul.mubr.msk.bf16.gmra.mrb[20].mxu1 %vm244_vm0, %v1080_v24 }
  0x2f   :  { %1014 = vmatprep.mubr.msk.bf16.mxu0 %vm244_vm0, %v1081_v25  ;;  %1046 = vmatprep.mubr.msk.bf16.mxu1 %vm244_vm0, %v1082_v26 }
  0x36   :  { %1015 = vmatmul.mubr.msk.bf16.gmra.mrb[24].mxu0 %vm244_vm0, %v1083_v27  ;;  %1047 = vmatmul.mubr.msk.bf16.gmra.mrb[24].mxu1 %vm244_vm0, %v1084_v28 }
  0x37   :  { %1018 = vmatprep.mubr.msk.bf16.mxu0 %vm244_vm0, %v1085_v29  ;;  %1050 = vmatprep.mubr.msk.bf16.mxu1 %vm244_vm0, %v1086_v30 }
  0x3e   :  { %1019 = vmatmul.mubr.msk.bf16.gmra.mrb[28].mxu0 %vm244_vm0, %v1087_v31  ;;  %1051 = vmatmul.mubr.msk.bf16.gmra.mrb[28].mxu1 %vm244_vm0, %v1088_v32 }
  0xd9   :  { %v992_v33 = vpop.f32.mrb[0].mxu0  ;;  %v1024_v34 = vpop.f32.mrb[0].mxu1 }
  0xda   :  { %vm632_vm1 = vcmp.gt.f32.partialorder %v992_v33, 0.0  ;;  %v696_v35 = vmul.f32 0.2, %v992_v33  ;;  %vm664_vm2 = vcmp.gt.f32.partialorder %v1024_v34, 0.0  ;;  %v728_v36 = vmul.f32 0.2, %v1024_v34 }
  0xdb   :  { %v375_v37 = vpop.f32.mrb[1].mxu0  ;;  %v503_v38 = vpop.f32.mrb[1].mxu1 }
  0xdc   :  { %v760_v39 = vsel %vm632_vm1, %v992_v33, %v696_v35  ;;  %v792_v40 = vsel %vm664_vm2, %v1024_v34, %v728_v36  ;;  %vm630_vm3 = vcmp.gt.f32.partialorder %v375_v37, 0.0  ;;  %v694_v41 = vmul.f32 0.2, %v375_v37  ;;  %v993_v42 = vpop.f32.mrb[2].mxu0  ;;  %v1025_v43 = vpop.f32.mrb[2].mxu1 }
  0xdd   :  { %824 = vst [vmem:[%s1429_s2 + $0x10] sm:$0xff] %v760_v39  ;;  %856 = vst [vmem:[%s1429_s2 + $0x110] sm:$0xff] %v792_v40  ;;  %vm662_vm4 = vcmp.gt.f32.partialorder %v503_v38, 0.0  ;;  %v726_v44 = vmul.f32 0.2, %v503_v38  ;;  %vm633_vm5 = vcmp.gt.f32.partialorder %v993_v42, 0.0 }
  0xde   :  { %v697_v45 = vmul.f32 0.2, %v993_v42  ;;  %v758_v46 = vsel %vm630_vm3, %v375_v37, %v694_v41  ;;  %vm665_vm6 = vcmp.gt.f32.partialorder %v1025_v43, 0.0  ;;  %v729_v47 = vmul.f32 0.2, %v1025_v43  ;;  %v378_v48 = vpop.f32.mrb[3].mxu0 }
  0xdf   :  { %v506_v49 = vpop.f32.mrb[3].mxu1  ;;  %822 = vst [vmem:[%s1429_s2] sm:$0xff] %v758_v46  ;;  %v790_v50 = vsel %vm662_vm4, %v503_v38, %v726_v44  ;;  %vm631_vm7 = vcmp.gt.f32.partialorder %v378_v48, 0.0  ;;  %v695_v52 = vmul.f32 0.2, %v378_v48 }
  0xe0   :  { %v761_v51 = vsel %vm633_vm5, %v993_v42, %v697_v45  ;;  %854 = vst [vmem:[%s1429_s2 + $0x100] sm:$0xff] %v790_v50  ;;  %v793_v53 = vsel %vm665_vm6, %v1025_v43, %v729_v47  ;;  %vm663_vm8 = vcmp.gt.f32.partialorder %v506_v49, 0.0  ;;  %v727_v54 = vmul.f32 0.2, %v506_v49 }
  0xe1   :  { %825 = vst [vmem:[%s1429_s2 + $0x18] sm:$0xff] %v761_v51  ;;  %857 = vst [vmem:[%s1429_s2 + $0x118] sm:$0xff] %v793_v53  ;;  %v759_v55 = vsel %vm631_vm7, %v378_v48, %v695_v52  ;;  %v996_v56 = vpop.f32.mrb[4].mxu0  ;;  %v1028_v57 = vpop.f32.mrb[4].mxu1 }
  0xe2   :  { %823 = vst [vmem:[%s1429_s2 + $0x8] sm:$0xff] %v759_v55  ;;  %v791_v58 = vsel %vm663_vm8, %v506_v49, %v727_v54  ;;  %vm636_vm9 = vcmp.gt.f32.partialorder %v996_v56, 0.0  ;;  %v700_v59 = vmul.f32 0.2, %v996_v56  ;;  %vm668_vm10 = vcmp.gt.f32.partialorder %v1028_v57, 0.0  ;;  %v391_v60 = vpop.f32.mrb[5].mxu0 }
  0xe3   :  { %v519_v61 = vpop.f32.mrb[5].mxu1  ;;  %855 = vst [vmem:[%s1429_s2 + $0x108] sm:$0xff] %v791_v58  ;;  %v732_v62 = vmul.f32 0.2, %v1028_v57  ;;  %vm634_vm11 = vcmp.gt.f32.partialorder %v391_v60, 0.0  ;;  %v997_v2 = vpop.f32.mrb[6].mxu0 }
  0xe4   :  { %v698_v63 = vmul.f32 0.2, %v391_v60  ;;  %vm666_vm12 = vcmp.gt.f32.partialorder %v519_v61, 0.0  ;;  %v764_v0 = vsel %vm636_vm9, %v996_v56, %v700_v59  ;;  %v730_v1 = vmul.f32 0.2, %v519_v61  ;;  %v1029_v3 = vpop.f32.mrb[6].mxu1 }
  0xe5   :  { %828 = vst [vmem:[%s1429_s2 + $0x30] sm:$0xff] %v764_v0  ;;  %v796_v4 = vsel %vm668_vm10, %v1028_v57, %v732_v62  ;;  %vm637_vm13 = vcmp.gt.f32.partialorder %v997_v2, 0.0  ;;  %v701_v6 = vmul.f32 0.2, %v997_v2  ;;  %v394_v7 = vpop.f32.mrb[7].mxu0  ;;  %v522_v8 = vpop.f32.mrb[7].mxu1 }
  0xe6   :  { %v762_v5 = vsel %vm634_vm11, %v391_v60, %v698_v63  ;;  %860 = vst [vmem:[%s1429_s2 + $0x130] sm:$0xff] %v796_v4  ;;  %v794_v9 = vsel %vm666_vm12, %v519_v61, %v730_v1  ;;  %vm669_vm14 = vcmp.gt.f32.partialorder %v1029_v3, 0.0  ;;  %v733_v10 = vmul.f32 0.2, %v1029_v3 }
  0xe7   :  { %826 = vst [vmem:[%s1429_s2 + $0x20] sm:$0xff] %v762_v5  ;;  %vm635_vm15 = vcmp.gt.f32.partialorder %v394_v7, 0.0  ;;  %858 = vst [vmem:[%s1429_s2 + $0x120] sm:$0xff] %v794_v9  ;;  %v765_v11 = vsel %vm637_vm13, %v997_v2, %v701_v6  ;;  %v699_v12 = vmul.f32 0.2, %v394_v7  ;;  %vm667_vm0 = vcmp.gt.f32.partialorder %v522_v8, 0.0 }
  0xe8   :  { %v731_v13 = vmul.f32 0.2, %v522_v8  ;;  %829 = vst [vmem:[%s1429_s2 + $0x38] sm:$0xff] %v765_v11  ;;  %v797_v14 = vsel %vm669_vm14, %v1029_v3, %v733_v10 }
  0xe9   :  { %861 = vst [vmem:[%s1429_s2 + $0x138] sm:$0xff] %v797_v14  ;;  %v763_v15 = vsel %vm635_vm15, %v394_v7, %v699_v12  ;;  %v1000_v17 = vpop.f32.mrb[8].mxu0  ;;  %v1032_v18 = vpop.f32.mrb[8].mxu1 }
  0xea   :  { %v795_v16 = vsel %vm667_vm0, %v522_v8, %v731_v13  ;;  %827 = vst [vmem:[%s1429_s2 + $0x28] sm:$0xff] %v763_v15  ;;  %vm640_vm1 = vcmp.gt.f32.partialorder %v1000_v17, 0.0  ;;  %v704_v19 = vmul.f32 0.2, %v1000_v17  ;;  %vm672_vm2 = vcmp.gt.f32.partialorder %v1032_v18, 0.0  ;;  %v407_v21 = vpop.f32.mrb[9].mxu0 }
  0xeb   :  { %859 = vst [vmem:[%s1429_s2 + $0x128] sm:$0xff] %v795_v16  ;;  %v736_v20 = vmul.f32 0.2, %v1032_v18  ;;  %v535_v22 = vpop.f32.mrb[9].mxu1  ;;  %vm638_vm3 = vcmp.gt.f32.partialorder %v407_v21, 0.0  ;;  %v1001_v26 = vpop.f32.mrb[10].mxu0 }
  0xec   :  { %v768_v23 = vsel %vm640_vm1, %v1000_v17, %v704_v19  ;;  %v702_v25 = vmul.f32 0.2, %v407_v21  ;;  %v1033_v27 = vpop.f32.mrb[10].mxu1  ;;  %vm670_vm4 = vcmp.gt.f32.partialorder %v535_v22, 0.0  ;;  %v734_v28 = vmul.f32 0.2, %v535_v22 }
  0xed   :  { %v800_v24 = vsel %vm672_vm2, %v1032_v18, %v736_v20  ;;  %832 = vst [vmem:[%s1429_s2 + $0x50] sm:$0xff] %v768_v23  ;;  %vm641_vm5 = vcmp.gt.f32.partialorder %v1001_v26, 0.0  ;;  %v705_v29 = vmul.f32 0.2, %v1001_v26  ;;  %vm673_vm6 = vcmp.gt.f32.partialorder %v1033_v27, 0.0  ;;  %v410_v32 = vpop.f32.mrb[11].mxu0 }
  0xee   :  { %864 = vst [vmem:[%s1429_s2 + $0x150] sm:$0xff] %v800_v24  ;;  %v766_v30 = vsel %vm638_vm3, %v407_v21, %v702_v25  ;;  %v737_v31 = vmul.f32 0.2, %v1033_v27  ;;  %v538_v33 = vpop.f32.mrb[11].mxu1  ;;  %v798_v34 = vsel %vm670_vm4, %v535_v22, %v734_v28  ;;  %vm639_vm7 = vcmp.gt.f32.partialorder %v410_v32, 0.0 }
  0xef   :  { %830 = vst [vmem:[%s1429_s2 + $0x40] sm:$0xff] %v766_v30  ;;  %v769_v35 = vsel %vm641_vm5, %v1001_v26, %v705_v29  ;;  %v703_v36 = vmul.f32 0.2, %v410_v32  ;;  %862 = vst [vmem:[%s1429_s2 + $0x140] sm:$0xff] %v798_v34  ;;  %vm671_vm8 = vcmp.gt.f32.partialorder %v538_v33, 0.0 }
  0xf0   :  { %833 = vst [vmem:[%s1429_s2 + $0x58] sm:$0xff] %v769_v35  ;;  %v801_v37 = vsel %vm673_vm6, %v1033_v27, %v737_v31  ;;  %v735_v38 = vmul.f32 0.2, %v538_v33 }
  0xf1   :  { %865 = vst [vmem:[%s1429_s2 + $0x158] sm:$0xff] %v801_v37  ;;  %v767_v39 = vsel %vm639_vm7, %v410_v32, %v703_v36  ;;  %v1004_v40 = vpop.f32.mrb[12].mxu0  ;;  %v1036_v41 = vpop.f32.mrb[12].mxu1 }
  0xf2   :  { %831 = vst [vmem:[%s1429_s2 + $0x48] sm:$0xff] %v767_v39  ;;  %v799_v42 = vsel %vm671_vm8, %v538_v33, %v735_v38  ;;  %vm644_vm9 = vcmp.gt.f32.partialorder %v1004_v40, 0.0  ;;  %v708_v43 = vmul.f32 0.2, %v1004_v40  ;;  %vm676_vm10 = vcmp.gt.f32.partialorder %v1036_v41, 0.0  ;;  %v423_v44 = vpop.f32.mrb[13].mxu0 }
  0xf3   :  { %v551_v45 = vpop.f32.mrb[13].mxu1  ;;  %863 = vst [vmem:[%s1429_s2 + $0x148] sm:$0xff] %v799_v42  ;;  %v740_v46 = vmul.f32 0.2, %v1036_v41  ;;  %vm642_vm11 = vcmp.gt.f32.partialorder %v423_v44, 0.0  ;;  %v1005_v50 = vpop.f32.mrb[14].mxu0 }
  0xf4   :  { %v706_v47 = vmul.f32 0.2, %v423_v44  ;;  %vm674_vm12 = vcmp.gt.f32.partialorder %v551_v45, 0.0  ;;  %v772_v48 = vsel %vm644_vm9, %v1004_v40, %v708_v43  ;;  %v738_v49 = vmul.f32 0.2, %v551_v45  ;;  %v1037_v51 = vpop.f32.mrb[14].mxu1 }
  0xf5   :  { %836 = vst [vmem:[%s1429_s2 + $0x70] sm:$0xff] %v772_v48  ;;  %v804_v52 = vsel %vm676_vm10, %v1036_v41, %v740_v46  ;;  %vm645_vm13 = vcmp.gt.f32.partialorder %v1005_v50, 0.0  ;;  %v709_v54 = vmul.f32 0.2, %v1005_v50  ;;  %v426_v55 = vpop.f32.mrb[15].mxu0  ;;  %v554_v56 = vpop.f32.mrb[15].mxu1 }
  0xf6   :  { %v770_v53 = vsel %vm642_vm11, %v423_v44, %v706_v47  ;;  %868 = vst [vmem:[%s1429_s2 + $0x170] sm:$0xff] %v804_v52  ;;  %v802_v57 = vsel %vm674_vm12, %v551_v45, %v738_v49  ;;  %vm677_vm14 = vcmp.gt.f32.partialorder %v1037_v51, 0.0  ;;  %v741_v58 = vmul.f32 0.2, %v1037_v51 }
  0xf7   :  { %834 = vst [vmem:[%s1429_s2 + $0x60] sm:$0xff] %v770_v53  ;;  %vm643_vm15 = vcmp.gt.f32.partialorder %v426_v55, 0.0  ;;  %866 = vst [vmem:[%s1429_s2 + $0x160] sm:$0xff] %v802_v57  ;;  %v773_v59 = vsel %vm645_vm13, %v1005_v50, %v709_v54  ;;  %v707_v60 = vmul.f32 0.2, %v426_v55  ;;  %vm675_vm0 = vcmp.gt.f32.partialorder %v554_v56, 0.0 }
  0xf8   :  { %v739_v61 = vmul.f32 0.2, %v554_v56  ;;  %837 = vst [vmem:[%s1429_s2 + $0x78] sm:$0xff] %v773_v59  ;;  %v805_v62 = vsel %vm677_vm14, %v1037_v51, %v741_v58 }
  0xf9   :  { %869 = vst [vmem:[%s1429_s2 + $0x178] sm:$0xff] %v805_v62  ;;  %v771_v63 = vsel %vm643_vm15, %v426_v55, %v707_v60  ;;  %v1008_v1 = vpop.f32.mrb[16].mxu0  ;;  %v1040_v2 = vpop.f32.mrb[16].mxu1 }
  0xfa   :  { %v803_v0 = vsel %vm675_vm0, %v554_v56, %v739_v61  ;;  %835 = vst [vmem:[%s1429_s2 + $0x68] sm:$0xff] %v771_v63  ;;  %vm648_vm1 = vcmp.gt.f32.partialorder %v1008_v1, 0.0  ;;  %v712_v3 = vmul.f32 0.2, %v1008_v1  ;;  %vm680_vm2 = vcmp.gt.f32.partialorder %v1040_v2, 0.0  ;;  %v439_v5 = vpop.f32.mrb[17].mxu0 }
  0xfb   :  { %867 = vst [vmem:[%s1429_s2 + $0x168] sm:$0xff] %v803_v0  ;;  %v744_v4 = vmul.f32 0.2, %v1040_v2  ;;  %v567_v6 = vpop.f32.mrb[17].mxu1  ;;  %vm646_vm3 = vcmp.gt.f32.partialorder %v439_v5, 0.0  ;;  %v1009_v10 = vpop.f32.mrb[18].mxu0 }
  0xfc   :  { %v776_v7 = vsel %vm648_vm1, %v1008_v1, %v712_v3  ;;  %v710_v9 = vmul.f32 0.2, %v439_v5  ;;  %v1041_v11 = vpop.f32.mrb[18].mxu1  ;;  %vm678_vm4 = vcmp.gt.f32.partialorder %v567_v6, 0.0  ;;  %v742_v12 = vmul.f32 0.2, %v567_v6 }
  0xfd   :  { %v808_v8 = vsel %vm680_vm2, %v1040_v2, %v744_v4  ;;  %840 = vst [vmem:[%s1429_s2 + $0x90] sm:$0xff] %v776_v7  ;;  %vm649_vm5 = vcmp.gt.f32.partialorder %v1009_v10, 0.0  ;;  %v713_v13 = vmul.f32 0.2, %v1009_v10  ;;  %vm681_vm6 = vcmp.gt.f32.partialorder %v1041_v11, 0.0  ;;  %v442_v16 = vpop.f32.mrb[19].mxu0 }
  0xfe   :  { %872 = vst [vmem:[%s1429_s2 + $0x190] sm:$0xff] %v808_v8  ;;  %v774_v14 = vsel %vm646_vm3, %v439_v5, %v710_v9  ;;  %v745_v15 = vmul.f32 0.2, %v1041_v11  ;;  %v570_v17 = vpop.f32.mrb[19].mxu1  ;;  %v806_v18 = vsel %vm678_vm4, %v567_v6, %v742_v12  ;;  %vm647_vm7 = vcmp.gt.f32.partialorder %v442_v16, 0.0 }
  0xff   :  { %838 = vst [vmem:[%s1429_s2 + $0x80] sm:$0xff] %v774_v14  ;;  %v777_v19 = vsel %vm649_vm5, %v1009_v10, %v713_v13  ;;  %v711_v20 = vmul.f32 0.2, %v442_v16  ;;  %870 = vst [vmem:[%s1429_s2 + $0x180] sm:$0xff] %v806_v18  ;;  %vm679_vm8 = vcmp.gt.f32.partialorder %v570_v17, 0.0 }
 0x100   :  { %841 = vst [vmem:[%s1429_s2 + $0x98] sm:$0xff] %v777_v19  ;;  %v809_v21 = vsel %vm681_vm6, %v1041_v11, %v745_v15  ;;  %v743_v22 = vmul.f32 0.2, %v570_v17 }
 0x101   :  { %873 = vst [vmem:[%s1429_s2 + $0x198] sm:$0xff] %v809_v21  ;;  %v775_v23 = vsel %vm647_vm7, %v442_v16, %v711_v20  ;;  %v1012_v24 = vpop.f32.mrb[20].mxu0  ;;  %v1044_v25 = vpop.f32.mrb[20].mxu1 }
 0x102   :  { %839 = vst [vmem:[%s1429_s2 + $0x88] sm:$0xff] %v775_v23  ;;  %v807_v26 = vsel %vm679_vm8, %v570_v17, %v743_v22  ;;  %vm652_vm9 = vcmp.gt.f32.partialorder %v1012_v24, 0.0  ;;  %v716_v27 = vmul.f32 0.2, %v1012_v24  ;;  %vm684_vm10 = vcmp.gt.f32.partialorder %v1044_v25, 0.0  ;;  %v455_v28 = vpop.f32.mrb[21].mxu0 }
 0x103   :  { %v583_v29 = vpop.f32.mrb[21].mxu1  ;;  %871 = vst [vmem:[%s1429_s2 + $0x188] sm:$0xff] %v807_v26  ;;  %v748_v30 = vmul.f32 0.2, %v1044_v25  ;;  %vm650_vm11 = vcmp.gt.f32.partialorder %v455_v28, 0.0  ;;  %v1013_v34 = vpop.f32.mrb[22].mxu0 }
 0x104   :  { %v714_v31 = vmul.f32 0.2, %v455_v28  ;;  %vm682_vm12 = vcmp.gt.f32.partialorder %v583_v29, 0.0  ;;  %v780_v32 = vsel %vm652_vm9, %v1012_v24, %v716_v27  ;;  %v746_v33 = vmul.f32 0.2, %v583_v29  ;;  %v1045_v35 = vpop.f32.mrb[22].mxu1 }
 0x105   :  { %844 = vst [vmem:[%s1429_s2 + $0xb0] sm:$0xff] %v780_v32  ;;  %v812_v36 = vsel %vm684_vm10, %v1044_v25, %v748_v30  ;;  %vm653_vm13 = vcmp.gt.f32.partialorder %v1013_v34, 0.0  ;;  %v717_v38 = vmul.f32 0.2, %v1013_v34  ;;  %v458_v39 = vpop.f32.mrb[23].mxu0  ;;  %v586_v40 = vpop.f32.mrb[23].mxu1 }
 0x106   :  { %v778_v37 = vsel %vm650_vm11, %v455_v28, %v714_v31  ;;  %876 = vst [vmem:[%s1429_s2 + $0x1b0] sm:$0xff] %v812_v36  ;;  %v810_v41 = vsel %vm682_vm12, %v583_v29, %v746_v33  ;;  %vm685_vm14 = vcmp.gt.f32.partialorder %v1045_v35, 0.0  ;;  %v749_v42 = vmul.f32 0.2, %v1045_v35 }
 0x107   :  { %842 = vst [vmem:[%s1429_s2 + $0xa0] sm:$0xff] %v778_v37  ;;  %vm651_vm15 = vcmp.gt.f32.partialorder %v458_v39, 0.0  ;;  %874 = vst [vmem:[%s1429_s2 + $0x1a0] sm:$0xff] %v810_v41  ;;  %v781_v43 = vsel %vm653_vm13, %v1013_v34, %v717_v38  ;;  %v715_v44 = vmul.f32 0.2, %v458_v39  ;;  %vm683_vm0 = vcmp.gt.f32.partialorder %v586_v40, 0.0 }
 0x108   :  { %v747_v45 = vmul.f32 0.2, %v586_v40  ;;  %845 = vst [vmem:[%s1429_s2 + $0xb8] sm:$0xff] %v781_v43  ;;  %v813_v46 = vsel %vm685_vm14, %v1045_v35, %v749_v42 }
 0x109   :  { %877 = vst [vmem:[%s1429_s2 + $0x1b8] sm:$0xff] %v813_v46  ;;  %v779_v47 = vsel %vm651_vm15, %v458_v39, %v715_v44  ;;  %v1016_v49 = vpop.f32.mrb[24].mxu0  ;;  %v1048_v50 = vpop.f32.mrb[24].mxu1 }
 0x10a   :  { %v811_v48 = vsel %vm683_vm0, %v586_v40, %v747_v45  ;;  %843 = vst [vmem:[%s1429_s2 + $0xa8] sm:$0xff] %v779_v47  ;;  %vm656_vm1 = vcmp.gt.f32.partialorder %v1016_v49, 0.0  ;;  %v720_v51 = vmul.f32 0.2, %v1016_v49  ;;  %vm688_vm2 = vcmp.gt.f32.partialorder %v1048_v50, 0.0  ;;  %v471_v53 = vpop.f32.mrb[25].mxu0 }
 0x10b   :  { %875 = vst [vmem:[%s1429_s2 + $0x1a8] sm:$0xff] %v811_v48  ;;  %v752_v52 = vmul.f32 0.2, %v1048_v50  ;;  %v599_v54 = vpop.f32.mrb[25].mxu1  ;;  %vm654_vm3 = vcmp.gt.f32.partialorder %v471_v53, 0.0  ;;  %v1017_v58 = vpop.f32.mrb[26].mxu0 }
 0x10c   :  { %v784_v55 = vsel %vm656_vm1, %v1016_v49, %v720_v51  ;;  %v718_v57 = vmul.f32 0.2, %v471_v53  ;;  %v1049_v59 = vpop.f32.mrb[26].mxu1  ;;  %vm686_vm4 = vcmp.gt.f32.partialorder %v599_v54, 0.0  ;;  %v750_v60 = vmul.f32 0.2, %v599_v54 }
 0x10d   :  { %v816_v56 = vsel %vm688_vm2, %v1048_v50, %v752_v52  ;;  %848 = vst [vmem:[%s1429_s2 + $0xd0] sm:$0xff] %v784_v55  ;;  %vm657_vm5 = vcmp.gt.f32.partialorder %v1017_v58, 0.0  ;;  %v721_v61 = vmul.f32 0.2, %v1017_v58  ;;  %vm689_vm6 = vcmp.gt.f32.partialorder %v1049_v59, 0.0  ;;  %v474_v0 = vpop.f32.mrb[27].mxu0 }
 0x10e   :  { %880 = vst [vmem:[%s1429_s2 + $0x1d0] sm:$0xff] %v816_v56  ;;  %v782_v62 = vsel %vm654_vm3, %v471_v53, %v718_v57  ;;  %v753_v63 = vmul.f32 0.2, %v1049_v59  ;;  %v602_v1 = vpop.f32.mrb[27].mxu1  ;;  %v814_v2 = vsel %vm686_vm4, %v599_v54, %v750_v60  ;;  %vm655_vm7 = vcmp.gt.f32.partialorder %v474_v0, 0.0 }
 0x10f   :  { %846 = vst [vmem:[%s1429_s2 + $0xc0] sm:$0xff] %v782_v62  ;;  %v785_v3 = vsel %vm657_vm5, %v1017_v58, %v721_v61  ;;  %v719_v4 = vmul.f32 0.2, %v474_v0  ;;  %878 = vst [vmem:[%s1429_s2 + $0x1c0] sm:$0xff] %v814_v2  ;;  %vm687_vm8 = vcmp.gt.f32.partialorder %v602_v1, 0.0 }
 0x110   :  { %849 = vst [vmem:[%s1429_s2 + $0xd8] sm:$0xff] %v785_v3  ;;  %v817_v5 = vsel %vm689_vm6, %v1049_v59, %v753_v63  ;;  %v751_v6 = vmul.f32 0.2, %v602_v1 }
 0x111   :  { %881 = vst [vmem:[%s1429_s2 + $0x1d8] sm:$0xff] %v817_v5  ;;  %v783_v7 = vsel %vm655_vm7, %v474_v0, %v719_v4  ;;  %v1020_v8 = vpop.f32.mrb[28].mxu0  ;;  %v1052_v9 = vpop.f32.mrb[28].mxu1 }
 0x112   :  { %847 = vst [vmem:[%s1429_s2 + $0xc8] sm:$0xff] %v783_v7  ;;  %v815_v10 = vsel %vm687_vm8, %v602_v1, %v751_v6  ;;  %vm660_vm9 = vcmp.gt.f32.partialorder %v1020_v8, 0.0  ;;  %v724_v11 = vmul.f32 0.2, %v1020_v8  ;;  %vm692_vm10 = vcmp.gt.f32.partialorder %v1052_v9, 0.0  ;;  %v487_v12 = vpop.f32.mrb[29].mxu0 }
 0x113   :  { %v615_v13 = vpop.f32.mrb[29].mxu1  ;;  %879 = vst [vmem:[%s1429_s2 + $0x1c8] sm:$0xff] %v815_v10  ;;  %v756_v14 = vmul.f32 0.2, %v1052_v9  ;;  %vm658_vm11 = vcmp.gt.f32.partialorder %v487_v12, 0.0  ;;  %v1021_v18 = vpop.f32.mrb[30].mxu0 }
 0x114   :  { %v722_v15 = vmul.f32 0.2, %v487_v12  ;;  %vm690_vm12 = vcmp.gt.f32.partialorder %v615_v13, 0.0  ;;  %v788_v16 = vsel %vm660_vm9, %v1020_v8, %v724_v11  ;;  %v754_v17 = vmul.f32 0.2, %v615_v13  ;;  %v1053_v19 = vpop.f32.mrb[30].mxu1 }
 0x115   :  { %852 = vst [vmem:[%s1429_s2 + $0xf0] sm:$0xff] %v788_v16  ;;  %v820_v20 = vsel %vm692_vm10, %v1052_v9, %v756_v14  ;;  %vm661_vm13 = vcmp.gt.f32.partialorder %v1021_v18, 0.0  ;;  %v725_v22 = vmul.f32 0.2, %v1021_v18  ;;  %v490_v23 = vpop.f32.mrb[31].mxu0  ;;  %v618_v24 = vpop.f32.mrb[31].mxu1 }
 0x116   :  { %v786_v21 = vsel %vm658_vm11, %v487_v12, %v722_v15  ;;  %884 = vst [vmem:[%s1429_s2 + $0x1f0] sm:$0xff] %v820_v20  ;;  %v818_v25 = vsel %vm690_vm12, %v615_v13, %v754_v17  ;;  %vm693_vm14 = vcmp.gt.f32.partialorder %v1053_v19, 0.0  ;;  %v757_v26 = vmul.f32 0.2, %v1053_v19 }
 0x117   :  { %850 = vst [vmem:[%s1429_s2 + $0xe0] sm:$0xff] %v786_v21  ;;  %vm659_vm15 = vcmp.gt.f32.partialorder %v490_v23, 0.0  ;;  %882 = vst [vmem:[%s1429_s2 + $0x1e0] sm:$0xff] %v818_v25  ;;  %v789_v27 = vsel %vm661_vm13, %v1021_v18, %v725_v22  ;;  %v723_v28 = vmul.f32 0.2, %v490_v23  ;;  %vm691_vm0 = vcmp.gt.f32.partialorder %v618_v24, 0.0 }
 0x118   :  { %v755_v29 = vmul.f32 0.2, %v618_v24  ;;  %853 = vst [vmem:[%s1429_s2 + $0xf8] sm:$0xff] %v789_v27  ;;  %v821_v30 = vsel %vm693_vm14, %v1053_v19, %v757_v26 }
 0x119   :  { %885 = vst [vmem:[%s1429_s2 + $0x1f8] sm:$0xff] %v821_v30  ;;  %v787_v31 = vsel %vm659_vm15, %v490_v23, %v723_v28 }
 0x11a   :  { %v819_v32 = vsel %vm691_vm0, %v618_v24, %v755_v29  ;;  %851 = vst [vmem:[%s1429_s2 + $0xe8] sm:$0xff] %v787_v31 }
 0x11b   :  { %883 = vst [vmem:[%s1429_s2 + $0x1e8] sm:$0xff] %v819_v32 }

// kernel: discriminator_forward.5
= control target key start
LH: loop header
LB: loop body
LE: loop exit
PB: predicated region body
PF: predicated region fallthrough
CT: control target
= control target key end

     0   :  { %s5199_s15 = smov 0   ;;  %s5201_s16 = smov 0   ;;  %s6634_s0 = inlined_call_operand.vmem [shape: bf16[128,2048], index: 0, kind: input, shape index: {}]   ;;  %s6635_s1 = inlined_call_operand.vmem [shape: bf16[2048,256], index: 1, kind: input, shape index: {}]   ;;  %s6636_s2 = inlined_call_operand.vmem [shape: f32[1,256], index: 2, kind: input, shape index: {}]   ;;  %s6637_s3 = inlined_call_operand.vmem [shape: f32[1,256], index: 3, kind: input, shape index: {}]   ;;  %s6638_s4 = inlined_call_operand.vmem [shape: f32[128,256], index: 4, kind: output, shape index: {}]  }
   0x1   :  { %s5203_s17 = smov 0  }
   0x2 LB: > { %s5215_s18 = sadd.s32 4294967295, %s5172_s17   ;;  %s5218_s19 = sadd.s32 1, %s5172_s17   ;;  %s5172_s17 = sphi %s5203_s17, %s6642_s17   ;;  %s5168_s16 = sphi %s5201_s16, %s6641_s16   ;;  %s5164_s15 = sphi %s5199_s15, %s6640_s15  }
   0x3   : > { %s39_s20 = ssub.s32 %s5172_s17, %s5218_s19  ;;  %s42_s21 = sadd.s32 1, %s5168_s16 }
   0x4   : > { %p40_p0 = scmp.eq.s32.totalorder %s39_s20, 0  ;;  %p49_p1 = scmp.ne.s32.totalorder %s5168_s16, %s5164_s15 }
   0x5   : > { %p50_p2 = scmp.eq.s32.totalorder %s5172_s17, 0  ;;  %p131_p3 = scmp.eq.s32.totalorder %s5215_s18, 1 }
   0x6   : > { %s5228_s22 = scalar_select %p40_p0, %s5168_s16, %s42_s21  }
   0x7   : > { %p51_p4 = por %p50_p2, %p49_p1  ;;  %p5230_p5 = por %p131_p3, %p49_p1 }
   0x8   : > { %p4217_p6 = scmp.ge.s32.totalorder %s5172_s17, 2 }
   0xa   : > { %156 = sbr.rel (%p4217_p6) target bundleno = 191 (0xbf), region = 20 }
  0x11   : > { %159 = sbr.rel (!%p51_p4) target bundleno = 191 (0xbf), region = 24  ;;  %s161_s24 = sand.u32 (%p51_p4), 1, %s5168_s16  }
  0x12   : > { %s4219_s25 = sshll.u32 (%p51_p4), %s5172_s17, 2  ;;  %s4218_s26 = sshll.u32 (%p51_p4), %s161_s24, 10 }
  0x13   : > { %s5240_s29 = scalar_lea.vmem (%p51_p4), %s6635_s1, %s4219_s25  ;;  %s5244_s30 = scalar_lea.vmem (%p51_p4), [#allocation2], %s4218_s26 }
  0x14   : > { %v181_v0 = vld [vmem:[%s5240_s29] sm:$0xf] (%p51_p4)  ;;  %v183_v1 = vld [vmem:[%s5240_s29 + $0x8] sm:$0xf] (%p51_p4)  ;;  %v185_v2 = vld [vmem:[%s5240_s29 + $0x10] sm:$0xf] (%p51_p4) }
  0x15   : > { %182 = vst [vmem:[%s5244_s30] sm:$0xf] (%p51_p4), %v181_v0  ;;  %184 = vst [vmem:[%s5244_s30 + $0x4] sm:$0xf] (%p51_p4), %v183_v1  ;;  %v187_v3 = vld [vmem:[%s5240_s29 + $0x18] sm:$0xf] (%p51_p4) }
  0x16   : > { %v189_v4 = vld [vmem:[%s5240_s29 + $0x20] sm:$0xf] (%p51_p4)  ;;  %186 = vst [vmem:[%s5244_s30 + $0x8] sm:$0xf] (%p51_p4), %v185_v2  ;;  %188 = vst [vmem:[%s5244_s30 + $0xc] sm:$0xf] (%p51_p4), %v187_v3 }
  0x17   : > { %190 = vst [vmem:[%s5244_s30 + $0x10] sm:$0xf] (%p51_p4), %v189_v4  ;;  %v191_v5 = vld [vmem:[%s5240_s29 + $0x28] sm:$0xf] (%p51_p4)  ;;  %v193_v6 = vld [vmem:[%s5240_s29 + $0x30] sm:$0xf] (%p51_p4) }
  0x18   : > { %v195_v7 = vld [vmem:[%s5240_s29 + $0x38] sm:$0xf]  ;;  %192 = vst [vmem:[%s5244_s30 + $0x14] sm:$0xf] %v191_v5  ;;  %194 = vst [vmem:[%s5244_s30 + $0x18] sm:$0xf] %v193_v6 }
  0x19   : > { %196 = vst [vmem:[%s5244_s30 + $0x1c] sm:$0xf] %v195_v7  ;;  %v197_v8 = vld [vmem:[%s5240_s29 + $0x40] sm:$0xf]  ;;  %v199_v9 = vld [vmem:[%s5240_s29 + $0x48] sm:$0xf] }
  0x1a   : > { %v201_v10 = vld [vmem:[%s5240_s29 + $0x50] sm:$0xf]  ;;  %198 = vst [vmem:[%s5244_s30 + $0x20] sm:$0xf] %v197_v8  ;;  %200 = vst [vmem:[%s5244_s30 + $0x24] sm:$0xf] %v199_v9 }
  0x1b   : > { %202 = vst [vmem:[%s5244_s30 + $0x28] sm:$0xf] %v201_v10  ;;  %v203_v11 = vld [vmem:[%s5240_s29 + $0x58] sm:$0xf]  ;;  %v205_v12 = vld [vmem:[%s5240_s29 + $0x60] sm:$0xf] }
  0x1c   : > { %v207_v13 = vld [vmem:[%s5240_s29 + $0x68] sm:$0xf]  ;;  %204 = vst [vmem:[%s5244_s30 + $0x2c] sm:$0xf] %v203_v11  ;;  %206 = vst [vmem:[%s5244_s30 + $0x30] sm:$0xf] %v205_v12 }
  0x1d   : > { %208 = vst [vmem:[%s5244_s30 + $0x34] sm:$0xf] %v207_v13  ;;  %v209_v14 = vld [vmem:[%s5240_s29 + $0x70] sm:$0xf]  ;;  %v211_v15 = vld [vmem:[%s5240_s29 + $0x78] sm:$0xf] }
  0x1e   : > { %v213_v16 = vld [vmem:[%s5240_s29 + $0x80] sm:$0xf]  ;;  %210 = vst [vmem:[%s5244_s30 + $0x38] sm:$0xf] %v209_v14  ;;  %212 = vst [vmem:[%s5244_s30 + $0x3c] sm:$0xf] %v211_v15 }
  0x1f   : > { %214 = vst [vmem:[%s5244_s30 + $0x40] sm:$0xf] %v213_v16  ;;  %v215_v17 = vld [vmem:[%s5240_s29 + $0x88] sm:$0xf]  ;;  %v217_v18 = vld [vmem:[%s5240_s29 + $0x90] sm:$0xf] }
  0x20   : > { %v219_v19 = vld [vmem:[%s5240_s29 + $0x98] sm:$0xf]  ;;  %216 = vst [vmem:[%s5244_s30 + $0x44] sm:$0xf] %v215_v17  ;;  %218 = vst [vmem:[%s5244_s30 + $0x48] sm:$0xf] %v217_v18 }
  0x21   : > { %220 = vst [vmem:[%s5244_s30 + $0x4c] sm:$0xf] %v219_v19  ;;  %v221_v20 = vld [vmem:[%s5240_s29 + $0xa0] sm:$0xf]  ;;  %v223_v21 = vld [vmem:[%s5240_s29 + $0xa8] sm:$0xf] }
  0x22   : > { %v225_v22 = vld [vmem:[%s5240_s29 + $0xb0] sm:$0xf]  ;;  %222 = vst [vmem:[%s5244_s30 + $0x50] sm:$0xf] %v221_v20  ;;  %224 = vst [vmem:[%s5244_s30 + $0x54] sm:$0xf] %v223_v21 }
  0x23   : > { %226 = vst [vmem:[%s5244_s30 + $0x58] sm:$0xf] %v225_v22  ;;  %v227_v23 = vld [vmem:[%s5240_s29 + $0xb8] sm:$0xf]  ;;  %v229_v24 = vld [vmem:[%s5240_s29 + $0xc0] sm:$0xf] }
  0x24   : > { %v231_v25 = vld [vmem:[%s5240_s29 + $0xc8] sm:$0xf]  ;;  %228 = vst [vmem:[%s5244_s30 + $0x5c] sm:$0xf] %v227_v23  ;;  %230 = vst [vmem:[%s5244_s30 + $0x60] sm:$0xf] %v229_v24 }
  0x25   : > { %232 = vst [vmem:[%s5244_s30 + $0x64] sm:$0xf] %v231_v25  ;;  %v233_v26 = vld [vmem:[%s5240_s29 + $0xd0] sm:$0xf]  ;;  %v235_v27 = vld [vmem:[%s5240_s29 + $0xd8] sm:$0xf] }
  0x26   : > { %v237_v28 = vld [vmem:[%s5240_s29 + $0xe0] sm:$0xf]  ;;  %234 = vst [vmem:[%s5244_s30 + $0x68] sm:$0xf] %v233_v26  ;;  %236 = vst [vmem:[%s5244_s30 + $0x6c] sm:$0xf] %v235_v27 }
  0x27   : > { %238 = vst [vmem:[%s5244_s30 + $0x70] sm:$0xf] %v237_v28  ;;  %v239_v29 = vld [vmem:[%s5240_s29 + $0xe8] sm:$0xf]  ;;  %v241_v30 = vld [vmem:[%s5240_s29 + $0xf0] sm:$0xf] }
  0x28   : > { %v243_v31 = vld [vmem:[%s5240_s29 + $0xf8] sm:$0xf]  ;;  %240 = vst [vmem:[%s5244_s30 + $0x74] sm:$0xf] %v239_v29  ;;  %242 = vst [vmem:[%s5244_s30 + $0x78] sm:$0xf] %v241_v30 }
  0x29   : > { %244 = vst [vmem:[%s5244_s30 + $0x7c] sm:$0xf] %v243_v31  ;;  %v245_v32 = vld [vmem:[%s5240_s29 + $0x100] sm:$0xf]  ;;  %v247_v33 = vld [vmem:[%s5240_s29 + $0x108] sm:$0xf] }
  0x2a   : > { %v249_v34 = vld [vmem:[%s5240_s29 + $0x110] sm:$0xf]  ;;  %246 = vst [vmem:[%s5244_s30 + $0x80] sm:$0xf] %v245_v32  ;;  %248 = vst [vmem:[%s5244_s30 + $0x84] sm:$0xf] %v247_v33 }
  0x2b   : > { %250 = vst [vmem:[%s5244_s30 + $0x88] sm:$0xf] %v249_v34  ;;  %v251_v35 = vld [vmem:[%s5240_s29 + $0x118] sm:$0xf]  ;;  %v253_v36 = vld [vmem:[%s5240_s29 + $0x120] sm:$0xf] }
  0x2c   : > { %v255_v37 = vld [vmem:[%s5240_s29 + $0x128] sm:$0xf]  ;;  %252 = vst [vmem:[%s5244_s30 + $0x8c] sm:$0xf] %v251_v35  ;;  %254 = vst [vmem:[%s5244_s30 + $0x90] sm:$0xf] %v253_v36 }
  0x2d   : > { %256 = vst [vmem:[%s5244_s30 + $0x94] sm:$0xf] %v255_v37  ;;  %v257_v38 = vld [vmem:[%s5240_s29 + $0x130] sm:$0xf]  ;;  %v259_v39 = vld [vmem:[%s5240_s29 + $0x138] sm:$0xf] }
  0x2e   : > { %v261_v40 = vld [vmem:[%s5240_s29 + $0x140] sm:$0xf]  ;;  %258 = vst [vmem:[%s5244_s30 + $0x98] sm:$0xf] %v257_v38  ;;  %260 = vst [vmem:[%s5244_s30 + $0x9c] sm:$0xf] %v259_v39 }
  0x2f   : > { %262 = vst [vmem:[%s5244_s30 + $0xa0] sm:$0xf] %v261_v40  ;;  %v263_v41 = vld [vmem:[%s5240_s29 + $0x148] sm:$0xf]  ;;  %v265_v42 = vld [vmem:[%s5240_s29 + $0x150] sm:$0xf] }
  0x30   : > { %v267_v43 = vld [vmem:[%s5240_s29 + $0x158] sm:$0xf]  ;;  %264 = vst [vmem:[%s5244_s30 + $0xa4] sm:$0xf] %v263_v41  ;;  %266 = vst [vmem:[%s5244_s30 + $0xa8] sm:$0xf] %v265_v42 }
  0x31   : > { %268 = vst [vmem:[%s5244_s30 + $0xac] sm:$0xf] %v267_v43  ;;  %v269_v44 = vld [vmem:[%s5240_s29 + $0x160] sm:$0xf]  ;;  %v271_v45 = vld [vmem:[%s5240_s29 + $0x168] sm:$0xf] }
  0x32   : > { %v273_v46 = vld [vmem:[%s5240_s29 + $0x170] sm:$0xf]  ;;  %270 = vst [vmem:[%s5244_s30 + $0xb0] sm:$0xf] %v269_v44  ;;  %272 = vst [vmem:[%s5244_s30 + $0xb4] sm:$0xf] %v271_v45 }
  0x33   : > { %274 = vst [vmem:[%s5244_s30 + $0xb8] sm:$0xf] %v273_v46  ;;  %v275_v47 = vld [vmem:[%s5240_s29 + $0x178] sm:$0xf]  ;;  %v277_v48 = vld [vmem:[%s5240_s29 + $0x180] sm:$0xf] }
  0x34   : > { %v279_v49 = vld [vmem:[%s5240_s29 + $0x188] sm:$0xf]  ;;  %276 = vst [vmem:[%s5244_s30 + $0xbc] sm:$0xf] %v275_v47  ;;  %278 = vst [vmem:[%s5244_s30 + $0xc0] sm:$0xf] %v277_v48 }
  0x35   : > { %280 = vst [vmem:[%s5244_s30 + $0xc4] sm:$0xf] %v279_v49  ;;  %v281_v50 = vld [vmem:[%s5240_s29 + $0x190] sm:$0xf]  ;;  %v283_v51 = vld [vmem:[%s5240_s29 + $0x198] sm:$0xf] }
  0x36   : > { %v285_v52 = vld [vmem:[%s5240_s29 + $0x1a0] sm:$0xf]  ;;  %282 = vst [vmem:[%s5244_s30 + $0xc8] sm:$0xf] %v281_v50  ;;  %284 = vst [vmem:[%s5244_s30 + $0xcc] sm:$0xf] %v283_v51 }
  0x37   : > { %286 = vst [vmem:[%s5244_s30 + $0xd0] sm:$0xf] %v285_v52  ;;  %v287_v53 = vld [vmem:[%s5240_s29 + $0x1a8] sm:$0xf]  ;;  %v289_v54 = vld [vmem:[%s5240_s29 + $0x1b0] sm:$0xf] }
  0x38   : > { %v291_v55 = vld [vmem:[%s5240_s29 + $0x1b8] sm:$0xf]  ;;  %288 = vst [vmem:[%s5244_s30 + $0xd4] sm:$0xf] %v287_v53  ;;  %290 = vst [vmem:[%s5244_s30 + $0xd8] sm:$0xf] %v289_v54 }
  0x39   : > { %292 = vst [vmem:[%s5244_s30 + $0xdc] sm:$0xf] %v291_v55  ;;  %v293_v56 = vld [vmem:[%s5240_s29 + $0x1c0] sm:$0xf]  ;;  %v295_v57 = vld [vmem:[%s5240_s29 + $0x1c8] sm:$0xf] }
  0x3a   : > { %v297_v58 = vld [vmem:[%s5240_s29 + $0x1d0] sm:$0xf]  ;;  %294 = vst [vmem:[%s5244_s30 + $0xe0] sm:$0xf] %v293_v56  ;;  %296 = vst [vmem:[%s5244_s30 + $0xe4] sm:$0xf] %v295_v57 }
  0x3b   : > { %298 = vst [vmem:[%s5244_s30 + $0xe8] sm:$0xf] %v297_v58  ;;  %v299_v59 = vld [vmem:[%s5240_s29 + $0x1d8] sm:$0xf]  ;;  %v301_v60 = vld [vmem:[%s5240_s29 + $0x1e0] sm:$0xf] }
  0x3c   : > { %v303_v61 = vld [vmem:[%s5240_s29 + $0x1e8] sm:$0xf]  ;;  %300 = vst [vmem:[%s5244_s30 + $0xec] sm:$0xf] %v299_v59  ;;  %302 = vst [vmem:[%s5244_s30 + $0xf0] sm:$0xf] %v301_v60 }
  0x3d   : > { %304 = vst [vmem:[%s5244_s30 + $0xf4] sm:$0xf] %v303_v61  ;;  %v305_v62 = vld [vmem:[%s5240_s29 + $0x1f0] sm:$0xf]  ;;  %v307_v63 = vld [vmem:[%s5240_s29 + $0x1f8] sm:$0xf] }
  0x3e   : > { %v309_v0 = vld [vmem:[%s5240_s29 + $0x200] sm:$0xf]  ;;  %306 = vst [vmem:[%s5244_s30 + $0xf8] sm:$0xf] %v305_v62  ;;  %308 = vst [vmem:[%s5244_s30 + $0xfc] sm:$0xf] %v307_v63 }
  0x3f   : > { %310 = vst [vmem:[%s5244_s30 + $0x100] sm:$0xf] %v309_v0  ;;  %v311_v1 = vld [vmem:[%s5240_s29 + $0x208] sm:$0xf]  ;;  %v313_v2 = vld [vmem:[%s5240_s29 + $0x210] sm:$0xf] }
  0x40   : > { %v315_v3 = vld [vmem:[%s5240_s29 + $0x218] sm:$0xf]  ;;  %312 = vst [vmem:[%s5244_s30 + $0x104] sm:$0xf] %v311_v1  ;;  %314 = vst [vmem:[%s5244_s30 + $0x108] sm:$0xf] %v313_v2 }
  0x41   : > { %316 = vst [vmem:[%s5244_s30 + $0x10c] sm:$0xf] %v315_v3  ;;  %v317_v4 = vld [vmem:[%s5240_s29 + $0x220] sm:$0xf]  ;;  %v319_v5 = vld [vmem:[%s5240_s29 + $0x228] sm:$0xf] }
  0x42   : > { %v321_v6 = vld [vmem:[%s5240_s29 + $0x230] sm:$0xf]  ;;  %318 = vst [vmem:[%s5244_s30 + $0x110] sm:$0xf] %v317_v4  ;;  %320 = vst [vmem:[%s5244_s30 + $0x114] sm:$0xf] %v319_v5 }
  0x43   : > { %322 = vst [vmem:[%s5244_s30 + $0x118] sm:$0xf] %v321_v6  ;;  %v323_v7 = vld [vmem:[%s5240_s29 + $0x238] sm:$0xf]  ;;  %v325_v8 = vld [vmem:[%s5240_s29 + $0x240] sm:$0xf] }
  0x44   : > { %v327_v9 = vld [vmem:[%s5240_s29 + $0x248] sm:$0xf]  ;;  %324 = vst [vmem:[%s5244_s30 + $0x11c] sm:$0xf] %v323_v7  ;;  %326 = vst [vmem:[%s5244_s30 + $0x120] sm:$0xf] %v325_v8 }
  0x45   : > { %328 = vst [vmem:[%s5244_s30 + $0x124] sm:$0xf] %v327_v9  ;;  %v329_v10 = vld [vmem:[%s5240_s29 + $0x250] sm:$0xf]  ;;  %v331_v11 = vld [vmem:[%s5240_s29 + $0x258] sm:$0xf] }
  0x46   : > { %v333_v12 = vld [vmem:[%s5240_s29 + $0x260] sm:$0xf]  ;;  %330 = vst [vmem:[%s5244_s30 + $0x128] sm:$0xf] %v329_v10  ;;  %332 = vst [vmem:[%s5244_s30 + $0x12c] sm:$0xf] %v331_v11 }
  0x47   : > { %334 = vst [vmem:[%s5244_s30 + $0x130] sm:$0xf] %v333_v12  ;;  %v335_v13 = vld [vmem:[%s5240_s29 + $0x268] sm:$0xf]  ;;  %v337_v14 = vld [vmem:[%s5240_s29 + $0x270] sm:$0xf] }
  0x48   : > { %v339_v15 = vld [vmem:[%s5240_s29 + $0x278] sm:$0xf]  ;;  %336 = vst [vmem:[%s5244_s30 + $0x134] sm:$0xf] %v335_v13  ;;  %338 = vst [vmem:[%s5244_s30 + $0x138] sm:$0xf] %v337_v14 }
  0x49   : > { %340 = vst [vmem:[%s5244_s30 + $0x13c] sm:$0xf] %v339_v15  ;;  %v341_v16 = vld [vmem:[%s5240_s29 + $0x280] sm:$0xf]  ;;  %v343_v17 = vld [vmem:[%s5240_s29 + $0x288] sm:$0xf] }
  0x4a   : > { %v345_v18 = vld [vmem:[%s5240_s29 + $0x290] sm:$0xf]  ;;  %342 = vst [vmem:[%s5244_s30 + $0x140] sm:$0xf] %v341_v16  ;;  %344 = vst [vmem:[%s5244_s30 + $0x144] sm:$0xf] %v343_v17 }
  0x4b   : > { %346 = vst [vmem:[%s5244_s30 + $0x148] sm:$0xf] %v345_v18  ;;  %v347_v19 = vld [vmem:[%s5240_s29 + $0x298] sm:$0xf]  ;;  %v349_v20 = vld [vmem:[%s5240_s29 + $0x2a0] sm:$0xf] }
  0x4c   : > { %v351_v21 = vld [vmem:[%s5240_s29 + $0x2a8] sm:$0xf]  ;;  %348 = vst [vmem:[%s5244_s30 + $0x14c] sm:$0xf] %v347_v19  ;;  %350 = vst [vmem:[%s5244_s30 + $0x150] sm:$0xf] %v349_v20 }
  0x4d   : > { %352 = vst [vmem:[%s5244_s30 + $0x154] sm:$0xf] %v351_v21  ;;  %v353_v22 = vld [vmem:[%s5240_s29 + $0x2b0] sm:$0xf]  ;;  %v355_v23 = vld [vmem:[%s5240_s29 + $0x2b8] sm:$0xf] }
  0x4e   : > { %v357_v24 = vld [vmem:[%s5240_s29 + $0x2c0] sm:$0xf]  ;;  %354 = vst [vmem:[%s5244_s30 + $0x158] sm:$0xf] %v353_v22  ;;  %356 = vst [vmem:[%s5244_s30 + $0x15c] sm:$0xf] %v355_v23 }
  0x4f   : > { %358 = vst [vmem:[%s5244_s30 + $0x160] sm:$0xf] %v357_v24  ;;  %v359_v25 = vld [vmem:[%s5240_s29 + $0x2c8] sm:$0xf]  ;;  %v361_v26 = vld [vmem:[%s5240_s29 + $0x2d0] sm:$0xf] }
  0x50   : > { %v363_v27 = vld [vmem:[%s5240_s29 + $0x2d8] sm:$0xf]  ;;  %360 = vst [vmem:[%s5244_s30 + $0x164] sm:$0xf] %v359_v25  ;;  %362 = vst [vmem:[%s5244_s30 + $0x168] sm:$0xf] %v361_v26 }
  0x51   : > { %364 = vst [vmem:[%s5244_s30 + $0x16c] sm:$0xf] %v363_v27  ;;  %v365_v28 = vld [vmem:[%s5240_s29 + $0x2e0] sm:$0xf]  ;;  %v367_v29 = vld [vmem:[%s5240_s29 + $0x2e8] sm:$0xf] }
  0x52   : > { %v369_v30 = vld [vmem:[%s5240_s29 + $0x2f0] sm:$0xf]  ;;  %366 = vst [vmem:[%s5244_s30 + $0x170] sm:$0xf] %v365_v28  ;;  %368 = vst [vmem:[%s5244_s30 + $0x174] sm:$0xf] %v367_v29 }
  0x53   : > { %370 = vst [vmem:[%s5244_s30 + $0x178] sm:$0xf] %v369_v30  ;;  %v371_v31 = vld [vmem:[%s5240_s29 + $0x2f8] sm:$0xf]  ;;  %v373_v32 = vld [vmem:[%s5240_s29 + $0x300] sm:$0xf] }
  0x54   : > { %v375_v33 = vld [vmem:[%s5240_s29 + $0x308] sm:$0xf]  ;;  %372 = vst [vmem:[%s5244_s30 + $0x17c] sm:$0xf] %v371_v31  ;;  %374 = vst [vmem:[%s5244_s30 + $0x180] sm:$0xf] %v373_v32 }
  0x55   : > { %376 = vst [vmem:[%s5244_s30 + $0x184] sm:$0xf] %v375_v33  ;;  %v377_v34 = vld [vmem:[%s5240_s29 + $0x310] sm:$0xf]  ;;  %v379_v35 = vld [vmem:[%s5240_s29 + $0x318] sm:$0xf] }
  0x56   : > { %v381_v36 = vld [vmem:[%s5240_s29 + $0x320] sm:$0xf]  ;;  %378 = vst [vmem:[%s5244_s30 + $0x188] sm:$0xf] %v377_v34  ;;  %380 = vst [vmem:[%s5244_s30 + $0x18c] sm:$0xf] %v379_v35 }
  0x57   : > { %382 = vst [vmem:[%s5244_s30 + $0x190] sm:$0xf] %v381_v36  ;;  %v383_v37 = vld [vmem:[%s5240_s29 + $0x328] sm:$0xf]  ;;  %v385_v38 = vld [vmem:[%s5240_s29 + $0x330] sm:$0xf] }
  0x58   : > { %v387_v39 = vld [vmem:[%s5240_s29 + $0x338] sm:$0xf]  ;;  %384 = vst [vmem:[%s5244_s30 + $0x194] sm:$0xf] %v383_v37  ;;  %386 = vst [vmem:[%s5244_s30 + $0x198] sm:$0xf] %v385_v38 }
  0x59   : > { %388 = vst [vmem:[%s5244_s30 + $0x19c] sm:$0xf] %v387_v39  ;;  %v389_v40 = vld [vmem:[%s5240_s29 + $0x340] sm:$0xf]  ;;  %v391_v41 = vld [vmem:[%s5240_s29 + $0x348] sm:$0xf] }
  0x5a   : > { %v393_v42 = vld [vmem:[%s5240_s29 + $0x350] sm:$0xf]  ;;  %390 = vst [vmem:[%s5244_s30 + $0x1a0] sm:$0xf] %v389_v40  ;;  %392 = vst [vmem:[%s5244_s30 + $0x1a4] sm:$0xf] %v391_v41 }
  0x5b   : > { %394 = vst [vmem:[%s5244_s30 + $0x1a8] sm:$0xf] %v393_v42  ;;  %v395_v43 = vld [vmem:[%s5240_s29 + $0x358] sm:$0xf]  ;;  %v397_v44 = vld [vmem:[%s5240_s29 + $0x360] sm:$0xf] }
  0x5c   : > { %v399_v45 = vld [vmem:[%s5240_s29 + $0x368] sm:$0xf]  ;;  %396 = vst [vmem:[%s5244_s30 + $0x1ac] sm:$0xf] %v395_v43  ;;  %398 = vst [vmem:[%s5244_s30 + $0x1b0] sm:$0xf] %v397_v44 }
  0x5d   : > { %400 = vst [vmem:[%s5244_s30 + $0x1b4] sm:$0xf] %v399_v45  ;;  %v401_v46 = vld [vmem:[%s5240_s29 + $0x370] sm:$0xf]  ;;  %v403_v47 = vld [vmem:[%s5240_s29 + $0x378] sm:$0xf] }
  0x5e   : > { %v405_v48 = vld [vmem:[%s5240_s29 + $0x380] sm:$0xf]  ;;  %402 = vst [vmem:[%s5244_s30 + $0x1b8] sm:$0xf] %v401_v46  ;;  %404 = vst [vmem:[%s5244_s30 + $0x1bc] sm:$0xf] %v403_v47 }
  0x5f   : > { %406 = vst [vmem:[%s5244_s30 + $0x1c0] sm:$0xf] %v405_v48  ;;  %v407_v49 = vld [vmem:[%s5240_s29 + $0x388] sm:$0xf]  ;;  %v409_v50 = vld [vmem:[%s5240_s29 + $0x390] sm:$0xf] }
  0x60   : > { %v411_v51 = vld [vmem:[%s5240_s29 + $0x398] sm:$0xf]  ;;  %408 = vst [vmem:[%s5244_s30 + $0x1c4] sm:$0xf] %v407_v49  ;;  %410 = vst [vmem:[%s5244_s30 + $0x1c8] sm:$0xf] %v409_v50 }
  0x61   : > { %412 = vst [vmem:[%s5244_s30 + $0x1cc] sm:$0xf] %v411_v51  ;;  %v413_v52 = vld [vmem:[%s5240_s29 + $0x3a0] sm:$0xf]  ;;  %v415_v53 = vld [vmem:[%s5240_s29 + $0x3a8] sm:$0xf] }
  0x62   : > { %v417_v54 = vld [vmem:[%s5240_s29 + $0x3b0] sm:$0xf]  ;;  %414 = vst [vmem:[%s5244_s30 + $0x1d0] sm:$0xf] %v413_v52  ;;  %416 = vst [vmem:[%s5244_s30 + $0x1d4] sm:$0xf] %v415_v53 }
  0x63   : > { %418 = vst [vmem:[%s5244_s30 + $0x1d8] sm:$0xf] %v417_v54  ;;  %v419_v55 = vld [vmem:[%s5240_s29 + $0x3b8] sm:$0xf]  ;;  %v421_v56 = vld [vmem:[%s5240_s29 + $0x3c0] sm:$0xf] }
  0x64   : > { %v423_v57 = vld [vmem:[%s5240_s29 + $0x3c8] sm:$0xf]  ;;  %420 = vst [vmem:[%s5244_s30 + $0x1dc] sm:$0xf] %v419_v55  ;;  %422 = vst [vmem:[%s5244_s30 + $0x1e0] sm:$0xf] %v421_v56 }
  0x65   : > { %424 = vst [vmem:[%s5244_s30 + $0x1e4] sm:$0xf] %v423_v57  ;;  %v425_v58 = vld [vmem:[%s5240_s29 + $0x3d0] sm:$0xf]  ;;  %v427_v59 = vld [vmem:[%s5240_s29 + $0x3d8] sm:$0xf] }
  0x66   : > { %v429_v60 = vld [vmem:[%s5240_s29 + $0x3e0] sm:$0xf]  ;;  %426 = vst [vmem:[%s5244_s30 + $0x1e8] sm:$0xf] %v425_v58  ;;  %428 = vst [vmem:[%s5244_s30 + $0x1ec] sm:$0xf] %v427_v59 }
  0x67   : > { %430 = vst [vmem:[%s5244_s30 + $0x1f0] sm:$0xf] %v429_v60  ;;  %v431_v61 = vld [vmem:[%s5240_s29 + $0x3e8] sm:$0xf]  ;;  %v433_v62 = vld [vmem:[%s5240_s29 + $0x3f0] sm:$0xf] }
  0x68   : > { %v435_v63 = vld [vmem:[%s5240_s29 + $0x3f8] sm:$0xf]  ;;  %432 = vst [vmem:[%s5244_s30 + $0x1f4] sm:$0xf] %v431_v61  ;;  %434 = vst [vmem:[%s5244_s30 + $0x1f8] sm:$0xf] %v433_v62 }
  0x69   : > { %436 = vst [vmem:[%s5244_s30 + $0x1fc] sm:$0xf] %v435_v63  ;;  %v437_v0 = vld [vmem:[%s5240_s29 + $0x400] sm:$0xf]  ;;  %v439_v1 = vld [vmem:[%s5240_s29 + $0x408] sm:$0xf] }
  0x6a   : > { %v441_v2 = vld [vmem:[%s5240_s29 + $0x410] sm:$0xf]  ;;  %438 = vst [vmem:[%s5244_s30 + $0x200] sm:$0xf] %v437_v0  ;;  %440 = vst [vmem:[%s5244_s30 + $0x204] sm:$0xf] %v439_v1 }
  0x6b   : > { %442 = vst [vmem:[%s5244_s30 + $0x208] sm:$0xf] %v441_v2  ;;  %v443_v3 = vld [vmem:[%s5240_s29 + $0x418] sm:$0xf]  ;;  %v445_v4 = vld [vmem:[%s5240_s29 + $0x420] sm:$0xf] }
  0x6c   : > { %v447_v5 = vld [vmem:[%s5240_s29 + $0x428] sm:$0xf]  ;;  %444 = vst [vmem:[%s5244_s30 + $0x20c] sm:$0xf] %v443_v3  ;;  %446 = vst [vmem:[%s5244_s30 + $0x210] sm:$0xf] %v445_v4 }
  0x6d   : > { %448 = vst [vmem:[%s5244_s30 + $0x214] sm:$0xf] %v447_v5  ;;  %v449_v6 = vld [vmem:[%s5240_s29 + $0x430] sm:$0xf]  ;;  %v451_v7 = vld [vmem:[%s5240_s29 + $0x438] sm:$0xf] }
  0x6e   : > { %v453_v8 = vld [vmem:[%s5240_s29 + $0x440] sm:$0xf]  ;;  %450 = vst [vmem:[%s5244_s30 + $0x218] sm:$0xf] %v449_v6  ;;  %452 = vst [vmem:[%s5244_s30 + $0x21c] sm:$0xf] %v451_v7 }
  0x6f   : > { %454 = vst [vmem:[%s5244_s30 + $0x220] sm:$0xf] %v453_v8  ;;  %v455_v9 = vld [vmem:[%s5240_s29 + $0x448] sm:$0xf]  ;;  %v457_v10 = vld [vmem:[%s5240_s29 + $0x450] sm:$0xf] }
  0x70   : > { %v459_v11 = vld [vmem:[%s5240_s29 + $0x458] sm:$0xf]  ;;  %456 = vst [vmem:[%s5244_s30 + $0x224] sm:$0xf] %v455_v9  ;;  %458 = vst [vmem:[%s5244_s30 + $0x228] sm:$0xf] %v457_v10 }
  0x71   : > { %460 = vst [vmem:[%s5244_s30 + $0x22c] sm:$0xf] %v459_v11  ;;  %v461_v12 = vld [vmem:[%s5240_s29 + $0x460] sm:$0xf]  ;;  %v463_v13 = vld [vmem:[%s5240_s29 + $0x468] sm:$0xf] }
  0x72   : > { %v465_v14 = vld [vmem:[%s5240_s29 + $0x470] sm:$0xf]  ;;  %462 = vst [vmem:[%s5244_s30 + $0x230] sm:$0xf] %v461_v12  ;;  %464 = vst [vmem:[%s5244_s30 + $0x234] sm:$0xf] %v463_v13 }
  0x73   : > { %466 = vst [vmem:[%s5244_s30 + $0x238] sm:$0xf] %v465_v14  ;;  %v467_v15 = vld [vmem:[%s5240_s29 + $0x478] sm:$0xf]  ;;  %v469_v16 = vld [vmem:[%s5240_s29 + $0x480] sm:$0xf] }
  0x74   : > { %v471_v17 = vld [vmem:[%s5240_s29 + $0x488] sm:$0xf]  ;;  %468 = vst [vmem:[%s5244_s30 + $0x23c] sm:$0xf] %v467_v15  ;;  %470 = vst [vmem:[%s5244_s30 + $0x240] sm:$0xf] %v469_v16 }
  0x75   : > { %472 = vst [vmem:[%s5244_s30 + $0x244] sm:$0xf] %v471_v17  ;;  %v473_v18 = vld [vmem:[%s5240_s29 + $0x490] sm:$0xf]  ;;  %v475_v19 = vld [vmem:[%s5240_s29 + $0x498] sm:$0xf] }
  0x76   : > { %v477_v20 = vld [vmem:[%s5240_s29 + $0x4a0] sm:$0xf]  ;;  %474 = vst [vmem:[%s5244_s30 + $0x248] sm:$0xf] %v473_v18  ;;  %476 = vst [vmem:[%s5244_s30 + $0x24c] sm:$0xf] %v475_v19 }
  0x77   : > { %478 = vst [vmem:[%s5244_s30 + $0x250] sm:$0xf] %v477_v20  ;;  %v479_v21 = vld [vmem:[%s5240_s29 + $0x4a8] sm:$0xf]  ;;  %v481_v22 = vld [vmem:[%s5240_s29 + $0x4b0] sm:$0xf] }
  0x78   : > { %v483_v23 = vld [vmem:[%s5240_s29 + $0x4b8] sm:$0xf]  ;;  %480 = vst [vmem:[%s5244_s30 + $0x254] sm:$0xf] %v479_v21  ;;  %482 = vst [vmem:[%s5244_s30 + $0x258] sm:$0xf] %v481_v22 }
  0x79   : > { %484 = vst [vmem:[%s5244_s30 + $0x25c] sm:$0xf] %v483_v23  ;;  %v485_v24 = vld [vmem:[%s5240_s29 + $0x4c0] sm:$0xf]  ;;  %v487_v25 = vld [vmem:[%s5240_s29 + $0x4c8] sm:$0xf] }
  0x7a   : > { %v489_v26 = vld [vmem:[%s5240_s29 + $0x4d0] sm:$0xf]  ;;  %486 = vst [vmem:[%s5244_s30 + $0x260] sm:$0xf] %v485_v24  ;;  %488 = vst [vmem:[%s5244_s30 + $0x264] sm:$0xf] %v487_v25 }
  0x7b   : > { %490 = vst [vmem:[%s5244_s30 + $0x268] sm:$0xf] %v489_v26  ;;  %v491_v27 = vld [vmem:[%s5240_s29 + $0x4d8] sm:$0xf]  ;;  %v493_v28 = vld [vmem:[%s5240_s29 + $0x4e0] sm:$0xf] }
  0x7c   : > { %v495_v29 = vld [vmem:[%s5240_s29 + $0x4e8] sm:$0xf]  ;;  %492 = vst [vmem:[%s5244_s30 + $0x26c] sm:$0xf] %v491_v27  ;;  %494 = vst [vmem:[%s5244_s30 + $0x270] sm:$0xf] %v493_v28 }
  0x7d   : > { %496 = vst [vmem:[%s5244_s30 + $0x274] sm:$0xf] %v495_v29  ;;  %v497_v30 = vld [vmem:[%s5240_s29 + $0x4f0] sm:$0xf]  ;;  %v499_v31 = vld [vmem:[%s5240_s29 + $0x4f8] sm:$0xf] }
  0x7e   : > { %v501_v32 = vld [vmem:[%s5240_s29 + $0x500] sm:$0xf]  ;;  %498 = vst [vmem:[%s5244_s30 + $0x278] sm:$0xf] %v497_v30  ;;  %500 = vst [vmem:[%s5244_s30 + $0x27c] sm:$0xf] %v499_v31 }
  0x7f   : > { %502 = vst [vmem:[%s5244_s30 + $0x280] sm:$0xf] %v501_v32  ;;  %v503_v33 = vld [vmem:[%s5240_s29 + $0x508] sm:$0xf]  ;;  %v505_v34 = vld [vmem:[%s5240_s29 + $0x510] sm:$0xf] }
  0x80   : > { %v507_v35 = vld [vmem:[%s5240_s29 + $0x518] sm:$0xf]  ;;  %504 = vst [vmem:[%s5244_s30 + $0x284] sm:$0xf] %v503_v33  ;;  %506 = vst [vmem:[%s5244_s30 + $0x288] sm:$0xf] %v505_v34 }
  0x81   : > { %508 = vst [vmem:[%s5244_s30 + $0x28c] sm:$0xf] %v507_v35  ;;  %v509_v36 = vld [vmem:[%s5240_s29 + $0x520] sm:$0xf]  ;;  %v511_v37 = vld [vmem:[%s5240_s29 + $0x528] sm:$0xf] }
  0x82   : > { %v513_v38 = vld [vmem:[%s5240_s29 + $0x530] sm:$0xf]  ;;  %510 = vst [vmem:[%s5244_s30 + $0x290] sm:$0xf] %v509_v36  ;;  %512 = vst [vmem:[%s5244_s30 + $0x294] sm:$0xf] %v511_v37 }
  0x83   : > { %514 = vst [vmem:[%s5244_s30 + $0x298] sm:$0xf] %v513_v38  ;;  %v515_v39 = vld [vmem:[%s5240_s29 + $0x538] sm:$0xf]  ;;  %v517_v40 = vld [vmem:[%s5240_s29 + $0x540] sm:$0xf] }
  0x84   : > { %v519_v41 = vld [vmem:[%s5240_s29 + $0x548] sm:$0xf]  ;;  %516 = vst [vmem:[%s5244_s30 + $0x29c] sm:$0xf] %v515_v39  ;;  %518 = vst [vmem:[%s5244_s30 + $0x2a0] sm:$0xf] %v517_v40 }
  0x85   : > { %520 = vst [vmem:[%s5244_s30 + $0x2a4] sm:$0xf] %v519_v41  ;;  %v521_v42 = vld [vmem:[%s5240_s29 + $0x550] sm:$0xf]  ;;  %v523_v43 = vld [vmem:[%s5240_s29 + $0x558] sm:$0xf] }
  0x86   : > { %v525_v44 = vld [vmem:[%s5240_s29 + $0x560] sm:$0xf]  ;;  %522 = vst [vmem:[%s5244_s30 + $0x2a8] sm:$0xf] %v521_v42  ;;  %524 = vst [vmem:[%s5244_s30 + $0x2ac] sm:$0xf] %v523_v43 }
  0x87   : > { %526 = vst [vmem:[%s5244_s30 + $0x2b0] sm:$0xf] %v525_v44  ;;  %v527_v45 = vld [vmem:[%s5240_s29 + $0x568] sm:$0xf]  ;;  %v529_v46 = vld [vmem:[%s5240_s29 + $0x570] sm:$0xf] }
  0x88   : > { %v531_v47 = vld [vmem:[%s5240_s29 + $0x578] sm:$0xf]  ;;  %528 = vst [vmem:[%s5244_s30 + $0x2b4] sm:$0xf] %v527_v45  ;;  %530 = vst [vmem:[%s5244_s30 + $0x2b8] sm:$0xf] %v529_v46 }
  0x89   : > { %532 = vst [vmem:[%s5244_s30 + $0x2bc] sm:$0xf] %v531_v47  ;;  %v533_v48 = vld [vmem:[%s5240_s29 + $0x580] sm:$0xf]  ;;  %v535_v49 = vld [vmem:[%s5240_s29 + $0x588] sm:$0xf] }
  0x8a   : > { %v537_v50 = vld [vmem:[%s5240_s29 + $0x590] sm:$0xf]  ;;  %534 = vst [vmem:[%s5244_s30 + $0x2c0] sm:$0xf] %v533_v48  ;;  %536 = vst [vmem:[%s5244_s30 + $0x2c4] sm:$0xf] %v535_v49 }
  0x8b   : > { %538 = vst [vmem:[%s5244_s30 + $0x2c8] sm:$0xf] %v537_v50  ;;  %v539_v51 = vld [vmem:[%s5240_s29 + $0x598] sm:$0xf]  ;;  %v541_v52 = vld [vmem:[%s5240_s29 + $0x5a0] sm:$0xf] }
  0x8c   : > { %v543_v53 = vld [vmem:[%s5240_s29 + $0x5a8] sm:$0xf]  ;;  %540 = vst [vmem:[%s5244_s30 + $0x2cc] sm:$0xf] %v539_v51  ;;  %542 = vst [vmem:[%s5244_s30 + $0x2d0] sm:$0xf] %v541_v52 }
  0x8d   : > { %544 = vst [vmem:[%s5244_s30 + $0x2d4] sm:$0xf] %v543_v53  ;;  %v545_v54 = vld [vmem:[%s5240_s29 + $0x5b0] sm:$0xf]  ;;  %v547_v55 = vld [vmem:[%s5240_s29 + $0x5b8] sm:$0xf] }
  0x8e   : > { %v549_v56 = vld [vmem:[%s5240_s29 + $0x5c0] sm:$0xf]  ;;  %546 = vst [vmem:[%s5244_s30 + $0x2d8] sm:$0xf] %v545_v54  ;;  %548 = vst [vmem:[%s5244_s30 + $0x2dc] sm:$0xf] %v547_v55 }
  0x8f   : > { %550 = vst [vmem:[%s5244_s30 + $0x2e0] sm:$0xf] %v549_v56  ;;  %v551_v57 = vld [vmem:[%s5240_s29 + $0x5c8] sm:$0xf]  ;;  %v553_v58 = vld [vmem:[%s5240_s29 + $0x5d0] sm:$0xf] }
  0x90   : > { %v555_v59 = vld [vmem:[%s5240_s29 + $0x5d8] sm:$0xf]  ;;  %552 = vst [vmem:[%s5244_s30 + $0x2e4] sm:$0xf] %v551_v57  ;;  %554 = vst [vmem:[%s5244_s30 + $0x2e8] sm:$0xf] %v553_v58 }
  0x91   : > { %556 = vst [vmem:[%s5244_s30 + $0x2ec] sm:$0xf] %v555_v59  ;;  %v557_v60 = vld [vmem:[%s5240_s29 + $0x5e0] sm:$0xf]  ;;  %v559_v61 = vld [vmem:[%s5240_s29 + $0x5e8] sm:$0xf] }
  0x92   : > { %v561_v62 = vld [vmem:[%s5240_s29 + $0x5f0] sm:$0xf]  ;;  %558 = vst [vmem:[%s5244_s30 + $0x2f0] sm:$0xf] %v557_v60  ;;  %560 = vst [vmem:[%s5244_s30 + $0x2f4] sm:$0xf] %v559_v61 }
  0x93   : > { %562 = vst [vmem:[%s5244_s30 + $0x2f8] sm:$0xf] %v561_v62  ;;  %v563_v63 = vld [vmem:[%s5240_s29 + $0x5f8] sm:$0xf]  ;;  %v565_v0 = vld [vmem:[%s5240_s29 + $0x600] sm:$0xf] }
  0x94   : > { %v567_v1 = vld [vmem:[%s5240_s29 + $0x608] sm:$0xf]  ;;  %564 = vst [vmem:[%s5244_s30 + $0x2fc] sm:$0xf] %v563_v63  ;;  %566 = vst [vmem:[%s5244_s30 + $0x300] sm:$0xf] %v565_v0 }
  0x95   : > { %568 = vst [vmem:[%s5244_s30 + $0x304] sm:$0xf] %v567_v1  ;;  %v569_v2 = vld [vmem:[%s5240_s29 + $0x610] sm:$0xf]  ;;  %v571_v3 = vld [vmem:[%s5240_s29 + $0x618] sm:$0xf] }
  0x96   : > { %v573_v4 = vld [vmem:[%s5240_s29 + $0x620] sm:$0xf]  ;;  %570 = vst [vmem:[%s5244_s30 + $0x308] sm:$0xf] %v569_v2  ;;  %572 = vst [vmem:[%s5244_s30 + $0x30c] sm:$0xf] %v571_v3 }
  0x97   : > { %574 = vst [vmem:[%s5244_s30 + $0x310] sm:$0xf] %v573_v4  ;;  %v575_v5 = vld [vmem:[%s5240_s29 + $0x628] sm:$0xf]  ;;  %v577_v6 = vld [vmem:[%s5240_s29 + $0x630] sm:$0xf] }
  0x98   : > { %v579_v7 = vld [vmem:[%s5240_s29 + $0x638] sm:$0xf]  ;;  %576 = vst [vmem:[%s5244_s30 + $0x314] sm:$0xf] %v575_v5  ;;  %578 = vst [vmem:[%s5244_s30 + $0x318] sm:$0xf] %v577_v6 }
  0x99   : > { %580 = vst [vmem:[%s5244_s30 + $0x31c] sm:$0xf] %v579_v7  ;;  %v581_v8 = vld [vmem:[%s5240_s29 + $0x640] sm:$0xf]  ;;  %v583_v9 = vld [vmem:[%s5240_s29 + $0x648] sm:$0xf] }
  0x9a   : > { %v585_v10 = vld [vmem:[%s5240_s29 + $0x650] sm:$0xf]  ;;  %582 = vst [vmem:[%s5244_s30 + $0x320] sm:$0xf] %v581_v8  ;;  %584 = vst [vmem:[%s5244_s30 + $0x324] sm:$0xf] %v583_v9 }
  0x9b   : > { %586 = vst [vmem:[%s5244_s30 + $0x328] sm:$0xf] %v585_v10  ;;  %v587_v11 = vld [vmem:[%s5240_s29 + $0x658] sm:$0xf]  ;;  %v589_v12 = vld [vmem:[%s5240_s29 + $0x660] sm:$0xf] }
  0x9c   : > { %v591_v13 = vld [vmem:[%s5240_s29 + $0x668] sm:$0xf]  ;;  %588 = vst [vmem:[%s5244_s30 + $0x32c] sm:$0xf] %v587_v11  ;;  %590 = vst [vmem:[%s5244_s30 + $0x330] sm:$0xf] %v589_v12 }
  0x9d   : > { %592 = vst [vmem:[%s5244_s30 + $0x334] sm:$0xf] %v591_v13  ;;  %v593_v14 = vld [vmem:[%s5240_s29 + $0x670] sm:$0xf]  ;;  %v595_v15 = vld [vmem:[%s5240_s29 + $0x678] sm:$0xf] }
  0x9e   : > { %v597_v16 = vld [vmem:[%s5240_s29 + $0x680] sm:$0xf]  ;;  %594 = vst [vmem:[%s5244_s30 + $0x338] sm:$0xf] %v593_v14  ;;  %596 = vst [vmem:[%s5244_s30 + $0x33c] sm:$0xf] %v595_v15 }
  0x9f   : > { %598 = vst [vmem:[%s5244_s30 + $0x340] sm:$0xf] %v597_v16  ;;  %v599_v17 = vld [vmem:[%s5240_s29 + $0x688] sm:$0xf]  ;;  %v601_v18 = vld [vmem:[%s5240_s29 + $0x690] sm:$0xf] }
  0xa0   : > { %v603_v19 = vld [vmem:[%s5240_s29 + $0x698] sm:$0xf]  ;;  %600 = vst [vmem:[%s5244_s30 + $0x344] sm:$0xf] %v599_v17  ;;  %602 = vst [vmem:[%s5244_s30 + $0x348] sm:$0xf] %v601_v18 }
  0xa1   : > { %604 = vst [vmem:[%s5244_s30 + $0x34c] sm:$0xf] %v603_v19  ;;  %v605_v20 = vld [vmem:[%s5240_s29 + $0x6a0] sm:$0xf]  ;;  %v607_v21 = vld [vmem:[%s5240_s29 + $0x6a8] sm:$0xf] }
  0xa2   : > { %v609_v22 = vld [vmem:[%s5240_s29 + $0x6b0] sm:$0xf]  ;;  %606 = vst [vmem:[%s5244_s30 + $0x350] sm:$0xf] %v605_v20  ;;  %608 = vst [vmem:[%s5244_s30 + $0x354] sm:$0xf] %v607_v21 }
  0xa3   : > { %610 = vst [vmem:[%s5244_s30 + $0x358] sm:$0xf] %v609_v22  ;;  %v611_v23 = vld [vmem:[%s5240_s29 + $0x6b8] sm:$0xf]  ;;  %v613_v24 = vld [vmem:[%s5240_s29 + $0x6c0] sm:$0xf] }
  0xa4   : > { %v615_v25 = vld [vmem:[%s5240_s29 + $0x6c8] sm:$0xf]  ;;  %612 = vst [vmem:[%s5244_s30 + $0x35c] sm:$0xf] %v611_v23  ;;  %614 = vst [vmem:[%s5244_s30 + $0x360] sm:$0xf] %v613_v24 }
  0xa5   : > { %616 = vst [vmem:[%s5244_s30 + $0x364] sm:$0xf] %v615_v25  ;;  %v617_v26 = vld [vmem:[%s5240_s29 + $0x6d0] sm:$0xf]  ;;  %v619_v27 = vld [vmem:[%s5240_s29 + $0x6d8] sm:$0xf] }
  0xa6   : > { %v621_v28 = vld [vmem:[%s5240_s29 + $0x6e0] sm:$0xf]  ;;  %618 = vst [vmem:[%s5244_s30 + $0x368] sm:$0xf] %v617_v26  ;;  %620 = vst [vmem:[%s5244_s30 + $0x36c] sm:$0xf] %v619_v27 }
  0xa7   : > { %622 = vst [vmem:[%s5244_s30 + $0x370] sm:$0xf] %v621_v28  ;;  %v623_v29 = vld [vmem:[%s5240_s29 + $0x6e8] sm:$0xf]  ;;  %v625_v30 = vld [vmem:[%s5240_s29 + $0x6f0] sm:$0xf] }
  0xa8   : > { %v627_v31 = vld [vmem:[%s5240_s29 + $0x6f8] sm:$0xf]  ;;  %624 = vst [vmem:[%s5244_s30 + $0x374] sm:$0xf] %v623_v29  ;;  %626 = vst [vmem:[%s5244_s30 + $0x378] sm:$0xf] %v625_v30 }
  0xa9   : > { %628 = vst [vmem:[%s5244_s30 + $0x37c] sm:$0xf] %v627_v31  ;;  %v629_v32 = vld [vmem:[%s5240_s29 + $0x700] sm:$0xf]  ;;  %v631_v33 = vld [vmem:[%s5240_s29 + $0x708] sm:$0xf] }
  0xaa   : > { %v633_v34 = vld [vmem:[%s5240_s29 + $0x710] sm:$0xf]  ;;  %630 = vst [vmem:[%s5244_s30 + $0x380] sm:$0xf] %v629_v32  ;;  %632 = vst [vmem:[%s5244_s30 + $0x384] sm:$0xf] %v631_v33 }
  0xab   : > { %634 = vst [vmem:[%s5244_s30 + $0x388] sm:$0xf] %v633_v34  ;;  %v635_v35 = vld [vmem:[%s5240_s29 + $0x718] sm:$0xf]  ;;  %v637_v36 = vld [vmem:[%s5240_s29 + $0x720] sm:$0xf] }
  0xac   : > { %v639_v37 = vld [vmem:[%s5240_s29 + $0x728] sm:$0xf]  ;;  %636 = vst [vmem:[%s5244_s30 + $0x38c] sm:$0xf] %v635_v35  ;;  %638 = vst [vmem:[%s5244_s30 + $0x390] sm:$0xf] %v637_v36 }
  0xad   : > { %640 = vst [vmem:[%s5244_s30 + $0x394] sm:$0xf] %v639_v37  ;;  %v641_v38 = vld [vmem:[%s5240_s29 + $0x730] sm:$0xf]  ;;  %v643_v39 = vld [vmem:[%s5240_s29 + $0x738] sm:$0xf] }
  0xae   : > { %v645_v40 = vld [vmem:[%s5240_s29 + $0x740] sm:$0xf]  ;;  %642 = vst [vmem:[%s5244_s30 + $0x398] sm:$0xf] %v641_v38  ;;  %644 = vst [vmem:[%s5244_s30 + $0x39c] sm:$0xf] %v643_v39 }
  0xaf   : > { %646 = vst [vmem:[%s5244_s30 + $0x3a0] sm:$0xf] %v645_v40  ;;  %v647_v41 = vld [vmem:[%s5240_s29 + $0x748] sm:$0xf]  ;;  %v649_v42 = vld [vmem:[%s5240_s29 + $0x750] sm:$0xf] }
  0xb0   : > { %v651_v43 = vld [vmem:[%s5240_s29 + $0x758] sm:$0xf]  ;;  %648 = vst [vmem:[%s5244_s30 + $0x3a4] sm:$0xf] %v647_v41  ;;  %650 = vst [vmem:[%s5244_s30 + $0x3a8] sm:$0xf] %v649_v42 }
  0xb1   : > { %652 = vst [vmem:[%s5244_s30 + $0x3ac] sm:$0xf] %v651_v43  ;;  %v653_v44 = vld [vmem:[%s5240_s29 + $0x760] sm:$0xf]  ;;  %v655_v45 = vld [vmem:[%s5240_s29 + $0x768] sm:$0xf] }
  0xb2   : > { %v657_v46 = vld [vmem:[%s5240_s29 + $0x770] sm:$0xf]  ;;  %654 = vst [vmem:[%s5244_s30 + $0x3b0] sm:$0xf] %v653_v44  ;;  %656 = vst [vmem:[%s5244_s30 + $0x3b4] sm:$0xf] %v655_v45 }
  0xb3   : > { %658 = vst [vmem:[%s5244_s30 + $0x3b8] sm:$0xf] %v657_v46  ;;  %v659_v47 = vld [vmem:[%s5240_s29 + $0x778] sm:$0xf]  ;;  %v661_v48 = vld [vmem:[%s5240_s29 + $0x780] sm:$0xf] }
  0xb4   : > { %v663_v49 = vld [vmem:[%s5240_s29 + $0x788] sm:$0xf]  ;;  %660 = vst [vmem:[%s5244_s30 + $0x3bc] sm:$0xf] %v659_v47  ;;  %662 = vst [vmem:[%s5244_s30 + $0x3c0] sm:$0xf] %v661_v48 }
  0xb5   : > { %664 = vst [vmem:[%s5244_s30 + $0x3c4] sm:$0xf] %v663_v49  ;;  %v665_v50 = vld [vmem:[%s5240_s29 + $0x790] sm:$0xf]  ;;  %v667_v51 = vld [vmem:[%s5240_s29 + $0x798] sm:$0xf] }
  0xb6   : > { %v669_v52 = vld [vmem:[%s5240_s29 + $0x7a0] sm:$0xf]  ;;  %666 = vst [vmem:[%s5244_s30 + $0x3c8] sm:$0xf] %v665_v50  ;;  %668 = vst [vmem:[%s5244_s30 + $0x3cc] sm:$0xf] %v667_v51 }
  0xb7   : > { %670 = vst [vmem:[%s5244_s30 + $0x3d0] sm:$0xf] %v669_v52  ;;  %v671_v53 = vld [vmem:[%s5240_s29 + $0x7a8] sm:$0xf]  ;;  %v673_v54 = vld [vmem:[%s5240_s29 + $0x7b0] sm:$0xf] }
  0xb8   : > { %v675_v55 = vld [vmem:[%s5240_s29 + $0x7b8] sm:$0xf]  ;;  %672 = vst [vmem:[%s5244_s30 + $0x3d4] sm:$0xf] %v671_v53  ;;  %674 = vst [vmem:[%s5244_s30 + $0x3d8] sm:$0xf] %v673_v54 }
  0xb9   : > { %676 = vst [vmem:[%s5244_s30 + $0x3dc] sm:$0xf] %v675_v55  ;;  %v677_v56 = vld [vmem:[%s5240_s29 + $0x7c0] sm:$0xf]  ;;  %v679_v57 = vld [vmem:[%s5240_s29 + $0x7c8] sm:$0xf] }
  0xba   : > { %v681_v58 = vld [vmem:[%s5240_s29 + $0x7d0] sm:$0xf]  ;;  %678 = vst [vmem:[%s5244_s30 + $0x3e0] sm:$0xf] %v677_v56  ;;  %680 = vst [vmem:[%s5244_s30 + $0x3e4] sm:$0xf] %v679_v57 }
  0xbb   : > { %682 = vst [vmem:[%s5244_s30 + $0x3e8] sm:$0xf] %v681_v58  ;;  %v683_v59 = vld [vmem:[%s5240_s29 + $0x7d8] sm:$0xf]  ;;  %v685_v60 = vld [vmem:[%s5240_s29 + $0x7e0] sm:$0xf] }
  0xbc   : > { %v687_v61 = vld [vmem:[%s5240_s29 + $0x7e8] sm:$0xf]  ;;  %684 = vst [vmem:[%s5244_s30 + $0x3ec] sm:$0xf] %v683_v59  ;;  %686 = vst [vmem:[%s5244_s30 + $0x3f0] sm:$0xf] %v685_v60 }
  0xbd   : > { %688 = vst [vmem:[%s5244_s30 + $0x3f4] sm:$0xf] %v687_v61  ;;  %v689_v62 = vld [vmem:[%s5240_s29 + $0x7f0] sm:$0xf]  ;;  %v691_v63 = vld [vmem:[%s5240_s29 + $0x7f8] sm:$0xf] }
  0xbe   : > { %690 = vst [vmem:[%s5244_s30 + $0x3f8] sm:$0xf] %v689_v62  ;;  %692 = vst [vmem:[%s5244_s30 + $0x3fc] sm:$0xf] %v691_v63 }
  0xbf PF: > { %p4220_p7 = scmp.ge.s32.totalorder %s5172_s17, 1  ;;  %p1238_p8 = scmp.lt.s32.totalorder %s5172_s17, 3 }
  0xc1   : > { %p1239_p9 = pnand %p4220_p7, %p1238_p8 }
  0xc2   : > { %s1245_s5 = sand.u32 (!%p1239_p9), 1, %s5164_s15   ;;  %v5762_v0 = vld [vmem:[%s6634_s0] sm:$0xff] (!%p1239_p9)  ;;  %v5772_v2 = vld [vmem:[%s6634_s0 + $0x8] sm:$0xff] (!%p1239_p9)  ;;  %p1275_p10 = scmp.lt.s32.totalorder (!%p1239_p9), %s5215_s18, 1 }
  0xc3   : > { %1242 = sbr.rel (%p1239_p9) target bundleno = 816 (0x330), region = 73  ;;  %v5767_v1 = vld [vmem:[%s6634_s0 + $0x40] sm:$0xff] (!%p1239_p9)  ;;  %s4221_s12 = sshll.u32 (!%p1239_p9), %s1245_s5, 10  ;;  %v5781_v4 = vld [vmem:[%s6634_s0 + $0x48] sm:$0xff] (!%p1239_p9) }
  0xc4   : > { %v4224_v3 = vcombine.high (!%p1239_p9), %v5762_v0, %v5767_v1  ;;  %v4226_v5 = vcombine.high (!%p1239_p9), %v5772_v2, %v5781_v4  ;;  %s5785_s17 = scalar_lea.vmem (!%p1239_p9), [#allocation2], %s4221_s12  ;;  %v1298_v35 = vld [vmem:[%s6634_s0 + $0x80] sm:$0xff] (!%p1239_p9)  ;;  %v1299_v38 = vld [vmem:[%s6634_s0 + $0x88] sm:$0xff] (!%p1239_p9)  ;;  %v4223_v42 = vcombine.low (!%p1239_p9), %v5762_v0, %v5767_v1  ;;  %v4225_v43 = vcombine.low (!%p1239_p9), %v5772_v2, %v5781_v4  ;;  %s6565_s13 = sshll.u32 (!%p1239_p9), %s1245_s5, 7 }
  0xc5   : > { %v5020_v6 = vld [vmem:[%s5785_s17 + $0x40] sm:$0xff] (!%p1239_p9)   ;;  %v5024_v10 = vld [vmem:[%s5785_s17 + $0x48] sm:$0xff] (!%p1239_p9)   ;;  %v5028_v14 = vld [vmem:[%s5785_s17 + $0x50] sm:$0xff] (!%p1239_p9)   ;;  %s6570_s15 = scalar_lea.vmem (!%p1239_p9), [#allocation3], %s6565_s13 }
  0xc6   : > { %3106 = vmatprep.mubr.bf16.mxu0 (!%p1239_p9), %v4224_v3  ;;  %v5021_v7 = vld [vmem:[%s5785_s17 + $0xc0] sm:$0xff] (!%p1239_p9)   ;;  %3203 = vmatprep.mubr.bf16.mxu1 (!%p1239_p9), %v4226_v5  ;;  %v5025_v11 = vld [vmem:[%s5785_s17 + $0xc8] sm:$0xff] (!%p1239_p9)   ;;  %v5029_v15 = vld [vmem:[%s5785_s17 + $0xd0] sm:$0xff] (!%p1239_p9)  }
  0xc7   : > { %4484 = vmatprep.subr.bf16.mxu0 (!%p1239_p9), %v5020_v6  ;;  %v5022_v8 = vld [vmem:[%s5785_s17] sm:$0xff] (!%p1239_p9)   ;;  %4548 = vmatprep.subr.bf16.mxu1 (!%p1239_p9), %v5021_v7  ;;  %v5026_v12 = vld [vmem:[%s5785_s17 + $0x8] sm:$0xff] (!%p1239_p9)   ;;  %v5030_v16 = vld [vmem:[%s5785_s17 + $0x10] sm:$0xff] (!%p1239_p9)  }
  0xc8   : > { %v5023_v9 = vld [vmem:[%s5785_s17 + $0x80] sm:$0xff] (!%p1239_p9)   ;;  %4485 = vmatpush3.bf16.msra.mxu0 (!%p1239_p9), %v5022_v8  ;;  %v5027_v13 = vld [vmem:[%s5785_s17 + $0x88] sm:$0xff] (!%p1239_p9)   ;;  %v5031_v17 = vld [vmem:[%s5785_s17 + $0x90] sm:$0xff] (!%p1239_p9)  }
  0xc9   : > { %4549 = vmatpush3.bf16.msra.mxu1 (!%p1239_p9), %v5023_v9  ;;  %4486 = vmatprep.subr.bf16.mxu0 (!%p1239_p9), %v5024_v10  ;;  %v5032_v18 = vld [vmem:[%s5785_s17 + $0x58] sm:$0xff] (!%p1239_p9)   ;;  %v5036_v22 = vld [vmem:[%s5785_s17 + $0x60] sm:$0xff] (!%p1239_p9)   ;;  %v5040_v26 = vld [vmem:[%s5785_s17 + $0x68] sm:$0xff] (!%p1239_p9)  }
  0xca   : > { %4550 = vmatprep.subr.bf16.mxu1 %v5025_v11  ;;  %v5033_v19 = vld [vmem:[%s5785_s17 + $0xd8] sm:$0xff]   ;;  %v5037_v23 = vld [vmem:[%s5785_s17 + $0xe0] sm:$0xff]   ;;  %v5041_v27 = vld [vmem:[%s5785_s17 + $0xe8] sm:$0xff]   ;;  %s4481_s5 = sshll.u32 (%p5230_p5), %s5215_s18, 3 }
  0xcb   : > { %v5034_v20 = vld [vmem:[%s5785_s17 + $0x18] sm:$0xff]   ;;  %v5038_v24 = vld [vmem:[%s5785_s17 + $0x20] sm:$0xff]   ;;  %v5042_v28 = vld [vmem:[%s5785_s17 + $0x28] sm:$0xff]   ;;  %s4047_s21 = scalar_lea.vmem (%p5230_p5), %s6638_s4, %s4481_s5 }
  0xcc   : > { %4487 = vmatpush3.bf16.msra.mxu0 %v5026_v12  ;;  %v5035_v21 = vld [vmem:[%s5785_s17 + $0x98] sm:$0xff]   ;;  %v5039_v25 = vld [vmem:[%s5785_s17 + $0xa0] sm:$0xff]   ;;  %v5043_v29 = vld [vmem:[%s5785_s17 + $0xa8] sm:$0xff]  }
  0xcd   : > { %4551 = vmatpush3.bf16.msra.mxu1 %v5027_v13  ;;  %4488 = vmatprep.subr.bf16.mxu0 %v5028_v14  ;;  %v5044_v30 = vld [vmem:[%s5785_s17 + $0x70] sm:$0xff]   ;;  %v5048_v34 = vld [vmem:[%s5785_s17 + $0x78] sm:$0xff]   ;;  %v1306_v36 = vld [vmem:[%s6634_s0 + $0xc0] sm:$0xff] }
  0xce   : > { %4552 = vmatprep.subr.bf16.mxu1 %v5029_v15  ;;  %v5045_v31 = vld [vmem:[%s5785_s17 + $0xf0] sm:$0xff]   ;;  %v5049_v37 = vld [vmem:[%s5785_s17 + $0xf8] sm:$0xff]   ;;  %v1307_v39 = vld [vmem:[%s6634_s0 + $0xc8] sm:$0xff]  ;;  %v4240_v46 = vcombine.high %v1298_v35, %v1306_v36  ;;  %v4239_v54 = vcombine.low %v1298_v35, %v1306_v36 }
  0xcf   : > { %v5046_v32 = vld [vmem:[%s5785_s17 + $0x30] sm:$0xff]   ;;  %v5050_v40 = vld [vmem:[%s5785_s17 + $0x38] sm:$0xff]   ;;  %v5052_v44 = vld [vmem:[%s5785_s17 + $0x140] sm:$0xff]   ;;  %v4242_v48 = vcombine.high %v1299_v38, %v1307_v39  ;;  %v4241_v56 = vcombine.low %v1299_v38, %v1307_v39 }
  0xd0   : > { %4489 = vmatpush3.bf16.msra.mxu0 %v5030_v16  ;;  %v5047_v33 = vld [vmem:[%s5785_s17 + $0xb0] sm:$0xff]   ;;  %v5051_v41 = vld [vmem:[%s5785_s17 + $0xb8] sm:$0xff]   ;;  %v5053_v45 = vld [vmem:[%s5785_s17 + $0x100] sm:$0xff]  }
  0xd1   : > { %4553 = vmatpush3.bf16.msra.mxu1 %v5031_v17  ;;  %4490 = vmatprep.subr.bf16.mxu0 %v5032_v18  ;;  %v5054_v47 = vld [vmem:[%s5785_s17 + $0x1c0] sm:$0xff]   ;;  %v5056_v50 = vld [vmem:[%s5785_s17 + $0x148] sm:$0xff]   ;;  %v5060_v62 = vld [vmem:[%s5785_s17 + $0x150] sm:$0xff]  }
  0xd2   : > { %4554 = vmatprep.subr.bf16.mxu1 %v5033_v19  ;;  %v5055_v49 = vld [vmem:[%s5785_s17 + $0x180] sm:$0xff]   ;;  %v5057_v52 = vld [vmem:[%s5785_s17 + $0x108] sm:$0xff]   ;;  %v5061_v63 = vld [vmem:[%s5785_s17 + $0x110] sm:$0xff]  }
  0xd3   : > { %v1314_v51 = vld [vmem:[%s6634_s0 + $0x100] sm:$0xff]  ;;  %v5058_v53 = vld [vmem:[%s5785_s17 + $0x1c8] sm:$0xff]   ;;  %v5062_v0 = vld [vmem:[%s5785_s17 + $0x1d0] sm:$0xff]  }
  0xd4   : > { %4491 = vmatpush3.bf16.msra.mxu0 %v5034_v20  ;;  %v5059_v55 = vld [vmem:[%s5785_s17 + $0x188] sm:$0xff]   ;;  %v1322_v57 = vld [vmem:[%s6634_s0 + $0x140] sm:$0xff]  ;;  %v5063_v1 = vld [vmem:[%s5785_s17 + $0x190] sm:$0xff]  }
  0xd5   : > { %4555 = vmatpush3.bf16.msra.mxu1 %v5035_v21  ;;  %4492 = vmatprep.subr.bf16.mxu0 %v5036_v22  ;;  %v1315_v58 = vld [vmem:[%s6634_s0 + $0x108] sm:$0xff]  ;;  %v4256_v60 = vcombine.high %v1314_v51, %v1322_v57  ;;  %v1330_v2 = vld [vmem:[%s6634_s0 + $0x180] sm:$0xff]  ;;  %v4255_v6 = vcombine.low %v1314_v51, %v1322_v57  ;;  %v5064_v7 = vld [vmem:[%s5785_s17 + $0x158] sm:$0xff]  }
  0xd6   : > { %4556 = vmatprep.subr.bf16.mxu1 %v5037_v23  ;;  %v1323_v59 = vld [vmem:[%s6634_s0 + $0x148] sm:$0xff]  ;;  %v1338_v3 = vld [vmem:[%s6634_s0 + $0x1c0] sm:$0xff]  ;;  %v5065_v10 = vld [vmem:[%s5785_s17 + $0x118] sm:$0xff]  }
  0xd7   : > { %v4258_v61 = vcombine.high %v1315_v58, %v1323_v59  ;;  %v1331_v4 = vld [vmem:[%s6634_s0 + $0x188] sm:$0xff]  ;;  %v4257_v8 = vcombine.low %v1315_v58, %v1323_v59  ;;  %v4272_v9 = vcombine.high %v1330_v2, %v1338_v3  ;;  %v5066_v12 = vld [vmem:[%s5785_s17 + $0x1d8] sm:$0xff]   ;;  %v1346_v14 = vld [vmem:[%s6634_s0 + $0x200] sm:$0xff]  ;;  %v4271_v21 = vcombine.low %v1330_v2, %v1338_v3 }
  0xd8   : > { %4493 = vmatpush3.bf16.msra.mxu0 %v5038_v24  ;;  %v1339_v5 = vld [vmem:[%s6634_s0 + $0x1c8] sm:$0xff]  ;;  %v5067_v13 = vld [vmem:[%s5785_s17 + $0x198] sm:$0xff]   ;;  %v1354_v15 = vld [vmem:[%s6634_s0 + $0x240] sm:$0xff] }
  0xd9   : > { %4557 = vmatpush3.bf16.msra.mxu1 %v5039_v25  ;;  %4494 = vmatprep.subr.bf16.mxu0 %v5040_v26  ;;  %v4274_v11 = vcombine.high %v1331_v4, %v1339_v5  ;;  %v1347_v16 = vld [vmem:[%s6634_s0 + $0x208] sm:$0xff]  ;;  %v5068_v18 = vld [vmem:[%s5785_s17 + $0x160] sm:$0xff]   ;;  %v4273_v23 = vcombine.low %v1331_v4, %v1339_v5  ;;  %v4288_v24 = vcombine.high %v1346_v14, %v1354_v15  ;;  %v5076_v35 = vld [vmem:[%s5785_s17 + $0x170] sm:$0xff]  }
  0xda   : > { %4558 = vmatprep.subr.bf16.mxu1 %v5041_v27  ;;  %v1355_v17 = vld [vmem:[%s6634_s0 + $0x248] sm:$0xff]  ;;  %v5069_v19 = vld [vmem:[%s5785_s17 + $0x120] sm:$0xff]   ;;  %v5077_v38 = vld [vmem:[%s5785_s17 + $0x130] sm:$0xff]  }
  0xdb   : > { %v5070_v20 = vld [vmem:[%s5785_s17 + $0x1e0] sm:$0xff]   ;;  %v4290_v25 = vcombine.high %v1347_v16, %v1355_v17  ;;  %v5072_v26 = vld [vmem:[%s5785_s17 + $0x168] sm:$0xff]   ;;  %v4289_v36 = vcombine.low %v1347_v16, %v1355_v17  ;;  %v1285_v2 = vld [vmem:[%s6634_s0 + $0x18] sm:$0xff] }
  0xdc   : > { %4495 = vmatpush3.bf16.msra.mxu0 %v5042_v28  ;;  %v5071_v22 = vld [vmem:[%s5785_s17 + $0x1a0] sm:$0xff]   ;;  %v5073_v27 = vld [vmem:[%s5785_s17 + $0x128] sm:$0xff]   ;;  %v1293_v3 = vld [vmem:[%s6634_s0 + $0x58] sm:$0xff] }
  0xdd   : > { %4559 = vmatpush3.bf16.msra.mxu1 %v5043_v29  ;;  %4496 = vmatprep.subr.bf16.mxu0 %v5044_v30  ;;  %v5074_v28 = vld [vmem:[%s5785_s17 + $0x1e8] sm:$0xff]   ;;  %v1362_v30 = vld [vmem:[%s6634_s0 + $0x280] sm:$0xff] }
  0xde   : > { %4560 = vmatprep.subr.bf16.mxu1 %v5045_v31  ;;  %v5075_v29 = vld [vmem:[%s5785_s17 + $0x1a8] sm:$0xff]   ;;  %v1370_v31 = vld [vmem:[%s6634_s0 + $0x2c0] sm:$0xff] }
  0xdf   : > { %v1402_v57 = vld [vmem:[%s6634_s0 + $0x3c0] sm:$0xff]  ;;  %v1395_v58 = vld [vmem:[%s6634_s0 + $0x388] sm:$0xff] }
  0xe0   : > { %4497 = vmatpush3.bf16.msra.mxu0 %v5046_v32  ;;  %v1363_v32 = vld [vmem:[%s6634_s0 + $0x288] sm:$0xff] }
  0xe1   : > { %4561 = vmatpush3.bf16.msra.mxu1 %v5047_v33  ;;  %4498 = vmatprep.subr.bf16.mxu0 %v5048_v34  ;;  %v1371_v33 = vld [vmem:[%s6634_s0 + $0x2c8] sm:$0xff]  ;;  %v4287_v34 = vcombine.low %v1346_v14, %v1354_v15  ;;  %v5085_v14 = vld [vmem:[%s5785_s17 + $0x200] sm:$0xff]  }
  0xe2   : > { %4562 = vmatprep.subr.bf16.mxu1 %v5049_v37  ;;  %v4304_v37 = vcombine.high %v1362_v30, %v1370_v31  ;;  %v4306_v39 = vcombine.high %v1363_v32, %v1371_v33  ;;  %v4305_v51 = vcombine.low %v1363_v32, %v1371_v33  ;;  %v1403_v59 = vld [vmem:[%s6634_s0 + $0x3c8] sm:$0xff]  ;;  %v5087_v15 = vld [vmem:[%s5785_s17 + $0x280] sm:$0xff]   ;;  %v5095_v33 = vld [vmem:[%s5785_s17 + $0x290] sm:$0xff]  }
  0xe3   : > { %v4337_v5 = vcombine.low %v1395_v58, %v1403_v59 }
  0xe4   : > { %4499 = vmatpush3.bf16.msra.mxu0 %v5050_v40  ;;  %v5078_v40 = vld [vmem:[%s5785_s17 + $0x1f0] sm:$0xff]  }
  0xe5   : > { %4563 = vmatpush3.bf16.msra.mxu1 %v5051_v41  ;;  %4612 = vmatprep.subr.bf16.mxu0 %v5052_v44  ;;  %v5079_v41 = vld [vmem:[%s5785_s17 + $0x1b0] sm:$0xff]   ;;  %v1379_v44 = vld [vmem:[%s6634_s0 + $0x308] sm:$0xff] }
  0xe6   : > { %4676 = vmatprep.subr.bf16.mxu1 %v5054_v47  ;;  %v5081_v47 = vld [vmem:[%s5785_s17 + $0x138] sm:$0xff]  }
  0xe7   : > { %3107 = vmatmul.mubr.bf16.vlgmr.msra.gmra.mrb[0].mxu0 %v4223_v42  ;;  %v1378_v42 = vld [vmem:[%s6634_s0 + $0x300] sm:$0xff] }
  0xe8   : > { %3204 = vmatmul.mubr.bf16.vlgmr.msra.gmra.mrb[0].mxu1 %v4225_v43  ;;  %4613 = vmatpush3.bf16.msra.mxu0 %v5053_v45  ;;  %v1386_v43 = vld [vmem:[%s6634_s0 + $0x340] sm:$0xff]  ;;  %v1387_v45 = vld [vmem:[%s6634_s0 + $0x348] sm:$0xff] }
  0xe9   : > { %3114 = vmatprep.mubr.bf16.mxu0 %v4240_v46  ;;  %4677 = vmatpush3.bf16.msra.mxu1 %v5055_v49  ;;  %v5080_v46 = vld [vmem:[%s5785_s17 + $0x178] sm:$0xff]   ;;  %v4303_v49 = vcombine.low %v1362_v30, %v1370_v31  ;;  %v5093_v31 = vld [vmem:[%s5785_s17 + $0x210] sm:$0xff]  }
  0xea   : > { %3211 = vmatprep.mubr.bf16.mxu1 %v4242_v48  ;;  %4614 = vmatprep.subr.bf16.mxu0 %v5056_v50  ;;  %v5082_v48 = vld [vmem:[%s5785_s17 + $0x1f8] sm:$0xff]  }
  0xeb   : > { %4678 = vmatprep.subr.bf16.mxu1 %v5058_v53  ;;  %v5083_v50 = vld [vmem:[%s5785_s17 + $0x1b8] sm:$0xff]   ;;  %v4322_v53 = vcombine.high %v1379_v44, %v1387_v45 }
  0xec   : > { %4615 = vmatpush3.bf16.msra.mxu0 %v5057_v52  ;;  %v4320_v52 = vcombine.high %v1378_v42, %v1386_v43 }
  0xed   : > { %4679 = vmatpush3.bf16.msra.mxu1 %v5059_v55  ;;  %4616 = vmatprep.subr.bf16.mxu0 %v5060_v62  ;;  %v5086_v55 = vld [vmem:[%s5785_s17 + $0x2c0] sm:$0xff]  }
  0xee   : > { %4680 = vmatprep.subr.bf16.mxu1 %v5062_v0  ;;  %v1284_v0 = vld [vmem:[%s6634_s0 + $0x10] sm:$0xff] }
  0xef   : > { %3115 = vmatmul.mubr.bf16.gmra.mrb[4].mxu0 %v4239_v54  ;;  %v5084_v54 = vld [vmem:[%s5785_s17 + $0x240] sm:$0xff]  }
  0xf0   : > { %3212 = vmatmul.mubr.bf16.gmra.mrb[4].mxu1 %v4241_v56  ;;  %3122 = vmatprep.mubr.bf16.mxu0 %v4256_v60  ;;  %v1394_v56 = vld [vmem:[%s6634_s0 + $0x380] sm:$0xff]  ;;  %v4319_v60 = vcombine.low %v1378_v42, %v1386_v43 }
  0xf1   : > { %3219 = vmatprep.mubr.bf16.mxu1 %v4258_v61  ;;  %4617 = vmatpush3.bf16.msra.mxu0 %v5061_v63  ;;  %v4321_v61 = vcombine.low %v1379_v44, %v1387_v45  ;;  %v4336_v62 = vcombine.high %v1394_v56, %v1402_v57  ;;  %v4338_v63 = vcombine.high %v1395_v58, %v1403_v59  ;;  %v5100_v42 = vld [vmem:[%s5785_s17 + $0x260] sm:$0xff]   ;;  %v5108_v58 = vld [vmem:[%s5785_s17 + $0x270] sm:$0xff]  }
  0xf2   : > { %4681 = vmatpush3.bf16.msra.mxu1 %v5063_v1  ;;  %4618 = vmatprep.subr.bf16.mxu0 %v5064_v7  ;;  %v1292_v1 = vld [vmem:[%s6634_s0 + $0x50] sm:$0xff]  ;;  %v4335_v4 = vcombine.low %v1394_v56, %v1402_v57  ;;  %v4230_v7 = vcombine.high %v1285_v2, %v1293_v3  ;;  %v5102_v44 = vld [vmem:[%s5785_s17 + $0x2e0] sm:$0xff]   ;;  %v5105_v56 = vld [vmem:[%s5785_s17 + $0x228] sm:$0xff]  }
  0xf3   : > { %4682 = vmatprep.subr.bf16.mxu1 %v5066_v12  ;;  %v1309_v12 = vld [vmem:[%s6634_s0 + $0xd8] sm:$0xff]  ;;  %v5107_v57 = vld [vmem:[%s5785_s17 + $0x2a8] sm:$0xff]  }
  0xf5   : > { %4619 = vmatpush3.bf16.msra.mxu0 %v5065_v10  ;;  %v1301_v10 = vld [vmem:[%s6634_s0 + $0x98] sm:$0xff] }
  0xf6   : > { %4683 = vmatpush3.bf16.msra.mxu1 %v5067_v13  ;;  %4620 = vmatprep.subr.bf16.mxu0 %v5068_v18  ;;  %v4229_v13 = vcombine.low %v1285_v2, %v1293_v3  ;;  %v4246_v17 = vcombine.high %v1301_v10, %v1309_v12  ;;  %v5088_v18 = vld [vmem:[%s5785_s17 + $0x248] sm:$0xff]   ;;  %v5112_v2 = vld [vmem:[%s5785_s17 + $0x278] sm:$0xff]   ;;  %v1364_v3 = vld [vmem:[%s6634_s0 + $0x290] sm:$0xff] }
  0xf7   : > { %3123 = vmatmul.mubr.bf16.gmra.mrb[8].mxu0 %v4255_v6  ;;  %4684 = vmatprep.subr.bf16.mxu1 %v5070_v20  ;;  %v4228_v6 = vcombine.high %v1284_v0, %v1292_v1  ;;  %v5090_v20 = vld [vmem:[%s5785_s17 + $0x2c8] sm:$0xff]  }
  0xf8   : > { %3220 = vmatmul.mubr.bf16.gmra.mrb[8].mxu1 %v4257_v8  ;;  %3130 = vmatprep.mubr.bf16.mxu0 %v4272_v9  ;;  %v1300_v8 = vld [vmem:[%s6634_s0 + $0x90] sm:$0xff] }
  0xf9   : > { %3227 = vmatprep.mubr.bf16.mxu1 %v4274_v11  ;;  %4621 = vmatpush3.bf16.msra.mxu0 %v5069_v19  ;;  %v1308_v9 = vld [vmem:[%s6634_s0 + $0xd0] sm:$0xff]  ;;  %v4227_v11 = vcombine.low %v1284_v0, %v1292_v1  ;;  %v5089_v19 = vld [vmem:[%s5785_s17 + $0x208] sm:$0xff]  }
  0xfa   : > { %4685 = vmatpush3.bf16.msra.mxu1 %v5071_v22  ;;  %4622 = vmatprep.subr.bf16.mxu0 %v5072_v26  ;;  %v4244_v16 = vcombine.high %v1300_v8, %v1308_v9  ;;  %v1316_v22 = vld [vmem:[%s6634_s0 + $0x110] sm:$0xff] }
  0xfb   : > { %4686 = vmatprep.subr.bf16.mxu1 %v5074_v28  ;;  %v5092_v26 = vld [vmem:[%s5785_s17 + $0x250] sm:$0xff]   ;;  %v4243_v28 = vcombine.low %v1300_v8, %v1308_v9  ;;  %v5113_v8 = vld [vmem:[%s5785_s17 + $0x238] sm:$0xff]  }
  0xfc   : > { %v5111_v1 = vld [vmem:[%s5785_s17 + $0x2b0] sm:$0xff]   ;;  %v5115_v9 = vld [vmem:[%s5785_s17 + $0x2b8] sm:$0xff]  }
  0xfd   : > { %4623 = vmatpush3.bf16.msra.mxu0 %v5073_v27  ;;  %v5094_v27 = vld [vmem:[%s5785_s17 + $0x2d0] sm:$0xff]  }
  0xfe   : > { %4687 = vmatpush3.bf16.msra.mxu1 %v5075_v29  ;;  %4624 = vmatprep.subr.bf16.mxu0 %v5076_v35  ;;  %v4245_v29 = vcombine.low %v1301_v10, %v1309_v12  ;;  %v1332_v35 = vld [vmem:[%s6634_s0 + $0x190] sm:$0xff]  ;;  %v5116_v10 = vld [vmem:[%s5785_s17 + $0x340] sm:$0xff]  }
  0xff   : > { %3131 = vmatmul.mubr.bf16.gmra.mrb[12].mxu0 %v4271_v21  ;;  %4688 = vmatprep.subr.bf16.mxu1 %v5078_v40  ;;  %v5091_v21 = vld [vmem:[%s5785_s17 + $0x288] sm:$0xff]   ;;  %v5097_v40 = vld [vmem:[%s5785_s17 + $0x218] sm:$0xff]   ;;  %v5118_v12 = vld [vmem:[%s5785_s17 + $0x3c0] sm:$0xff]  }
 0x100   : > { %3228 = vmatmul.mubr.bf16.gmra.mrb[12].mxu1 %v4273_v23  ;;  %3138 = vmatprep.mubr.bf16.mxu0 %v4288_v24  ;;  %v1324_v23 = vld [vmem:[%s6634_s0 + $0x150] sm:$0xff]  ;;  %v1317_v24 = vld [vmem:[%s6634_s0 + $0x118] sm:$0xff] }
 0x101   : > { %3235 = vmatprep.mubr.bf16.mxu1 %v4290_v25  ;;  %4625 = vmatpush3.bf16.msra.mxu0 %v5077_v38  ;;  %v1325_v25 = vld [vmem:[%s6634_s0 + $0x158] sm:$0xff]  ;;  %v4260_v30 = vcombine.high %v1316_v22, %v1324_v23  ;;  %v4259_v43 = vcombine.low %v1316_v22, %v1324_v23 }
 0x102   : > { %4689 = vmatpush3.bf16.msra.mxu1 %v5079_v41  ;;  %4626 = vmatprep.subr.bf16.mxu0 %v5080_v46  ;;  %v4262_v32 = vcombine.high %v1317_v24, %v1325_v25  ;;  %v1333_v38 = vld [vmem:[%s6634_s0 + $0x198] sm:$0xff]  ;;  %v4261_v45 = vcombine.low %v1317_v24, %v1325_v25  ;;  %v1396_v24 = vld [vmem:[%s6634_s0 + $0x390] sm:$0xff] }
 0x103   : > { %4690 = vmatprep.subr.bf16.mxu1 %v5082_v48  ;;  %v5099_v41 = vld [vmem:[%s5785_s17 + $0x298] sm:$0xff]   ;;  %v5101_v48 = vld [vmem:[%s5785_s17 + $0x220] sm:$0xff]   ;;  %v1404_v25 = vld [vmem:[%s6634_s0 + $0x3d0] sm:$0xff] }
 0x105   : > { %4627 = vmatpush3.bf16.msra.mxu0 %v5081_v47 }
 0x106   : > { %4691 = vmatpush3.bf16.msra.mxu1 %v5083_v50  ;;  %4740 = vmatprep.subr.bf16.mxu0 %v5084_v54  ;;  %v5104_v50 = vld [vmem:[%s5785_s17 + $0x268] sm:$0xff]   ;;  %v1349_v54 = vld [vmem:[%s6634_s0 + $0x218] sm:$0xff] }
 0x107   : > { %3139 = vmatmul.mubr.bf16.gmra.mrb[16].mxu0 %v4287_v34  ;;  %4804 = vmatprep.subr.bf16.mxu1 %v5086_v55  ;;  %v5096_v34 = vld [vmem:[%s5785_s17 + $0x258] sm:$0xff]  }
 0x108   : > { %3236 = vmatmul.mubr.bf16.gmra.mrb[16].mxu1 %v4289_v36  ;;  %3146 = vmatprep.mubr.bf16.mxu0 %v4304_v37  ;;  %v1340_v36 = vld [vmem:[%s6634_s0 + $0x1d0] sm:$0xff]  ;;  %v5098_v37 = vld [vmem:[%s5785_s17 + $0x2d8] sm:$0xff]  }
 0x109   : > { %3243 = vmatprep.mubr.bf16.mxu1 %v4306_v39  ;;  %v1341_v39 = vld [vmem:[%s6634_s0 + $0x1d8] sm:$0xff]  ;;  %v4276_v46 = vcombine.high %v1332_v35, %v1340_v36  ;;  %v4275_v59 = vcombine.low %v1332_v35, %v1340_v36  ;;  %v1295_v35 = vld [vmem:[%s6634_s0 + $0x68] sm:$0xff]  ;;  %v4339_v36 = vcombine.low %v1396_v24, %v1404_v25 }
 0x10a   : > { %v4278_v47 = vcombine.high %v1333_v38, %v1341_v39  ;;  %v1357_v55 = vld [vmem:[%s6634_s0 + $0x258] sm:$0xff] }
 0x10b   : > { %v4294_v0 = vcombine.high %v1349_v54, %v1357_v55 }
 0x10f   : > { %3147 = vmatmul.mubr.bf16.gmra.mrb[20].mxu0 %v4303_v49  ;;  %v5103_v49 = vld [vmem:[%s5785_s17 + $0x2a0] sm:$0xff]  }
 0x110   : > { %3244 = vmatmul.mubr.bf16.gmra.mrb[20].mxu1 %v4305_v51  ;;  %3154 = vmatprep.mubr.bf16.mxu0 %v4320_v52  ;;  %v1348_v51 = vld [vmem:[%s6634_s0 + $0x210] sm:$0xff] }
 0x111   : > { %3251 = vmatprep.mubr.bf16.mxu1 %v4322_v53  ;;  %v1356_v52 = vld [vmem:[%s6634_s0 + $0x250] sm:$0xff]  ;;  %v5106_v53 = vld [vmem:[%s5785_s17 + $0x2e8] sm:$0xff]  }
 0x117   : > { %3155 = vmatmul.mubr.bf16.gmra.mrb[24].mxu0 %v4319_v60  ;;  %v5110_v60 = vld [vmem:[%s5785_s17 + $0x2f0] sm:$0xff]  }
 0x118   : > { %3252 = vmatmul.mubr.bf16.gmra.mrb[24].mxu1 %v4321_v61  ;;  %3162 = vmatprep.mubr.bf16.mxu0 %v4336_v62  ;;  %v4277_v61 = vcombine.low %v1333_v38, %v1341_v39  ;;  %v4292_v62 = vcombine.high %v1348_v51, %v1356_v52 }
 0x119   : > { %3259 = vmatprep.mubr.bf16.mxu1 %v4338_v63  ;;  %v5109_v63 = vld [vmem:[%s5785_s17 + $0x230] sm:$0xff]  }
 0x11f   : > { %3163 = vmatmul.mubr.bf16.gmra.mrb[28].mxu0 %v4335_v4  ;;  %v1372_v4 = vld [vmem:[%s6634_s0 + $0x2d0] sm:$0xff] }
 0x120   : > { %3260 = vmatmul.mubr.bf16.gmra.mrb[28].mxu1 %v4337_v5  ;;  %3300 = vmatprep.mubr.bf16.mxu0 %v4228_v6  ;;  %v5114_v5 = vld [vmem:[%s5785_s17 + $0x2f8] sm:$0xff]  }
 0x121   : > { %3397 = vmatprep.mubr.bf16.mxu1 %v4230_v7  ;;  %v1365_v6 = vld [vmem:[%s6634_s0 + $0x298] sm:$0xff] }
 0x122   : > { %v1373_v7 = vld [vmem:[%s6634_s0 + $0x2d8] sm:$0xff] }
 0x127   : > { %3301 = vmatmul.mubr.bf16.vlgmr.msra.gmra.mrb[32].mxu0 %v4227_v11  ;;  %v4291_v11 = vcombine.low %v1348_v51, %v1356_v52  ;;  %v5122_v51 = vld [vmem:[%s5785_s17 + $0x3c8] sm:$0xff]  }
 0x128   : > { %3398 = vmatmul.mubr.bf16.vlgmr.msra.gmra.mrb[32].mxu1 %v4229_v13  ;;  %4741 = vmatpush3.bf16.msra.mxu0 %v5085_v14  ;;  %v4293_v13 = vcombine.low %v1349_v54, %v1357_v55  ;;  %v4308_v14 = vcombine.high %v1364_v3, %v1372_v4  ;;  %v5121_v52 = vld [vmem:[%s5785_s17 + $0x308] sm:$0xff]   ;;  %v1318_v54 = vld [vmem:[%s6634_s0 + $0x120] sm:$0xff] }
 0x129   : > { %4805 = vmatpush3.bf16.msra.mxu1 %v5087_v15  ;;  %3308 = vmatprep.mubr.bf16.mxu0 %v4244_v16  ;;  %v4310_v15 = vcombine.high %v1365_v6, %v1373_v7  ;;  %v1380_v16 = vld [vmem:[%s6634_s0 + $0x310] sm:$0xff]  ;;  %v1326_v55 = vld [vmem:[%s6634_s0 + $0x160] sm:$0xff] }
 0x12a   : > { %3405 = vmatprep.mubr.bf16.mxu1 %v4246_v17  ;;  %4742 = vmatprep.subr.bf16.mxu0 %v5088_v18  ;;  %v1388_v17 = vld [vmem:[%s6634_s0 + $0x350] sm:$0xff]  ;;  %v1381_v18 = vld [vmem:[%s6634_s0 + $0x318] sm:$0xff] }
 0x12b   : > { %4806 = vmatprep.subr.bf16.mxu1 %v5090_v20  ;;  %v4307_v20 = vcombine.low %v1364_v3, %v1372_v4  ;;  %v4324_v22 = vcombine.high %v1380_v16, %v1388_v17  ;;  %v5130_v3 = vld [vmem:[%s5785_s17 + $0x3d8] sm:$0xff]   ;;  %v1334_v4 = vld [vmem:[%s6634_s0 + $0x1a0] sm:$0xff] }
 0x12c   : > { %4743 = vmatpush3.bf16.msra.mxu0 %v5089_v19  ;;  %v1389_v19 = vld [vmem:[%s6634_s0 + $0x358] sm:$0xff] }
 0x12d   : > { %4807 = vmatpush3.bf16.msra.mxu1 %v5091_v21  ;;  %4744 = vmatprep.subr.bf16.mxu0 %v5092_v26  ;;  %v4309_v21 = vcombine.low %v1365_v6, %v1373_v7  ;;  %v4326_v23 = vcombine.high %v1381_v18, %v1389_v19  ;;  %v1397_v26 = vld [vmem:[%s6634_s0 + $0x398] sm:$0xff]  ;;  %v1335_v6 = vld [vmem:[%s6634_s0 + $0x1a8] sm:$0xff] }
 0x12e   : > { %4808 = vmatprep.subr.bf16.mxu1 %v5094_v27  ;;  %v1405_v27 = vld [vmem:[%s6634_s0 + $0x3d8] sm:$0xff] }
 0x12f   : > { %3309 = vmatmul.mubr.bf16.gmra.mrb[36].mxu0 %v4243_v28  ;;  %v4323_v28 = vcombine.low %v1380_v16, %v1388_v17  ;;  %v5129_v7 = vld [vmem:[%s5785_s17 + $0x318] sm:$0xff]   ;;  %v5133_v16 = vld [vmem:[%s5785_s17 + $0x320] sm:$0xff]  }
 0x130   : > { %3406 = vmatmul.mubr.bf16.gmra.mrb[36].mxu1 %v4245_v29  ;;  %3316 = vmatprep.mubr.bf16.mxu0 %v4260_v30  ;;  %v4325_v29 = vcombine.low %v1381_v18, %v1389_v19  ;;  %v4340_v30 = vcombine.high %v1396_v24, %v1404_v25  ;;  %v5135_v17 = vld [vmem:[%s5785_s17 + $0x3a0] sm:$0xff]   ;;  %v5136_v18 = vld [vmem:[%s5785_s17 + $0x368] sm:$0xff]  }
 0x131   : > { %3413 = vmatprep.mubr.bf16.mxu1 %v4262_v32  ;;  %4745 = vmatpush3.bf16.msra.mxu0 %v5093_v31  ;;  %v4342_v31 = vcombine.high %v1397_v26, %v1405_v27  ;;  %v1286_v32 = vld [vmem:[%s6634_s0 + $0x20] sm:$0xff]  ;;  %v5138_v19 = vld [vmem:[%s5785_s17 + $0x3e8] sm:$0xff]  }
 0x132   : > { %4809 = vmatpush3.bf16.msra.mxu1 %v5095_v33  ;;  %4746 = vmatprep.subr.bf16.mxu0 %v5096_v34  ;;  %v1294_v33 = vld [vmem:[%s6634_s0 + $0x60] sm:$0xff]  ;;  %v1287_v34 = vld [vmem:[%s6634_s0 + $0x28] sm:$0xff] }
 0x133   : > { %4810 = vmatprep.subr.bf16.mxu1 %v5098_v37  ;;  %v4341_v37 = vcombine.low %v1397_v26, %v1405_v27  ;;  %v4232_v38 = vcombine.high %v1286_v32, %v1294_v33  ;;  %v4234_v39 = vcombine.high %v1287_v34, %v1295_v35  ;;  %v1359_v24 = vld [vmem:[%s6634_s0 + $0x268] sm:$0xff]  ;;  %v5140_v26 = vld [vmem:[%s5785_s17 + $0x370] sm:$0xff]  }
 0x134   : > { %v5139_v25 = vld [vmem:[%s5785_s17 + $0x3a8] sm:$0xff]  }
 0x135   : > { %4747 = vmatpush3.bf16.msra.mxu0 %v5097_v40  ;;  %v1302_v40 = vld [vmem:[%s6634_s0 + $0xa0] sm:$0xff] }
 0x136   : > { %4811 = vmatpush3.bf16.msra.mxu1 %v5099_v41  ;;  %4748 = vmatprep.subr.bf16.mxu0 %v5100_v42  ;;  %v1310_v41 = vld [vmem:[%s6634_s0 + $0xe0] sm:$0xff]  ;;  %v4231_v42 = vcombine.low %v1286_v32, %v1294_v33  ;;  %v5141_v32 = vld [vmem:[%s5785_s17 + $0x330] sm:$0xff]  }
 0x137   : > { %3317 = vmatmul.mubr.bf16.gmra.mrb[40].mxu0 %v4259_v43  ;;  %4812 = vmatprep.subr.bf16.mxu1 %v5102_v44  ;;  %v1303_v43 = vld [vmem:[%s6634_s0 + $0xa8] sm:$0xff]  ;;  %v5143_v33 = vld [vmem:[%s5785_s17 + $0x3b0] sm:$0xff]  }
 0x138   : > { %3414 = vmatmul.mubr.bf16.gmra.mrb[40].mxu1 %v4261_v45  ;;  %3324 = vmatprep.mubr.bf16.mxu0 %v4276_v46  ;;  %v1311_v44 = vld [vmem:[%s6634_s0 + $0xe8] sm:$0xff]  ;;  %v4233_v45 = vcombine.low %v1287_v34, %v1295_v35  ;;  %v5117_v46 = vld [vmem:[%s5785_s17 + $0x300] sm:$0xff]   ;;  %v5144_v34 = vld [vmem:[%s5785_s17 + $0x378] sm:$0xff]  }
 0x139   : > { %3421 = vmatprep.mubr.bf16.mxu1 %v4278_v47  ;;  %4749 = vmatpush3.bf16.msra.mxu0 %v5101_v48  ;;  %v5119_v47 = vld [vmem:[%s5785_s17 + $0x380] sm:$0xff]   ;;  %v4248_v48 = vcombine.high %v1302_v40, %v1310_v41  ;;  %v5146_v35 = vld [vmem:[%s5785_s17 + $0x3f8] sm:$0xff]  }
 0x13a   : > { %4813 = vmatpush3.bf16.msra.mxu1 %v5103_v49  ;;  %4750 = vmatprep.subr.bf16.mxu0 %v5104_v50  ;;  %v4250_v49 = vcombine.high %v1303_v43, %v1311_v44  ;;  %v5120_v50 = vld [vmem:[%s5785_s17 + $0x348] sm:$0xff]  }
 0x13b   : > { %4814 = vmatprep.subr.bf16.mxu1 %v5106_v53  ;;  %v5123_v53 = vld [vmem:[%s5785_s17 + $0x388] sm:$0xff]  }
 0x13d   : > { %4751 = vmatpush3.bf16.msra.mxu0 %v5105_v56  ;;  %v5124_v56 = vld [vmem:[%s5785_s17 + $0x350] sm:$0xff]  }
 0x13e   : > { %4815 = vmatpush3.bf16.msra.mxu1 %v5107_v57  ;;  %4752 = vmatprep.subr.bf16.mxu0 %v5108_v58  ;;  %v1319_v57 = vld [vmem:[%s6634_s0 + $0x128] sm:$0xff] }
 0x13f   : > { %3325 = vmatmul.mubr.bf16.gmra.mrb[44].mxu0 %v4275_v59  ;;  %4816 = vmatprep.subr.bf16.mxu1 %v5110_v60  ;;  %v1327_v58 = vld [vmem:[%s6634_s0 + $0x168] sm:$0xff]  ;;  %v5126_v59 = vld [vmem:[%s5785_s17 + $0x3d0] sm:$0xff]   ;;  %v4247_v60 = vcombine.low %v1302_v40, %v1310_v41  ;;  %v5147_v41 = vld [vmem:[%s5785_s17 + $0x3b8] sm:$0xff]  }
 0x140   : > { %3422 = vmatmul.mubr.bf16.gmra.mrb[44].mxu1 %v4277_v61  ;;  %3332 = vmatprep.mubr.bf16.mxu0 %v4292_v62  ;;  %v4249_v61 = vcombine.low %v1303_v43, %v1311_v44  ;;  %v4264_v62 = vcombine.high %v1318_v54, %v1326_v55  ;;  %v1375_v40 = vld [vmem:[%s6634_s0 + $0x2e8] sm:$0xff] }
 0x141   : > { %3429 = vmatprep.mubr.bf16.mxu1 %v4294_v0  ;;  %4753 = vmatpush3.bf16.msra.mxu0 %v5109_v63  ;;  %v4266_v63 = vcombine.high %v1319_v57, %v1327_v58  ;;  %v5125_v0 = vld [vmem:[%s5785_s17 + $0x310] sm:$0xff]  }
 0x142   : > { %4817 = vmatpush3.bf16.msra.mxu1 %v5111_v1  ;;  %4754 = vmatprep.subr.bf16.mxu0 %v5112_v2  ;;  %v5127_v1 = vld [vmem:[%s5785_s17 + $0x390] sm:$0xff]   ;;  %v5128_v2 = vld [vmem:[%s5785_s17 + $0x358] sm:$0xff]  }
 0x143   : > { %4818 = vmatprep.subr.bf16.mxu1 %v5114_v5  ;;  %v1342_v5 = vld [vmem:[%s6634_s0 + $0x1e0] sm:$0xff] }
 0x144   : > { %v4279_v27 = vcombine.low %v1334_v4, %v1342_v5 }
 0x145   : > { %4755 = vmatpush3.bf16.msra.mxu0 %v5113_v8  ;;  %v1343_v8 = vld [vmem:[%s6634_s0 + $0x1e8] sm:$0xff] }
 0x146   : > { %4819 = vmatpush3.bf16.msra.mxu1 %v5115_v9  ;;  %4868 = vmatprep.subr.bf16.mxu0 %v5116_v10  ;;  %v5131_v9 = vld [vmem:[%s5785_s17 + $0x398] sm:$0xff]   ;;  %v5132_v10 = vld [vmem:[%s5785_s17 + $0x360] sm:$0xff]  }
 0x147   : > { %3333 = vmatmul.mubr.bf16.gmra.mrb[48].mxu0 %v4291_v11  ;;  %4932 = vmatprep.subr.bf16.mxu1 %v5118_v12  ;;  %v4263_v11 = vcombine.low %v1318_v54, %v1326_v55  ;;  %v5134_v12 = vld [vmem:[%s5785_s17 + $0x3e0] sm:$0xff]  }
 0x148   : > { %3430 = vmatmul.mubr.bf16.gmra.mrb[48].mxu1 %v4293_v13  ;;  %3340 = vmatprep.mubr.bf16.mxu0 %v4308_v14  ;;  %v4265_v13 = vcombine.low %v1319_v57, %v1327_v58  ;;  %v4280_v14 = vcombine.high %v1334_v4, %v1342_v5  ;;  %v1398_v54 = vld [vmem:[%s6634_s0 + $0x3a0] sm:$0xff]  ;;  %v1407_v57 = vld [vmem:[%s6634_s0 + $0x3e8] sm:$0xff] }
 0x149   : > { %3437 = vmatprep.mubr.bf16.mxu1 %v4310_v15  ;;  %v4282_v15 = vcombine.high %v1335_v6, %v1343_v8  ;;  %v1406_v55 = vld [vmem:[%s6634_s0 + $0x3e0] sm:$0xff] }
 0x14f   : > { %3341 = vmatmul.mubr.bf16.gmra.mrb[52].mxu0 %v4307_v20  ;;  %v1350_v20 = vld [vmem:[%s6634_s0 + $0x220] sm:$0xff] }
 0x150   : > { %3438 = vmatmul.mubr.bf16.gmra.mrb[52].mxu1 %v4309_v21  ;;  %3348 = vmatprep.mubr.bf16.mxu0 %v4324_v22  ;;  %v1358_v21 = vld [vmem:[%s6634_s0 + $0x260] sm:$0xff]  ;;  %v1351_v22 = vld [vmem:[%s6634_s0 + $0x228] sm:$0xff] }
 0x151   : > { %3445 = vmatprep.mubr.bf16.mxu1 %v4326_v23  ;;  %v5137_v23 = vld [vmem:[%s5785_s17 + $0x328] sm:$0xff]   ;;  %v4297_v43 = vcombine.low %v1351_v22, %v1359_v24 }
 0x157   : > { %3349 = vmatmul.mubr.bf16.gmra.mrb[56].mxu0 %v4323_v28  ;;  %v5142_v28 = vld [vmem:[%s5785_s17 + $0x3f0] sm:$0xff]  }
 0x158   : > { %3446 = vmatmul.mubr.bf16.gmra.mrb[56].mxu1 %v4325_v29  ;;  %3356 = vmatprep.mubr.bf16.mxu0 %v4340_v30  ;;  %v4281_v29 = vcombine.low %v1335_v6, %v1343_v8  ;;  %v4296_v30 = vcombine.high %v1350_v20, %v1358_v21  ;;  %v1304_v6 = vld [vmem:[%s6634_s0 + $0xb0] sm:$0xff]  ;;  %v1305_v8 = vld [vmem:[%s6634_s0 + $0xb8] sm:$0xff] }
 0x159   : > { %3453 = vmatprep.mubr.bf16.mxu1 %v4342_v31  ;;  %v4298_v31 = vcombine.high %v1351_v22, %v1359_v24  ;;  %v1336_v22 = vld [vmem:[%s6634_s0 + $0x1b0] sm:$0xff]  ;;  %v1337_v24 = vld [vmem:[%s6634_s0 + $0x1b8] sm:$0xff] }
 0x15f   : > { %3357 = vmatmul.mubr.bf16.gmra.mrb[60].mxu0 %v4339_v36  ;;  %v1366_v36 = vld [vmem:[%s6634_s0 + $0x2a0] sm:$0xff] }
 0x160   : > { %3454 = vmatmul.mubr.bf16.gmra.mrb[60].mxu1 %v4341_v37  ;;  %3494 = vmatprep.mubr.bf16.mxu0 %v4232_v38  ;;  %v1374_v37 = vld [vmem:[%s6634_s0 + $0x2e0] sm:$0xff]  ;;  %v5145_v38 = vld [vmem:[%s5785_s17 + $0x338] sm:$0xff]   ;;  %s1276_s17 = scalar_select %p1275_p10, %s5215_s18, 1 }
 0x161   : > { %3591 = vmatprep.mubr.bf16.mxu1 %v4234_v39  ;;  %v1367_v39 = vld [vmem:[%s6634_s0 + $0x2a8] sm:$0xff]  ;;  %v4312_v44 = vcombine.high %v1366_v36, %v1374_v37 }
 0x162   : > { %s1277_s9 = scalar_lea.vmem %s6636_s2, %s1276_s17  ;;  %s1280_s12 = scalar_lea.vmem %s6637_s3, %s1276_s17 }
 0x167   : > { %3495 = vmatmul.mubr.bf16.vlgmr.msra.gmra.mrb[64].mxu0 %v4231_v42  ;;  %v4295_v42 = vcombine.low %v1350_v20, %v1358_v21 }
 0x168   : > { %3592 = vmatmul.mubr.bf16.vlgmr.msra.gmra.mrb[64].mxu1 %v4233_v45  ;;  %4869 = vmatpush3.bf16.msra.mxu0 %v5117_v46  ;;  %v4314_v45 = vcombine.high %v1367_v39, %v1375_v40  ;;  %v1382_v46 = vld [vmem:[%s6634_s0 + $0x320] sm:$0xff] }
 0x169   : > { %4933 = vmatpush3.bf16.msra.mxu1 %v5119_v47  ;;  %3502 = vmatprep.mubr.bf16.mxu0 %v4248_v48  ;;  %v1390_v47 = vld [vmem:[%s6634_s0 + $0x360] sm:$0xff]  ;;  %v1383_v48 = vld [vmem:[%s6634_s0 + $0x328] sm:$0xff] }
 0x16a   : > { %3599 = vmatprep.mubr.bf16.mxu1 %v4250_v49  ;;  %4870 = vmatprep.subr.bf16.mxu0 %v5120_v50  ;;  %v1391_v49 = vld [vmem:[%s6634_s0 + $0x368] sm:$0xff]  ;;  %v4311_v50 = vcombine.low %v1366_v36, %v1374_v37  ;;  %v4327_v58 = vcombine.low %v1382_v46, %v1390_v47 }
 0x16b   : > { %4934 = vmatprep.subr.bf16.mxu1 %v5122_v51  ;;  %v4313_v51 = vcombine.low %v1367_v39, %v1375_v40 }
 0x16c   : > { %4871 = vmatpush3.bf16.msra.mxu0 %v5121_v52  ;;  %v4328_v52 = vcombine.high %v1382_v46, %v1390_v47 }
 0x16d   : > { %4935 = vmatpush3.bf16.msra.mxu1 %v5123_v53  ;;  %4872 = vmatprep.subr.bf16.mxu0 %v5124_v56  ;;  %v4330_v53 = vcombine.high %v1383_v48, %v1391_v49  ;;  %v1399_v56 = vld [vmem:[%s6634_s0 + $0x3a8] sm:$0xff] }
 0x16e   : > { %4936 = vmatprep.subr.bf16.mxu1 %v5126_v59  ;;  %v4329_v59 = vcombine.low %v1383_v48, %v1391_v49 }
 0x16f   : > { %3503 = vmatmul.mubr.bf16.gmra.mrb[68].mxu0 %v4247_v60  ;;  %v4344_v60 = vcombine.high %v1398_v54, %v1406_v55 }
 0x170   : > { %3600 = vmatmul.mubr.bf16.gmra.mrb[68].mxu1 %v4249_v61  ;;  %3510 = vmatprep.mubr.bf16.mxu0 %v4264_v62  ;;  %v4346_v61 = vcombine.high %v1399_v56, %v1407_v57  ;;  %v1288_v62 = vld [vmem:[%s6634_s0 + $0x30] sm:$0xff] }
 0x171   : > { %3607 = vmatprep.mubr.bf16.mxu1 %v4266_v63  ;;  %4873 = vmatpush3.bf16.msra.mxu0 %v5125_v0  ;;  %v1296_v63 = vld [vmem:[%s6634_s0 + $0x70] sm:$0xff]  ;;  %v1289_v0 = vld [vmem:[%s6634_s0 + $0x38] sm:$0xff] }
 0x172   : > { %4937 = vmatpush3.bf16.msra.mxu1 %v5127_v1  ;;  %4874 = vmatprep.subr.bf16.mxu0 %v5128_v2  ;;  %v1297_v1 = vld [vmem:[%s6634_s0 + $0x78] sm:$0xff]  ;;  %v4343_v2 = vcombine.low %v1398_v54, %v1406_v55  ;;  %v4236_v4 = vcombine.high %v1288_v62, %v1296_v63 }
 0x173   : > { %4938 = vmatprep.subr.bf16.mxu1 %v5130_v3  ;;  %v4345_v3 = vcombine.low %v1399_v56, %v1407_v57  ;;  %v4238_v5 = vcombine.high %v1289_v0, %v1297_v1  ;;  %v1369_v55 = vld [vmem:[%s6634_s0 + $0x2b8] sm:$0xff] }
 0x174   : > { %v1377_v56 = vld [vmem:[%s6634_s0 + $0x2f8] sm:$0xff] }
 0x175   : > { %4875 = vmatpush3.bf16.msra.mxu0 %v5129_v7  ;;  %v1312_v7 = vld [vmem:[%s6634_s0 + $0xf0] sm:$0xff] }
 0x176   : > { %4939 = vmatpush3.bf16.msra.mxu1 %v5131_v9  ;;  %4876 = vmatprep.subr.bf16.mxu0 %v5132_v10  ;;  %v1313_v9 = vld [vmem:[%s6634_s0 + $0xf8] sm:$0xff]  ;;  %v4235_v10 = vcombine.low %v1288_v62, %v1296_v63 }
 0x177   : > { %3511 = vmatmul.mubr.bf16.gmra.mrb[72].mxu0 %v4263_v11  ;;  %4940 = vmatprep.subr.bf16.mxu1 %v5134_v12  ;;  %v4237_v11 = vcombine.low %v1289_v0, %v1297_v1  ;;  %v4252_v12 = vcombine.high %v1304_v6, %v1312_v7 }
 0x178   : > { %3608 = vmatmul.mubr.bf16.gmra.mrb[72].mxu1 %v4265_v13  ;;  %3518 = vmatprep.mubr.bf16.mxu0 %v4280_v14  ;;  %v4254_v13 = vcombine.high %v1305_v8, %v1313_v9  ;;  %v1320_v14 = vld [vmem:[%s6634_s0 + $0x130] sm:$0xff] }
 0x179   : > { %3615 = vmatprep.mubr.bf16.mxu1 %v4282_v15  ;;  %4877 = vmatpush3.bf16.msra.mxu0 %v5133_v16  ;;  %v1328_v15 = vld [vmem:[%s6634_s0 + $0x170] sm:$0xff]  ;;  %v1321_v16 = vld [vmem:[%s6634_s0 + $0x138] sm:$0xff] }
 0x17a   : > { %4941 = vmatpush3.bf16.msra.mxu1 %v5135_v17  ;;  %4878 = vmatprep.subr.bf16.mxu0 %v5136_v18  ;;  %v1329_v17 = vld [vmem:[%s6634_s0 + $0x178] sm:$0xff]  ;;  %v4251_v18 = vcombine.low %v1304_v6, %v1312_v7  ;;  %v4268_v20 = vcombine.high %v1320_v14, %v1328_v15 }
 0x17b   : > { %4942 = vmatprep.subr.bf16.mxu1 %v5138_v19  ;;  %v4253_v19 = vcombine.low %v1305_v8, %v1313_v9  ;;  %v4270_v21 = vcombine.high %v1321_v16, %v1329_v17 }
 0x17d   : > { %4879 = vmatpush3.bf16.msra.mxu0 %v5137_v23  ;;  %v1344_v23 = vld [vmem:[%s6634_s0 + $0x1f0] sm:$0xff] }
 0x17e   : > { %4943 = vmatpush3.bf16.msra.mxu1 %v5139_v25  ;;  %4880 = vmatprep.subr.bf16.mxu0 %v5140_v26  ;;  %v1345_v25 = vld [vmem:[%s6634_s0 + $0x1f8] sm:$0xff]  ;;  %v4267_v26 = vcombine.low %v1320_v14, %v1328_v15  ;;  %v4283_v37 = vcombine.low %v1336_v22, %v1344_v23 }
 0x17f   : > { %3519 = vmatmul.mubr.bf16.gmra.mrb[76].mxu0 %v4279_v27  ;;  %4944 = vmatprep.subr.bf16.mxu1 %v5142_v28  ;;  %v4269_v27 = vcombine.low %v1321_v16, %v1329_v17  ;;  %v4284_v28 = vcombine.high %v1336_v22, %v1344_v23  ;;  %v1393_v14 = vld [vmem:[%s6634_s0 + $0x378] sm:$0xff] }
 0x180   : > { %3616 = vmatmul.mubr.bf16.gmra.mrb[76].mxu1 %v4281_v29  ;;  %3526 = vmatprep.mubr.bf16.mxu0 %v4296_v30  ;;  %v4286_v29 = vcombine.high %v1337_v24, %v1345_v25  ;;  %v1352_v30 = vld [vmem:[%s6634_s0 + $0x230] sm:$0xff] }
 0x181   : > { %3623 = vmatprep.mubr.bf16.mxu1 %v4298_v31  ;;  %4881 = vmatpush3.bf16.msra.mxu0 %v5141_v32  ;;  %v1360_v31 = vld [vmem:[%s6634_s0 + $0x270] sm:$0xff] }
 0x182   : > { %4945 = vmatpush3.bf16.msra.mxu1 %v5143_v33  ;;  %4882 = vmatprep.subr.bf16.mxu0 %v5144_v34  ;;  %v1353_v33 = vld [vmem:[%s6634_s0 + $0x238] sm:$0xff] }
 0x183   : > { %4946 = vmatprep.subr.bf16.mxu1 %v5146_v35  ;;  %v1361_v34 = vld [vmem:[%s6634_s0 + $0x278] sm:$0xff] }
 0x184   : > { %v4302_v46 = vcombine.high %v1353_v33, %v1361_v34  ;;  %v4301_v63 = vcombine.low %v1353_v33, %v1361_v34  ;;  %v1408_v33 = vld [vmem:[%s6634_s0 + $0x3f0] sm:$0xff] }
 0x185   : > { %4883 = vmatpush3.bf16.msra.mxu0 %v5145_v38 }
 0x186   : > { %4947 = vmatpush3.bf16.msra.mxu1 %v5147_v41  ;;  %v4285_v41 = vcombine.low %v1337_v24, %v1345_v25 }
 0x187   : > { %3527 = vmatmul.mubr.bf16.gmra.mrb[80].mxu0 %v4295_v42  ;;  %v4300_v42 = vcombine.high %v1352_v30, %v1360_v31 }
 0x188   : > { %3624 = vmatmul.mubr.bf16.gmra.mrb[80].mxu1 %v4297_v43  ;;  %3534 = vmatprep.mubr.bf16.mxu0 %v4312_v44 }
 0x189   : > { %3631 = vmatprep.mubr.bf16.mxu1 %v4314_v45 }
 0x18f   : > { %3535 = vmatmul.mubr.bf16.gmra.mrb[84].mxu0 %v4311_v50 }
 0x190   : > { %3632 = vmatmul.mubr.bf16.gmra.mrb[84].mxu1 %v4313_v51  ;;  %3542 = vmatprep.mubr.bf16.mxu0 %v4328_v52  ;;  %v1368_v52 = vld [vmem:[%s6634_s0 + $0x2b0] sm:$0xff] }
 0x191   : > { %3639 = vmatprep.mubr.bf16.mxu1 %v4330_v53  ;;  %v1376_v53 = vld [vmem:[%s6634_s0 + $0x2f0] sm:$0xff] }
 0x192   : > { %v4316_v0 = vcombine.high %v1368_v52, %v1376_v53  ;;  %v4315_v17 = vcombine.low %v1368_v52, %v1376_v53 }
 0x197   : > { %3543 = vmatmul.mubr.bf16.gmra.mrb[88].mxu0 %v4327_v58 }
 0x198   : > { %3640 = vmatmul.mubr.bf16.gmra.mrb[88].mxu1 %v4329_v59  ;;  %3550 = vmatprep.mubr.bf16.mxu0 %v4344_v60  ;;  %v4299_v59 = vcombine.low %v1352_v30, %v1360_v31 }
 0x199   : > { %3647 = vmatprep.mubr.bf16.mxu1 %v4346_v61 }
 0x19f   : > { %3551 = vmatmul.mubr.bf16.gmra.mrb[92].mxu0 %v4343_v2 }
 0x1a0   : > { %3648 = vmatmul.mubr.bf16.gmra.mrb[92].mxu1 %v4345_v3  ;;  %3688 = vmatprep.mubr.bf16.mxu0 %v4236_v4  ;;  %v4318_v4 = vcombine.high %v1369_v55, %v1377_v56 }
 0x1a1   : > { %3785 = vmatprep.mubr.bf16.mxu1 %v4238_v5 }
 0x1a7   : > { %3689 = vmatmul.mubr.bf16.vlgmr.msra.gmra.mrb[96].mxu0 %v4235_v10  ;;  %v1384_v10 = vld [vmem:[%s6634_s0 + $0x330] sm:$0xff] }
 0x1a8   : > { %3786 = vmatmul.mubr.bf16.vlgmr.msra.gmra.mrb[96].mxu1 %v4237_v11  ;;  %3696 = vmatprep.mubr.bf16.mxu0 %v4252_v12  ;;  %v1392_v11 = vld [vmem:[%s6634_s0 + $0x370] sm:$0xff] }
 0x1a9   : > { %3793 = vmatprep.mubr.bf16.mxu1 %v4254_v13  ;;  %v1385_v13 = vld [vmem:[%s6634_s0 + $0x338] sm:$0xff]  ;;  %v4332_v22 = vcombine.high %v1384_v10, %v1392_v11 }
 0x1af   : > { %3697 = vmatmul.mubr.bf16.gmra.mrb[100].mxu0 %v4251_v18 }
 0x1b0   : > { %3794 = vmatmul.mubr.bf16.gmra.mrb[100].mxu1 %v4253_v19  ;;  %3704 = vmatprep.mubr.bf16.mxu0 %v4268_v20 }
 0x1b1   : > { %3801 = vmatprep.mubr.bf16.mxu1 %v4270_v21  ;;  %v4317_v21 = vcombine.low %v1369_v55, %v1377_v56 }
 0x1b7   : > { %3705 = vmatmul.mubr.bf16.gmra.mrb[104].mxu0 %v4267_v26  ;;  %v4334_v26 = vcombine.high %v1385_v13, %v1393_v14 }
 0x1b8   : > { %3802 = vmatmul.mubr.bf16.gmra.mrb[104].mxu1 %v4269_v27  ;;  %3712 = vmatprep.mubr.bf16.mxu0 %v4284_v28 }
 0x1b9   : > { %3809 = vmatprep.mubr.bf16.mxu1 %v4286_v29 }
 0x1ba   : > { %v4500_v32 = vpop.f32.mrb[0].mxu0 }
 0x1bb   : > { %v4564_v35 = vpop.f32.mrb[0].mxu1  ;;  %v4501_v36 = vpop.f32.mrb[1].mxu0 }
 0x1bc   : > { %v4502_v38 = vadd.f32 %v4501_v36, %v4500_v32  ;;  %v4565_v39 = vpop.f32.mrb[1].mxu1  ;;  %v4503_v40 = vpop.f32.mrb[2].mxu0  ;;  %v1400_v32 = vld [vmem:[%s6634_s0 + $0x3b0] sm:$0xff]  ;;  %v1409_v36 = vld [vmem:[%s6634_s0 + $0x3f8] sm:$0xff] }
 0x1bd   : > { %v4566_v43 = vadd.f32 %v4565_v39, %v4564_v35  ;;  %v4567_v44 = vpop.f32.mrb[2].mxu1  ;;  %v4504_v45 = vpop.f32.mrb[3].mxu0  ;;  %v1401_v35 = vld [vmem:[%s6634_s0 + $0x3b8] sm:$0xff]  ;;  %v4331_v39 = vcombine.low %v1384_v10, %v1392_v11 }
 0x1be   : > { %v4505_v47 = vadd.f32 %v4504_v45, %v4503_v40  ;;  %v4568_v48 = vpop.f32.mrb[3].mxu1 }
 0x1bf   : > { %v6255_v49 = vadd.f32 %v4566_v43, %v4502_v38  ;;  %v4569_v50 = vadd.f32 %v4568_v48, %v4567_v44  ;;  %3713 = vmatmul.mubr.bf16.gmra.mrb[108].mxu0 %v4283_v37  ;;  %v4333_v43 = vcombine.low %v1385_v13, %v1393_v14  ;;  %v4348_v44 = vcombine.high %v1400_v32, %v1408_v33 }
 0x1c0   : > { %3810 = vmatmul.mubr.bf16.gmra.mrb[108].mxu1 %v4285_v41  ;;  %3720 = vmatprep.mubr.bf16.mxu0 %v4300_v42  ;;  %v4350_v48 = vcombine.high %v1401_v35, %v1409_v36 }
 0x1c1   : > { %v6257_v51 = vadd.f32 %v4569_v50, %v4505_v47  ;;  %3817 = vmatprep.mubr.bf16.mxu1 %v4302_v46 }
 0x1c2   : > { %v4506_v54 = vpop.f32.mrb[4].mxu0 }
 0x1c3   : > { %v4570_v57 = vpop.f32.mrb[4].mxu1  ;;  %v4507_v58 = vpop.f32.mrb[5].mxu0 }
 0x1c4   : > { %v4508_v60 = vadd.f32 %v4507_v58, %v4506_v54  ;;  %v4571_v61 = vpop.f32.mrb[5].mxu1  ;;  %v4509_v62 = vpop.f32.mrb[6].mxu0 }
 0x1c5   : > { %v4572_v1 = vadd.f32 %v4571_v61, %v4570_v57  ;;  %v4573_v2 = vpop.f32.mrb[6].mxu1  ;;  %v4510_v3 = vpop.f32.mrb[7].mxu0 }
 0x1c6   : > { %v4511_v5 = vadd.f32 %v4510_v3, %v4509_v62  ;;  %v4574_v6 = vpop.f32.mrb[7].mxu1 }
 0x1c7   : > { %v6271_v7 = vadd.f32 %v4572_v1, %v4508_v60  ;;  %v4575_v8 = vadd.f32 %v4574_v6, %v4573_v2  ;;  %3721 = vmatmul.mubr.bf16.gmra.mrb[112].mxu0 %v4299_v59  ;;  %v4347_v59 = vcombine.low %v1400_v32, %v1408_v33 }
 0x1c8   : > { %3818 = vmatmul.mubr.bf16.gmra.mrb[112].mxu1 %v4301_v63  ;;  %3728 = vmatprep.mubr.bf16.mxu0 %v4316_v0  ;;  %v4349_v63 = vcombine.low %v1401_v35, %v1409_v36 }
 0x1c9   : > { %v6273_v9 = vadd.f32 %v4575_v8, %v4511_v5  ;;  %3825 = vmatprep.mubr.bf16.mxu1 %v4318_v4 }
 0x1ca   : > { %v4512_v12 = vpop.f32.mrb[8].mxu0 }
 0x1cb   : > { %v4576_v15 = vpop.f32.mrb[8].mxu1  ;;  %v4513_v16 = vpop.f32.mrb[9].mxu0 }
 0x1cc   : > { %v4514_v18 = vadd.f32 %v4513_v16, %v4512_v12  ;;  %v4577_v19 = vpop.f32.mrb[9].mxu1  ;;  %v4515_v20 = vpop.f32.mrb[10].mxu0 }
 0x1cd   : > { %v4578_v23 = vadd.f32 %v4577_v19, %v4576_v15  ;;  %v4579_v24 = vpop.f32.mrb[10].mxu1  ;;  %v4516_v25 = vpop.f32.mrb[11].mxu0 }
 0x1ce   : > { %v4517_v27 = vadd.f32 %v4516_v25, %v4515_v20  ;;  %v4580_v28 = vpop.f32.mrb[11].mxu1 }
 0x1cf   : > { %v6287_v29 = vadd.f32 %v4578_v23, %v4514_v18  ;;  %v4581_v30 = vadd.f32 %v4580_v28, %v4579_v24  ;;  %3729 = vmatmul.mubr.bf16.gmra.mrb[116].mxu0 %v4315_v17 }
 0x1d0   : > { %3826 = vmatmul.mubr.bf16.gmra.mrb[116].mxu1 %v4317_v21  ;;  %3736 = vmatprep.mubr.bf16.mxu0 %v4332_v22 }
 0x1d1   : > { %v6289_v31 = vadd.f32 %v4581_v30, %v4517_v27  ;;  %3833 = vmatprep.mubr.bf16.mxu1 %v4334_v26 }
 0x1d2   : > { %v4518_v34 = vpop.f32.mrb[12].mxu0 }
 0x1d3   : > { %v4582_v37 = vpop.f32.mrb[12].mxu1  ;;  %v4519_v38 = vpop.f32.mrb[13].mxu0 }
 0x1d4   : > { %v4520_v40 = vadd.f32 %v4519_v38, %v4518_v34  ;;  %v4583_v41 = vpop.f32.mrb[13].mxu1  ;;  %v4521_v42 = vpop.f32.mrb[14].mxu0 }
 0x1d5   : > { %v4584_v45 = vadd.f32 %v4583_v41, %v4582_v37  ;;  %v4585_v46 = vpop.f32.mrb[14].mxu1  ;;  %v4522_v47 = vpop.f32.mrb[15].mxu0 }
 0x1d6   : > { %v4523_v50 = vadd.f32 %v4522_v47, %v4521_v42  ;;  %v4586_v52 = vpop.f32.mrb[15].mxu1 }
 0x1d7   : > { %v6303_v53 = vadd.f32 %v4584_v45, %v4520_v40  ;;  %v4587_v54 = vadd.f32 %v4586_v52, %v4585_v46  ;;  %3737 = vmatmul.mubr.bf16.gmra.mrb[120].mxu0 %v4331_v39 }
 0x1d8   : > { %3834 = vmatmul.mubr.bf16.gmra.mrb[120].mxu1 %v4333_v43  ;;  %3744 = vmatprep.mubr.bf16.mxu0 %v4348_v44 }
 0x1d9   : > { %v6305_v55 = vadd.f32 %v4587_v54, %v4523_v50  ;;  %3841 = vmatprep.mubr.bf16.mxu1 %v4350_v48 }
 0x1da   : > { %v4524_v56 = vpop.f32.mrb[16].mxu0 }
 0x1db   : > { %v4588_v57 = vpop.f32.mrb[16].mxu1  ;;  %v4525_v58 = vpop.f32.mrb[17].mxu0 }
 0x1dc   : > { %v4526_v60 = vadd.f32 %v4525_v58, %v4524_v56  ;;  %v4589_v61 = vpop.f32.mrb[17].mxu1  ;;  %v4527_v62 = vpop.f32.mrb[18].mxu0 }
 0x1dd   : > { %v4590_v0 = vadd.f32 %v4589_v61, %v4588_v57  ;;  %v4591_v1 = vpop.f32.mrb[18].mxu1  ;;  %v4528_v2 = vpop.f32.mrb[19].mxu0 }
 0x1de   : > { %v4529_v3 = vadd.f32 %v4528_v2, %v4527_v62  ;;  %v4592_v4 = vpop.f32.mrb[19].mxu1 }
 0x1df   : > { %v6307_v5 = vadd.f32 %v4590_v0, %v4526_v60  ;;  %v4593_v6 = vadd.f32 %v4592_v4, %v4591_v1  ;;  %3745 = vmatmul.mubr.bf16.gmra.mrb[124].mxu0 %v4347_v59 }
 0x1e0   : > { %3842 = vmatmul.mubr.bf16.gmra.mrb[124].mxu1 %v4349_v63 }
 0x1e1   : > { %v6309_v8 = vadd.f32 %v4593_v6, %v4529_v3 }
 0x1e2   : > { %v4530_v10 = vpop.f32.mrb[20].mxu0 }
 0x1e3   : > { %v4594_v11 = vpop.f32.mrb[20].mxu1  ;;  %v4531_v12 = vpop.f32.mrb[21].mxu0 }
 0x1e4   : > { %v4532_v13 = vadd.f32 %v4531_v12, %v4530_v10  ;;  %v4595_v14 = vpop.f32.mrb[21].mxu1  ;;  %v4533_v15 = vpop.f32.mrb[22].mxu0 }
 0x1e5   : > { %v4596_v16 = vadd.f32 %v4595_v14, %v4594_v11  ;;  %v4597_v17 = vpop.f32.mrb[22].mxu1  ;;  %v4534_v18 = vpop.f32.mrb[23].mxu0 }
 0x1e6   : > { %v4535_v19 = vadd.f32 %v4534_v18, %v4533_v15  ;;  %v4598_v20 = vpop.f32.mrb[23].mxu1 }
 0x1e7   : > { %v6311_v21 = vadd.f32 %v4596_v16, %v4532_v13  ;;  %v4599_v22 = vadd.f32 %v4598_v20, %v4597_v17 }
 0x1e9   : > { %v6313_v23 = vadd.f32 %v4599_v22, %v4535_v19 }
 0x1ea   : > { %v4536_v24 = vpop.f32.mrb[24].mxu0 }
 0x1eb   : > { %v4600_v25 = vpop.f32.mrb[24].mxu1  ;;  %v4537_v26 = vpop.f32.mrb[25].mxu0 }
 0x1ec   : > { %v4538_v27 = vadd.f32 %v4537_v26, %v4536_v24  ;;  %v4601_v28 = vpop.f32.mrb[25].mxu1  ;;  %v4539_v30 = vpop.f32.mrb[26].mxu0 }
 0x1ed   : > { %v4602_v32 = vadd.f32 %v4601_v28, %v4600_v25  ;;  %v4603_v33 = vpop.f32.mrb[26].mxu1  ;;  %v4540_v34 = vpop.f32.mrb[27].mxu0 }
 0x1ee   : > { %v4541_v35 = vadd.f32 %v4540_v34, %v4539_v30  ;;  %v4604_v36 = vpop.f32.mrb[27].mxu1 }
 0x1ef   : > { %v6315_v37 = vadd.f32 %v4602_v32, %v4538_v27  ;;  %v4605_v38 = vadd.f32 %v4604_v36, %v4603_v33 }
 0x1f1   : > { %v6317_v39 = vadd.f32 %v4605_v38, %v4541_v35 }
 0x1f2   : > { %v4542_v40 = vpop.f32.mrb[28].mxu0 }
 0x1f3   : > { %v4606_v41 = vpop.f32.mrb[28].mxu1  ;;  %v4543_v42 = vpop.f32.mrb[29].mxu0 }
 0x1f4   : > { %v4544_v43 = vadd.f32 %v4543_v42, %v4542_v40  ;;  %v4607_v44 = vpop.f32.mrb[29].mxu1  ;;  %v4545_v45 = vpop.f32.mrb[30].mxu0 }
 0x1f5   : > { %v4608_v46 = vadd.f32 %v4607_v44, %v4606_v41  ;;  %v4609_v47 = vpop.f32.mrb[30].mxu1  ;;  %v4546_v48 = vpop.f32.mrb[31].mxu0 }
 0x1f6   : > { %v4547_v50 = vadd.f32 %v4546_v48, %v4545_v45  ;;  %v4610_v52 = vpop.f32.mrb[31].mxu1 }
 0x1f7   : > { %v6319_v54 = vadd.f32 %v4608_v46, %v4544_v43  ;;  %v4611_v56 = vadd.f32 %v4610_v52, %v4609_v47 }
 0x1f9   : > { %v6321_v57 = vadd.f32 %v4611_v56, %v4547_v50 }
 0x1fa   : > { %v4628_v58 = vpop.f32.mrb[32].mxu0 }
 0x1fb   : > { %v4692_v59 = vpop.f32.mrb[32].mxu1  ;;  %v4629_v60 = vpop.f32.mrb[33].mxu0 }
 0x1fc   : > { %v4630_v61 = vadd.f32 %v4629_v60, %v4628_v58  ;;  %v4693_v62 = vpop.f32.mrb[33].mxu1  ;;  %v4631_v63 = vpop.f32.mrb[34].mxu0 }
 0x1fd   : > { %v4694_v0 = vadd.f32 %v4693_v62, %v4692_v59  ;;  %v4695_v1 = vpop.f32.mrb[34].mxu1  ;;  %v4632_v2 = vpop.f32.mrb[35].mxu0 }
 0x1fe   : > { %v3303_v3 = vadd.f32 %v4630_v61, %v6255_v49  ;;  %v4633_v4 = vadd.f32 %v4632_v2, %v4631_v63  ;;  %v4696_v6 = vpop.f32.mrb[35].mxu1 }
 0x1ff   : > { %v4697_v10 = vadd.f32 %v4696_v6, %v4695_v1 }
 0x200   : > { %v6324_v11 = vadd.f32 %v4694_v0, %v3303_v3  ;;  %v3306_v12 = vadd.f32 %v4633_v4, %v6257_v51 }
 0x202   : > { %v6327_v13 = vadd.f32 %v4697_v10, %v3306_v12  ;;  %v4634_v14 = vpop.f32.mrb[36].mxu0 }
 0x203   : > { %v4698_v15 = vpop.f32.mrb[36].mxu1  ;;  %v4635_v16 = vpop.f32.mrb[37].mxu0 }
 0x204   : > { %v4636_v17 = vadd.f32 %v4635_v16, %v4634_v14  ;;  %v4699_v18 = vpop.f32.mrb[37].mxu1  ;;  %v4637_v19 = vpop.f32.mrb[38].mxu0 }
 0x205   : > { %v4700_v20 = vadd.f32 %v4699_v18, %v4698_v15  ;;  %v4701_v22 = vpop.f32.mrb[38].mxu1  ;;  %v4638_v24 = vpop.f32.mrb[39].mxu0 }
 0x206   : > { %v3311_v49 = vadd.f32 %v4636_v17, %v6271_v7  ;;  %v4639_v25 = vadd.f32 %v4638_v24, %v4637_v19  ;;  %v4702_v26 = vpop.f32.mrb[39].mxu1 }
 0x207   : > { %v4703_v27 = vadd.f32 %v4702_v26, %v4701_v22 }
 0x208   : > { %v6330_v28 = vadd.f32 %v4700_v20, %v3311_v49  ;;  %v3314_v51 = vadd.f32 %v4639_v25, %v6273_v9 }
 0x20a   : > { %v6333_v30 = vadd.f32 %v4703_v27, %v3314_v51  ;;  %v4640_v32 = vpop.f32.mrb[40].mxu0 }
 0x20b   : > { %v4704_v33 = vpop.f32.mrb[40].mxu1  ;;  %v4641_v34 = vpop.f32.mrb[41].mxu0 }
 0x20c   : > { %v4642_v35 = vadd.f32 %v4641_v34, %v4640_v32  ;;  %v4705_v36 = vpop.f32.mrb[41].mxu1  ;;  %v4643_v38 = vpop.f32.mrb[42].mxu0 }
 0x20d   : > { %v4706_v40 = vadd.f32 %v4705_v36, %v4704_v33  ;;  %v4707_v41 = vpop.f32.mrb[42].mxu1  ;;  %v4644_v42 = vpop.f32.mrb[43].mxu0 }
 0x20e   : > { %v3319_v7 = vadd.f32 %v4642_v35, %v6287_v29  ;;  %v4645_v43 = vadd.f32 %v4644_v42, %v4643_v38  ;;  %v4708_v44 = vpop.f32.mrb[43].mxu1 }
 0x20f   : > { %v4709_v45 = vadd.f32 %v4708_v44, %v4707_v41 }
 0x210   : > { %v6336_v46 = vadd.f32 %v4706_v40, %v3319_v7  ;;  %v3322_v9 = vadd.f32 %v4645_v43, %v6289_v31 }
 0x212   : > { %v6339_v47 = vadd.f32 %v4709_v45, %v3322_v9  ;;  %v4646_v48 = vpop.f32.mrb[44].mxu0 }
 0x213   : > { %v4710_v50 = vpop.f32.mrb[44].mxu1  ;;  %v4647_v52 = vpop.f32.mrb[45].mxu0 }
 0x214   : > { %v4648_v56 = vadd.f32 %v4647_v52, %v4646_v48  ;;  %v4711_v58 = vpop.f32.mrb[45].mxu1  ;;  %v4649_v59 = vpop.f32.mrb[46].mxu0 }
 0x215   : > { %v4712_v60 = vadd.f32 %v4711_v58, %v4710_v50  ;;  %v4713_v61 = vpop.f32.mrb[46].mxu1  ;;  %v4650_v62 = vpop.f32.mrb[47].mxu0 }
 0x216   : > { %v3327_v29 = vadd.f32 %v4648_v56, %v6303_v53  ;;  %v4651_v63 = vadd.f32 %v4650_v62, %v4649_v59  ;;  %v4714_v0 = vpop.f32.mrb[47].mxu1 }
 0x217   : > { %v4715_v1 = vadd.f32 %v4714_v0, %v4713_v61 }
 0x218   : > { %v6342_v2 = vadd.f32 %v4712_v60, %v3327_v29  ;;  %v3330_v31 = vadd.f32 %v4651_v63, %v6305_v55 }
 0x21a   : > { %v6345_v3 = vadd.f32 %v4715_v1, %v3330_v31  ;;  %v4652_v4 = vpop.f32.mrb[48].mxu0 }
 0x21b   : > { %v4716_v6 = vpop.f32.mrb[48].mxu1  ;;  %v4653_v10 = vpop.f32.mrb[49].mxu0 }
 0x21c   : > { %v4654_v12 = vadd.f32 %v4653_v10, %v4652_v4  ;;  %v4717_v14 = vpop.f32.mrb[49].mxu1  ;;  %v4655_v15 = vpop.f32.mrb[50].mxu0 }
 0x21d   : > { %v4718_v16 = vadd.f32 %v4717_v14, %v4716_v6  ;;  %v4719_v17 = vpop.f32.mrb[50].mxu1  ;;  %v4656_v18 = vpop.f32.mrb[51].mxu0 }
 0x21e   : > { %v3335_v53 = vadd.f32 %v4654_v12, %v6307_v5  ;;  %v4657_v19 = vadd.f32 %v4656_v18, %v4655_v15  ;;  %v4720_v20 = vpop.f32.mrb[51].mxu1 }
 0x21f   : > { %v4721_v22 = vadd.f32 %v4720_v20, %v4719_v17 }
 0x220   : > { %v6348_v24 = vadd.f32 %v4718_v16, %v3335_v53  ;;  %v3338_v55 = vadd.f32 %v4657_v19, %v6309_v8 }
 0x222   : > { %v6351_v49 = vadd.f32 %v4721_v22, %v3338_v55  ;;  %v4658_v25 = vpop.f32.mrb[52].mxu0 }
 0x223   : > { %v4722_v26 = vpop.f32.mrb[52].mxu1  ;;  %v4659_v27 = vpop.f32.mrb[53].mxu0 }
 0x224   : > { %v4660_v51 = vadd.f32 %v4659_v27, %v4658_v25  ;;  %v4723_v32 = vpop.f32.mrb[53].mxu1  ;;  %v4661_v33 = vpop.f32.mrb[54].mxu0 }
 0x225   : > { %v4724_v34 = vadd.f32 %v4723_v32, %v4722_v26  ;;  %v4725_v35 = vpop.f32.mrb[54].mxu1  ;;  %v4662_v36 = vpop.f32.mrb[55].mxu0 }
 0x226   : > { %v3343_v5 = vadd.f32 %v4660_v51, %v6311_v21  ;;  %v4663_v38 = vadd.f32 %v4662_v36, %v4661_v33  ;;  %v4726_v40 = vpop.f32.mrb[55].mxu1 }
 0x227   : > { %v4727_v41 = vadd.f32 %v4726_v40, %v4725_v35 }
 0x228   : > { %v6354_v42 = vadd.f32 %v4724_v34, %v3343_v5  ;;  %v3346_v8 = vadd.f32 %v4663_v38, %v6313_v23 }
 0x22a   : > { %v6357_v7 = vadd.f32 %v4727_v41, %v3346_v8  ;;  %v4664_v43 = vpop.f32.mrb[56].mxu0 }
 0x22b   : > { %v4728_v44 = vpop.f32.mrb[56].mxu1  ;;  %v4665_v45 = vpop.f32.mrb[57].mxu0 }
 0x22c   : > { %v4666_v9 = vadd.f32 %v4665_v45, %v4664_v43  ;;  %v4729_v48 = vpop.f32.mrb[57].mxu1  ;;  %v4667_v50 = vpop.f32.mrb[58].mxu0 }
 0x22d   : > { %v4730_v52 = vadd.f32 %v4729_v48, %v4728_v44  ;;  %v4731_v56 = vpop.f32.mrb[58].mxu1  ;;  %v4668_v58 = vpop.f32.mrb[59].mxu0 }
 0x22e   : > { %v3351_v21 = vadd.f32 %v4666_v9, %v6315_v37  ;;  %v4669_v59 = vadd.f32 %v4668_v58, %v4667_v50  ;;  %v4732_v60 = vpop.f32.mrb[59].mxu1 }
 0x22f   : > { %v4733_v61 = vadd.f32 %v4732_v60, %v4731_v56 }
 0x230   : > { %v6360_v62 = vadd.f32 %v4730_v52, %v3351_v21  ;;  %v3354_v23 = vadd.f32 %v4669_v59, %v6317_v39 }
 0x232   : > { %v6363_v29 = vadd.f32 %v4733_v61, %v3354_v23  ;;  %v4670_v63 = vpop.f32.mrb[60].mxu0 }
 0x233   : > { %v4734_v0 = vpop.f32.mrb[60].mxu1  ;;  %v4671_v1 = vpop.f32.mrb[61].mxu0 }
 0x234   : > { %v4672_v31 = vadd.f32 %v4671_v1, %v4670_v63  ;;  %v4735_v4 = vpop.f32.mrb[61].mxu1  ;;  %v4673_v6 = vpop.f32.mrb[62].mxu0 }
 0x235   : > { %v4736_v10 = vadd.f32 %v4735_v4, %v4734_v0  ;;  %v4737_v12 = vpop.f32.mrb[62].mxu1  ;;  %v4674_v14 = vpop.f32.mrb[63].mxu0 }
 0x236   : > { %v3359_v37 = vadd.f32 %v4672_v31, %v6319_v54  ;;  %v4675_v15 = vadd.f32 %v4674_v14, %v4673_v6  ;;  %v4738_v16 = vpop.f32.mrb[63].mxu1 }
 0x237   : > { %v4739_v17 = vadd.f32 %v4738_v16, %v4737_v12 }
 0x238   : > { %v6366_v18 = vadd.f32 %v4736_v10, %v3359_v37  ;;  %v3362_v39 = vadd.f32 %v4675_v15, %v6321_v57 }
 0x23a   : > { %v6369_v53 = vadd.f32 %v4739_v17, %v3362_v39  ;;  %v4756_v19 = vpop.f32.mrb[64].mxu0 }
 0x23b   : > { %v4820_v20 = vpop.f32.mrb[64].mxu1  ;;  %v4757_v22 = vpop.f32.mrb[65].mxu0 }
 0x23c   : > { %v4758_v55 = vadd.f32 %v4757_v22, %v4756_v19  ;;  %v4821_v25 = vpop.f32.mrb[65].mxu1  ;;  %v4759_v26 = vpop.f32.mrb[66].mxu0 }
 0x23d   : > { %v4822_v27 = vadd.f32 %v4821_v25, %v4820_v20  ;;  %v4823_v51 = vpop.f32.mrb[66].mxu1  ;;  %v4760_v32 = vpop.f32.mrb[67].mxu0 }
 0x23e   : > { %v3497_v54 = vadd.f32 %v4758_v55, %v6324_v11  ;;  %v4761_v33 = vadd.f32 %v4760_v32, %v4759_v26  ;;  %v4824_v34 = vpop.f32.mrb[67].mxu1 }
 0x23f   : > { %v4825_v35 = vadd.f32 %v4824_v34, %v4823_v51 }
 0x240   : > { %v6372_v36 = vadd.f32 %v4822_v27, %v3497_v54  ;;  %v3500_v57 = vadd.f32 %v4761_v33, %v6327_v13 }
 0x242   : > { %v6375_v5 = vadd.f32 %v4825_v35, %v3500_v57  ;;  %v4762_v38 = vpop.f32.mrb[68].mxu0 }
 0x243   : > { %v4826_v40 = vpop.f32.mrb[68].mxu1  ;;  %v4763_v41 = vpop.f32.mrb[69].mxu0 }
 0x244   : > { %v4764_v8 = vadd.f32 %v4763_v41, %v4762_v38  ;;  %v4827_v43 = vpop.f32.mrb[69].mxu1  ;;  %v4765_v44 = vpop.f32.mrb[70].mxu0 }
 0x245   : > { %v4828_v45 = vadd.f32 %v4827_v43, %v4826_v40  ;;  %v4829_v9 = vpop.f32.mrb[70].mxu1  ;;  %v4766_v48 = vpop.f32.mrb[71].mxu0 }
 0x246   : > { %v3505_v11 = vadd.f32 %v4764_v8, %v6330_v28  ;;  %v4767_v50 = vadd.f32 %v4766_v48, %v4765_v44  ;;  %v4830_v52 = vpop.f32.mrb[71].mxu1 }
 0x247   : > { %v4831_v56 = vadd.f32 %v4830_v52, %v4829_v9 }
 0x248   : > { %v6378_v58 = vadd.f32 %v4828_v45, %v3505_v11  ;;  %v3508_v13 = vadd.f32 %v4767_v50, %v6333_v30 }
 0x24a   : > { %v6381_v21 = vadd.f32 %v4831_v56, %v3508_v13  ;;  %v4768_v59 = vpop.f32.mrb[72].mxu0 }
 0x24b   : > { %v4832_v60 = vpop.f32.mrb[72].mxu1  ;;  %v4769_v61 = vpop.f32.mrb[73].mxu0 }
 0x24c   : > { %v4770_v23 = vadd.f32 %v4769_v61, %v4768_v59  ;;  %v4833_v63 = vpop.f32.mrb[73].mxu1  ;;  %v4771_v0 = vpop.f32.mrb[74].mxu0 }
 0x24d   : > { %v4834_v1 = vadd.f32 %v4833_v63, %v4832_v60  ;;  %v4835_v31 = vpop.f32.mrb[74].mxu1  ;;  %v4772_v4 = vpop.f32.mrb[75].mxu0 }
 0x24e   : > { %v3513_v28 = vadd.f32 %v4770_v23, %v6336_v46  ;;  %v4773_v6 = vadd.f32 %v4772_v4, %v4771_v0  ;;  %v4836_v10 = vpop.f32.mrb[75].mxu1 }
 0x24f   : > { %v4837_v12 = vadd.f32 %v4836_v10, %v4835_v31 }
 0x250   : > { %v6384_v14 = vadd.f32 %v4834_v1, %v3513_v28  ;;  %v3516_v30 = vadd.f32 %v4773_v6, %v6339_v47 }
 0x252   : > { %v6387_v37 = vadd.f32 %v4837_v12, %v3516_v30  ;;  %v4774_v15 = vpop.f32.mrb[76].mxu0 }
 0x253   : > { %v4838_v16 = vpop.f32.mrb[76].mxu1  ;;  %v4775_v17 = vpop.f32.mrb[77].mxu0 }
 0x254   : > { %v4776_v39 = vadd.f32 %v4775_v17, %v4774_v15  ;;  %v4839_v19 = vpop.f32.mrb[77].mxu1  ;;  %v4777_v20 = vpop.f32.mrb[78].mxu0 }
 0x255   : > { %v4840_v22 = vadd.f32 %v4839_v19, %v4838_v16  ;;  %v4841_v55 = vpop.f32.mrb[78].mxu1  ;;  %v4778_v25 = vpop.f32.mrb[79].mxu0 }
 0x256   : > { %v3521_v46 = vadd.f32 %v4776_v39, %v6342_v2  ;;  %v4779_v26 = vadd.f32 %v4778_v25, %v4777_v20  ;;  %v4842_v27 = vpop.f32.mrb[79].mxu1 }
 0x257   : > { %v4843_v51 = vadd.f32 %v4842_v27, %v4841_v55 }
 0x258   : > { %v6390_v32 = vadd.f32 %v4840_v22, %v3521_v46  ;;  %v3524_v47 = vadd.f32 %v4779_v26, %v6345_v3 }
 0x25a   : > { %v6393_v54 = vadd.f32 %v4843_v51, %v3524_v47  ;;  %v4780_v33 = vpop.f32.mrb[80].mxu0 }
 0x25b   : > { %v4844_v34 = vpop.f32.mrb[80].mxu1  ;;  %v4781_v35 = vpop.f32.mrb[81].mxu0 }
 0x25c   : > { %v4782_v57 = vadd.f32 %v4781_v35, %v4780_v33  ;;  %v4845_v38 = vpop.f32.mrb[81].mxu1  ;;  %v4783_v40 = vpop.f32.mrb[82].mxu0 }
 0x25d   : > { %v4846_v41 = vadd.f32 %v4845_v38, %v4844_v34  ;;  %v4847_v8 = vpop.f32.mrb[82].mxu1  ;;  %v4784_v43 = vpop.f32.mrb[83].mxu0 }
 0x25e   : > { %v3529_v2 = vadd.f32 %v4782_v57, %v6348_v24  ;;  %v4785_v44 = vadd.f32 %v4784_v43, %v4783_v40  ;;  %v4848_v45 = vpop.f32.mrb[83].mxu1 }
 0x25f   : > { %v4849_v9 = vadd.f32 %v4848_v45, %v4847_v8 }
 0x260   : > { %v6396_v48 = vadd.f32 %v4846_v41, %v3529_v2  ;;  %v3532_v3 = vadd.f32 %v4785_v44, %v6351_v49 }
 0x262   : > { %v6399_v11 = vadd.f32 %v4849_v9, %v3532_v3  ;;  %v4786_v50 = vpop.f32.mrb[84].mxu0 }
 0x263   : > { %v4850_v52 = vpop.f32.mrb[84].mxu1  ;;  %v4787_v56 = vpop.f32.mrb[85].mxu0 }
 0x264   : > { %v4788_v13 = vadd.f32 %v4787_v56, %v4786_v50  ;;  %v4851_v59 = vpop.f32.mrb[85].mxu1  ;;  %v4789_v60 = vpop.f32.mrb[86].mxu0 }
 0x265   : > { %v4852_v61 = vadd.f32 %v4851_v59, %v4850_v52  ;;  %v4853_v23 = vpop.f32.mrb[86].mxu1  ;;  %v4790_v63 = vpop.f32.mrb[87].mxu0 }
 0x266   : > { %v3537_v24 = vadd.f32 %v4788_v13, %v6354_v42  ;;  %v4791_v0 = vadd.f32 %v4790_v63, %v4789_v60  ;;  %v4854_v1 = vpop.f32.mrb[87].mxu1 }
 0x267   : > { %v4855_v31 = vadd.f32 %v4854_v1, %v4853_v23 }
 0x268   : > { %v6402_v4 = vadd.f32 %v4852_v61, %v3537_v24  ;;  %v3540_v49 = vadd.f32 %v4791_v0, %v6357_v7 }
 0x26a   : > { %v6405_v28 = vadd.f32 %v4855_v31, %v3540_v49  ;;  %v4792_v6 = vpop.f32.mrb[88].mxu0 }
 0x26b   : > { %v4856_v10 = vpop.f32.mrb[88].mxu1  ;;  %v4793_v12 = vpop.f32.mrb[89].mxu0 }
 0x26c   : > { %v4794_v30 = vadd.f32 %v4793_v12, %v4792_v6  ;;  %v4857_v15 = vpop.f32.mrb[89].mxu1  ;;  %v4795_v16 = vpop.f32.mrb[90].mxu0 }
 0x26d   : > { %v4858_v17 = vadd.f32 %v4857_v15, %v4856_v10  ;;  %v4859_v39 = vpop.f32.mrb[90].mxu1  ;;  %v4796_v19 = vpop.f32.mrb[91].mxu0 }
 0x26e   : > { %v3545_v42 = vadd.f32 %v4794_v30, %v6360_v62  ;;  %v4797_v20 = vadd.f32 %v4796_v19, %v4795_v16  ;;  %v4860_v22 = vpop.f32.mrb[91].mxu1 }
 0x26f   : > { %v4861_v55 = vadd.f32 %v4860_v22, %v4859_v39 }
 0x270   : > { %v6408_v25 = vadd.f32 %v4858_v17, %v3545_v42  ;;  %v3548_v7 = vadd.f32 %v4797_v20, %v6363_v29 }
 0x272   : > { %v6411_v46 = vadd.f32 %v4861_v55, %v3548_v7  ;;  %v4798_v26 = vpop.f32.mrb[92].mxu0 }
 0x273   : > { %v4862_v27 = vpop.f32.mrb[92].mxu1  ;;  %v4799_v51 = vpop.f32.mrb[93].mxu0 }
 0x274   : > { %v4800_v47 = vadd.f32 %v4799_v51, %v4798_v26  ;;  %v4863_v33 = vpop.f32.mrb[93].mxu1  ;;  %v4801_v34 = vpop.f32.mrb[94].mxu0 }
 0x275   : > { %v4864_v35 = vadd.f32 %v4863_v33, %v4862_v27  ;;  %v4865_v57 = vpop.f32.mrb[94].mxu1  ;;  %v4802_v38 = vpop.f32.mrb[95].mxu0 }
 0x276   : > { %v3553_v62 = vadd.f32 %v4800_v47, %v6366_v18  ;;  %v4803_v40 = vadd.f32 %v4802_v38, %v4801_v34  ;;  %v4866_v41 = vpop.f32.mrb[95].mxu1 }
 0x277   : > { %v4867_v8 = vadd.f32 %v4866_v41, %v4865_v57 }
 0x278   : > { %v6414_v43 = vadd.f32 %v4864_v35, %v3553_v62  ;;  %v3556_v29 = vadd.f32 %v4803_v40, %v6369_v53 }
 0x27a   : > { %v6417_v2 = vadd.f32 %v4867_v8, %v3556_v29  ;;  %v4884_v44 = vpop.f32.mrb[96].mxu0 }
 0x27b   : > { %v4948_v45 = vpop.f32.mrb[96].mxu1  ;;  %v4885_v9 = vpop.f32.mrb[97].mxu0 }
 0x27c   : > { %v4886_v3 = vadd.f32 %v4885_v9, %v4884_v44  ;;  %v4949_v50 = vpop.f32.mrb[97].mxu1  ;;  %v4887_v52 = vpop.f32.mrb[98].mxu0 }
 0x27d   : > { %v4950_v56 = vadd.f32 %v4949_v50, %v4948_v45  ;;  %v4951_v13 = vpop.f32.mrb[98].mxu1  ;;  %v4888_v59 = vpop.f32.mrb[99].mxu0 }
 0x27e   : > { %v3691_v18 = vadd.f32 %v4886_v3, %v6372_v36  ;;  %v4889_v60 = vadd.f32 %v4888_v59, %v4887_v52  ;;  %v4952_v61 = vpop.f32.mrb[99].mxu1 }
 0x27f   : > { %v4953_v23 = vadd.f32 %v4952_v61, %v4951_v13 }
 0x280   : > { %v6420_v63 = vadd.f32 %v4950_v56, %v3691_v18  ;;  %v3694_v53 = vadd.f32 %v4889_v60, %v6375_v5 }
 0x282   : > { %v6423_v24 = vadd.f32 %v4953_v23, %v3694_v53  ;;  %v4890_v0 = vpop.f32.mrb[100].mxu0 }
 0x283   : > { %v4954_v1 = vpop.f32.mrb[100].mxu1  ;;  %v4891_v31 = vpop.f32.mrb[101].mxu0 }
 0x284   : > { %v3850_v49 = vadd.f32 %v6423_v24, %v6420_v63  ;;  %v4892_v6 = vadd.f32 %v4891_v31, %v4890_v0  ;;  %v4955_v10 = vpop.f32.mrb[101].mxu1  ;;  %v4893_v12 = vpop.f32.mrb[102].mxu0 }
 0x285   : > { %v4956_v30 = vadd.f32 %v4955_v10, %v4954_v1  ;;  %v4957_v36 = vpop.f32.mrb[102].mxu1  ;;  %v4894_v15 = vpop.f32.mrb[103].mxu0 }
 0x286   : > { %v3699_v16 = vadd.f32 %v4892_v6, %v6378_v58  ;;  %v4895_v17 = vadd.f32 %v4894_v15, %v4893_v12  ;;  %v4958_v39 = vpop.f32.mrb[103].mxu1 }
 0x287   : > { %v4959_v19 = vadd.f32 %v4958_v39, %v4957_v36 }
 0x288   : > { %v6428_v5 = vadd.f32 %v4956_v30, %v3699_v16  ;;  %v3702_v42 = vadd.f32 %v4895_v17, %v6381_v21 }
 0x28a   : > { %v3851_v20 = vadd.f32 %v3850_v49, %v6428_v5  ;;  %v6432_v22 = vadd.f32 %v4959_v19, %v3702_v42  ;;  %v4896_v55 = vpop.f32.mrb[104].mxu0 }
 0x28b   : > { %v4960_v7 = vpop.f32.mrb[104].mxu1  ;;  %v4897_v26 = vpop.f32.mrb[105].mxu0 }
 0x28c   : > { %v3852_v27 = vadd.f32 %v3851_v20, %v6432_v22  ;;  %v4898_v51 = vadd.f32 %v4897_v26, %v4896_v55  ;;  %v4961_v47 = vpop.f32.mrb[105].mxu1  ;;  %v4899_v33 = vpop.f32.mrb[106].mxu0 }
 0x28d   : > { %v4962_v58 = vadd.f32 %v4961_v47, %v4960_v7  ;;  %v4963_v34 = vpop.f32.mrb[106].mxu1  ;;  %v4900_v35 = vpop.f32.mrb[107].mxu0 }
 0x28e   : > { %v3707_v57 = vadd.f32 %v4898_v51, %v6384_v14  ;;  %v4901_v38 = vadd.f32 %v4900_v35, %v4899_v33  ;;  %v4964_v62 = vpop.f32.mrb[107].mxu1 }
 0x28f   : > { %v4965_v21 = vadd.f32 %v4964_v62, %v4963_v34 }
 0x290   : > { %v6436_v40 = vadd.f32 %v4962_v58, %v3707_v57  ;;  %v3710_v41 = vadd.f32 %v4901_v38, %v6387_v37 }
 0x292   : > { %v3853_v8 = vadd.f32 %v3852_v27, %v6436_v40  ;;  %v6440_v29 = vadd.f32 %v4965_v21, %v3710_v41  ;;  %v4902_v44 = vpop.f32.mrb[108].mxu0 }
 0x293   : > { %v4966_v45 = vpop.f32.mrb[108].mxu1  ;;  %v4903_v9 = vpop.f32.mrb[109].mxu0 }
 0x294   : > { %v3854_v3 = vadd.f32 %v3853_v8, %v6440_v29  ;;  %v4904_v50 = vadd.f32 %v4903_v9, %v4902_v44  ;;  %v4967_v52 = vpop.f32.mrb[109].mxu1  ;;  %v4905_v56 = vpop.f32.mrb[110].mxu0 }
 0x295   : > { %v4968_v14 = vadd.f32 %v4967_v52, %v4966_v45  ;;  %v4969_v13 = vpop.f32.mrb[110].mxu1  ;;  %v4906_v59 = vpop.f32.mrb[111].mxu0 }
 0x296   : > { %v3715_v18 = vadd.f32 %v4904_v50, %v6390_v32  ;;  %v4907_v60 = vadd.f32 %v4906_v59, %v4905_v56  ;;  %v4970_v61 = vpop.f32.mrb[111].mxu1 }
 0x297   : > { %v4971_v37 = vadd.f32 %v4970_v61, %v4969_v13 }
 0x298   : > { %v6444_v23 = vadd.f32 %v4968_v14, %v3715_v18  ;;  %v3718_v53 = vadd.f32 %v4907_v60, %v6393_v54 }
 0x29a   : > { %v3855_v0 = vadd.f32 %v3854_v3, %v6444_v23  ;;  %v6448_v1 = vadd.f32 %v4971_v37, %v3718_v53  ;;  %v4908_v31 = vpop.f32.mrb[112].mxu0 }
 0x29b   : > { %v4972_v49 = vpop.f32.mrb[112].mxu1  ;;  %v4909_v6 = vpop.f32.mrb[113].mxu0 }
 0x29c   : > { %v3856_v10 = vadd.f32 %v3855_v0, %v6448_v1  ;;  %v4910_v12 = vadd.f32 %v4909_v6, %v4908_v31  ;;  %v4973_v30 = vpop.f32.mrb[113].mxu1  ;;  %v4911_v36 = vpop.f32.mrb[114].mxu0 }
 0x29d   : > { %v4974_v32 = vadd.f32 %v4973_v30, %v4972_v49  ;;  %v4975_v15 = vpop.f32.mrb[114].mxu1  ;;  %v4912_v16 = vpop.f32.mrb[115].mxu0 }
 0x29e   : > { %v3723_v17 = vadd.f32 %v4910_v12, %v6396_v48  ;;  %v4913_v39 = vadd.f32 %v4912_v16, %v4911_v36  ;;  %v4976_v19 = vpop.f32.mrb[115].mxu1 }
 0x29f   : > { %v4977_v54 = vadd.f32 %v4976_v19, %v4975_v15 }
 0x2a0   : > { %v6452_v42 = vadd.f32 %v4974_v32, %v3723_v17  ;;  %v3726_v20 = vadd.f32 %v4913_v39, %v6399_v11 }
 0x2a2   : > { %v3857_v55 = vadd.f32 %v3856_v10, %v6452_v42  ;;  %v6456_v7 = vadd.f32 %v4977_v54, %v3726_v20  ;;  %v4914_v26 = vpop.f32.mrb[116].mxu0 }
 0x2a3   : > { %v4978_v27 = vpop.f32.mrb[116].mxu1  ;;  %v4915_v51 = vpop.f32.mrb[117].mxu0 }
 0x2a4   : > { %v3858_v47 = vadd.f32 %v3857_v55, %v6456_v7  ;;  %v4916_v33 = vadd.f32 %v4915_v51, %v4914_v26  ;;  %v4979_v58 = vpop.f32.mrb[117].mxu1  ;;  %v4917_v34 = vpop.f32.mrb[118].mxu0 }
 0x2a5   : > { %v4980_v48 = vadd.f32 %v4979_v58, %v4978_v27  ;;  %v4981_v35 = vpop.f32.mrb[118].mxu1  ;;  %v4918_v57 = vpop.f32.mrb[119].mxu0 }
 0x2a6   : > { %v3731_v38 = vadd.f32 %v4916_v33, %v6402_v4  ;;  %v4919_v62 = vadd.f32 %v4918_v57, %v4917_v34  ;;  %v4982_v21 = vpop.f32.mrb[119].mxu1 }
 0x2a7   : > { %v4983_v11 = vadd.f32 %v4982_v21, %v4981_v35 }
 0x2a8   : > { %v3828_v41 = vadd.f32 %v4980_v48, %v3731_v38  ;;  %v3734_v8 = vadd.f32 %v4919_v62, %v6405_v28 }
 0x2aa   : > { %v3859_v44 = vadd.f32 %v3858_v47, %v3828_v41  ;;  %v3831_v45 = vadd.f32 %v4983_v11, %v3734_v8  ;;  %v4920_v9 = vpop.f32.mrb[120].mxu0 }
 0x2ab   : > { %v4984_v3 = vpop.f32.mrb[120].mxu1  ;;  %v4921_v50 = vpop.f32.mrb[121].mxu0 }
 0x2ac   : > { %v3860_v52 = vadd.f32 %v3859_v44, %v3831_v45  ;;  %v4922_v56 = vadd.f32 %v4921_v50, %v4920_v9  ;;  %v4985_v14 = vpop.f32.mrb[121].mxu1  ;;  %v4923_v13 = vpop.f32.mrb[122].mxu0 }
 0x2ad   : > { %v4986_v59 = vadd.f32 %v4985_v14, %v4984_v3  ;;  %v4987_v18 = vpop.f32.mrb[122].mxu1  ;;  %v4924_v60 = vpop.f32.mrb[123].mxu0 }
 0x2ae   : > { %v3739_v4 = vadd.f32 %v4922_v56, %v6408_v25  ;;  %v4925_v61 = vadd.f32 %v4924_v60, %v4923_v13  ;;  %v4988_v37 = vpop.f32.mrb[123].mxu1 }
 0x2af   : > { %v4989_v53 = vadd.f32 %v4988_v37, %v4987_v18 }
 0x2b0   : > { %v3836_v0 = vadd.f32 %v4986_v59, %v3739_v4  ;;  %v3742_v28 = vadd.f32 %v4925_v61, %v6411_v46 }
 0x2b2   : > { %v3861_v31 = vadd.f32 %v3860_v52, %v3836_v0  ;;  %v3839_v49 = vadd.f32 %v4989_v53, %v3742_v28  ;;  %v4926_v6 = vpop.f32.mrb[124].mxu0 }
 0x2b3   : > { %v4990_v10 = vpop.f32.mrb[124].mxu1  ;;  %v4927_v12 = vpop.f32.mrb[125].mxu0 }
 0x2b4   : > { %v3862_v30 = vadd.f32 %v3861_v31, %v3839_v49  ;;  %v4928_v36 = vadd.f32 %v4927_v12, %v4926_v6  ;;  %v4991_v32 = vpop.f32.mrb[125].mxu1  ;;  %v4929_v15 = vpop.f32.mrb[126].mxu0 }
 0x2b5   : > { %v4992_v16 = vadd.f32 %v4991_v32, %v4990_v10  ;;  %v4993_v17 = vpop.f32.mrb[126].mxu1  ;;  %v4930_v39 = vpop.f32.mrb[127].mxu0 }
 0x2b6   : > { %v3747_v25 = vadd.f32 %v4928_v36, %v6414_v43  ;;  %v4931_v19 = vadd.f32 %v4930_v39, %v4929_v15  ;;  %v4994_v54 = vpop.f32.mrb[127].mxu1 }
 0x2b7   : > { %v4995_v20 = vadd.f32 %v4994_v54, %v4993_v17 }
 0x2b8   : > { %v3844_v55 = vadd.f32 %v4992_v16, %v3747_v25  ;;  %v3750_v46 = vadd.f32 %v4931_v19, %v6417_v2 }
 0x2ba   : > { %v3863_v26 = vadd.f32 %v3862_v30, %v3844_v55  ;;  %v3847_v27 = vadd.f32 %v4995_v20, %v3750_v46 }
 0x2bc   : > { %v3864_v51 = vadd.f32 %v3863_v26, %v3847_v27 }
 0x2be   : > { %v3865_v47 = vrot.slane %v3864_v51, 4 }
 0x2c0   : > { %v3866_v33 = vadd.f32 %v3865_v47, %v3864_v51  ;;  %v3926_v47 = vld [vmem:[%s1277_s9] sm:$0x1] }
 0x2c2   : > { %v3867_v58 = vrot.slane %v3866_v33, 2 }
 0x2c4   : > { %v3868_v34 = vadd.f32 %v3867_v58, %v3866_v33 }
 0x2c6   : > { %v3869_v48 = vrot.slane %v3868_v34, 1 }
 0x2c8   : > { %v3870_v35 = vadd.f32 %v3869_v48, %v3868_v34 }
 0x2ca   : > { %v3871_v57 = vmul.f32 0.0078125, %v3870_v35 }
 0x2cc   : > { %v6466_v38 = vsub.f32 %v6420_v63, %v3871_v57  ;;  %v6469_v43 = vsub.f32 %v6423_v24, %v3871_v57  ;;  %v6472_v62 = vsub.f32 %v6428_v5, %v3871_v57  ;;  %v6475_v2 = vsub.f32 %v6432_v22, %v3871_v57 }
 0x2cd   : > { %v6478_v21 = vsub.f32 %v6436_v40, %v3871_v57  ;;  %v6481_v11 = vsub.f32 %v6440_v29, %v3871_v57  ;;  %v6484_v8 = vsub.f32 %v6444_v23, %v3871_v57  ;;  %v6487_v63 = vsub.f32 %v6448_v1, %v3871_v57 }
 0x2ce   : > { %v6490_v24 = vsub.f32 %v6452_v42, %v3871_v57  ;;  %v6493_v5 = vsub.f32 %v6456_v7, %v3871_v57  ;;  %v6495_v22 = vsub.f32 %v3828_v41, %v3871_v57  ;;  %v6497_v44 = vsub.f32 %v3831_v45, %v3871_v57 }
 0x2cf   : > { %v6499_v40 = vsub.f32 %v3836_v0, %v3871_v57  ;;  %v6501_v29 = vsub.f32 %v3839_v49, %v3871_v57  ;;  %v6503_v9 = vsub.f32 %v3844_v55, %v3871_v57  ;;  %v6505_v23 = vsub.f32 %v3847_v27, %v3871_v57 }
 0x2d0   : > { %v3888_v1 = vmul.f32 %v6466_v38, %v6466_v38  ;;  %v3889_v42 = vmul.f32 %v6469_v43, %v6469_v43  ;;  %v3890_v7 = vmul.f32 %v6472_v62, %v6472_v62  ;;  %v3891_v45 = vmul.f32 %v6475_v2, %v6475_v2 }
 0x2d1   : > { %v3892_v50 = vmul.f32 %v6478_v21, %v6478_v21  ;;  %v3893_v56 = vmul.f32 %v6481_v11, %v6481_v11  ;;  %v3894_v13 = vmul.f32 %v6484_v8, %v6484_v8  ;;  %v3895_v18 = vmul.f32 %v6487_v63, %v6487_v63 }
 0x2d2   : > { %v3904_v41 = vadd.f32 %v3889_v42, %v3888_v1  ;;  %v3896_v4 = vmul.f32 %v6490_v24, %v6490_v24  ;;  %v3897_v37 = vmul.f32 %v6493_v5, %v6493_v5  ;;  %v3898_v0 = vmul.f32 %v6495_v22, %v6495_v22 }
 0x2d3   : > { %v3899_v31 = vmul.f32 %v6497_v44, %v6497_v44  ;;  %v3900_v6 = vmul.f32 %v6499_v40, %v6499_v40  ;;  %v3901_v12 = vmul.f32 %v6501_v29, %v6501_v29  ;;  %v3902_v36 = vmul.f32 %v6503_v9, %v6503_v9 }
 0x2d4   : > { %v3905_v3 = vadd.f32 %v3904_v41, %v3890_v7  ;;  %v3903_v15 = vmul.f32 %v6505_v23, %v6505_v23  ;;  %v3931_v27 = vlaneseq }
 0x2d6   : > { %v3906_v52 = vadd.f32 %v3905_v3, %v3891_v45  ;;  %v3932_v51 = vshrl.u32 %v3931_v27, 7 }
 0x2d8   : > { %v3907_v14 = vadd.f32 %v3906_v52, %v3892_v50  ;;  %v3933_v33 = vsub.s32 0, %v3932_v51  ;;  %v4479_v50 = vld [vmem:[%s1280_s12] ss:$0 sm:$0xff] }
 0x2da   : > { %v3908_v59 = vadd.f32 %v3907_v14, %v3893_v56 }
 0x2dc   : > { %v3909_v60 = vadd.f32 %v3908_v59, %v3894_v13 }
 0x2de   : > { %v3910_v61 = vadd.f32 %v3909_v60, %v3895_v18 }
 0x2e0   : > { %v3911_v53 = vadd.f32 %v3910_v61, %v3896_v4 }
 0x2e2   : > { %v3912_v28 = vadd.f32 %v3911_v53, %v3897_v37 }
 0x2e4   : > { %v3913_v49 = vadd.f32 %v3912_v28, %v3898_v0 }
 0x2e6   : > { %v3914_v10 = vadd.f32 %v3913_v49, %v3899_v31 }
 0x2e8   : > { %v3915_v30 = vadd.f32 %v3914_v10, %v3900_v6 }
 0x2ea   : > { %v3916_v32 = vadd.f32 %v3915_v30, %v3901_v12 }
 0x2ec   : > { %v3917_v16 = vadd.f32 %v3916_v32, %v3902_v36 }
 0x2ee   : > { %v3918_v17 = vadd.f32 %v3917_v16, %v3903_v15 }
 0x2f0   : > { %v3919_v39 = vrot.slane %v3918_v17, 4 }
 0x2f2   : > { %v3920_v25 = vadd.f32 %v3919_v39, %v3918_v17 }
 0x2f4   : > { %v3921_v19 = vrot.slane %v3920_v25, 2 }
 0x2f6   : > { %v3922_v54 = vadd.f32 %v3921_v19, %v3920_v25 }
 0x2f8   : > { %v3923_v20 = vrot.slane %v3922_v54, 1 }
 0x2fa   : > { %v3924_v55 = vadd.f32 %v3923_v20, %v3922_v54 }
 0x2fc   : > { %v3925_v46 = vmul.f32 0.0078125, %v3924_v55 }
 0x2fe   : > { %v3927_v26 = vadd.f32 1e-05, %v3925_v46 }
 0x300   : > { %5148 = vrsqrt.f32 %v3927_v26 }
 0x30a   : > { %v5149_v58 = vpop.eup %5148 }
 0x30b   : > { %v3929_v34 = vmul.f32 %v5149_v58, %v3926_v47 }
 0x30d   : > { %v3934_v48 = vrot.slane %v3929_v34, %v3933_v33 }
 0x30f   : > { %v3936_v35 = vmul.f32 %v3934_v48, %v6466_v38  ;;  %v3937_v57 = vmul.f32 %v3934_v48, %v6469_v43  ;;  %v3938_v1 = vmul.f32 %v3934_v48, %v6472_v62  ;;  %v3939_v42 = vmul.f32 %v3934_v48, %v6475_v2 }
 0x310   : > { %v3940_v7 = vmul.f32 %v3934_v48, %v6478_v21  ;;  %v3941_v41 = vmul.f32 %v3934_v48, %v6481_v11  ;;  %v3942_v45 = vmul.f32 %v3934_v48, %v6484_v8  ;;  %v3943_v3 = vmul.f32 %v3934_v48, %v6487_v63 }
 0x311   : > { %v3944_v52 = vmul.f32 %v3934_v48, %v6490_v24  ;;  %v3945_v56 = vmul.f32 %v3934_v48, %v6493_v5  ;;  %v3946_v38 = vmul.f32 %v3934_v48, %v6495_v22  ;;  %v3947_v43 = vmul.f32 %v3934_v48, %v6497_v44 }
 0x312   : > { %v3948_v62 = vmul.f32 %v3934_v48, %v6499_v40  ;;  %v3949_v2 = vmul.f32 %v3934_v48, %v6501_v29  ;;  %v3950_v21 = vmul.f32 %v3934_v48, %v6503_v9  ;;  %v3951_v11 = vmul.f32 %v3934_v48, %v6505_v23 }
 0x313   : > { %v3959_v8 = vadd.f32 %v4479_v50, %v3936_v35  ;;  %v3960_v63 = vadd.f32 %v4479_v50, %v3937_v57  ;;  %v3961_v14 = vadd.f32 %v4479_v50, %v3938_v1  ;;  %v3962_v13 = vadd.f32 %v4479_v50, %v3939_v42 }
 0x314   : > { %v3963_v24 = vadd.f32 %v4479_v50, %v3940_v7  ;;  %v3964_v59 = vadd.f32 %v4479_v50, %v3941_v41  ;;  %v3965_v5 = vadd.f32 %v4479_v50, %v3942_v45  ;;  %v3966_v18 = vadd.f32 %v4479_v50, %v3943_v3 }
 0x315   : > { %v3967_v22 = vadd.f32 %v4479_v50, %v3944_v52  ;;  %v3968_v60 = vadd.f32 %v4479_v50, %v3945_v56  ;;  %v3969_v44 = vadd.f32 %v4479_v50, %v3946_v38  ;;  %v3970_v4 = vadd.f32 %v4479_v50, %v3947_v43 }
 0x316   : > { %v3971_v40 = vadd.f32 %v4479_v50, %v3948_v62  ;;  %v3972_v61 = vadd.f32 %v4479_v50, %v3949_v2  ;;  %v3973_v29 = vadd.f32 %v4479_v50, %v3950_v21  ;;  %v3974_v37 = vadd.f32 %v4479_v50, %v3951_v11 }
 0x317   : > { %vm3975_vm0 = vcmp.gt.f32.partialorder %v3959_v8, 0.0  ;;  %vm3976_vm1 = vcmp.gt.f32.partialorder %v3960_v63, 0.0  ;;  %vm3977_vm2 = vcmp.gt.f32.partialorder %v3961_v14, 0.0  ;;  %vm3978_vm3 = vcmp.gt.f32.partialorder %v3962_v13, 0.0 }
 0x318   : > { %vm3979_vm4 = vcmp.gt.f32.partialorder %v3963_v24, 0.0  ;;  %vm3980_vm5 = vcmp.gt.f32.partialorder %v3964_v59, 0.0  ;;  %vm3981_vm6 = vcmp.gt.f32.partialorder %v3965_v5, 0.0  ;;  %vm3982_vm7 = vcmp.gt.f32.partialorder %v3966_v18, 0.0 }
 0x319   : > { %vm3983_vm8 = vcmp.gt.f32.partialorder %v3967_v22, 0.0  ;;  %vm3984_vm9 = vcmp.gt.f32.partialorder %v3968_v60, 0.0  ;;  %vm3985_vm10 = vcmp.gt.f32.partialorder %v3969_v44, 0.0  ;;  %vm3986_vm11 = vcmp.gt.f32.partialorder %v3970_v4, 0.0 }
 0x31a   : > { %vm3987_vm12 = vcmp.gt.f32.partialorder %v3971_v40, 0.0  ;;  %vm3988_vm13 = vcmp.gt.f32.partialorder %v3972_v61, 0.0  ;;  %vm3989_vm14 = vcmp.gt.f32.partialorder %v3973_v29, 0.0  ;;  %vm3990_vm15 = vcmp.gt.f32.partialorder %v3974_v37, 0.0 }
 0x31b   : > { %v3991_v9 = vmul.f32 0.2, %v3959_v8  ;;  %v3992_v23 = vmul.f32 0.2, %v3960_v63  ;;  %v3993_v53 = vmul.f32 0.2, %v3961_v14 }
 0x31c   : > { %v3994_v0 = vmul.f32 0.2, %v3962_v13  ;;  %v3995_v28 = vmul.f32 0.2, %v3963_v24  ;;  %v3996_v31 = vmul.f32 0.2, %v3964_v59 }
 0x31d   : > { %v3997_v49 = vmul.f32 0.2, %v3965_v5  ;;  %v3998_v6 = vmul.f32 0.2, %v3966_v18  ;;  %v3999_v10 = vmul.f32 0.2, %v3967_v22  ;;  %v4007_v12 = vsel %vm3975_vm0, %v3959_v8, %v3991_v9 }
 0x31e   : > { %v4000_v30 = vmul.f32 0.2, %v3968_v60  ;;  %v4001_v36 = vmul.f32 0.2, %v3969_v44  ;;  %v4002_v32 = vmul.f32 0.2, %v3970_v4  ;;  %v4008_v15 = vsel %vm3976_vm1, %v3960_v63, %v3992_v23  ;;  %4023 = vst [vmem:[%s6570_s15] sm:$0xff] %v4007_v12 }
 0x31f   : > { %v4003_v16 = vmul.f32 0.2, %v3971_v40  ;;  %v4004_v17 = vmul.f32 0.2, %v3972_v61  ;;  %v4005_v39 = vmul.f32 0.2, %v3973_v29  ;;  %v4009_v25 = vsel %vm3977_vm2, %v3961_v14, %v3993_v53 }
 0x320   : > { %4024 = vst [vmem:[%s6570_s15 + $0x8] sm:$0xff] %v4008_v15  ;;  %v4006_v19 = vmul.f32 0.2, %v3974_v37  ;;  %v4010_v54 = vsel %vm3978_vm3, %v3962_v13, %v3994_v0  ;;  %v4011_v20 = vsel %vm3979_vm4, %v3963_v24, %v3995_v28  ;;  %v4012_v55 = vsel %vm3980_vm5, %v3964_v59, %v3996_v31  ;;  %4025 = vst [vmem:[%s6570_s15 + $0x10] sm:$0xff] %v4009_v25 }
 0x321   : > { %v4013_v46 = vsel %vm3981_vm6, %v3965_v5, %v3997_v49  ;;  %v4014_v26 = vsel %vm3982_vm7, %v3966_v18, %v3998_v6  ;;  %v4015_v27 = vsel %vm3983_vm8, %v3967_v22, %v3999_v10  ;;  %v4016_v51 = vsel %vm3984_vm9, %v3968_v60, %v4000_v30  ;;  %4026 = vst [vmem:[%s6570_s15 + $0x18] sm:$0xff] %v4010_v54  ;;  %4045 = sbr.rel (!%p5230_p5) target bundleno = 816 (0x330), region = 81 }
 0x322   : > { %4027 = vst [vmem:[%s6570_s15 + $0x20] sm:$0xff] %v4011_v20  ;;  %4028 = vst [vmem:[%s6570_s15 + $0x28] sm:$0xff] %v4012_v55  ;;  %v4017_v47 = vsel %vm3985_vm10, %v3969_v44, %v4001_v36  ;;  %v4018_v33 = vsel %vm3986_vm11, %v3970_v4, %v4002_v32  ;;  %v4019_v58 = vsel %vm3987_vm12, %v3971_v40, %v4003_v16 }
 0x323   : > { %v4020_v34 = vsel %vm3988_vm13, %v3972_v61, %v4004_v17  ;;  %4029 = vst [vmem:[%s6570_s15 + $0x30] sm:$0xff] %v4013_v46  ;;  %4030 = vst [vmem:[%s6570_s15 + $0x38] sm:$0xff] %v4014_v26  ;;  %v4021_v48 = vsel %vm3989_vm14, %v3973_v29, %v4005_v39  ;;  %v4022_v35 = vsel %vm3990_vm15, %v3974_v37, %v4006_v19 }
 0x324   : > { %4031 = vst [vmem:[%s6570_s15 + $0x40] sm:$0xff] %v4015_v27  ;;  %4032 = vst [vmem:[%s6570_s15 + $0x48] sm:$0xff] %v4016_v51 }
 0x325   : > { %4033 = vst [vmem:[%s6570_s15 + $0x50] sm:$0xff] %v4017_v47  ;;  %4034 = vst [vmem:[%s6570_s15 + $0x58] sm:$0xff] %v4018_v33  ;;  %v4105_v57 = vld [vmem:[%s6570_s15] sm:$0xff] (%p5230_p5) }
 0x326   : > { %4035 = vst [vmem:[%s6570_s15 + $0x60] sm:$0xff] %v4019_v58  ;;  %4036 = vst [vmem:[%s6570_s15 + $0x68] sm:$0xff] %v4020_v34 }
 0x327   : > { %4037 = vst [vmem:[%s6570_s15 + $0x70] sm:$0xff] %v4021_v48  ;;  %4038 = vst [vmem:[%s6570_s15 + $0x78] sm:$0xff] %v4022_v35  ;;  %v4107_v1 = vld [vmem:[%s6570_s15 + $0x8] sm:$0xff] (%p5230_p5)  ;;  %v4109_v42 = vld [vmem:[%s6570_s15 + $0x10] sm:$0xff] (%p5230_p5) }
 0x328   : > { %v4111_v7 = vld [vmem:[%s6570_s15 + $0x18] sm:$0xff]  ;;  %4106 = vst [vmem:[%s4047_s21] sm:$0xff] %v4105_v57  ;;  %4108 = vst [vmem:[%s4047_s21 + $0x10] sm:$0xff] %v4107_v1 }
 0x329   : > { %v4113_v41 = vld [vmem:[%s6570_s15 + $0x20] sm:$0xff]  ;;  %v4115_v45 = vld [vmem:[%s6570_s15 + $0x28] sm:$0xff]  ;;  %4110 = vst [vmem:[%s4047_s21 + $0x20] sm:$0xff] %v4109_v42  ;;  %4112 = vst [vmem:[%s4047_s21 + $0x30] sm:$0xff] %v4111_v7 }
 0x32a   : > { %4114 = vst [vmem:[%s4047_s21 + $0x40] sm:$0xff] %v4113_v41  ;;  %4116 = vst [vmem:[%s4047_s21 + $0x50] sm:$0xff] %v4115_v45  ;;  %v4117_v3 = vld [vmem:[%s6570_s15 + $0x30] sm:$0xff]  ;;  %v4119_v50 = vld [vmem:[%s6570_s15 + $0x38] sm:$0xff] }
 0x32b   : > { %v4121_v52 = vld [vmem:[%s6570_s15 + $0x40] sm:$0xff]  ;;  %4118 = vst [vmem:[%s4047_s21 + $0x60] sm:$0xff] %v4117_v3  ;;  %4120 = vst [vmem:[%s4047_s21 + $0x70] sm:$0xff] %v4119_v50  ;;  %v4123_v56 = vld [vmem:[%s6570_s15 + $0x48] sm:$0xff] }
 0x32c   : > { %4122 = vst [vmem:[%s4047_s21 + $0x80] sm:$0xff] %v4121_v52  ;;  %v4125_v38 = vld [vmem:[%s6570_s15 + $0x50] sm:$0xff]  ;;  %v4127_v43 = vld [vmem:[%s6570_s15 + $0x58] sm:$0xff]  ;;  %4124 = vst [vmem:[%s4047_s21 + $0x90] sm:$0xff] %v4123_v56 }
 0x32d   : > { %4126 = vst [vmem:[%s4047_s21 + $0xa0] sm:$0xff] %v4125_v38  ;;  %4128 = vst [vmem:[%s4047_s21 + $0xb0] sm:$0xff] %v4127_v43  ;;  %v4129_v62 = vld [vmem:[%s6570_s15 + $0x60] sm:$0xff]  ;;  %v4131_v2 = vld [vmem:[%s6570_s15 + $0x68] sm:$0xff] }
 0x32e   : > { %v4133_v21 = vld [vmem:[%s6570_s15 + $0x70] sm:$0xff]  ;;  %4130 = vst [vmem:[%s4047_s21 + $0xc0] sm:$0xff] %v4129_v62  ;;  %4132 = vst [vmem:[%s4047_s21 + $0xd0] sm:$0xff] %v4131_v2  ;;  %v4135_v11 = vld [vmem:[%s6570_s15 + $0x78] sm:$0xff] }
 0x32f   : > { %4134 = vst [vmem:[%s4047_s21 + $0xe0] sm:$0xff] %v4133_v21  ;;  %4136 = vst [vmem:[%s4047_s21 + $0xf0] sm:$0xff] %v4135_v11 }
 0x330 PF: > { %p11_p11 = scmp.ge.s32.totalorder %s5218_s19, 4   ;;  %s6640_s15 = smov %s5168_s16 }
 0x331   : > { %s6641_s16 = smov %s5228_s22  ;;  %s6642_s17 = smov %s5218_s19 }
 0x332   :  { %13 = sbr.rel (!%p11_p11) target bundleno = 2 (0x2), region = 156 }

// kernel: discriminator_forward.6
= control target key start
LH: loop header
LB: loop body
LE: loop exit
PB: predicated region body
PF: predicated region fallthrough
CT: control target
= control target key end

     0   :  { %s8917_s15 = smov 0   ;;  %s8919_s16 = smov 0   ;;  %s10495_s0 = inlined_call_operand.vmem [shape: bf16[32,4096], index: 0, kind: input, shape index: {}]   ;;  %s10496_s1 = inlined_call_operand.vmem [shape: bf16[4096,512], index: 1, kind: input, shape index: {}]   ;;  %s10497_s2 = inlined_call_operand.vmem [shape: f32[1,512], index: 2, kind: input, shape index: {}]   ;;  %s10498_s3 = inlined_call_operand.vmem [shape: f32[1,512], index: 3, kind: input, shape index: {}]   ;;  %s10499_s4 = inlined_call_operand.vmem [shape: f32[32,512], index: 4, kind: output, shape index: {}]  }
   0x1   :  { %s8921_s17 = smov 0  }
   0x2 LB: > { %s8933_s18 = sadd.s32 4294967295, %s8890_s17   ;;  %s8936_s19 = sadd.s32 1, %s8890_s17   ;;  %s8890_s17 = sphi %s8921_s17, %s10503_s17   ;;  %s8886_s16 = sphi %s8919_s16, %s10502_s16   ;;  %s8882_s15 = sphi %s8917_s15, %s10501_s15  }
   0x3   : > { %s39_s20 = ssub.s32 %s8890_s17, %s8936_s19  ;;  %s42_s21 = sadd.s32 1, %s8886_s16 }
   0x4   : > { %p40_p0 = scmp.eq.s32.totalorder %s39_s20, 0  ;;  %p49_p1 = scmp.ne.s32.totalorder %s8886_s16, %s8882_s15 }
   0x5   : > { %p50_p2 = scmp.eq.s32.totalorder %s8890_s17, 0  ;;  %p131_p3 = scmp.eq.s32.totalorder %s8933_s18, 3 }
   0x6   : > { %s8946_s22 = scalar_select %p40_p0, %s8886_s16, %s42_s21  }
   0x7   : > { %p51_p4 = por %p50_p2, %p49_p1  ;;  %p8948_p5 = por %p131_p3, %p49_p1 }
   0x8   : > { %p7807_p6 = scmp.ge.s32.totalorder %s8890_s17, 4 }
   0xa   : > { %156 = sbr.rel (%p7807_p6) target bundleno = 362 (0x16a), region = 20 }
  0x11   : > { %159 = sbr.rel (!%p51_p4) target bundleno = 362 (0x16a), region = 24  ;;  %s161_s24 = sand.u32 (%p51_p4), 1, %s8886_s16  }
  0x12   : > { %s7809_s25 = sshll.u32 (%p51_p4), %s8890_s17, 2  ;;  %s7808_s26 = sshll.u32 (%p51_p4), %s161_s24, 11 }
  0x13   : > { %s8958_s29 = scalar_lea.vmem (%p51_p4), %s10496_s1, %s7809_s25  ;;  %s8962_s30 = scalar_lea.vmem (%p51_p4), [#allocation2], %s7808_s26 }
  0x14   : > { %v181_v0 = vld [vmem:[%s8958_s29] sm:$0xf] (%p51_p4)  ;;  %v183_v1 = vld [vmem:[%s8958_s29 + $0x10] sm:$0xf] (%p51_p4) }
  0x15   : > { %182 = vst [vmem:[%s8962_s30] sm:$0xf] (%p51_p4), %v181_v0  ;;  %184 = vst [vmem:[%s8962_s30 + $0x4] sm:$0xf] (%p51_p4), %v183_v1  ;;  %v185_v2 = vld [vmem:[%s8958_s29 + $0x20] sm:$0xf] (%p51_p4) }
  0x16   : > { %v187_v3 = vld [vmem:[%s8958_s29 + $0x30] sm:$0xf] (%p51_p4)  ;;  %v189_v4 = vld [vmem:[%s8958_s29 + $0x40] sm:$0xf] (%p51_p4)  ;;  %186 = vst [vmem:[%s8962_s30 + $0x8] sm:$0xf] (%p51_p4), %v185_v2 }
  0x17   : > { %188 = vst [vmem:[%s8962_s30 + $0xc] sm:$0xf] (%p51_p4), %v187_v3  ;;  %190 = vst [vmem:[%s8962_s30 + $0x10] sm:$0xf] (%p51_p4), %v189_v4  ;;  %v191_v5 = vld [vmem:[%s8958_s29 + $0x50] sm:$0xf] (%p51_p4) }
  0x18   : > { %v193_v6 = vld [vmem:[%s8958_s29 + $0x60] sm:$0xf]  ;;  %v195_v7 = vld [vmem:[%s8958_s29 + $0x70] sm:$0xf]  ;;  %192 = vst [vmem:[%s8962_s30 + $0x14] sm:$0xf] %v191_v5 }
  0x19   : > { %194 = vst [vmem:[%s8962_s30 + $0x18] sm:$0xf] %v193_v6  ;;  %196 = vst [vmem:[%s8962_s30 + $0x1c] sm:$0xf] %v195_v7  ;;  %v197_v8 = vld [vmem:[%s8958_s29 + $0x80] sm:$0xf] }
  0x1a   : > { %v199_v9 = vld [vmem:[%s8958_s29 + $0x90] sm:$0xf]  ;;  %v201_v10 = vld [vmem:[%s8958_s29 + $0xa0] sm:$0xf]  ;;  %198 = vst [vmem:[%s8962_s30 + $0x20] sm:$0xf] %v197_v8 }
  0x1b   : > { %200 = vst [vmem:[%s8962_s30 + $0x24] sm:$0xf] %v199_v9  ;;  %202 = vst [vmem:[%s8962_s30 + $0x28] sm:$0xf] %v201_v10  ;;  %v203_v11 = vld [vmem:[%s8958_s29 + $0xb0] sm:$0xf] }
  0x1c   : > { %v205_v12 = vld [vmem:[%s8958_s29 + $0xc0] sm:$0xf]  ;;  %v207_v13 = vld [vmem:[%s8958_s29 + $0xd0] sm:$0xf]  ;;  %204 = vst [vmem:[%s8962_s30 + $0x2c] sm:$0xf] %v203_v11 }
  0x1d   : > { %206 = vst [vmem:[%s8962_s30 + $0x30] sm:$0xf] %v205_v12  ;;  %208 = vst [vmem:[%s8962_s30 + $0x34] sm:$0xf] %v207_v13  ;;  %v209_v14 = vld [vmem:[%s8958_s29 + $0xe0] sm:$0xf] }
  0x1e   : > { %v211_v15 = vld [vmem:[%s8958_s29 + $0xf0] sm:$0xf]  ;;  %v213_v16 = vld [vmem:[%s8958_s29 + $0x100] sm:$0xf]  ;;  %210 = vst [vmem:[%s8962_s30 + $0x38] sm:$0xf] %v209_v14 }
  0x1f   : > { %212 = vst [vmem:[%s8962_s30 + $0x3c] sm:$0xf] %v211_v15  ;;  %214 = vst [vmem:[%s8962_s30 + $0x40] sm:$0xf] %v213_v16  ;;  %v215_v17 = vld [vmem:[%s8958_s29 + $0x110] sm:$0xf] }
  0x20   : > { %v217_v18 = vld [vmem:[%s8958_s29 + $0x120] sm:$0xf]  ;;  %v219_v19 = vld [vmem:[%s8958_s29 + $0x130] sm:$0xf]  ;;  %216 = vst [vmem:[%s8962_s30 + $0x44] sm:$0xf] %v215_v17 }
  0x21   : > { %218 = vst [vmem:[%s8962_s30 + $0x48] sm:$0xf] %v217_v18  ;;  %220 = vst [vmem:[%s8962_s30 + $0x4c] sm:$0xf] %v219_v19  ;;  %v221_v20 = vld [vmem:[%s8958_s29 + $0x140] sm:$0xf] }
  0x22   : > { %v223_v21 = vld [vmem:[%s8958_s29 + $0x150] sm:$0xf]  ;;  %v225_v22 = vld [vmem:[%s8958_s29 + $0x160] sm:$0xf]  ;;  %222 = vst [vmem:[%s8962_s30 + $0x50] sm:$0xf] %v221_v20 }
  0x23   : > { %224 = vst [vmem:[%s8962_s30 + $0x54] sm:$0xf] %v223_v21  ;;  %226 = vst [vmem:[%s8962_s30 + $0x58] sm:$0xf] %v225_v22  ;;  %v227_v23 = vld [vmem:[%s8958_s29 + $0x170] sm:$0xf] }
  0x24   : > { %v229_v24 = vld [vmem:[%s8958_s29 + $0x180] sm:$0xf]  ;;  %v231_v25 = vld [vmem:[%s8958_s29 + $0x190] sm:$0xf]  ;;  %228 = vst [vmem:[%s8962_s30 + $0x5c] sm:$0xf] %v227_v23 }
  0x25   : > { %230 = vst [vmem:[%s8962_s30 + $0x60] sm:$0xf] %v229_v24  ;;  %232 = vst [vmem:[%s8962_s30 + $0x64] sm:$0xf] %v231_v25  ;;  %v233_v26 = vld [vmem:[%s8958_s29 + $0x1a0] sm:$0xf] }
  0x26   : > { %v235_v27 = vld [vmem:[%s8958_s29 + $0x1b0] sm:$0xf]  ;;  %v237_v28 = vld [vmem:[%s8958_s29 + $0x1c0] sm:$0xf]  ;;  %234 = vst [vmem:[%s8962_s30 + $0x68] sm:$0xf] %v233_v26 }
  0x27   : > { %236 = vst [vmem:[%s8962_s30 + $0x6c] sm:$0xf] %v235_v27  ;;  %238 = vst [vmem:[%s8962_s30 + $0x70] sm:$0xf] %v237_v28  ;;  %v239_v29 = vld [vmem:[%s8958_s29 + $0x1d0] sm:$0xf] }
  0x28   : > { %v241_v30 = vld [vmem:[%s8958_s29 + $0x1e0] sm:$0xf]  ;;  %v243_v31 = vld [vmem:[%s8958_s29 + $0x1f0] sm:$0xf]  ;;  %240 = vst [vmem:[%s8962_s30 + $0x74] sm:$0xf] %v239_v29 }
  0x29   : > { %242 = vst [vmem:[%s8962_s30 + $0x78] sm:$0xf] %v241_v30  ;;  %244 = vst [vmem:[%s8962_s30 + $0x7c] sm:$0xf] %v243_v31  ;;  %v245_v32 = vld [vmem:[%s8958_s29 + $0x200] sm:$0xf] }
  0x2a   : > { %v247_v33 = vld [vmem:[%s8958_s29 + $0x210] sm:$0xf]  ;;  %v249_v34 = vld [vmem:[%s8958_s29 + $0x220] sm:$0xf]  ;;  %246 = vst [vmem:[%s8962_s30 + $0x80] sm:$0xf] %v245_v32 }
  0x2b   : > { %248 = vst [vmem:[%s8962_s30 + $0x84] sm:$0xf] %v247_v33  ;;  %250 = vst [vmem:[%s8962_s30 + $0x88] sm:$0xf] %v249_v34  ;;  %v251_v35 = vld [vmem:[%s8958_s29 + $0x230] sm:$0xf] }
  0x2c   : > { %v253_v36 = vld [vmem:[%s8958_s29 + $0x240] sm:$0xf]  ;;  %v255_v37 = vld [vmem:[%s8958_s29 + $0x250] sm:$0xf]  ;;  %252 = vst [vmem:[%s8962_s30 + $0x8c] sm:$0xf] %v251_v35 }
  0x2d   : > { %254 = vst [vmem:[%s8962_s30 + $0x90] sm:$0xf] %v253_v36  ;;  %256 = vst [vmem:[%s8962_s30 + $0x94] sm:$0xf] %v255_v37  ;;  %v257_v38 = vld [vmem:[%s8958_s29 + $0x260] sm:$0xf] }
  0x2e   : > { %v259_v39 = vld [vmem:[%s8958_s29 + $0x270] sm:$0xf]  ;;  %v261_v40 = vld [vmem:[%s8958_s29 + $0x280] sm:$0xf]  ;;  %258 = vst [vmem:[%s8962_s30 + $0x98] sm:$0xf] %v257_v38 }
  0x2f   : > { %260 = vst [vmem:[%s8962_s30 + $0x9c] sm:$0xf] %v259_v39  ;;  %262 = vst [vmem:[%s8962_s30 + $0xa0] sm:$0xf] %v261_v40  ;;  %v263_v41 = vld [vmem:[%s8958_s29 + $0x290] sm:$0xf] }
  0x30   : > { %v265_v42 = vld [vmem:[%s8958_s29 + $0x2a0] sm:$0xf]  ;;  %v267_v43 = vld [vmem:[%s8958_s29 + $0x2b0] sm:$0xf]  ;;  %264 = vst [vmem:[%s8962_s30 + $0xa4] sm:$0xf] %v263_v41 }
  0x31   : > { %266 = vst [vmem:[%s8962_s30 + $0xa8] sm:$0xf] %v265_v42  ;;  %268 = vst [vmem:[%s8962_s30 + $0xac] sm:$0xf] %v267_v43  ;;  %v269_v44 = vld [vmem:[%s8958_s29 + $0x2c0] sm:$0xf] }
  0x32   : > { %v271_v45 = vld [vmem:[%s8958_s29 + $0x2d0] sm:$0xf]  ;;  %v273_v46 = vld [vmem:[%s8958_s29 + $0x2e0] sm:$0xf]  ;;  %270 = vst [vmem:[%s8962_s30 + $0xb0] sm:$0xf] %v269_v44 }
  0x33   : > { %272 = vst [vmem:[%s8962_s30 + $0xb4] sm:$0xf] %v271_v45  ;;  %274 = vst [vmem:[%s8962_s30 + $0xb8] sm:$0xf] %v273_v46  ;;  %v275_v47 = vld [vmem:[%s8958_s29 + $0x2f0] sm:$0xf] }
  0x34   : > { %v277_v48 = vld [vmem:[%s8958_s29 + $0x300] sm:$0xf]  ;;  %v279_v49 = vld [vmem:[%s8958_s29 + $0x310] sm:$0xf]  ;;  %276 = vst [vmem:[%s8962_s30 + $0xbc] sm:$0xf] %v275_v47 }
  0x35   : > { %278 = vst [vmem:[%s8962_s30 + $0xc0] sm:$0xf] %v277_v48  ;;  %280 = vst [vmem:[%s8962_s30 + $0xc4] sm:$0xf] %v279_v49  ;;  %v281_v50 = vld [vmem:[%s8958_s29 + $0x320] sm:$0xf] }
  0x36   : > { %v283_v51 = vld [vmem:[%s8958_s29 + $0x330] sm:$0xf]  ;;  %v285_v52 = vld [vmem:[%s8958_s29 + $0x340] sm:$0xf]  ;;  %282 = vst [vmem:[%s8962_s30 + $0xc8] sm:$0xf] %v281_v50 }
  0x37   : > { %284 = vst [vmem:[%s8962_s30 + $0xcc] sm:$0xf] %v283_v51  ;;  %286 = vst [vmem:[%s8962_s30 + $0xd0] sm:$0xf] %v285_v52  ;;  %v287_v53 = vld [vmem:[%s8958_s29 + $0x350] sm:$0xf] }
  0x38   : > { %v289_v54 = vld [vmem:[%s8958_s29 + $0x360] sm:$0xf]  ;;  %v291_v55 = vld [vmem:[%s8958_s29 + $0x370] sm:$0xf]  ;;  %288 = vst [vmem:[%s8962_s30 + $0xd4] sm:$0xf] %v287_v53 }
  0x39   : > { %290 = vst [vmem:[%s8962_s30 + $0xd8] sm:$0xf] %v289_v54  ;;  %292 = vst [vmem:[%s8962_s30 + $0xdc] sm:$0xf] %v291_v55  ;;  %v293_v56 = vld [vmem:[%s8958_s29 + $0x380] sm:$0xf] }
  0x3a   : > { %v295_v57 = vld [vmem:[%s8958_s29 + $0x390] sm:$0xf]  ;;  %v297_v58 = vld [vmem:[%s8958_s29 + $0x3a0] sm:$0xf]  ;;  %294 = vst [vmem:[%s8962_s30 + $0xe0] sm:$0xf] %v293_v56 }
  0x3b   : > { %296 = vst [vmem:[%s8962_s30 + $0xe4] sm:$0xf] %v295_v57  ;;  %298 = vst [vmem:[%s8962_s30 + $0xe8] sm:$0xf] %v297_v58  ;;  %v299_v59 = vld [vmem:[%s8958_s29 + $0x3b0] sm:$0xf] }
  0x3c   : > { %v301_v60 = vld [vmem:[%s8958_s29 + $0x3c0] sm:$0xf]  ;;  %v303_v61 = vld [vmem:[%s8958_s29 + $0x3d0] sm:$0xf]  ;;  %300 = vst [vmem:[%s8962_s30 + $0xec] sm:$0xf] %v299_v59 }
  0x3d   : > { %302 = vst [vmem:[%s8962_s30 + $0xf0] sm:$0xf] %v301_v60  ;;  %304 = vst [vmem:[%s8962_s30 + $0xf4] sm:$0xf] %v303_v61  ;;  %v305_v62 = vld [vmem:[%s8958_s29 + $0x3e0] sm:$0xf] }
  0x3e   : > { %v307_v63 = vld [vmem:[%s8958_s29 + $0x3f0] sm:$0xf]  ;;  %v309_v0 = vld [vmem:[%s8958_s29 + $0x400] sm:$0xf]  ;;  %306 = vst [vmem:[%s8962_s30 + $0xf8] sm:$0xf] %v305_v62 }
  0x3f   : > { %308 = vst [vmem:[%s8962_s30 + $0xfc] sm:$0xf] %v307_v63  ;;  %310 = vst [vmem:[%s8962_s30 + $0x100] sm:$0xf] %v309_v0  ;;  %v311_v1 = vld [vmem:[%s8958_s29 + $0x410] sm:$0xf] }
  0x40   : > { %v313_v2 = vld [vmem:[%s8958_s29 + $0x420] sm:$0xf]  ;;  %v315_v3 = vld [vmem:[%s8958_s29 + $0x430] sm:$0xf]  ;;  %312 = vst [vmem:[%s8962_s30 + $0x104] sm:$0xf] %v311_v1 }
  0x41   : > { %314 = vst [vmem:[%s8962_s30 + $0x108] sm:$0xf] %v313_v2  ;;  %316 = vst [vmem:[%s8962_s30 + $0x10c] sm:$0xf] %v315_v3  ;;  %v317_v4 = vld [vmem:[%s8958_s29 + $0x440] sm:$0xf] }
  0x42   : > { %v319_v5 = vld [vmem:[%s8958_s29 + $0x450] sm:$0xf]  ;;  %v321_v6 = vld [vmem:[%s8958_s29 + $0x460] sm:$0xf]  ;;  %318 = vst [vmem:[%s8962_s30 + $0x110] sm:$0xf] %v317_v4 }
  0x43   : > { %320 = vst [vmem:[%s8962_s30 + $0x114] sm:$0xf] %v319_v5  ;;  %322 = vst [vmem:[%s8962_s30 + $0x118] sm:$0xf] %v321_v6  ;;  %v323_v7 = vld [vmem:[%s8958_s29 + $0x470] sm:$0xf] }
  0x44   : > { %v325_v8 = vld [vmem:[%s8958_s29 + $0x480] sm:$0xf]  ;;  %v327_v9 = vld [vmem:[%s8958_s29 + $0x490] sm:$0xf]  ;;  %324 = vst [vmem:[%s8962_s30 + $0x11c] sm:$0xf] %v323_v7 }
  0x45   : > { %326 = vst [vmem:[%s8962_s30 + $0x120] sm:$0xf] %v325_v8  ;;  %328 = vst [vmem:[%s8962_s30 + $0x124] sm:$0xf] %v327_v9  ;;  %v329_v10 = vld [vmem:[%s8958_s29 + $0x4a0] sm:$0xf] }
  0x46   : > { %v331_v11 = vld [vmem:[%s8958_s29 + $0x4b0] sm:$0xf]  ;;  %v333_v12 = vld [vmem:[%s8958_s29 + $0x4c0] sm:$0xf]  ;;  %330 = vst [vmem:[%s8962_s30 + $0x128] sm:$0xf] %v329_v10 }
  0x47   : > { %332 = vst [vmem:[%s8962_s30 + $0x12c] sm:$0xf] %v331_v11  ;;  %334 = vst [vmem:[%s8962_s30 + $0x130] sm:$0xf] %v333_v12  ;;  %v335_v13 = vld [vmem:[%s8958_s29 + $0x4d0] sm:$0xf] }
  0x48   : > { %v337_v14 = vld [vmem:[%s8958_s29 + $0x4e0] sm:$0xf]  ;;  %v339_v15 = vld [vmem:[%s8958_s29 + $0x4f0] sm:$0xf]  ;;  %336 = vst [vmem:[%s8962_s30 + $0x134] sm:$0xf] %v335_v13 }
  0x49   : > { %338 = vst [vmem:[%s8962_s30 + $0x138] sm:$0xf] %v337_v14  ;;  %340 = vst [vmem:[%s8962_s30 + $0x13c] sm:$0xf] %v339_v15  ;;  %v341_v16 = vld [vmem:[%s8958_s29 + $0x500] sm:$0xf] }
  0x4a   : > { %v343_v17 = vld [vmem:[%s8958_s29 + $0x510] sm:$0xf]  ;;  %v345_v18 = vld [vmem:[%s8958_s29 + $0x520] sm:$0xf]  ;;  %342 = vst [vmem:[%s8962_s30 + $0x140] sm:$0xf] %v341_v16 }
  0x4b   : > { %344 = vst [vmem:[%s8962_s30 + $0x144] sm:$0xf] %v343_v17  ;;  %346 = vst [vmem:[%s8962_s30 + $0x148] sm:$0xf] %v345_v18  ;;  %v347_v19 = vld [vmem:[%s8958_s29 + $0x530] sm:$0xf] }
  0x4c   : > { %v349_v20 = vld [vmem:[%s8958_s29 + $0x540] sm:$0xf]  ;;  %v351_v21 = vld [vmem:[%s8958_s29 + $0x550] sm:$0xf]  ;;  %348 = vst [vmem:[%s8962_s30 + $0x14c] sm:$0xf] %v347_v19 }
  0x4d   : > { %350 = vst [vmem:[%s8962_s30 + $0x150] sm:$0xf] %v349_v20  ;;  %352 = vst [vmem:[%s8962_s30 + $0x154] sm:$0xf] %v351_v21  ;;  %v353_v22 = vld [vmem:[%s8958_s29 + $0x560] sm:$0xf] }
  0x4e   : > { %v355_v23 = vld [vmem:[%s8958_s29 + $0x570] sm:$0xf]  ;;  %v357_v24 = vld [vmem:[%s8958_s29 + $0x580] sm:$0xf]  ;;  %354 = vst [vmem:[%s8962_s30 + $0x158] sm:$0xf] %v353_v22 }
  0x4f   : > { %356 = vst [vmem:[%s8962_s30 + $0x15c] sm:$0xf] %v355_v23  ;;  %358 = vst [vmem:[%s8962_s30 + $0x160] sm:$0xf] %v357_v24  ;;  %v359_v25 = vld [vmem:[%s8958_s29 + $0x590] sm:$0xf] }
  0x50   : > { %v361_v26 = vld [vmem:[%s8958_s29 + $0x5a0] sm:$0xf]  ;;  %v363_v27 = vld [vmem:[%s8958_s29 + $0x5b0] sm:$0xf]  ;;  %360 = vst [vmem:[%s8962_s30 + $0x164] sm:$0xf] %v359_v25 }
  0x51   : > { %362 = vst [vmem:[%s8962_s30 + $0x168] sm:$0xf] %v361_v26  ;;  %364 = vst [vmem:[%s8962_s30 + $0x16c] sm:$0xf] %v363_v27  ;;  %v365_v28 = vld [vmem:[%s8958_s29 + $0x5c0] sm:$0xf] }
  0x52   : > { %v367_v29 = vld [vmem:[%s8958_s29 + $0x5d0] sm:$0xf]  ;;  %v369_v30 = vld [vmem:[%s8958_s29 + $0x5e0] sm:$0xf]  ;;  %366 = vst [vmem:[%s8962_s30 + $0x170] sm:$0xf] %v365_v28 }
  0x53   : > { %368 = vst [vmem:[%s8962_s30 + $0x174] sm:$0xf] %v367_v29  ;;  %370 = vst [vmem:[%s8962_s30 + $0x178] sm:$0xf] %v369_v30  ;;  %v371_v31 = vld [vmem:[%s8958_s29 + $0x5f0] sm:$0xf] }
  0x54   : > { %v373_v32 = vld [vmem:[%s8958_s29 + $0x600] sm:$0xf]  ;;  %v375_v33 = vld [vmem:[%s8958_s29 + $0x610] sm:$0xf]  ;;  %372 = vst [vmem:[%s8962_s30 + $0x17c] sm:$0xf] %v371_v31 }
  0x55   : > { %374 = vst [vmem:[%s8962_s30 + $0x180] sm:$0xf] %v373_v32  ;;  %376 = vst [vmem:[%s8962_s30 + $0x184] sm:$0xf] %v375_v33  ;;  %v377_v34 = vld [vmem:[%s8958_s29 + $0x620] sm:$0xf] }
  0x56   : > { %v379_v35 = vld [vmem:[%s8958_s29 + $0x630] sm:$0xf]  ;;  %v381_v36 = vld [vmem:[%s8958_s29 + $0x640] sm:$0xf]  ;;  %378 = vst [vmem:[%s8962_s30 + $0x188] sm:$0xf] %v377_v34 }
  0x57   : > { %380 = vst [vmem:[%s8962_s30 + $0x18c] sm:$0xf] %v379_v35  ;;  %382 = vst [vmem:[%s8962_s30 + $0x190] sm:$0xf] %v381_v36  ;;  %v383_v37 = vld [vmem:[%s8958_s29 + $0x650] sm:$0xf] }
  0x58   : > { %v385_v38 = vld [vmem:[%s8958_s29 + $0x660] sm:$0xf]  ;;  %v387_v39 = vld [vmem:[%s8958_s29 + $0x670] sm:$0xf]  ;;  %384 = vst [vmem:[%s8962_s30 + $0x194] sm:$0xf] %v383_v37 }
  0x59   : > { %386 = vst [vmem:[%s8962_s30 + $0x198] sm:$0xf] %v385_v38  ;;  %388 = vst [vmem:[%s8962_s30 + $0x19c] sm:$0xf] %v387_v39  ;;  %v389_v40 = vld [vmem:[%s8958_s29 + $0x680] sm:$0xf] }
  0x5a   : > { %v391_v41 = vld [vmem:[%s8958_s29 + $0x690] sm:$0xf]  ;;  %v393_v42 = vld [vmem:[%s8958_s29 + $0x6a0] sm:$0xf]  ;;  %390 = vst [vmem:[%s8962_s30 + $0x1a0] sm:$0xf] %v389_v40 }
  0x5b   : > { %392 = vst [vmem:[%s8962_s30 + $0x1a4] sm:$0xf] %v391_v41  ;;  %394 = vst [vmem:[%s8962_s30 + $0x1a8] sm:$0xf] %v393_v42  ;;  %v395_v43 = vld [vmem:[%s8958_s29 + $0x6b0] sm:$0xf] }
  0x5c   : > { %v397_v44 = vld [vmem:[%s8958_s29 + $0x6c0] sm:$0xf]  ;;  %v399_v45 = vld [vmem:[%s8958_s29 + $0x6d0] sm:$0xf]  ;;  %396 = vst [vmem:[%s8962_s30 + $0x1ac] sm:$0xf] %v395_v43 }
  0x5d   : > { %398 = vst [vmem:[%s8962_s30 + $0x1b0] sm:$0xf] %v397_v44  ;;  %400 = vst [vmem:[%s8962_s30 + $0x1b4] sm:$0xf] %v399_v45  ;;  %v401_v46 = vld [vmem:[%s8958_s29 + $0x6e0] sm:$0xf] }
  0x5e   : > { %v403_v47 = vld [vmem:[%s8958_s29 + $0x6f0] sm:$0xf]  ;;  %v405_v48 = vld [vmem:[%s8958_s29 + $0x700] sm:$0xf]  ;;  %402 = vst [vmem:[%s8962_s30 + $0x1b8] sm:$0xf] %v401_v46 }
  0x5f   : > { %404 = vst [vmem:[%s8962_s30 + $0x1bc] sm:$0xf] %v403_v47  ;;  %406 = vst [vmem:[%s8962_s30 + $0x1c0] sm:$0xf] %v405_v48  ;;  %v407_v49 = vld [vmem:[%s8958_s29 + $0x710] sm:$0xf] }
  0x60   : > { %v409_v50 = vld [vmem:[%s8958_s29 + $0x720] sm:$0xf]  ;;  %v411_v51 = vld [vmem:[%s8958_s29 + $0x730] sm:$0xf]  ;;  %408 = vst [vmem:[%s8962_s30 + $0x1c4] sm:$0xf] %v407_v49 }
  0x61   : > { %410 = vst [vmem:[%s8962_s30 + $0x1c8] sm:$0xf] %v409_v50  ;;  %412 = vst [vmem:[%s8962_s30 + $0x1cc] sm:$0xf] %v411_v51  ;;  %v413_v52 = vld [vmem:[%s8958_s29 + $0x740] sm:$0xf] }
  0x62   : > { %v415_v53 = vld [vmem:[%s8958_s29 + $0x750] sm:$0xf]  ;;  %v417_v54 = vld [vmem:[%s8958_s29 + $0x760] sm:$0xf]  ;;  %414 = vst [vmem:[%s8962_s30 + $0x1d0] sm:$0xf] %v413_v52 }
  0x63   : > { %416 = vst [vmem:[%s8962_s30 + $0x1d4] sm:$0xf] %v415_v53  ;;  %418 = vst [vmem:[%s8962_s30 + $0x1d8] sm:$0xf] %v417_v54  ;;  %v419_v55 = vld [vmem:[%s8958_s29 + $0x770] sm:$0xf] }
  0x64   : > { %v421_v56 = vld [vmem:[%s8958_s29 + $0x780] sm:$0xf]  ;;  %v423_v57 = vld [vmem:[%s8958_s29 + $0x790] sm:$0xf]  ;;  %420 = vst [vmem:[%s8962_s30 + $0x1dc] sm:$0xf] %v419_v55 }
  0x65   : > { %422 = vst [vmem:[%s8962_s30 + $0x1e0] sm:$0xf] %v421_v56  ;;  %424 = vst [vmem:[%s8962_s30 + $0x1e4] sm:$0xf] %v423_v57  ;;  %v425_v58 = vld [vmem:[%s8958_s29 + $0x7a0] sm:$0xf] }
  0x66   : > { %v427_v59 = vld [vmem:[%s8958_s29 + $0x7b0] sm:$0xf]  ;;  %v429_v60 = vld [vmem:[%s8958_s29 + $0x7c0] sm:$0xf]  ;;  %426 = vst [vmem:[%s8962_s30 + $0x1e8] sm:$0xf] %v425_v58 }
  0x67   : > { %428 = vst [vmem:[%s8962_s30 + $0x1ec] sm:$0xf] %v427_v59  ;;  %430 = vst [vmem:[%s8962_s30 + $0x1f0] sm:$0xf] %v429_v60  ;;  %v431_v61 = vld [vmem:[%s8958_s29 + $0x7d0] sm:$0xf] }
  0x68   : > { %v433_v62 = vld [vmem:[%s8958_s29 + $0x7e0] sm:$0xf]  ;;  %v435_v63 = vld [vmem:[%s8958_s29 + $0x7f0] sm:$0xf]  ;;  %432 = vst [vmem:[%s8962_s30 + $0x1f4] sm:$0xf] %v431_v61 }
  0x69   : > { %434 = vst [vmem:[%s8962_s30 + $0x1f8] sm:$0xf] %v433_v62  ;;  %436 = vst [vmem:[%s8962_s30 + $0x1fc] sm:$0xf] %v435_v63  ;;  %v437_v0 = vld [vmem:[%s8958_s29 + $0x800] sm:$0xf] }
  0x6a   : > { %v439_v1 = vld [vmem:[%s8958_s29 + $0x810] sm:$0xf]  ;;  %v441_v2 = vld [vmem:[%s8958_s29 + $0x820] sm:$0xf]  ;;  %438 = vst [vmem:[%s8962_s30 + $0x200] sm:$0xf] %v437_v0 }
  0x6b   : > { %440 = vst [vmem:[%s8962_s30 + $0x204] sm:$0xf] %v439_v1  ;;  %442 = vst [vmem:[%s8962_s30 + $0x208] sm:$0xf] %v441_v2  ;;  %v443_v3 = vld [vmem:[%s8958_s29 + $0x830] sm:$0xf] }
  0x6c   : > { %v445_v4 = vld [vmem:[%s8958_s29 + $0x840] sm:$0xf]  ;;  %v447_v5 = vld [vmem:[%s8958_s29 + $0x850] sm:$0xf]  ;;  %444 = vst [vmem:[%s8962_s30 + $0x20c] sm:$0xf] %v443_v3 }
  0x6d   : > { %446 = vst [vmem:[%s8962_s30 + $0x210] sm:$0xf] %v445_v4  ;;  %448 = vst [vmem:[%s8962_s30 + $0x214] sm:$0xf] %v447_v5  ;;  %v449_v6 = vld [vmem:[%s8958_s29 + $0x860] sm:$0xf] }
  0x6e   : > { %v451_v7 = vld [vmem:[%s8958_s29 + $0x870] sm:$0xf]  ;;  %v453_v8 = vld [vmem:[%s8958_s29 + $0x880] sm:$0xf]  ;;  %450 = vst [vmem:[%s8962_s30 + $0x218] sm:$0xf] %v449_v6 }
  0x6f   : > { %452 = vst [vmem:[%s8962_s30 + $0x21c] sm:$0xf] %v451_v7  ;;  %454 = vst [vmem:[%s8962_s30 + $0x220] sm:$0xf] %v453_v8  ;;  %v455_v9 = vld [vmem:[%s8958_s29 + $0x890] sm:$0xf] }
  0x70   : > { %v457_v10 = vld [vmem:[%s8958_s29 + $0x8a0] sm:$0xf]  ;;  %v459_v11 = vld [vmem:[%s8958_s29 + $0x8b0] sm:$0xf]  ;;  %456 = vst [vmem:[%s8962_s30 + $0x224] sm:$0xf] %v455_v9 }
  0x71   : > { %458 = vst [vmem:[%s8962_s30 + $0x228] sm:$0xf] %v457_v10  ;;  %460 = vst [vmem:[%s8962_s30 + $0x22c] sm:$0xf] %v459_v11  ;;  %v461_v12 = vld [vmem:[%s8958_s29 + $0x8c0] sm:$0xf] }
  0x72   : > { %v463_v13 = vld [vmem:[%s8958_s29 + $0x8d0] sm:$0xf]  ;;  %v465_v14 = vld [vmem:[%s8958_s29 + $0x8e0] sm:$0xf]  ;;  %462 = vst [vmem:[%s8962_s30 + $0x230] sm:$0xf] %v461_v12 }
  0x73   : > { %464 = vst [vmem:[%s8962_s30 + $0x234] sm:$0xf] %v463_v13  ;;  %466 = vst [vmem:[%s8962_s30 + $0x238] sm:$0xf] %v465_v14  ;;  %v467_v15 = vld [vmem:[%s8958_s29 + $0x8f0] sm:$0xf] }
  0x74   : > { %v469_v16 = vld [vmem:[%s8958_s29 + $0x900] sm:$0xf]  ;;  %v471_v17 = vld [vmem:[%s8958_s29 + $0x910] sm:$0xf]  ;;  %468 = vst [vmem:[%s8962_s30 + $0x23c] sm:$0xf] %v467_v15 }
  0x75   : > { %470 = vst [vmem:[%s8962_s30 + $0x240] sm:$0xf] %v469_v16  ;;  %472 = vst [vmem:[%s8962_s30 + $0x244] sm:$0xf] %v471_v17  ;;  %v473_v18 = vld [vmem:[%s8958_s29 + $0x920] sm:$0xf] }
  0x76   : > { %v475_v19 = vld [vmem:[%s8958_s29 + $0x930] sm:$0xf]  ;;  %v477_v20 = vld [vmem:[%s8958_s29 + $0x940] sm:$0xf]  ;;  %474 = vst [vmem:[%s8962_s30 + $0x248] sm:$0xf] %v473_v18 }
  0x77   : > { %476 = vst [vmem:[%s8962_s30 + $0x24c] sm:$0xf] %v475_v19  ;;  %478 = vst [vmem:[%s8962_s30 + $0x250] sm:$0xf] %v477_v20  ;;  %v479_v21 = vld [vmem:[%s8958_s29 + $0x950] sm:$0xf] }
  0x78   : > { %v481_v22 = vld [vmem:[%s8958_s29 + $0x960] sm:$0xf]  ;;  %v483_v23 = vld [vmem:[%s8958_s29 + $0x970] sm:$0xf]  ;;  %480 = vst [vmem:[%s8962_s30 + $0x254] sm:$0xf] %v479_v21 }
  0x79   : > { %482 = vst [vmem:[%s8962_s30 + $0x258] sm:$0xf] %v481_v22  ;;  %484 = vst [vmem:[%s8962_s30 + $0x25c] sm:$0xf] %v483_v23  ;;  %v485_v24 = vld [vmem:[%s8958_s29 + $0x980] sm:$0xf] }
  0x7a   : > { %v487_v25 = vld [vmem:[%s8958_s29 + $0x990] sm:$0xf]  ;;  %v489_v26 = vld [vmem:[%s8958_s29 + $0x9a0] sm:$0xf]  ;;  %486 = vst [vmem:[%s8962_s30 + $0x260] sm:$0xf] %v485_v24 }
  0x7b   : > { %488 = vst [vmem:[%s8962_s30 + $0x264] sm:$0xf] %v487_v25  ;;  %490 = vst [vmem:[%s8962_s30 + $0x268] sm:$0xf] %v489_v26  ;;  %v491_v27 = vld [vmem:[%s8958_s29 + $0x9b0] sm:$0xf] }
  0x7c   : > { %v493_v28 = vld [vmem:[%s8958_s29 + $0x9c0] sm:$0xf]  ;;  %v495_v29 = vld [vmem:[%s8958_s29 + $0x9d0] sm:$0xf]  ;;  %492 = vst [vmem:[%s8962_s30 + $0x26c] sm:$0xf] %v491_v27 }
  0x7d   : > { %494 = vst [vmem:[%s8962_s30 + $0x270] sm:$0xf] %v493_v28  ;;  %496 = vst [vmem:[%s8962_s30 + $0x274] sm:$0xf] %v495_v29  ;;  %v497_v30 = vld [vmem:[%s8958_s29 + $0x9e0] sm:$0xf] }
  0x7e   : > { %v499_v31 = vld [vmem:[%s8958_s29 + $0x9f0] sm:$0xf]  ;;  %v501_v32 = vld [vmem:[%s8958_s29 + $0xa00] sm:$0xf]  ;;  %498 = vst [vmem:[%s8962_s30 + $0x278] sm:$0xf] %v497_v30 }
  0x7f   : > { %500 = vst [vmem:[%s8962_s30 + $0x27c] sm:$0xf] %v499_v31  ;;  %502 = vst [vmem:[%s8962_s30 + $0x280] sm:$0xf] %v501_v32  ;;  %v503_v33 = vld [vmem:[%s8958_s29 + $0xa10] sm:$0xf] }
  0x80   : > { %v505_v34 = vld [vmem:[%s8958_s29 + $0xa20] sm:$0xf]  ;;  %v507_v35 = vld [vmem:[%s8958_s29 + $0xa30] sm:$0xf]  ;;  %504 = vst [vmem:[%s8962_s30 + $0x284] sm:$0xf] %v503_v33 }
  0x81   : > { %506 = vst [vmem:[%s8962_s30 + $0x288] sm:$0xf] %v505_v34  ;;  %508 = vst [vmem:[%s8962_s30 + $0x28c] sm:$0xf] %v507_v35  ;;  %v509_v36 = vld [vmem:[%s8958_s29 + $0xa40] sm:$0xf] }
  0x82   : > { %v511_v37 = vld [vmem:[%s8958_s29 + $0xa50] sm:$0xf]  ;;  %v513_v38 = vld [vmem:[%s8958_s29 + $0xa60] sm:$0xf]  ;;  %510 = vst [vmem:[%s8962_s30 + $0x290] sm:$0xf] %v509_v36 }
  0x83   : > { %512 = vst [vmem:[%s8962_s30 + $0x294] sm:$0xf] %v511_v37  ;;  %514 = vst [vmem:[%s8962_s30 + $0x298] sm:$0xf] %v513_v38  ;;  %v515_v39 = vld [vmem:[%s8958_s29 + $0xa70] sm:$0xf] }
  0x84   : > { %v517_v40 = vld [vmem:[%s8958_s29 + $0xa80] sm:$0xf]  ;;  %v519_v41 = vld [vmem:[%s8958_s29 + $0xa90] sm:$0xf]  ;;  %516 = vst [vmem:[%s8962_s30 + $0x29c] sm:$0xf] %v515_v39 }
  0x85   : > { %518 = vst [vmem:[%s8962_s30 + $0x2a0] sm:$0xf] %v517_v40  ;;  %520 = vst [vmem:[%s8962_s30 + $0x2a4] sm:$0xf] %v519_v41  ;;  %v521_v42 = vld [vmem:[%s8958_s29 + $0xaa0] sm:$0xf] }
  0x86   : > { %v523_v43 = vld [vmem:[%s8958_s29 + $0xab0] sm:$0xf]  ;;  %v525_v44 = vld [vmem:[%s8958_s29 + $0xac0] sm:$0xf]  ;;  %522 = vst [vmem:[%s8962_s30 + $0x2a8] sm:$0xf] %v521_v42 }
  0x87   : > { %524 = vst [vmem:[%s8962_s30 + $0x2ac] sm:$0xf] %v523_v43  ;;  %526 = vst [vmem:[%s8962_s30 + $0x2b0] sm:$0xf] %v525_v44  ;;  %v527_v45 = vld [vmem:[%s8958_s29 + $0xad0] sm:$0xf] }
  0x88   : > { %v529_v46 = vld [vmem:[%s8958_s29 + $0xae0] sm:$0xf]  ;;  %v531_v47 = vld [vmem:[%s8958_s29 + $0xaf0] sm:$0xf]  ;;  %528 = vst [vmem:[%s8962_s30 + $0x2b4] sm:$0xf] %v527_v45 }
  0x89   : > { %530 = vst [vmem:[%s8962_s30 + $0x2b8] sm:$0xf] %v529_v46  ;;  %532 = vst [vmem:[%s8962_s30 + $0x2bc] sm:$0xf] %v531_v47  ;;  %v533_v48 = vld [vmem:[%s8958_s29 + $0xb00] sm:$0xf] }
  0x8a   : > { %v535_v49 = vld [vmem:[%s8958_s29 + $0xb10] sm:$0xf]  ;;  %v537_v50 = vld [vmem:[%s8958_s29 + $0xb20] sm:$0xf]  ;;  %534 = vst [vmem:[%s8962_s30 + $0x2c0] sm:$0xf] %v533_v48 }
  0x8b   : > { %536 = vst [vmem:[%s8962_s30 + $0x2c4] sm:$0xf] %v535_v49  ;;  %538 = vst [vmem:[%s8962_s30 + $0x2c8] sm:$0xf] %v537_v50  ;;  %v539_v51 = vld [vmem:[%s8958_s29 + $0xb30] sm:$0xf] }
  0x8c   : > { %v541_v52 = vld [vmem:[%s8958_s29 + $0xb40] sm:$0xf]  ;;  %v543_v53 = vld [vmem:[%s8958_s29 + $0xb50] sm:$0xf]  ;;  %540 = vst [vmem:[%s8962_s30 + $0x2cc] sm:$0xf] %v539_v51 }
  0x8d   : > { %542 = vst [vmem:[%s8962_s30 + $0x2d0] sm:$0xf] %v541_v52  ;;  %544 = vst [vmem:[%s8962_s30 + $0x2d4] sm:$0xf] %v543_v53  ;;  %v545_v54 = vld [vmem:[%s8958_s29 + $0xb60] sm:$0xf] }
  0x8e   : > { %v547_v55 = vld [vmem:[%s8958_s29 + $0xb70] sm:$0xf]  ;;  %v549_v56 = vld [vmem:[%s8958_s29 + $0xb80] sm:$0xf]  ;;  %546 = vst [vmem:[%s8962_s30 + $0x2d8] sm:$0xf] %v545_v54 }
  0x8f   : > { %548 = vst [vmem:[%s8962_s30 + $0x2dc] sm:$0xf] %v547_v55  ;;  %550 = vst [vmem:[%s8962_s30 + $0x2e0] sm:$0xf] %v549_v56  ;;  %v551_v57 = vld [vmem:[%s8958_s29 + $0xb90] sm:$0xf] }
  0x90   : > { %v553_v58 = vld [vmem:[%s8958_s29 + $0xba0] sm:$0xf]  ;;  %v555_v59 = vld [vmem:[%s8958_s29 + $0xbb0] sm:$0xf]  ;;  %552 = vst [vmem:[%s8962_s30 + $0x2e4] sm:$0xf] %v551_v57 }
  0x91   : > { %554 = vst [vmem:[%s8962_s30 + $0x2e8] sm:$0xf] %v553_v58  ;;  %556 = vst [vmem:[%s8962_s30 + $0x2ec] sm:$0xf] %v555_v59  ;;  %v557_v60 = vld [vmem:[%s8958_s29 + $0xbc0] sm:$0xf] }
  0x92   : > { %v559_v61 = vld [vmem:[%s8958_s29 + $0xbd0] sm:$0xf]  ;;  %v561_v62 = vld [vmem:[%s8958_s29 + $0xbe0] sm:$0xf]  ;;  %558 = vst [vmem:[%s8962_s30 + $0x2f0] sm:$0xf] %v557_v60 }
  0x93   : > { %560 = vst [vmem:[%s8962_s30 + $0x2f4] sm:$0xf] %v559_v61  ;;  %562 = vst [vmem:[%s8962_s30 + $0x2f8] sm:$0xf] %v561_v62  ;;  %v563_v63 = vld [vmem:[%s8958_s29 + $0xbf0] sm:$0xf] }
  0x94   : > { %v565_v0 = vld [vmem:[%s8958_s29 + $0xc00] sm:$0xf]  ;;  %v567_v1 = vld [vmem:[%s8958_s29 + $0xc10] sm:$0xf]  ;;  %564 = vst [vmem:[%s8962_s30 + $0x2fc] sm:$0xf] %v563_v63 }
  0x95   : > { %566 = vst [vmem:[%s8962_s30 + $0x300] sm:$0xf] %v565_v0  ;;  %568 = vst [vmem:[%s8962_s30 + $0x304] sm:$0xf] %v567_v1  ;;  %v569_v2 = vld [vmem:[%s8958_s29 + $0xc20] sm:$0xf] }
  0x96   : > { %v571_v3 = vld [vmem:[%s8958_s29 + $0xc30] sm:$0xf]  ;;  %v573_v4 = vld [vmem:[%s8958_s29 + $0xc40] sm:$0xf]  ;;  %570 = vst [vmem:[%s8962_s30 + $0x308] sm:$0xf] %v569_v2 }
  0x97   : > { %572 = vst [vmem:[%s8962_s30 + $0x30c] sm:$0xf] %v571_v3  ;;  %574 = vst [vmem:[%s8962_s30 + $0x310] sm:$0xf] %v573_v4  ;;  %v575_v5 = vld [vmem:[%s8958_s29 + $0xc50] sm:$0xf] }
  0x98   : > { %v577_v6 = vld [vmem:[%s8958_s29 + $0xc60] sm:$0xf]  ;;  %v579_v7 = vld [vmem:[%s8958_s29 + $0xc70] sm:$0xf]  ;;  %576 = vst [vmem:[%s8962_s30 + $0x314] sm:$0xf] %v575_v5 }
  0x99   : > { %578 = vst [vmem:[%s8962_s30 + $0x318] sm:$0xf] %v577_v6  ;;  %580 = vst [vmem:[%s8962_s30 + $0x31c] sm:$0xf] %v579_v7  ;;  %v581_v8 = vld [vmem:[%s8958_s29 + $0xc80] sm:$0xf] }
  0x9a   : > { %v583_v9 = vld [vmem:[%s8958_s29 + $0xc90] sm:$0xf]  ;;  %v585_v10 = vld [vmem:[%s8958_s29 + $0xca0] sm:$0xf]  ;;  %582 = vst [vmem:[%s8962_s30 + $0x320] sm:$0xf] %v581_v8 }
  0x9b   : > { %584 = vst [vmem:[%s8962_s30 + $0x324] sm:$0xf] %v583_v9  ;;  %586 = vst [vmem:[%s8962_s30 + $0x328] sm:$0xf] %v585_v10  ;;  %v587_v11 = vld [vmem:[%s8958_s29 + $0xcb0] sm:$0xf] }
  0x9c   : > { %v589_v12 = vld [vmem:[%s8958_s29 + $0xcc0] sm:$0xf]  ;;  %v591_v13 = vld [vmem:[%s8958_s29 + $0xcd0] sm:$0xf]  ;;  %588 = vst [vmem:[%s8962_s30 + $0x32c] sm:$0xf] %v587_v11 }
  0x9d   : > { %590 = vst [vmem:[%s8962_s30 + $0x330] sm:$0xf] %v589_v12  ;;  %592 = vst [vmem:[%s8962_s30 + $0x334] sm:$0xf] %v591_v13  ;;  %v593_v14 = vld [vmem:[%s8958_s29 + $0xce0] sm:$0xf] }
  0x9e   : > { %v595_v15 = vld [vmem:[%s8958_s29 + $0xcf0] sm:$0xf]  ;;  %v597_v16 = vld [vmem:[%s8958_s29 + $0xd00] sm:$0xf]  ;;  %594 = vst [vmem:[%s8962_s30 + $0x338] sm:$0xf] %v593_v14 }
  0x9f   : > { %596 = vst [vmem:[%s8962_s30 + $0x33c] sm:$0xf] %v595_v15  ;;  %598 = vst [vmem:[%s8962_s30 + $0x340] sm:$0xf] %v597_v16  ;;  %v599_v17 = vld [vmem:[%s8958_s29 + $0xd10] sm:$0xf] }
  0xa0   : > { %v601_v18 = vld [vmem:[%s8958_s29 + $0xd20] sm:$0xf]  ;;  %v603_v19 = vld [vmem:[%s8958_s29 + $0xd30] sm:$0xf]  ;;  %600 = vst [vmem:[%s8962_s30 + $0x344] sm:$0xf] %v599_v17 }
  0xa1   : > { %602 = vst [vmem:[%s8962_s30 + $0x348] sm:$0xf] %v601_v18  ;;  %604 = vst [vmem:[%s8962_s30 + $0x34c] sm:$0xf] %v603_v19  ;;  %v605_v20 = vld [vmem:[%s8958_s29 + $0xd40] sm:$0xf] }
  0xa2   : > { %v607_v21 = vld [vmem:[%s8958_s29 + $0xd50] sm:$0xf]  ;;  %v609_v22 = vld [vmem:[%s8958_s29 + $0xd60] sm:$0xf]  ;;  %606 = vst [vmem:[%s8962_s30 + $0x350] sm:$0xf] %v605_v20 }
  0xa3   : > { %608 = vst [vmem:[%s8962_s30 + $0x354] sm:$0xf] %v607_v21  ;;  %610 = vst [vmem:[%s8962_s30 + $0x358] sm:$0xf] %v609_v22  ;;  %v611_v23 = vld [vmem:[%s8958_s29 + $0xd70] sm:$0xf] }
  0xa4   : > { %v613_v24 = vld [vmem:[%s8958_s29 + $0xd80] sm:$0xf]  ;;  %v615_v25 = vld [vmem:[%s8958_s29 + $0xd90] sm:$0xf]  ;;  %612 = vst [vmem:[%s8962_s30 + $0x35c] sm:$0xf] %v611_v23 }
  0xa5   : > { %614 = vst [vmem:[%s8962_s30 + $0x360] sm:$0xf] %v613_v24  ;;  %616 = vst [vmem:[%s8962_s30 + $0x364] sm:$0xf] %v615_v25  ;;  %v617_v26 = vld [vmem:[%s8958_s29 + $0xda0] sm:$0xf] }
  0xa6   : > { %v619_v27 = vld [vmem:[%s8958_s29 + $0xdb0] sm:$0xf]  ;;  %v621_v28 = vld [vmem:[%s8958_s29 + $0xdc0] sm:$0xf]  ;;  %618 = vst [vmem:[%s8962_s30 + $0x368] sm:$0xf] %v617_v26 }
  0xa7   : > { %620 = vst [vmem:[%s8962_s30 + $0x36c] sm:$0xf] %v619_v27  ;;  %622 = vst [vmem:[%s8962_s30 + $0x370] sm:$0xf] %v621_v28  ;;  %v623_v29 = vld [vmem:[%s8958_s29 + $0xdd0] sm:$0xf] }
  0xa8   : > { %v625_v30 = vld [vmem:[%s8958_s29 + $0xde0] sm:$0xf]  ;;  %v627_v31 = vld [vmem:[%s8958_s29 + $0xdf0] sm:$0xf]  ;;  %624 = vst [vmem:[%s8962_s30 + $0x374] sm:$0xf] %v623_v29 }
  0xa9   : > { %626 = vst [vmem:[%s8962_s30 + $0x378] sm:$0xf] %v625_v30  ;;  %628 = vst [vmem:[%s8962_s30 + $0x37c] sm:$0xf] %v627_v31  ;;  %v629_v32 = vld [vmem:[%s8958_s29 + $0xe00] sm:$0xf] }
  0xaa   : > { %v631_v33 = vld [vmem:[%s8958_s29 + $0xe10] sm:$0xf]  ;;  %v633_v34 = vld [vmem:[%s8958_s29 + $0xe20] sm:$0xf]  ;;  %630 = vst [vmem:[%s8962_s30 + $0x380] sm:$0xf] %v629_v32 }
  0xab   : > { %632 = vst [vmem:[%s8962_s30 + $0x384] sm:$0xf] %v631_v33  ;;  %634 = vst [vmem:[%s8962_s30 + $0x388] sm:$0xf] %v633_v34  ;;  %v635_v35 = vld [vmem:[%s8958_s29 + $0xe30] sm:$0xf] }
  0xac   : > { %v637_v36 = vld [vmem:[%s8958_s29 + $0xe40] sm:$0xf]  ;;  %v639_v37 = vld [vmem:[%s8958_s29 + $0xe50] sm:$0xf]  ;;  %636 = vst [vmem:[%s8962_s30 + $0x38c] sm:$0xf] %v635_v35 }
  0xad   : > { %638 = vst [vmem:[%s8962_s30 + $0x390] sm:$0xf] %v637_v36  ;;  %640 = vst [vmem:[%s8962_s30 + $0x394] sm:$0xf] %v639_v37  ;;  %v641_v38 = vld [vmem:[%s8958_s29 + $0xe60] sm:$0xf] }
  0xae   : > { %v643_v39 = vld [vmem:[%s8958_s29 + $0xe70] sm:$0xf]  ;;  %v645_v40 = vld [vmem:[%s8958_s29 + $0xe80] sm:$0xf]  ;;  %642 = vst [vmem:[%s8962_s30 + $0x398] sm:$0xf] %v641_v38 }
  0xaf   : > { %644 = vst [vmem:[%s8962_s30 + $0x39c] sm:$0xf] %v643_v39  ;;  %646 = vst [vmem:[%s8962_s30 + $0x3a0] sm:$0xf] %v645_v40  ;;  %v647_v41 = vld [vmem:[%s8958_s29 + $0xe90] sm:$0xf] }
  0xb0   : > { %v649_v42 = vld [vmem:[%s8958_s29 + $0xea0] sm:$0xf]  ;;  %v651_v43 = vld [vmem:[%s8958_s29 + $0xeb0] sm:$0xf]  ;;  %648 = vst [vmem:[%s8962_s30 + $0x3a4] sm:$0xf] %v647_v41 }
  0xb1   : > { %650 = vst [vmem:[%s8962_s30 + $0x3a8] sm:$0xf] %v649_v42  ;;  %652 = vst [vmem:[%s8962_s30 + $0x3ac] sm:$0xf] %v651_v43  ;;  %v653_v44 = vld [vmem:[%s8958_s29 + $0xec0] sm:$0xf] }
  0xb2   : > { %v655_v45 = vld [vmem:[%s8958_s29 + $0xed0] sm:$0xf]  ;;  %v657_v46 = vld [vmem:[%s8958_s29 + $0xee0] sm:$0xf]  ;;  %654 = vst [vmem:[%s8962_s30 + $0x3b0] sm:$0xf] %v653_v44 }
  0xb3   : > { %656 = vst [vmem:[%s8962_s30 + $0x3b4] sm:$0xf] %v655_v45  ;;  %658 = vst [vmem:[%s8962_s30 + $0x3b8] sm:$0xf] %v657_v46  ;;  %v659_v47 = vld [vmem:[%s8958_s29 + $0xef0] sm:$0xf] }
  0xb4   : > { %v661_v48 = vld [vmem:[%s8958_s29 + $0xf00] sm:$0xf]  ;;  %v663_v49 = vld [vmem:[%s8958_s29 + $0xf10] sm:$0xf]  ;;  %660 = vst [vmem:[%s8962_s30 + $0x3bc] sm:$0xf] %v659_v47 }
  0xb5   : > { %662 = vst [vmem:[%s8962_s30 + $0x3c0] sm:$0xf] %v661_v48  ;;  %664 = vst [vmem:[%s8962_s30 + $0x3c4] sm:$0xf] %v663_v49  ;;  %v665_v50 = vld [vmem:[%s8958_s29 + $0xf20] sm:$0xf] }
  0xb6   : > { %v667_v51 = vld [vmem:[%s8958_s29 + $0xf30] sm:$0xf]  ;;  %v669_v52 = vld [vmem:[%s8958_s29 + $0xf40] sm:$0xf]  ;;  %666 = vst [vmem:[%s8962_s30 + $0x3c8] sm:$0xf] %v665_v50 }
  0xb7   : > { %668 = vst [vmem:[%s8962_s30 + $0x3cc] sm:$0xf] %v667_v51  ;;  %670 = vst [vmem:[%s8962_s30 + $0x3d0] sm:$0xf] %v669_v52  ;;  %v671_v53 = vld [vmem:[%s8958_s29 + $0xf50] sm:$0xf] }
  0xb8   : > { %v673_v54 = vld [vmem:[%s8958_s29 + $0xf60] sm:$0xf]  ;;  %v675_v55 = vld [vmem:[%s8958_s29 + $0xf70] sm:$0xf]  ;;  %672 = vst [vmem:[%s8962_s30 + $0x3d4] sm:$0xf] %v671_v53 }
  0xb9   : > { %674 = vst [vmem:[%s8962_s30 + $0x3d8] sm:$0xf] %v673_v54  ;;  %676 = vst [vmem:[%s8962_s30 + $0x3dc] sm:$0xf] %v675_v55  ;;  %v677_v56 = vld [vmem:[%s8958_s29 + $0xf80] sm:$0xf] }
  0xba   : > { %v679_v57 = vld [vmem:[%s8958_s29 + $0xf90] sm:$0xf]  ;;  %v681_v58 = vld [vmem:[%s8958_s29 + $0xfa0] sm:$0xf]  ;;  %678 = vst [vmem:[%s8962_s30 + $0x3e0] sm:$0xf] %v677_v56 }
  0xbb   : > { %680 = vst [vmem:[%s8962_s30 + $0x3e4] sm:$0xf] %v679_v57  ;;  %682 = vst [vmem:[%s8962_s30 + $0x3e8] sm:$0xf] %v681_v58  ;;  %v683_v59 = vld [vmem:[%s8958_s29 + $0xfb0] sm:$0xf] }
  0xbc   : > { %v685_v60 = vld [vmem:[%s8958_s29 + $0xfc0] sm:$0xf]  ;;  %v687_v61 = vld [vmem:[%s8958_s29 + $0xfd0] sm:$0xf]  ;;  %684 = vst [vmem:[%s8962_s30 + $0x3ec] sm:$0xf] %v683_v59 }
  0xbd   : > { %686 = vst [vmem:[%s8962_s30 + $0x3f0] sm:$0xf] %v685_v60  ;;  %688 = vst [vmem:[%s8962_s30 + $0x3f4] sm:$0xf] %v687_v61  ;;  %v689_v62 = vld [vmem:[%s8958_s29 + $0xfe0] sm:$0xf] }
  0xbe   : > { %v691_v63 = vld [vmem:[%s8958_s29 + $0xff0] sm:$0xf]  ;;  %v693_v0 = vld [vmem:[%s8958_s29 + $0x1000] sm:$0xf]  ;;  %690 = vst [vmem:[%s8962_s30 + $0x3f8] sm:$0xf] %v689_v62 }
  0xbf   : > { %692 = vst [vmem:[%s8962_s30 + $0x3fc] sm:$0xf] %v691_v63  ;;  %694 = vst [vmem:[%s8962_s30 + $0x400] sm:$0xf] %v693_v0  ;;  %v695_v1 = vld [vmem:[%s8958_s29 + $0x1010] sm:$0xf] }
  0xc0   : > { %v697_v2 = vld [vmem:[%s8958_s29 + $0x1020] sm:$0xf]  ;;  %v699_v3 = vld [vmem:[%s8958_s29 + $0x1030] sm:$0xf]  ;;  %696 = vst [vmem:[%s8962_s30 + $0x404] sm:$0xf] %v695_v1 }
  0xc1   : > { %698 = vst [vmem:[%s8962_s30 + $0x408] sm:$0xf] %v697_v2  ;;  %700 = vst [vmem:[%s8962_s30 + $0x40c] sm:$0xf] %v699_v3  ;;  %v701_v4 = vld [vmem:[%s8958_s29 + $0x1040] sm:$0xf] }
  0xc2   : > { %v703_v5 = vld [vmem:[%s8958_s29 + $0x1050] sm:$0xf]  ;;  %v705_v6 = vld [vmem:[%s8958_s29 + $0x1060] sm:$0xf]  ;;  %702 = vst [vmem:[%s8962_s30 + $0x410] sm:$0xf] %v701_v4 }
  0xc3   : > { %704 = vst [vmem:[%s8962_s30 + $0x414] sm:$0xf] %v703_v5  ;;  %706 = vst [vmem:[%s8962_s30 + $0x418] sm:$0xf] %v705_v6  ;;  %v707_v7 = vld [vmem:[%s8958_s29 + $0x1070] sm:$0xf] }
  0xc4   : > { %v709_v8 = vld [vmem:[%s8958_s29 + $0x1080] sm:$0xf]  ;;  %v711_v9 = vld [vmem:[%s8958_s29 + $0x1090] sm:$0xf]  ;;  %708 = vst [vmem:[%s8962_s30 + $0x41c] sm:$0xf] %v707_v7 }
  0xc5   : > { %710 = vst [vmem:[%s8962_s30 + $0x420] sm:$0xf] %v709_v8  ;;  %712 = vst [vmem:[%s8962_s30 + $0x424] sm:$0xf] %v711_v9  ;;  %v713_v10 = vld [vmem:[%s8958_s29 + $0x10a0] sm:$0xf] }
  0xc6   : > { %v715_v11 = vld [vmem:[%s8958_s29 + $0x10b0] sm:$0xf]  ;;  %v717_v12 = vld [vmem:[%s8958_s29 + $0x10c0] sm:$0xf]  ;;  %714 = vst [vmem:[%s8962_s30 + $0x428] sm:$0xf] %v713_v10 }
  0xc7   : > { %716 = vst [vmem:[%s8962_s30 + $0x42c] sm:$0xf] %v715_v11  ;;  %718 = vst [vmem:[%s8962_s30 + $0x430] sm:$0xf] %v717_v12  ;;  %v719_v13 = vld [vmem:[%s8958_s29 + $0x10d0] sm:$0xf] }
  0xc8   : > { %v721_v14 = vld [vmem:[%s8958_s29 + $0x10e0] sm:$0xf]  ;;  %v723_v15 = vld [vmem:[%s8958_s29 + $0x10f0] sm:$0xf]  ;;  %720 = vst [vmem:[%s8962_s30 + $0x434] sm:$0xf] %v719_v13 }
  0xc9   : > { %722 = vst [vmem:[%s8962_s30 + $0x438] sm:$0xf] %v721_v14  ;;  %724 = vst [vmem:[%s8962_s30 + $0x43c] sm:$0xf] %v723_v15  ;;  %v725_v16 = vld [vmem:[%s8958_s29 + $0x1100] sm:$0xf] }
  0xca   : > { %v727_v17 = vld [vmem:[%s8958_s29 + $0x1110] sm:$0xf]  ;;  %v729_v18 = vld [vmem:[%s8958_s29 + $0x1120] sm:$0xf]  ;;  %726 = vst [vmem:[%s8962_s30 + $0x440] sm:$0xf] %v725_v16 }
  0xcb   : > { %728 = vst [vmem:[%s8962_s30 + $0x444] sm:$0xf] %v727_v17  ;;  %730 = vst [vmem:[%s8962_s30 + $0x448] sm:$0xf] %v729_v18  ;;  %v731_v19 = vld [vmem:[%s8958_s29 + $0x1130] sm:$0xf] }
  0xcc   : > { %v733_v20 = vld [vmem:[%s8958_s29 + $0x1140] sm:$0xf]  ;;  %v735_v21 = vld [vmem:[%s8958_s29 + $0x1150] sm:$0xf]  ;;  %732 = vst [vmem:[%s8962_s30 + $0x44c] sm:$0xf] %v731_v19 }
  0xcd   : > { %734 = vst [vmem:[%s8962_s30 + $0x450] sm:$0xf] %v733_v20  ;;  %736 = vst [vmem:[%s8962_s30 + $0x454] sm:$0xf] %v735_v21  ;;  %v737_v22 = vld [vmem:[%s8958_s29 + $0x1160] sm:$0xf] }
  0xce   : > { %v739_v23 = vld [vmem:[%s8958_s29 + $0x1170] sm:$0xf]  ;;  %v741_v24 = vld [vmem:[%s8958_s29 + $0x1180] sm:$0xf]  ;;  %738 = vst [vmem:[%s8962_s30 + $0x458] sm:$0xf] %v737_v22 }
  0xcf   : > { %740 = vst [vmem:[%s8962_s30 + $0x45c] sm:$0xf] %v739_v23  ;;  %742 = vst [vmem:[%s8962_s30 + $0x460] sm:$0xf] %v741_v24  ;;  %v743_v25 = vld [vmem:[%s8958_s29 + $0x1190] sm:$0xf] }
  0xd0   : > { %v745_v26 = vld [vmem:[%s8958_s29 + $0x11a0] sm:$0xf]  ;;  %v747_v27 = vld [vmem:[%s8958_s29 + $0x11b0] sm:$0xf]  ;;  %744 = vst [vmem:[%s8962_s30 + $0x464] sm:$0xf] %v743_v25 }
  0xd1   : > { %746 = vst [vmem:[%s8962_s30 + $0x468] sm:$0xf] %v745_v26  ;;  %748 = vst [vmem:[%s8962_s30 + $0x46c] sm:$0xf] %v747_v27  ;;  %v749_v28 = vld [vmem:[%s8958_s29 + $0x11c0] sm:$0xf] }
  0xd2   : > { %v751_v29 = vld [vmem:[%s8958_s29 + $0x11d0] sm:$0xf]  ;;  %v753_v30 = vld [vmem:[%s8958_s29 + $0x11e0] sm:$0xf]  ;;  %750 = vst [vmem:[%s8962_s30 + $0x470] sm:$0xf] %v749_v28 }
  0xd3   : > { %752 = vst [vmem:[%s8962_s30 + $0x474] sm:$0xf] %v751_v29  ;;  %754 = vst [vmem:[%s8962_s30 + $0x478] sm:$0xf] %v753_v30  ;;  %v755_v31 = vld [vmem:[%s8958_s29 + $0x11f0] sm:$0xf] }
  0xd4   : > { %v757_v32 = vld [vmem:[%s8958_s29 + $0x1200] sm:$0xf]  ;;  %v759_v33 = vld [vmem:[%s8958_s29 + $0x1210] sm:$0xf]  ;;  %756 = vst [vmem:[%s8962_s30 + $0x47c] sm:$0xf] %v755_v31 }
  0xd5   : > { %758 = vst [vmem:[%s8962_s30 + $0x480] sm:$0xf] %v757_v32  ;;  %760 = vst [vmem:[%s8962_s30 + $0x484] sm:$0xf] %v759_v33  ;;  %v761_v34 = vld [vmem:[%s8958_s29 + $0x1220] sm:$0xf] }
  0xd6   : > { %v763_v35 = vld [vmem:[%s8958_s29 + $0x1230] sm:$0xf]  ;;  %v765_v36 = vld [vmem:[%s8958_s29 + $0x1240] sm:$0xf]  ;;  %762 = vst [vmem:[%s8962_s30 + $0x488] sm:$0xf] %v761_v34 }
  0xd7   : > { %764 = vst [vmem:[%s8962_s30 + $0x48c] sm:$0xf] %v763_v35  ;;  %766 = vst [vmem:[%s8962_s30 + $0x490] sm:$0xf] %v765_v36  ;;  %v767_v37 = vld [vmem:[%s8958_s29 + $0x1250] sm:$0xf] }
  0xd8   : > { %v769_v38 = vld [vmem:[%s8958_s29 + $0x1260] sm:$0xf]  ;;  %v771_v39 = vld [vmem:[%s8958_s29 + $0x1270] sm:$0xf]  ;;  %768 = vst [vmem:[%s8962_s30 + $0x494] sm:$0xf] %v767_v37 }
  0xd9   : > { %770 = vst [vmem:[%s8962_s30 + $0x498] sm:$0xf] %v769_v38  ;;  %772 = vst [vmem:[%s8962_s30 + $0x49c] sm:$0xf] %v771_v39  ;;  %v773_v40 = vld [vmem:[%s8958_s29 + $0x1280] sm:$0xf] }
  0xda   : > { %v775_v41 = vld [vmem:[%s8958_s29 + $0x1290] sm:$0xf]  ;;  %v777_v42 = vld [vmem:[%s8958_s29 + $0x12a0] sm:$0xf]  ;;  %774 = vst [vmem:[%s8962_s30 + $0x4a0] sm:$0xf] %v773_v40 }
  0xdb   : > { %776 = vst [vmem:[%s8962_s30 + $0x4a4] sm:$0xf] %v775_v41  ;;  %778 = vst [vmem:[%s8962_s30 + $0x4a8] sm:$0xf] %v777_v42  ;;  %v779_v43 = vld [vmem:[%s8958_s29 + $0x12b0] sm:$0xf] }
  0xdc   : > { %v781_v44 = vld [vmem:[%s8958_s29 + $0x12c0] sm:$0xf]  ;;  %v783_v45 = vld [vmem:[%s8958_s29 + $0x12d0] sm:$0xf]  ;;  %780 = vst [vmem:[%s8962_s30 + $0x4ac] sm:$0xf] %v779_v43 }
  0xdd   : > { %782 = vst [vmem:[%s8962_s30 + $0x4b0] sm:$0xf] %v781_v44  ;;  %784 = vst [vmem:[%s8962_s30 + $0x4b4] sm:$0xf] %v783_v45  ;;  %v785_v46 = vld [vmem:[%s8958_s29 + $0x12e0] sm:$0xf] }
  0xde   : > { %v787_v47 = vld [vmem:[%s8958_s29 + $0x12f0] sm:$0xf]  ;;  %v789_v48 = vld [vmem:[%s8958_s29 + $0x1300] sm:$0xf]  ;;  %786 = vst [vmem:[%s8962_s30 + $0x4b8] sm:$0xf] %v785_v46 }
  0xdf   : > { %788 = vst [vmem:[%s8962_s30 + $0x4bc] sm:$0xf] %v787_v47  ;;  %790 = vst [vmem:[%s8962_s30 + $0x4c0] sm:$0xf] %v789_v48  ;;  %v791_v49 = vld [vmem:[%s8958_s29 + $0x1310] sm:$0xf] }
  0xe0   : > { %v793_v50 = vld [vmem:[%s8958_s29 + $0x1320] sm:$0xf]  ;;  %v795_v51 = vld [vmem:[%s8958_s29 + $0x1330] sm:$0xf]  ;;  %792 = vst [vmem:[%s8962_s30 + $0x4c4] sm:$0xf] %v791_v49 }
  0xe1   : > { %794 = vst [vmem:[%s8962_s30 + $0x4c8] sm:$0xf] %v793_v50  ;;  %796 = vst [vmem:[%s8962_s30 + $0x4cc] sm:$0xf] %v795_v51  ;;  %v797_v52 = vld [vmem:[%s8958_s29 + $0x1340] sm:$0xf] }
  0xe2   : > { %v799_v53 = vld [vmem:[%s8958_s29 + $0x1350] sm:$0xf]  ;;  %v801_v54 = vld [vmem:[%s8958_s29 + $0x1360] sm:$0xf]  ;;  %798 = vst [vmem:[%s8962_s30 + $0x4d0] sm:$0xf] %v797_v52 }
  0xe3   : > { %800 = vst [vmem:[%s8962_s30 + $0x4d4] sm:$0xf] %v799_v53  ;;  %802 = vst [vmem:[%s8962_s30 + $0x4d8] sm:$0xf] %v801_v54  ;;  %v803_v55 = vld [vmem:[%s8958_s29 + $0x1370] sm:$0xf] }
  0xe4   : > { %v805_v56 = vld [vmem:[%s8958_s29 + $0x1380] sm:$0xf]  ;;  %v807_v57 = vld [vmem:[%s8958_s29 + $0x1390] sm:$0xf]  ;;  %804 = vst [vmem:[%s8962_s30 + $0x4dc] sm:$0xf] %v803_v55 }
  0xe5   : > { %806 = vst [vmem:[%s8962_s30 + $0x4e0] sm:$0xf] %v805_v56  ;;  %808 = vst [vmem:[%s8962_s30 + $0x4e4] sm:$0xf] %v807_v57  ;;  %v809_v58 = vld [vmem:[%s8958_s29 + $0x13a0] sm:$0xf] }
  0xe6   : > { %v811_v59 = vld [vmem:[%s8958_s29 + $0x13b0] sm:$0xf]  ;;  %v813_v60 = vld [vmem:[%s8958_s29 + $0x13c0] sm:$0xf]  ;;  %810 = vst [vmem:[%s8962_s30 + $0x4e8] sm:$0xf] %v809_v58 }
  0xe7   : > { %812 = vst [vmem:[%s8962_s30 + $0x4ec] sm:$0xf] %v811_v59  ;;  %814 = vst [vmem:[%s8962_s30 + $0x4f0] sm:$0xf] %v813_v60  ;;  %v815_v61 = vld [vmem:[%s8958_s29 + $0x13d0] sm:$0xf] }
  0xe8   : > { %v817_v62 = vld [vmem:[%s8958_s29 + $0x13e0] sm:$0xf]  ;;  %v819_v63 = vld [vmem:[%s8958_s29 + $0x13f0] sm:$0xf]  ;;  %816 = vst [vmem:[%s8962_s30 + $0x4f4] sm:$0xf] %v815_v61 }
  0xe9   : > { %818 = vst [vmem:[%s8962_s30 + $0x4f8] sm:$0xf] %v817_v62  ;;  %820 = vst [vmem:[%s8962_s30 + $0x4fc] sm:$0xf] %v819_v63  ;;  %v821_v0 = vld [vmem:[%s8958_s29 + $0x1400] sm:$0xf] }
  0xea   : > { %v823_v1 = vld [vmem:[%s8958_s29 + $0x1410] sm:$0xf]  ;;  %v825_v2 = vld [vmem:[%s8958_s29 + $0x1420] sm:$0xf]  ;;  %822 = vst [vmem:[%s8962_s30 + $0x500] sm:$0xf] %v821_v0 }
  0xeb   : > { %824 = vst [vmem:[%s8962_s30 + $0x504] sm:$0xf] %v823_v1  ;;  %826 = vst [vmem:[%s8962_s30 + $0x508] sm:$0xf] %v825_v2  ;;  %v827_v3 = vld [vmem:[%s8958_s29 + $0x1430] sm:$0xf] }
  0xec   : > { %v829_v4 = vld [vmem:[%s8958_s29 + $0x1440] sm:$0xf]  ;;  %v831_v5 = vld [vmem:[%s8958_s29 + $0x1450] sm:$0xf]  ;;  %828 = vst [vmem:[%s8962_s30 + $0x50c] sm:$0xf] %v827_v3 }
  0xed   : > { %830 = vst [vmem:[%s8962_s30 + $0x510] sm:$0xf] %v829_v4  ;;  %832 = vst [vmem:[%s8962_s30 + $0x514] sm:$0xf] %v831_v5  ;;  %v833_v6 = vld [vmem:[%s8958_s29 + $0x1460] sm:$0xf] }
  0xee   : > { %v835_v7 = vld [vmem:[%s8958_s29 + $0x1470] sm:$0xf]  ;;  %v837_v8 = vld [vmem:[%s8958_s29 + $0x1480] sm:$0xf]  ;;  %834 = vst [vmem:[%s8962_s30 + $0x518] sm:$0xf] %v833_v6 }
  0xef   : > { %836 = vst [vmem:[%s8962_s30 + $0x51c] sm:$0xf] %v835_v7  ;;  %838 = vst [vmem:[%s8962_s30 + $0x520] sm:$0xf] %v837_v8  ;;  %v839_v9 = vld [vmem:[%s8958_s29 + $0x1490] sm:$0xf] }
  0xf0   : > { %v841_v10 = vld [vmem:[%s8958_s29 + $0x14a0] sm:$0xf]  ;;  %v843_v11 = vld [vmem:[%s8958_s29 + $0x14b0] sm:$0xf]  ;;  %840 = vst [vmem:[%s8962_s30 + $0x524] sm:$0xf] %v839_v9 }
  0xf1   : > { %842 = vst [vmem:[%s8962_s30 + $0x528] sm:$0xf] %v841_v10  ;;  %844 = vst [vmem:[%s8962_s30 + $0x52c] sm:$0xf] %v843_v11  ;;  %v845_v12 = vld [vmem:[%s8958_s29 + $0x14c0] sm:$0xf] }
  0xf2   : > { %v847_v13 = vld [vmem:[%s8958_s29 + $0x14d0] sm:$0xf]  ;;  %v849_v14 = vld [vmem:[%s8958_s29 + $0x14e0] sm:$0xf]  ;;  %846 = vst [vmem:[%s8962_s30 + $0x530] sm:$0xf] %v845_v12 }
  0xf3   : > { %848 = vst [vmem:[%s8962_s30 + $0x534] sm:$0xf] %v847_v13  ;;  %850 = vst [vmem:[%s8962_s30 + $0x538] sm:$0xf] %v849_v14  ;;  %v851_v15 = vld [vmem:[%s8958_s29 + $0x14f0] sm:$0xf] }
  0xf4   : > { %v853_v16 = vld [vmem:[%s8958_s29 + $0x1500] sm:$0xf]  ;;  %v855_v17 = vld [vmem:[%s8958_s29 + $0x1510] sm:$0xf]  ;;  %852 = vst [vmem:[%s8962_s30 + $0x53c] sm:$0xf] %v851_v15 }
  0xf5   : > { %854 = vst [vmem:[%s8962_s30 + $0x540] sm:$0xf] %v853_v16  ;;  %856 = vst [vmem:[%s8962_s30 + $0x544] sm:$0xf] %v855_v17  ;;  %v857_v18 = vld [vmem:[%s8958_s29 + $0x1520] sm:$0xf] }
  0xf6   : > { %v859_v19 = vld [vmem:[%s8958_s29 + $0x1530] sm:$0xf]  ;;  %v861_v20 = vld [vmem:[%s8958_s29 + $0x1540] sm:$0xf]  ;;  %858 = vst [vmem:[%s8962_s30 + $0x548] sm:$0xf] %v857_v18 }
  0xf7   : > { %860 = vst [vmem:[%s8962_s30 + $0x54c] sm:$0xf] %v859_v19  ;;  %862 = vst [vmem:[%s8962_s30 + $0x550] sm:$0xf] %v861_v20  ;;  %v863_v21 = vld [vmem:[%s8958_s29 + $0x1550] sm:$0xf] }
  0xf8   : > { %v865_v22 = vld [vmem:[%s8958_s29 + $0x1560] sm:$0xf]  ;;  %v867_v23 = vld [vmem:[%s8958_s29 + $0x1570] sm:$0xf]  ;;  %864 = vst [vmem:[%s8962_s30 + $0x554] sm:$0xf] %v863_v21 }
  0xf9   : > { %866 = vst [vmem:[%s8962_s30 + $0x558] sm:$0xf] %v865_v22  ;;  %868 = vst [vmem:[%s8962_s30 + $0x55c] sm:$0xf] %v867_v23  ;;  %v869_v24 = vld [vmem:[%s8958_s29 + $0x1580] sm:$0xf] }
  0xfa   : > { %v871_v25 = vld [vmem:[%s8958_s29 + $0x1590] sm:$0xf]  ;;  %v873_v26 = vld [vmem:[%s8958_s29 + $0x15a0] sm:$0xf]  ;;  %870 = vst [vmem:[%s8962_s30 + $0x560] sm:$0xf] %v869_v24 }
  0xfb   : > { %872 = vst [vmem:[%s8962_s30 + $0x564] sm:$0xf] %v871_v25  ;;  %874 = vst [vmem:[%s8962_s30 + $0x568] sm:$0xf] %v873_v26  ;;  %v875_v27 = vld [vmem:[%s8958_s29 + $0x15b0] sm:$0xf] }
  0xfc   : > { %v877_v28 = vld [vmem:[%s8958_s29 + $0x15c0] sm:$0xf]  ;;  %v879_v29 = vld [vmem:[%s8958_s29 + $0x15d0] sm:$0xf]  ;;  %876 = vst [vmem:[%s8962_s30 + $0x56c] sm:$0xf] %v875_v27 }
  0xfd   : > { %878 = vst [vmem:[%s8962_s30 + $0x570] sm:$0xf] %v877_v28  ;;  %880 = vst [vmem:[%s8962_s30 + $0x574] sm:$0xf] %v879_v29  ;;  %v881_v30 = vld [vmem:[%s8958_s29 + $0x15e0] sm:$0xf] }
  0xfe   : > { %v883_v31 = vld [vmem:[%s8958_s29 + $0x15f0] sm:$0xf]  ;;  %v885_v32 = vld [vmem:[%s8958_s29 + $0x1600] sm:$0xf]  ;;  %882 = vst [vmem:[%s8962_s30 + $0x578] sm:$0xf] %v881_v30 }
  0xff   : > { %884 = vst [vmem:[%s8962_s30 + $0x57c] sm:$0xf] %v883_v31  ;;  %886 = vst [vmem:[%s8962_s30 + $0x580] sm:$0xf] %v885_v32  ;;  %v887_v33 = vld [vmem:[%s8958_s29 + $0x1610] sm:$0xf] }
 0x100   : > { %v889_v34 = vld [vmem:[%s8958_s29 + $0x1620] sm:$0xf]  ;;  %v891_v35 = vld [vmem:[%s8958_s29 + $0x1630] sm:$0xf]  ;;  %888 = vst [vmem:[%s8962_s30 + $0x584] sm:$0xf] %v887_v33 }
 0x101   : > { %890 = vst [vmem:[%s8962_s30 + $0x588] sm:$0xf] %v889_v34  ;;  %892 = vst [vmem:[%s8962_s30 + $0x58c] sm:$0xf] %v891_v35  ;;  %v893_v36 = vld [vmem:[%s8958_s29 + $0x1640] sm:$0xf] }
 0x102   : > { %v895_v37 = vld [vmem:[%s8958_s29 + $0x1650] sm:$0xf]  ;;  %v897_v38 = vld [vmem:[%s8958_s29 + $0x1660] sm:$0xf]  ;;  %894 = vst [vmem:[%s8962_s30 + $0x590] sm:$0xf] %v893_v36 }
 0x103   : > { %896 = vst [vmem:[%s8962_s30 + $0x594] sm:$0xf] %v895_v37  ;;  %898 = vst [vmem:[%s8962_s30 + $0x598] sm:$0xf] %v897_v38  ;;  %v899_v39 = vld [vmem:[%s8958_s29 + $0x1670] sm:$0xf] }
 0x104   : > { %v901_v40 = vld [vmem:[%s8958_s29 + $0x1680] sm:$0xf]  ;;  %v903_v41 = vld [vmem:[%s8958_s29 + $0x1690] sm:$0xf]  ;;  %900 = vst [vmem:[%s8962_s30 + $0x59c] sm:$0xf] %v899_v39 }
 0x105   : > { %902 = vst [vmem:[%s8962_s30 + $0x5a0] sm:$0xf] %v901_v40  ;;  %904 = vst [vmem:[%s8962_s30 + $0x5a4] sm:$0xf] %v903_v41  ;;  %v905_v42 = vld [vmem:[%s8958_s29 + $0x16a0] sm:$0xf] }
 0x106   : > { %v907_v43 = vld [vmem:[%s8958_s29 + $0x16b0] sm:$0xf]  ;;  %v909_v44 = vld [vmem:[%s8958_s29 + $0x16c0] sm:$0xf]  ;;  %906 = vst [vmem:[%s8962_s30 + $0x5a8] sm:$0xf] %v905_v42 }
 0x107   : > { %908 = vst [vmem:[%s8962_s30 + $0x5ac] sm:$0xf] %v907_v43  ;;  %910 = vst [vmem:[%s8962_s30 + $0x5b0] sm:$0xf] %v909_v44  ;;  %v911_v45 = vld [vmem:[%s8958_s29 + $0x16d0] sm:$0xf] }
 0x108   : > { %v913_v46 = vld [vmem:[%s8958_s29 + $0x16e0] sm:$0xf]  ;;  %v915_v47 = vld [vmem:[%s8958_s29 + $0x16f0] sm:$0xf]  ;;  %912 = vst [vmem:[%s8962_s30 + $0x5b4] sm:$0xf] %v911_v45 }
 0x109   : > { %914 = vst [vmem:[%s8962_s30 + $0x5b8] sm:$0xf] %v913_v46  ;;  %916 = vst [vmem:[%s8962_s30 + $0x5bc] sm:$0xf] %v915_v47  ;;  %v917_v48 = vld [vmem:[%s8958_s29 + $0x1700] sm:$0xf] }
 0x10a   : > { %v919_v49 = vld [vmem:[%s8958_s29 + $0x1710] sm:$0xf]  ;;  %v921_v50 = vld [vmem:[%s8958_s29 + $0x1720] sm:$0xf]  ;;  %918 = vst [vmem:[%s8962_s30 + $0x5c0] sm:$0xf] %v917_v48 }
 0x10b   : > { %920 = vst [vmem:[%s8962_s30 + $0x5c4] sm:$0xf] %v919_v49  ;;  %922 = vst [vmem:[%s8962_s30 + $0x5c8] sm:$0xf] %v921_v50  ;;  %v923_v51 = vld [vmem:[%s8958_s29 + $0x1730] sm:$0xf] }
 0x10c   : > { %v925_v52 = vld [vmem:[%s8958_s29 + $0x1740] sm:$0xf]  ;;  %v927_v53 = vld [vmem:[%s8958_s29 + $0x1750] sm:$0xf]  ;;  %924 = vst [vmem:[%s8962_s30 + $0x5cc] sm:$0xf] %v923_v51 }
 0x10d   : > { %926 = vst [vmem:[%s8962_s30 + $0x5d0] sm:$0xf] %v925_v52  ;;  %928 = vst [vmem:[%s8962_s30 + $0x5d4] sm:$0xf] %v927_v53  ;;  %v929_v54 = vld [vmem:[%s8958_s29 + $0x1760] sm:$0xf] }
 0x10e   : > { %v931_v55 = vld [vmem:[%s8958_s29 + $0x1770] sm:$0xf]  ;;  %v933_v56 = vld [vmem:[%s8958_s29 + $0x1780] sm:$0xf]  ;;  %930 = vst [vmem:[%s8962_s30 + $0x5d8] sm:$0xf] %v929_v54 }
 0x10f   : > { %932 = vst [vmem:[%s8962_s30 + $0x5dc] sm:$0xf] %v931_v55  ;;  %934 = vst [vmem:[%s8962_s30 + $0x5e0] sm:$0xf] %v933_v56  ;;  %v935_v57 = vld [vmem:[%s8958_s29 + $0x1790] sm:$0xf] }
 0x110   : > { %v937_v58 = vld [vmem:[%s8958_s29 + $0x17a0] sm:$0xf]  ;;  %v939_v59 = vld [vmem:[%s8958_s29 + $0x17b0] sm:$0xf]  ;;  %936 = vst [vmem:[%s8962_s30 + $0x5e4] sm:$0xf] %v935_v57 }
 0x111   : > { %938 = vst [vmem:[%s8962_s30 + $0x5e8] sm:$0xf] %v937_v58  ;;  %940 = vst [vmem:[%s8962_s30 + $0x5ec] sm:$0xf] %v939_v59  ;;  %v941_v60 = vld [vmem:[%s8958_s29 + $0x17c0] sm:$0xf] }
 0x112   : > { %v943_v61 = vld [vmem:[%s8958_s29 + $0x17d0] sm:$0xf]  ;;  %v945_v62 = vld [vmem:[%s8958_s29 + $0x17e0] sm:$0xf]  ;;  %942 = vst [vmem:[%s8962_s30 + $0x5f0] sm:$0xf] %v941_v60 }
 0x113   : > { %944 = vst [vmem:[%s8962_s30 + $0x5f4] sm:$0xf] %v943_v61  ;;  %946 = vst [vmem:[%s8962_s30 + $0x5f8] sm:$0xf] %v945_v62  ;;  %v947_v63 = vld [vmem:[%s8958_s29 + $0x17f0] sm:$0xf] }
 0x114   : > { %v949_v0 = vld [vmem:[%s8958_s29 + $0x1800] sm:$0xf]  ;;  %v951_v1 = vld [vmem:[%s8958_s29 + $0x1810] sm:$0xf]  ;;  %948 = vst [vmem:[%s8962_s30 + $0x5fc] sm:$0xf] %v947_v63 }
 0x115   : > { %950 = vst [vmem:[%s8962_s30 + $0x600] sm:$0xf] %v949_v0  ;;  %952 = vst [vmem:[%s8962_s30 + $0x604] sm:$0xf] %v951_v1  ;;  %v953_v2 = vld [vmem:[%s8958_s29 + $0x1820] sm:$0xf] }
 0x116   : > { %v955_v3 = vld [vmem:[%s8958_s29 + $0x1830] sm:$0xf]  ;;  %v957_v4 = vld [vmem:[%s8958_s29 + $0x1840] sm:$0xf]  ;;  %954 = vst [vmem:[%s8962_s30 + $0x608] sm:$0xf] %v953_v2 }
 0x117   : > { %956 = vst [vmem:[%s8962_s30 + $0x60c] sm:$0xf] %v955_v3  ;;  %958 = vst [vmem:[%s8962_s30 + $0x610] sm:$0xf] %v957_v4  ;;  %v959_v5 = vld [vmem:[%s8958_s29 + $0x1850] sm:$0xf] }
 0x118   : > { %v961_v6 = vld [vmem:[%s8958_s29 + $0x1860] sm:$0xf]  ;;  %v963_v7 = vld [vmem:[%s8958_s29 + $0x1870] sm:$0xf]  ;;  %960 = vst [vmem:[%s8962_s30 + $0x614] sm:$0xf] %v959_v5 }
 0x119   : > { %962 = vst [vmem:[%s8962_s30 + $0x618] sm:$0xf] %v961_v6  ;;  %964 = vst [vmem:[%s8962_s30 + $0x61c] sm:$0xf] %v963_v7  ;;  %v965_v8 = vld [vmem:[%s8958_s29 + $0x1880] sm:$0xf] }
 0x11a   : > { %v967_v9 = vld [vmem:[%s8958_s29 + $0x1890] sm:$0xf]  ;;  %v969_v10 = vld [vmem:[%s8958_s29 + $0x18a0] sm:$0xf]  ;;  %966 = vst [vmem:[%s8962_s30 + $0x620] sm:$0xf] %v965_v8 }
 0x11b   : > { %968 = vst [vmem:[%s8962_s30 + $0x624] sm:$0xf] %v967_v9  ;;  %970 = vst [vmem:[%s8962_s30 + $0x628] sm:$0xf] %v969_v10  ;;  %v971_v11 = vld [vmem:[%s8958_s29 + $0x18b0] sm:$0xf] }
 0x11c   : > { %v973_v12 = vld [vmem:[%s8958_s29 + $0x18c0] sm:$0xf]  ;;  %v975_v13 = vld [vmem:[%s8958_s29 + $0x18d0] sm:$0xf]  ;;  %972 = vst [vmem:[%s8962_s30 + $0x62c] sm:$0xf] %v971_v11 }
 0x11d   : > { %974 = vst [vmem:[%s8962_s30 + $0x630] sm:$0xf] %v973_v12  ;;  %976 = vst [vmem:[%s8962_s30 + $0x634] sm:$0xf] %v975_v13  ;;  %v977_v14 = vld [vmem:[%s8958_s29 + $0x18e0] sm:$0xf] }
 0x11e   : > { %v979_v15 = vld [vmem:[%s8958_s29 + $0x18f0] sm:$0xf]  ;;  %v981_v16 = vld [vmem:[%s8958_s29 + $0x1900] sm:$0xf]  ;;  %978 = vst [vmem:[%s8962_s30 + $0x638] sm:$0xf] %v977_v14 }
 0x11f   : > { %980 = vst [vmem:[%s8962_s30 + $0x63c] sm:$0xf] %v979_v15  ;;  %982 = vst [vmem:[%s8962_s30 + $0x640] sm:$0xf] %v981_v16  ;;  %v983_v17 = vld [vmem:[%s8958_s29 + $0x1910] sm:$0xf] }
 0x120   : > { %v985_v18 = vld [vmem:[%s8958_s29 + $0x1920] sm:$0xf]  ;;  %v987_v19 = vld [vmem:[%s8958_s29 + $0x1930] sm:$0xf]  ;;  %984 = vst [vmem:[%s8962_s30 + $0x644] sm:$0xf] %v983_v17 }
 0x121   : > { %986 = vst [vmem:[%s8962_s30 + $0x648] sm:$0xf] %v985_v18  ;;  %988 = vst [vmem:[%s8962_s30 + $0x64c] sm:$0xf] %v987_v19  ;;  %v989_v20 = vld [vmem:[%s8958_s29 + $0x1940] sm:$0xf] }
 0x122   : > { %v991_v21 = vld [vmem:[%s8958_s29 + $0x1950] sm:$0xf]  ;;  %v993_v22 = vld [vmem:[%s8958_s29 + $0x1960] sm:$0xf]  ;;  %990 = vst [vmem:[%s8962_s30 + $0x650] sm:$0xf] %v989_v20 }
 0x123   : > { %992 = vst [vmem:[%s8962_s30 + $0x654] sm:$0xf] %v991_v21  ;;  %994 = vst [vmem:[%s8962_s30 + $0x658] sm:$0xf] %v993_v22  ;;  %v995_v23 = vld [vmem:[%s8958_s29 + $0x1970] sm:$0xf] }
 0x124   : > { %v997_v24 = vld [vmem:[%s8958_s29 + $0x1980] sm:$0xf]  ;;  %v999_v25 = vld [vmem:[%s8958_s29 + $0x1990] sm:$0xf]  ;;  %996 = vst [vmem:[%s8962_s30 + $0x65c] sm:$0xf] %v995_v23 }
 0x125   : > { %998 = vst [vmem:[%s8962_s30 + $0x660] sm:$0xf] %v997_v24  ;;  %1000 = vst [vmem:[%s8962_s30 + $0x664] sm:$0xf] %v999_v25  ;;  %v1001_v26 = vld [vmem:[%s8958_s29 + $0x19a0] sm:$0xf] }
 0x126   : > { %v1003_v27 = vld [vmem:[%s8958_s29 + $0x19b0] sm:$0xf]  ;;  %v1005_v28 = vld [vmem:[%s8958_s29 + $0x19c0] sm:$0xf]  ;;  %1002 = vst [vmem:[%s8962_s30 + $0x668] sm:$0xf] %v1001_v26 }
 0x127   : > { %1004 = vst [vmem:[%s8962_s30 + $0x66c] sm:$0xf] %v1003_v27  ;;  %1006 = vst [vmem:[%s8962_s30 + $0x670] sm:$0xf] %v1005_v28  ;;  %v1007_v29 = vld [vmem:[%s8958_s29 + $0x19d0] sm:$0xf] }
 0x128   : > { %v1009_v30 = vld [vmem:[%s8958_s29 + $0x19e0] sm:$0xf]  ;;  %v1011_v31 = vld [vmem:[%s8958_s29 + $0x19f0] sm:$0xf]  ;;  %1008 = vst [vmem:[%s8962_s30 + $0x674] sm:$0xf] %v1007_v29 }
 0x129   : > { %1010 = vst [vmem:[%s8962_s30 + $0x678] sm:$0xf] %v1009_v30  ;;  %1012 = vst [vmem:[%s8962_s30 + $0x67c] sm:$0xf] %v1011_v31  ;;  %v1013_v32 = vld [vmem:[%s8958_s29 + $0x1a00] sm:$0xf] }
 0x12a   : > { %v1015_v33 = vld [vmem:[%s8958_s29 + $0x1a10] sm:$0xf]  ;;  %v1017_v34 = vld [vmem:[%s8958_s29 + $0x1a20] sm:$0xf]  ;;  %1014 = vst [vmem:[%s8962_s30 + $0x680] sm:$0xf] %v1013_v32 }
 0x12b   : > { %1016 = vst [vmem:[%s8962_s30 + $0x684] sm:$0xf] %v1015_v33  ;;  %1018 = vst [vmem:[%s8962_s30 + $0x688] sm:$0xf] %v1017_v34  ;;  %v1019_v35 = vld [vmem:[%s8958_s29 + $0x1a30] sm:$0xf] }
 0x12c   : > { %v1021_v36 = vld [vmem:[%s8958_s29 + $0x1a40] sm:$0xf]  ;;  %v1023_v37 = vld [vmem:[%s8958_s29 + $0x1a50] sm:$0xf]  ;;  %1020 = vst [vmem:[%s8962_s30 + $0x68c] sm:$0xf] %v1019_v35 }
 0x12d   : > { %1022 = vst [vmem:[%s8962_s30 + $0x690] sm:$0xf] %v1021_v36  ;;  %1024 = vst [vmem:[%s8962_s30 + $0x694] sm:$0xf] %v1023_v37  ;;  %v1025_v38 = vld [vmem:[%s8958_s29 + $0x1a60] sm:$0xf] }
 0x12e   : > { %v1027_v39 = vld [vmem:[%s8958_s29 + $0x1a70] sm:$0xf]  ;;  %v1029_v40 = vld [vmem:[%s8958_s29 + $0x1a80] sm:$0xf]  ;;  %1026 = vst [vmem:[%s8962_s30 + $0x698] sm:$0xf] %v1025_v38 }
 0x12f   : > { %1028 = vst [vmem:[%s8962_s30 + $0x69c] sm:$0xf] %v1027_v39  ;;  %1030 = vst [vmem:[%s8962_s30 + $0x6a0] sm:$0xf] %v1029_v40  ;;  %v1031_v41 = vld [vmem:[%s8958_s29 + $0x1a90] sm:$0xf] }
 0x130   : > { %v1033_v42 = vld [vmem:[%s8958_s29 + $0x1aa0] sm:$0xf]  ;;  %v1035_v43 = vld [vmem:[%s8958_s29 + $0x1ab0] sm:$0xf]  ;;  %1032 = vst [vmem:[%s8962_s30 + $0x6a4] sm:$0xf] %v1031_v41 }
 0x131   : > { %1034 = vst [vmem:[%s8962_s30 + $0x6a8] sm:$0xf] %v1033_v42  ;;  %1036 = vst [vmem:[%s8962_s30 + $0x6ac] sm:$0xf] %v1035_v43  ;;  %v1037_v44 = vld [vmem:[%s8958_s29 + $0x1ac0] sm:$0xf] }
 0x132   : > { %v1039_v45 = vld [vmem:[%s8958_s29 + $0x1ad0] sm:$0xf]  ;;  %v1041_v46 = vld [vmem:[%s8958_s29 + $0x1ae0] sm:$0xf]  ;;  %1038 = vst [vmem:[%s8962_s30 + $0x6b0] sm:$0xf] %v1037_v44 }
 0x133   : > { %1040 = vst [vmem:[%s8962_s30 + $0x6b4] sm:$0xf] %v1039_v45  ;;  %1042 = vst [vmem:[%s8962_s30 + $0x6b8] sm:$0xf] %v1041_v46  ;;  %v1043_v47 = vld [vmem:[%s8958_s29 + $0x1af0] sm:$0xf] }
 0x134   : > { %v1045_v48 = vld [vmem:[%s8958_s29 + $0x1b00] sm:$0xf]  ;;  %v1047_v49 = vld [vmem:[%s8958_s29 + $0x1b10] sm:$0xf]  ;;  %1044 = vst [vmem:[%s8962_s30 + $0x6bc] sm:$0xf] %v1043_v47 }
 0x135   : > { %1046 = vst [vmem:[%s8962_s30 + $0x6c0] sm:$0xf] %v1045_v48  ;;  %1048 = vst [vmem:[%s8962_s30 + $0x6c4] sm:$0xf] %v1047_v49  ;;  %v1049_v50 = vld [vmem:[%s8958_s29 + $0x1b20] sm:$0xf] }
 0x136   : > { %v1051_v51 = vld [vmem:[%s8958_s29 + $0x1b30] sm:$0xf]  ;;  %v1053_v52 = vld [vmem:[%s8958_s29 + $0x1b40] sm:$0xf]  ;;  %1050 = vst [vmem:[%s8962_s30 + $0x6c8] sm:$0xf] %v1049_v50 }
 0x137   : > { %1052 = vst [vmem:[%s8962_s30 + $0x6cc] sm:$0xf] %v1051_v51  ;;  %1054 = vst [vmem:[%s8962_s30 + $0x6d0] sm:$0xf] %v1053_v52  ;;  %v1055_v53 = vld [vmem:[%s8958_s29 + $0x1b50] sm:$0xf] }
 0x138   : > { %v1057_v54 = vld [vmem:[%s8958_s29 + $0x1b60] sm:$0xf]  ;;  %v1059_v55 = vld [vmem:[%s8958_s29 + $0x1b70] sm:$0xf]  ;;  %1056 = vst [vmem:[%s8962_s30 + $0x6d4] sm:$0xf] %v1055_v53 }
 0x139   : > { %1058 = vst [vmem:[%s8962_s30 + $0x6d8] sm:$0xf] %v1057_v54  ;;  %1060 = vst [vmem:[%s8962_s30 + $0x6dc] sm:$0xf] %v1059_v55  ;;  %v1061_v56 = vld [vmem:[%s8958_s29 + $0x1b80] sm:$0xf] }
 0x13a   : > { %v1063_v57 = vld [vmem:[%s8958_s29 + $0x1b90] sm:$0xf]  ;;  %v1065_v58 = vld [vmem:[%s8958_s29 + $0x1ba0] sm:$0xf]  ;;  %1062 = vst [vmem:[%s8962_s30 + $0x6e0] sm:$0xf] %v1061_v56 }
 0x13b   : > { %1064 = vst [vmem:[%s8962_s30 + $0x6e4] sm:$0xf] %v1063_v57  ;;  %1066 = vst [vmem:[%s8962_s30 + $0x6e8] sm:$0xf] %v1065_v58  ;;  %v1067_v59 = vld [vmem:[%s8958_s29 + $0x1bb0] sm:$0xf] }
 0x13c   : > { %v1069_v60 = vld [vmem:[%s8958_s29 + $0x1bc0] sm:$0xf]  ;;  %v1071_v61 = vld [vmem:[%s8958_s29 + $0x1bd0] sm:$0xf]  ;;  %1068 = vst [vmem:[%s8962_s30 + $0x6ec] sm:$0xf] %v1067_v59 }
 0x13d   : > { %1070 = vst [vmem:[%s8962_s30 + $0x6f0] sm:$0xf] %v1069_v60  ;;  %1072 = vst [vmem:[%s8962_s30 + $0x6f4] sm:$0xf] %v1071_v61  ;;  %v1073_v62 = vld [vmem:[%s8958_s29 + $0x1be0] sm:$0xf] }
 0x13e   : > { %v1075_v63 = vld [vmem:[%s8958_s29 + $0x1bf0] sm:$0xf]  ;;  %v1077_v0 = vld [vmem:[%s8958_s29 + $0x1c00] sm:$0xf]  ;;  %1074 = vst [vmem:[%s8962_s30 + $0x6f8] sm:$0xf] %v1073_v62 }
 0x13f   : > { %1076 = vst [vmem:[%s8962_s30 + $0x6fc] sm:$0xf] %v1075_v63  ;;  %1078 = vst [vmem:[%s8962_s30 + $0x700] sm:$0xf] %v1077_v0  ;;  %v1079_v1 = vld [vmem:[%s8958_s29 + $0x1c10] sm:$0xf] }
 0x140   : > { %v1081_v2 = vld [vmem:[%s8958_s29 + $0x1c20] sm:$0xf]  ;;  %v1083_v3 = vld [vmem:[%s8958_s29 + $0x1c30] sm:$0xf]  ;;  %1080 = vst [vmem:[%s8962_s30 + $0x704] sm:$0xf] %v1079_v1 }
 0x141   : > { %1082 = vst [vmem:[%s8962_s30 + $0x708] sm:$0xf] %v1081_v2  ;;  %1084 = vst [vmem:[%s8962_s30 + $0x70c] sm:$0xf] %v1083_v3  ;;  %v1085_v4 = vld [vmem:[%s8958_s29 + $0x1c40] sm:$0xf] }
 0x142   : > { %v1087_v5 = vld [vmem:[%s8958_s29 + $0x1c50] sm:$0xf]  ;;  %v1089_v6 = vld [vmem:[%s8958_s29 + $0x1c60] sm:$0xf]  ;;  %1086 = vst [vmem:[%s8962_s30 + $0x710] sm:$0xf] %v1085_v4 }
 0x143   : > { %1088 = vst [vmem:[%s8962_s30 + $0x714] sm:$0xf] %v1087_v5  ;;  %1090 = vst [vmem:[%s8962_s30 + $0x718] sm:$0xf] %v1089_v6  ;;  %v1091_v7 = vld [vmem:[%s8958_s29 + $0x1c70] sm:$0xf] }
 0x144   : > { %v1093_v8 = vld [vmem:[%s8958_s29 + $0x1c80] sm:$0xf]  ;;  %v1095_v9 = vld [vmem:[%s8958_s29 + $0x1c90] sm:$0xf]  ;;  %1092 = vst [vmem:[%s8962_s30 + $0x71c] sm:$0xf] %v1091_v7 }
 0x145   : > { %1094 = vst [vmem:[%s8962_s30 + $0x720] sm:$0xf] %v1093_v8  ;;  %1096 = vst [vmem:[%s8962_s30 + $0x724] sm:$0xf] %v1095_v9  ;;  %v1097_v10 = vld [vmem:[%s8958_s29 + $0x1ca0] sm:$0xf] }
 0x146   : > { %v1099_v11 = vld [vmem:[%s8958_s29 + $0x1cb0] sm:$0xf]  ;;  %v1101_v12 = vld [vmem:[%s8958_s29 + $0x1cc0] sm:$0xf]  ;;  %1098 = vst [vmem:[%s8962_s30 + $0x728] sm:$0xf] %v1097_v10 }
 0x147   : > { %1100 = vst [vmem:[%s8962_s30 + $0x72c] sm:$0xf] %v1099_v11  ;;  %1102 = vst [vmem:[%s8962_s30 + $0x730] sm:$0xf] %v1101_v12  ;;  %v1103_v13 = vld [vmem:[%s8958_s29 + $0x1cd0] sm:$0xf] }
 0x148   : > { %v1105_v14 = vld [vmem:[%s8958_s29 + $0x1ce0] sm:$0xf]  ;;  %v1107_v15 = vld [vmem:[%s8958_s29 + $0x1cf0] sm:$0xf]  ;;  %1104 = vst [vmem:[%s8962_s30 + $0x734] sm:$0xf] %v1103_v13 }
 0x149   : > { %1106 = vst [vmem:[%s8962_s30 + $0x738] sm:$0xf] %v1105_v14  ;;  %1108 = vst [vmem:[%s8962_s30 + $0x73c] sm:$0xf] %v1107_v15  ;;  %v1109_v16 = vld [vmem:[%s8958_s29 + $0x1d00] sm:$0xf] }
 0x14a   : > { %v1111_v17 = vld [vmem:[%s8958_s29 + $0x1d10] sm:$0xf]  ;;  %v1113_v18 = vld [vmem:[%s8958_s29 + $0x1d20] sm:$0xf]  ;;  %1110 = vst [vmem:[%s8962_s30 + $0x740] sm:$0xf] %v1109_v16 }
 0x14b   : > { %1112 = vst [vmem:[%s8962_s30 + $0x744] sm:$0xf] %v1111_v17  ;;  %1114 = vst [vmem:[%s8962_s30 + $0x748] sm:$0xf] %v1113_v18  ;;  %v1115_v19 = vld [vmem:[%s8958_s29 + $0x1d30] sm:$0xf] }
 0x14c   : > { %v1117_v20 = vld [vmem:[%s8958_s29 + $0x1d40] sm:$0xf]  ;;  %v1119_v21 = vld [vmem:[%s8958_s29 + $0x1d50] sm:$0xf]  ;;  %1116 = vst [vmem:[%s8962_s30 + $0x74c] sm:$0xf] %v1115_v19 }
 0x14d   : > { %1118 = vst [vmem:[%s8962_s30 + $0x750] sm:$0xf] %v1117_v20  ;;  %1120 = vst [vmem:[%s8962_s30 + $0x754] sm:$0xf] %v1119_v21  ;;  %v1121_v22 = vld [vmem:[%s8958_s29 + $0x1d60] sm:$0xf] }
 0x14e   : > { %v1123_v23 = vld [vmem:[%s8958_s29 + $0x1d70] sm:$0xf]  ;;  %v1125_v24 = vld [vmem:[%s8958_s29 + $0x1d80] sm:$0xf]  ;;  %1122 = vst [vmem:[%s8962_s30 + $0x758] sm:$0xf] %v1121_v22 }
 0x14f   : > { %1124 = vst [vmem:[%s8962_s30 + $0x75c] sm:$0xf] %v1123_v23  ;;  %1126 = vst [vmem:[%s8962_s30 + $0x760] sm:$0xf] %v1125_v24  ;;  %v1127_v25 = vld [vmem:[%s8958_s29 + $0x1d90] sm:$0xf] }
 0x150   : > { %v1129_v26 = vld [vmem:[%s8958_s29 + $0x1da0] sm:$0xf]  ;;  %v1131_v27 = vld [vmem:[%s8958_s29 + $0x1db0] sm:$0xf]  ;;  %1128 = vst [vmem:[%s8962_s30 + $0x764] sm:$0xf] %v1127_v25 }
 0x151   : > { %1130 = vst [vmem:[%s8962_s30 + $0x768] sm:$0xf] %v1129_v26  ;;  %1132 = vst [vmem:[%s8962_s30 + $0x76c] sm:$0xf] %v1131_v27  ;;  %v1133_v28 = vld [vmem:[%s8958_s29 + $0x1dc0] sm:$0xf] }
 0x152   : > { %v1135_v29 = vld [vmem:[%s8958_s29 + $0x1dd0] sm:$0xf]  ;;  %v1137_v30 = vld [vmem:[%s8958_s29 + $0x1de0] sm:$0xf]  ;;  %1134 = vst [vmem:[%s8962_s30 + $0x770] sm:$0xf] %v1133_v28 }
 0x153   : > { %1136 = vst [vmem:[%s8962_s30 + $0x774] sm:$0xf] %v1135_v29  ;;  %1138 = vst [vmem:[%s8962_s30 + $0x778] sm:$0xf] %v1137_v30  ;;  %v1139_v31 = vld [vmem:[%s8958_s29 + $0x1df0] sm:$0xf] }
 0x154   : > { %v1141_v32 = vld [vmem:[%s8958_s29 + $0x1e00] sm:$0xf]  ;;  %v1143_v33 = vld [vmem:[%s8958_s29 + $0x1e10] sm:$0xf]  ;;  %1140 = vst [vmem:[%s8962_s30 + $0x77c] sm:$0xf] %v1139_v31 }
 0x155   : > { %1142 = vst [vmem:[%s8962_s30 + $0x780] sm:$0xf] %v1141_v32  ;;  %1144 = vst [vmem:[%s8962_s30 + $0x784] sm:$0xf] %v1143_v33  ;;  %v1145_v34 = vld [vmem:[%s8958_s29 + $0x1e20] sm:$0xf] }
 0x156   : > { %v1147_v35 = vld [vmem:[%s8958_s29 + $0x1e30] sm:$0xf]  ;;  %v1149_v36 = vld [vmem:[%s8958_s29 + $0x1e40] sm:$0xf]  ;;  %1146 = vst [vmem:[%s8962_s30 + $0x788] sm:$0xf] %v1145_v34 }
 0x157   : > { %1148 = vst [vmem:[%s8962_s30 + $0x78c] sm:$0xf] %v1147_v35  ;;  %1150 = vst [vmem:[%s8962_s30 + $0x790] sm:$0xf] %v1149_v36  ;;  %v1151_v37 = vld [vmem:[%s8958_s29 + $0x1e50] sm:$0xf] }
 0x158   : > { %v1153_v38 = vld [vmem:[%s8958_s29 + $0x1e60] sm:$0xf]  ;;  %v1155_v39 = vld [vmem:[%s8958_s29 + $0x1e70] sm:$0xf]  ;;  %1152 = vst [vmem:[%s8962_s30 + $0x794] sm:$0xf] %v1151_v37 }
 0x159   : > { %1154 = vst [vmem:[%s8962_s30 + $0x798] sm:$0xf] %v1153_v38  ;;  %1156 = vst [vmem:[%s8962_s30 + $0x79c] sm:$0xf] %v1155_v39  ;;  %v1157_v40 = vld [vmem:[%s8958_s29 + $0x1e80] sm:$0xf] }
 0x15a   : > { %v1159_v41 = vld [vmem:[%s8958_s29 + $0x1e90] sm:$0xf]  ;;  %v1161_v42 = vld [vmem:[%s8958_s29 + $0x1ea0] sm:$0xf]  ;;  %1158 = vst [vmem:[%s8962_s30 + $0x7a0] sm:$0xf] %v1157_v40 }
 0x15b   : > { %1160 = vst [vmem:[%s8962_s30 + $0x7a4] sm:$0xf] %v1159_v41  ;;  %1162 = vst [vmem:[%s8962_s30 + $0x7a8] sm:$0xf] %v1161_v42  ;;  %v1163_v43 = vld [vmem:[%s8958_s29 + $0x1eb0] sm:$0xf] }
 0x15c   : > { %v1165_v44 = vld [vmem:[%s8958_s29 + $0x1ec0] sm:$0xf]  ;;  %v1167_v45 = vld [vmem:[%s8958_s29 + $0x1ed0] sm:$0xf]  ;;  %1164 = vst [vmem:[%s8962_s30 + $0x7ac] sm:$0xf] %v1163_v43 }
 0x15d   : > { %1166 = vst [vmem:[%s8962_s30 + $0x7b0] sm:$0xf] %v1165_v44  ;;  %1168 = vst [vmem:[%s8962_s30 + $0x7b4] sm:$0xf] %v1167_v45  ;;  %v1169_v46 = vld [vmem:[%s8958_s29 + $0x1ee0] sm:$0xf] }
 0x15e   : > { %v1171_v47 = vld [vmem:[%s8958_s29 + $0x1ef0] sm:$0xf]  ;;  %v1173_v48 = vld [vmem:[%s8958_s29 + $0x1f00] sm:$0xf]  ;;  %1170 = vst [vmem:[%s8962_s30 + $0x7b8] sm:$0xf] %v1169_v46 }
 0x15f   : > { %1172 = vst [vmem:[%s8962_s30 + $0x7bc] sm:$0xf] %v1171_v47  ;;  %1174 = vst [vmem:[%s8962_s30 + $0x7c0] sm:$0xf] %v1173_v48  ;;  %v1175_v49 = vld [vmem:[%s8958_s29 + $0x1f10] sm:$0xf] }
 0x160   : > { %v1177_v50 = vld [vmem:[%s8958_s29 + $0x1f20] sm:$0xf]  ;;  %v1179_v51 = vld [vmem:[%s8958_s29 + $0x1f30] sm:$0xf]  ;;  %1176 = vst [vmem:[%s8962_s30 + $0x7c4] sm:$0xf] %v1175_v49 }
 0x161   : > { %1178 = vst [vmem:[%s8962_s30 + $0x7c8] sm:$0xf] %v1177_v50  ;;  %1180 = vst [vmem:[%s8962_s30 + $0x7cc] sm:$0xf] %v1179_v51  ;;  %v1181_v52 = vld [vmem:[%s8958_s29 + $0x1f40] sm:$0xf] }
 0x162   : > { %v1183_v53 = vld [vmem:[%s8958_s29 + $0x1f50] sm:$0xf]  ;;  %v1185_v54 = vld [vmem:[%s8958_s29 + $0x1f60] sm:$0xf]  ;;  %1182 = vst [vmem:[%s8962_s30 + $0x7d0] sm:$0xf] %v1181_v52 }
 0x163   : > { %1184 = vst [vmem:[%s8962_s30 + $0x7d4] sm:$0xf] %v1183_v53  ;;  %1186 = vst [vmem:[%s8962_s30 + $0x7d8] sm:$0xf] %v1185_v54  ;;  %v1187_v55 = vld [vmem:[%s8958_s29 + $0x1f70] sm:$0xf] }
 0x164   : > { %v1189_v56 = vld [vmem:[%s8958_s29 + $0x1f80] sm:$0xf]  ;;  %v1191_v57 = vld [vmem:[%s8958_s29 + $0x1f90] sm:$0xf]  ;;  %1188 = vst [vmem:[%s8962_s30 + $0x7dc] sm:$0xf] %v1187_v55 }
 0x165   : > { %1190 = vst [vmem:[%s8962_s30 + $0x7e0] sm:$0xf] %v1189_v56  ;;  %1192 = vst [vmem:[%s8962_s30 + $0x7e4] sm:$0xf] %v1191_v57  ;;  %v1193_v58 = vld [vmem:[%s8958_s29 + $0x1fa0] sm:$0xf] }
 0x166   : > { %v1195_v59 = vld [vmem:[%s8958_s29 + $0x1fb0] sm:$0xf]  ;;  %v1197_v60 = vld [vmem:[%s8958_s29 + $0x1fc0] sm:$0xf]  ;;  %1194 = vst [vmem:[%s8962_s30 + $0x7e8] sm:$0xf] %v1193_v58 }
 0x167   : > { %1196 = vst [vmem:[%s8962_s30 + $0x7ec] sm:$0xf] %v1195_v59  ;;  %1198 = vst [vmem:[%s8962_s30 + $0x7f0] sm:$0xf] %v1197_v60  ;;  %v1199_v61 = vld [vmem:[%s8958_s29 + $0x1fd0] sm:$0xf] }
 0x168   : > { %v1201_v62 = vld [vmem:[%s8958_s29 + $0x1fe0] sm:$0xf]  ;;  %v1203_v63 = vld [vmem:[%s8958_s29 + $0x1ff0] sm:$0xf]  ;;  %1200 = vst [vmem:[%s8962_s30 + $0x7f4] sm:$0xf] %v1199_v61 }
 0x169   : > { %1202 = vst [vmem:[%s8962_s30 + $0x7f8] sm:$0xf] %v1201_v62  ;;  %1204 = vst [vmem:[%s8962_s30 + $0x7fc] sm:$0xf] %v1203_v63 }
 0x16a PF: > { %p7810_p7 = scmp.ge.s32.totalorder %s8890_s17, 1  ;;  %p4340_p8 = scmp.lt.s32.totalorder %s8890_s17, 5 }
 0x16c   : > { %p4341_p9 = pnand %p7810_p7, %p4340_p8 }
 0x16d   : > { %s4347_s5 = sand.u32 (!%p4341_p9), 1, %s8882_s15   ;;  %v9992_v0 = vld [vmem:[%s10495_s0] sm:$0xff] (!%p4341_p9)  ;;  %v10002_v2 = vld [vmem:[%s10495_s0 + $0x8] sm:$0xff] (!%p4341_p9)  ;;  %p4377_p10 = scmp.lt.s32.totalorder (!%p4341_p9), %s8933_s18, 3 }
 0x16e   : > { %4344 = sbr.rel (%p4341_p9) target bundleno = 930 (0x3a2), region = 84  ;;  %v9997_v1 = vld [vmem:[%s10495_s0 + $0x80] sm:$0xff] (!%p4341_p9)  ;;  %s7811_s12 = sshll.u32 (!%p4341_p9), %s4347_s5, 11  ;;  %v10011_v4 = vld [vmem:[%s10495_s0 + $0x88] sm:$0xff] (!%p4341_p9) }
 0x16f   : > { %v7814_v3 = vcombine.high (!%p4341_p9), %v9992_v0, %v9997_v1  ;;  %v7816_v5 = vcombine.high (!%p4341_p9), %v10002_v2, %v10011_v4  ;;  %s10015_s17 = scalar_lea.vmem (!%p4341_p9), [#allocation2], %s7811_s12  ;;  %v4416_v35 = vld [vmem:[%s10495_s0 + $0x100] sm:$0xff] (!%p4341_p9)  ;;  %v4417_v38 = vld [vmem:[%s10495_s0 + $0x108] sm:$0xff] (!%p4341_p9)  ;;  %v7813_v42 = vcombine.low (!%p4341_p9), %v9992_v0, %v9997_v1  ;;  %v7815_v43 = vcombine.low (!%p4341_p9), %v10002_v2, %v10011_v4  ;;  %s7812_s20 = sshll.u32 (!%p4341_p9), %s4347_s5, 5 }
 0x170   : > { %v8610_v6 = vld [vmem:[%s10015_s17 + $0x40] sm:$0xff] (!%p4341_p9)   ;;  %v8614_v10 = vld [vmem:[%s10015_s17 + $0x48] sm:$0xff] (!%p4341_p9)   ;;  %v8618_v14 = vld [vmem:[%s10015_s17 + $0x50] sm:$0xff] (!%p4341_p9)   ;;  %s4376_s21 = scalar_lea.vmem (!%p4341_p9), [#allocation3], %s7812_s20 }
 0x171   : > { %6848 = vmatprep.mubr.bf16.mxu0 (!%p4341_p9), %v7814_v3  ;;  %v8611_v7 = vld [vmem:[%s10015_s17 + $0xc0] sm:$0xff] (!%p4341_p9)   ;;  %6897 = vmatprep.mubr.bf16.mxu1 (!%p4341_p9), %v7816_v5  ;;  %v8615_v11 = vld [vmem:[%s10015_s17 + $0xc8] sm:$0xff] (!%p4341_p9)   ;;  %v8619_v15 = vld [vmem:[%s10015_s17 + $0xd0] sm:$0xff] (!%p4341_p9)  }
 0x172   : > { %8138 = vmatprep.subr.bf16.mxu0 (!%p4341_p9), %v8610_v6  ;;  %v8612_v8 = vld [vmem:[%s10015_s17] sm:$0xff] (!%p4341_p9)   ;;  %8166 = vmatprep.subr.bf16.mxu1 (!%p4341_p9), %v8611_v7  ;;  %v8616_v12 = vld [vmem:[%s10015_s17 + $0x8] sm:$0xff] (!%p4341_p9)   ;;  %v8620_v16 = vld [vmem:[%s10015_s17 + $0x10] sm:$0xff] (!%p4341_p9)  }
 0x173   : > { %v8613_v9 = vld [vmem:[%s10015_s17 + $0x80] sm:$0xff] (!%p4341_p9)   ;;  %8139 = vmatpush3.bf16.msra.mxu0 (!%p4341_p9), %v8612_v8  ;;  %v8617_v13 = vld [vmem:[%s10015_s17 + $0x88] sm:$0xff] (!%p4341_p9)   ;;  %v8621_v17 = vld [vmem:[%s10015_s17 + $0x90] sm:$0xff] (!%p4341_p9)  }
 0x174   : > { %8167 = vmatpush3.bf16.msra.mxu1 (!%p4341_p9), %v8613_v9  ;;  %8140 = vmatprep.subr.bf16.mxu0 (!%p4341_p9), %v8614_v10  ;;  %v8622_v18 = vld [vmem:[%s10015_s17 + $0x58] sm:$0xff] (!%p4341_p9)   ;;  %v8626_v22 = vld [vmem:[%s10015_s17 + $0x60] sm:$0xff] (!%p4341_p9)   ;;  %v8630_v26 = vld [vmem:[%s10015_s17 + $0x68] sm:$0xff] (!%p4341_p9)  }
 0x175   : > { %8168 = vmatprep.subr.bf16.mxu1 %v8615_v11  ;;  %v8623_v19 = vld [vmem:[%s10015_s17 + $0xd8] sm:$0xff]   ;;  %v8627_v23 = vld [vmem:[%s10015_s17 + $0xe0] sm:$0xff]   ;;  %v8631_v27 = vld [vmem:[%s10015_s17 + $0xe8] sm:$0xff]   ;;  %s4378_s8 = scalar_select %p4377_p10, %s8933_s18, 3 }
 0x176   : > { %v8624_v20 = vld [vmem:[%s10015_s17 + $0x18] sm:$0xff]   ;;  %v8628_v24 = vld [vmem:[%s10015_s17 + $0x20] sm:$0xff]   ;;  %v8632_v28 = vld [vmem:[%s10015_s17 + $0x28] sm:$0xff]   ;;  %s8135_s15 = sshll.u32 (%p8948_p5), %s8933_s18, 3 }
 0x177   : > { %8141 = vmatpush3.bf16.msra.mxu0 %v8616_v12  ;;  %v8625_v21 = vld [vmem:[%s10015_s17 + $0x98] sm:$0xff]   ;;  %v8629_v25 = vld [vmem:[%s10015_s17 + $0xa0] sm:$0xff]   ;;  %v8633_v29 = vld [vmem:[%s10015_s17 + $0xa8] sm:$0xff]   ;;  %s4379_s11 = scalar_lea.vmem %s10497_s2, %s4378_s8  ;;  %s4382_s14 = scalar_lea.vmem %s10498_s3, %s4378_s8 }
 0x178   : > { %8169 = vmatpush3.bf16.msra.mxu1 %v8617_v13  ;;  %8142 = vmatprep.subr.bf16.mxu0 %v8618_v14  ;;  %v8634_v30 = vld [vmem:[%s10015_s17 + $0x70] sm:$0xff]   ;;  %v8638_v34 = vld [vmem:[%s10015_s17 + $0x78] sm:$0xff]   ;;  %v4432_v36 = vld [vmem:[%s10495_s0 + $0x180] sm:$0xff]  ;;  %s7677_s25 = scalar_lea.vmem (%p8948_p5), %s10499_s4, %s8135_s15 }
 0x179   : > { %8170 = vmatprep.subr.bf16.mxu1 %v8619_v15  ;;  %v8635_v31 = vld [vmem:[%s10015_s17 + $0xf0] sm:$0xff]   ;;  %v8639_v37 = vld [vmem:[%s10015_s17 + $0xf8] sm:$0xff]   ;;  %v4433_v39 = vld [vmem:[%s10495_s0 + $0x188] sm:$0xff]  ;;  %v7846_v46 = vcombine.high %v4416_v35, %v4432_v36  ;;  %v7845_v54 = vcombine.low %v4416_v35, %v4432_v36 }
 0x17a   : > { %v8636_v32 = vld [vmem:[%s10015_s17 + $0x30] sm:$0xff]   ;;  %v8640_v40 = vld [vmem:[%s10015_s17 + $0x38] sm:$0xff]   ;;  %v8642_v44 = vld [vmem:[%s10015_s17 + $0x140] sm:$0xff]   ;;  %v7848_v48 = vcombine.high %v4417_v38, %v4433_v39  ;;  %v7847_v56 = vcombine.low %v4417_v38, %v4433_v39 }
 0x17b   : > { %8143 = vmatpush3.bf16.msra.mxu0 %v8620_v16  ;;  %v8637_v33 = vld [vmem:[%s10015_s17 + $0xb0] sm:$0xff]   ;;  %v8641_v41 = vld [vmem:[%s10015_s17 + $0xb8] sm:$0xff]   ;;  %v8643_v45 = vld [vmem:[%s10015_s17 + $0x1c0] sm:$0xff]  }
 0x17c   : > { %8171 = vmatpush3.bf16.msra.mxu1 %v8621_v17  ;;  %8144 = vmatprep.subr.bf16.mxu0 %v8622_v18  ;;  %v8644_v47 = vld [vmem:[%s10015_s17 + $0x100] sm:$0xff]   ;;  %v8646_v50 = vld [vmem:[%s10015_s17 + $0x148] sm:$0xff]   ;;  %v8650_v55 = vld [vmem:[%s10015_s17 + $0x150] sm:$0xff]  }
 0x17d   : > { %8172 = vmatprep.subr.bf16.mxu1 %v8623_v19  ;;  %v8645_v49 = vld [vmem:[%s10015_s17 + $0x180] sm:$0xff]   ;;  %v8647_v51 = vld [vmem:[%s10015_s17 + $0x1c8] sm:$0xff]   ;;  %v8651_v57 = vld [vmem:[%s10015_s17 + $0x1d0] sm:$0xff]  }
 0x17e   : > { %v8648_v52 = vld [vmem:[%s10015_s17 + $0x108] sm:$0xff]   ;;  %v8652_v58 = vld [vmem:[%s10015_s17 + $0x110] sm:$0xff]   ;;  %v8654_v60 = vld [vmem:[%s10015_s17 + $0x158] sm:$0xff]  }
 0x17f   : > { %8145 = vmatpush3.bf16.msra.mxu0 %v8624_v20  ;;  %v8649_v53 = vld [vmem:[%s10015_s17 + $0x188] sm:$0xff]   ;;  %v8653_v59 = vld [vmem:[%s10015_s17 + $0x190] sm:$0xff]   ;;  %v8655_v61 = vld [vmem:[%s10015_s17 + $0x1d8] sm:$0xff]  }
 0x180   : > { %8173 = vmatpush3.bf16.msra.mxu1 %v8625_v21  ;;  %8146 = vmatprep.subr.bf16.mxu0 %v8626_v22  ;;  %v8656_v62 = vld [vmem:[%s10015_s17 + $0x118] sm:$0xff]   ;;  %v8658_v0 = vld [vmem:[%s10015_s17 + $0x160] sm:$0xff]   ;;  %v8662_v4 = vld [vmem:[%s10015_s17 + $0x168] sm:$0xff]  }
 0x181   : > { %8174 = vmatprep.subr.bf16.mxu1 %v8627_v23  ;;  %v8657_v63 = vld [vmem:[%s10015_s17 + $0x198] sm:$0xff]   ;;  %v8659_v1 = vld [vmem:[%s10015_s17 + $0x1e0] sm:$0xff]   ;;  %v8663_v5 = vld [vmem:[%s10015_s17 + $0x1e8] sm:$0xff]  }
 0x182   : > { %v8660_v2 = vld [vmem:[%s10015_s17 + $0x120] sm:$0xff]   ;;  %v8664_v6 = vld [vmem:[%s10015_s17 + $0x128] sm:$0xff]   ;;  %v8666_v8 = vld [vmem:[%s10015_s17 + $0x170] sm:$0xff]  }
 0x183   : > { %8147 = vmatpush3.bf16.msra.mxu0 %v8628_v24  ;;  %v8661_v3 = vld [vmem:[%s10015_s17 + $0x1a0] sm:$0xff]   ;;  %v8665_v7 = vld [vmem:[%s10015_s17 + $0x1a8] sm:$0xff]   ;;  %v8667_v9 = vld [vmem:[%s10015_s17 + $0x1f0] sm:$0xff]  }
 0x184   : > { %8175 = vmatpush3.bf16.msra.mxu1 %v8629_v25  ;;  %8148 = vmatprep.subr.bf16.mxu0 %v8630_v26  ;;  %v8668_v10 = vld [vmem:[%s10015_s17 + $0x130] sm:$0xff]   ;;  %v8670_v12 = vld [vmem:[%s10015_s17 + $0x178] sm:$0xff]   ;;  %v8674_v24 = vld [vmem:[%s10015_s17 + $0x240] sm:$0xff]  }
 0x185   : > { %8176 = vmatprep.subr.bf16.mxu1 %v8631_v27  ;;  %v8669_v11 = vld [vmem:[%s10015_s17 + $0x1b0] sm:$0xff]   ;;  %v8671_v14 = vld [vmem:[%s10015_s17 + $0x1f8] sm:$0xff]   ;;  %v8675_v25 = vld [vmem:[%s10015_s17 + $0x2c0] sm:$0xff]  }
 0x186   : > { %v4386_v13 = vld [vmem:[%s10495_s0 + $0x10] sm:$0xff]  ;;  %v8672_v15 = vld [vmem:[%s10015_s17 + $0x138] sm:$0xff]   ;;  %v8676_v26 = vld [vmem:[%s10015_s17 + $0x200] sm:$0xff]  }
 0x187   : > { %8149 = vmatpush3.bf16.msra.mxu0 %v8632_v28  ;;  %v8673_v16 = vld [vmem:[%s10015_s17 + $0x1b8] sm:$0xff]   ;;  %v4402_v17 = vld [vmem:[%s10495_s0 + $0x90] sm:$0xff]  ;;  %v8677_v27 = vld [vmem:[%s10015_s17 + $0x280] sm:$0xff]  }
 0x188   : > { %8177 = vmatpush3.bf16.msra.mxu1 %v8633_v29  ;;  %8150 = vmatprep.subr.bf16.mxu0 %v8634_v30  ;;  %v4387_v18 = vld [vmem:[%s10495_s0 + $0x18] sm:$0xff]  ;;  %v7817_v20 = vcombine.low %v4386_v13, %v4402_v17  ;;  %v7818_v21 = vcombine.high %v4386_v13, %v4402_v17  ;;  %v8678_v28 = vld [vmem:[%s10015_s17 + $0x248] sm:$0xff]   ;;  %v8682_v36 = vld [vmem:[%s10015_s17 + $0x250] sm:$0xff]  }
 0x189   : > { %8178 = vmatprep.subr.bf16.mxu1 %v8635_v31  ;;  %v4403_v19 = vld [vmem:[%s10495_s0 + $0x98] sm:$0xff]  ;;  %v8679_v29 = vld [vmem:[%s10015_s17 + $0x2c8] sm:$0xff]   ;;  %v4436_v17 = vld [vmem:[%s10495_s0 + $0x1a0] sm:$0xff] }
 0x18a   : > { %v7819_v22 = vcombine.low %v4387_v18, %v4403_v19  ;;  %v7820_v23 = vcombine.high %v4387_v18, %v4403_v19  ;;  %v8680_v30 = vld [vmem:[%s10015_s17 + $0x208] sm:$0xff]   ;;  %v4419_v38 = vld [vmem:[%s10495_s0 + $0x118] sm:$0xff] }
 0x18b   : > { %8151 = vmatpush3.bf16.msra.mxu0 %v8636_v32  ;;  %v8681_v31 = vld [vmem:[%s10015_s17 + $0x288] sm:$0xff]   ;;  %v4418_v32 = vld [vmem:[%s10495_s0 + $0x110] sm:$0xff]  ;;  %v4435_v39 = vld [vmem:[%s10495_s0 + $0x198] sm:$0xff] }
 0x18c   : > { %8179 = vmatpush3.bf16.msra.mxu1 %v8637_v33  ;;  %8152 = vmatprep.subr.bf16.mxu0 %v8638_v34  ;;  %v4434_v33 = vld [vmem:[%s10495_s0 + $0x190] sm:$0xff]  ;;  %v8711_v13 = vld [vmem:[%s10015_s17 + $0x3c8] sm:$0xff]  }
 0x18d   : > { %8180 = vmatprep.subr.bf16.mxu1 %v8639_v37  ;;  %v7850_v34 = vcombine.high %v4418_v32, %v4434_v33  ;;  %v7849_v35 = vcombine.low %v4418_v32, %v4434_v33  ;;  %v8683_v37 = vld [vmem:[%s10015_s17 + $0x2d0] sm:$0xff]   ;;  %v8722_v32 = vld [vmem:[%s10015_s17 + $0x360] sm:$0xff]  }
 0x18e   : > { %v8723_v33 = vld [vmem:[%s10015_s17 + $0x3e0] sm:$0xff]  }
 0x18f   : > { %8153 = vmatpush3.bf16.msra.mxu0 %v8640_v40  ;;  %v7852_v40 = vcombine.high %v4419_v38, %v4435_v39 }
 0x190   : > { %8181 = vmatpush3.bf16.msra.mxu1 %v8641_v41  ;;  %8194 = vmatprep.subr.bf16.mxu0 %v8642_v44  ;;  %v8684_v41 = vld [vmem:[%s10015_s17 + $0x210] sm:$0xff]   ;;  %v8686_v44 = vld [vmem:[%s10015_s17 + $0x258] sm:$0xff]  }
 0x191   : > { %8222 = vmatprep.subr.bf16.mxu1 %v8643_v45  ;;  %v8687_v45 = vld [vmem:[%s10015_s17 + $0x2d8] sm:$0xff]  }
 0x192   : > { %6849 = vmatmul.mubr.bf16.vlgmr.msra.gmra.mrb[0].mxu0 %v7813_v42  ;;  %v7851_v42 = vcombine.low %v4419_v38, %v4435_v39  ;;  %v8728_v38 = vld [vmem:[%s10015_s17 + $0x328] sm:$0xff]  }
 0x193   : > { %6898 = vmatmul.mubr.bf16.vlgmr.msra.gmra.mrb[0].mxu1 %v7815_v43  ;;  %8195 = vmatpush3.bf16.msra.mxu0 %v8644_v47  ;;  %v8685_v43 = vld [vmem:[%s10015_s17 + $0x290] sm:$0xff]   ;;  %v8689_v47 = vld [vmem:[%s10015_s17 + $0x298] sm:$0xff]   ;;  %v8729_v39 = vld [vmem:[%s10015_s17 + $0x3a8] sm:$0xff]  }
 0x194   : > { %8223 = vmatpush3.bf16.msra.mxu1 %v8645_v49  ;;  %6856 = vmatprep.mubr.bf16.mxu0 %v7846_v46  ;;  %v8688_v46 = vld [vmem:[%s10015_s17 + $0x218] sm:$0xff]   ;;  %v8691_v49 = vld [vmem:[%s10015_s17 + $0x2e0] sm:$0xff]  }
 0x195   : > { %8196 = vmatprep.subr.bf16.mxu0 %v8646_v50  ;;  %6905 = vmatprep.mubr.bf16.mxu1 %v7848_v48  ;;  %v8690_v48 = vld [vmem:[%s10015_s17 + $0x260] sm:$0xff]  }
 0x196   : > { %8224 = vmatprep.subr.bf16.mxu1 %v8647_v51  ;;  %v8692_v50 = vld [vmem:[%s10015_s17 + $0x220] sm:$0xff]  }
 0x197   : > { %8197 = vmatpush3.bf16.msra.mxu0 %v8648_v52  ;;  %v8693_v51 = vld [vmem:[%s10015_s17 + $0x2a0] sm:$0xff]   ;;  %v8694_v52 = vld [vmem:[%s10015_s17 + $0x268] sm:$0xff]  }
 0x198   : > { %8225 = vmatpush3.bf16.msra.mxu1 %v8649_v53  ;;  %8198 = vmatprep.subr.bf16.mxu0 %v8650_v55  ;;  %v8695_v53 = vld [vmem:[%s10015_s17 + $0x2e8] sm:$0xff]  }
 0x199   : > { %8226 = vmatprep.subr.bf16.mxu1 %v8651_v57  ;;  %v8697_v55 = vld [vmem:[%s10015_s17 + $0x2a8] sm:$0xff]   ;;  %v8699_v57 = vld [vmem:[%s10015_s17 + $0x2f0] sm:$0xff]  }
 0x19a   : > { %6857 = vmatmul.mubr.bf16.gmra.mrb[4].mxu0 %v7845_v54  ;;  %v8696_v54 = vld [vmem:[%s10015_s17 + $0x228] sm:$0xff]  }
 0x19b   : > { %8199 = vmatpush3.bf16.msra.mxu0 %v8652_v58  ;;  %6906 = vmatmul.mubr.bf16.gmra.mrb[4].mxu1 %v7847_v56  ;;  %v8698_v56 = vld [vmem:[%s10015_s17 + $0x270] sm:$0xff]  }
 0x19c   : > { %8227 = vmatpush3.bf16.msra.mxu1 %v8653_v59  ;;  %8200 = vmatprep.subr.bf16.mxu0 %v8654_v60  ;;  %v8700_v58 = vld [vmem:[%s10015_s17 + $0x230] sm:$0xff]   ;;  %v8702_v60 = vld [vmem:[%s10015_s17 + $0x278] sm:$0xff]  }
 0x19d   : > { %8228 = vmatprep.subr.bf16.mxu1 %v8655_v61  ;;  %6946 = vmatprep.mubr.bf16.mxu0 %v7818_v21  ;;  %v8701_v59 = vld [vmem:[%s10015_s17 + $0x2b0] sm:$0xff]   ;;  %v8703_v61 = vld [vmem:[%s10015_s17 + $0x2f8] sm:$0xff]  }
 0x19e   : > { %6995 = vmatprep.mubr.bf16.mxu1 %v7820_v23  ;;  %v8715_v21 = vld [vmem:[%s10015_s17 + $0x3d0] sm:$0xff]   ;;  %v4437_v23 = vld [vmem:[%s10495_s0 + $0x1a8] sm:$0xff] }
 0x19f   : > { %8201 = vmatpush3.bf16.msra.mxu0 %v8656_v62  ;;  %v8704_v62 = vld [vmem:[%s10015_s17 + $0x238] sm:$0xff]  }
 0x1a0   : > { %8229 = vmatpush3.bf16.msra.mxu1 %v8657_v63  ;;  %8202 = vmatprep.subr.bf16.mxu0 %v8658_v0  ;;  %v8705_v63 = vld [vmem:[%s10015_s17 + $0x2b8] sm:$0xff]   ;;  %v4388_v0 = vld [vmem:[%s10495_s0 + $0x20] sm:$0xff] }
 0x1a1   : > { %8230 = vmatprep.subr.bf16.mxu1 %v8659_v1  ;;  %v4404_v1 = vld [vmem:[%s10495_s0 + $0xa0] sm:$0xff] }
 0x1a3   : > { %8203 = vmatpush3.bf16.msra.mxu0 %v8660_v2  ;;  %v7821_v2 = vcombine.low %v4388_v0, %v4404_v1 }
 0x1a4   : > { %8231 = vmatpush3.bf16.msra.mxu1 %v8661_v3  ;;  %8204 = vmatprep.subr.bf16.mxu0 %v8662_v4  ;;  %v7822_v3 = vcombine.high %v4388_v0, %v4404_v1  ;;  %v4389_v4 = vld [vmem:[%s10495_s0 + $0x28] sm:$0xff]  ;;  %v4422_v0 = vld [vmem:[%s10495_s0 + $0x130] sm:$0xff] }
 0x1a5   : > { %8232 = vmatprep.subr.bf16.mxu1 %v8663_v5  ;;  %v4405_v5 = vld [vmem:[%s10495_s0 + $0xa8] sm:$0xff]  ;;  %v4438_v1 = vld [vmem:[%s10495_s0 + $0x1b0] sm:$0xff] }
 0x1a7   : > { %8205 = vmatpush3.bf16.msra.mxu0 %v8664_v6  ;;  %v7823_v6 = vcombine.low %v4389_v4, %v4405_v5 }
 0x1a8   : > { %8233 = vmatpush3.bf16.msra.mxu1 %v8665_v7  ;;  %8206 = vmatprep.subr.bf16.mxu0 %v8666_v8  ;;  %v7824_v7 = vcombine.high %v4389_v4, %v4405_v5  ;;  %v8706_v8 = vld [vmem:[%s10015_s17 + $0x340] sm:$0xff]   ;;  %v8746_v4 = vld [vmem:[%s10015_s17 + $0x450] sm:$0xff]  }
 0x1a9   : > { %8234 = vmatprep.subr.bf16.mxu1 %v8667_v9  ;;  %v8707_v9 = vld [vmem:[%s10015_s17 + $0x3c0] sm:$0xff]   ;;  %v8747_v5 = vld [vmem:[%s10015_s17 + $0x4d0] sm:$0xff]  }
 0x1ab   : > { %8207 = vmatpush3.bf16.msra.mxu0 %v8668_v10  ;;  %v8708_v10 = vld [vmem:[%s10015_s17 + $0x300] sm:$0xff]  }
 0x1ac   : > { %8235 = vmatpush3.bf16.msra.mxu1 %v8669_v11  ;;  %8208 = vmatprep.subr.bf16.mxu0 %v8670_v12  ;;  %v8709_v11 = vld [vmem:[%s10015_s17 + $0x380] sm:$0xff]   ;;  %v8710_v12 = vld [vmem:[%s10015_s17 + $0x348] sm:$0xff]  }
 0x1ad   : > { %8236 = vmatprep.subr.bf16.mxu1 %v8671_v14  ;;  %v8712_v14 = vld [vmem:[%s10015_s17 + $0x308] sm:$0xff]  }
 0x1af   : > { %8209 = vmatpush3.bf16.msra.mxu0 %v8672_v15  ;;  %v8713_v15 = vld [vmem:[%s10015_s17 + $0x388] sm:$0xff]  }
 0x1b0   : > { %8237 = vmatpush3.bf16.msra.mxu1 %v8673_v16  ;;  %8250 = vmatprep.subr.bf16.mxu0 %v8674_v24  ;;  %v4420_v16 = vld [vmem:[%s10495_s0 + $0x120] sm:$0xff] }
 0x1b1   : > { %8278 = vmatprep.subr.bf16.mxu1 %v8675_v25  ;;  %v7854_v18 = vcombine.high %v4420_v16, %v4436_v17  ;;  %v7853_v19 = vcombine.low %v4420_v16, %v4436_v17  ;;  %v8716_v25 = vld [vmem:[%s10015_s17 + $0x310] sm:$0xff]   ;;  %v8754_v16 = vld [vmem:[%s10015_s17 + $0x460] sm:$0xff]  }
 0x1b2   : > { %6947 = vmatmul.mubr.bf16.vlgmr.msra.gmra.mrb[8].mxu0 %v7817_v20  ;;  %v8714_v20 = vld [vmem:[%s10015_s17 + $0x350] sm:$0xff]   ;;  %v8755_v17 = vld [vmem:[%s10015_s17 + $0x4e0] sm:$0xff]  }
 0x1b3   : > { %6996 = vmatmul.mubr.bf16.vlgmr.msra.gmra.mrb[8].mxu1 %v7819_v22  ;;  %8251 = vmatpush3.bf16.msra.mxu0 %v8676_v26  ;;  %v4421_v22 = vld [vmem:[%s10495_s0 + $0x128] sm:$0xff] }
 0x1b4   : > { %8279 = vmatpush3.bf16.msra.mxu1 %v8677_v27  ;;  %8252 = vmatprep.subr.bf16.mxu0 %v8678_v28  ;;  %v7856_v24 = vcombine.high %v4421_v22, %v4437_v23  ;;  %v7855_v26 = vcombine.low %v4421_v22, %v4437_v23  ;;  %v8717_v27 = vld [vmem:[%s10015_s17 + $0x390] sm:$0xff]   ;;  %v8718_v28 = vld [vmem:[%s10015_s17 + $0x358] sm:$0xff]   ;;  %v8760_v22 = vld [vmem:[%s10015_s17 + $0x428] sm:$0xff]  }
 0x1b5   : > { %8280 = vmatprep.subr.bf16.mxu1 %v8679_v29  ;;  %6954 = vmatprep.mubr.bf16.mxu0 %v7850_v34  ;;  %v8719_v29 = vld [vmem:[%s10015_s17 + $0x3d8] sm:$0xff]   ;;  %v8724_v34 = vld [vmem:[%s10015_s17 + $0x320] sm:$0xff]   ;;  %v8761_v23 = vld [vmem:[%s10015_s17 + $0x4a8] sm:$0xff]  }
 0x1b6   : > { %7003 = vmatprep.mubr.bf16.mxu1 %v7852_v40  ;;  %v8730_v40 = vld [vmem:[%s10015_s17 + $0x370] sm:$0xff]  }
 0x1b7   : > { %8253 = vmatpush3.bf16.msra.mxu0 %v8680_v30  ;;  %v8720_v30 = vld [vmem:[%s10015_s17 + $0x318] sm:$0xff]  }
 0x1b8   : > { %8281 = vmatpush3.bf16.msra.mxu1 %v8681_v31  ;;  %8254 = vmatprep.subr.bf16.mxu0 %v8682_v36  ;;  %v8721_v31 = vld [vmem:[%s10015_s17 + $0x398] sm:$0xff]   ;;  %v8726_v36 = vld [vmem:[%s10015_s17 + $0x368] sm:$0xff]  }
 0x1b9   : > { %8282 = vmatprep.subr.bf16.mxu1 %v8683_v37  ;;  %v8727_v37 = vld [vmem:[%s10015_s17 + $0x3e8] sm:$0xff]  }
 0x1ba   : > { %6955 = vmatmul.mubr.bf16.gmra.mrb[12].mxu0 %v7849_v35  ;;  %v8725_v35 = vld [vmem:[%s10015_s17 + $0x3a0] sm:$0xff]  }
 0x1bb   : > { %8255 = vmatpush3.bf16.msra.mxu0 %v8684_v41  ;;  %7004 = vmatmul.mubr.bf16.gmra.mrb[12].mxu1 %v7851_v42  ;;  %v8731_v41 = vld [vmem:[%s10015_s17 + $0x3f0] sm:$0xff]  }
 0x1bc   : > { %8283 = vmatpush3.bf16.msra.mxu1 %v8685_v43  ;;  %8256 = vmatprep.subr.bf16.mxu0 %v8686_v44  ;;  %v8732_v42 = vld [vmem:[%s10015_s17 + $0x330] sm:$0xff]   ;;  %v8734_v44 = vld [vmem:[%s10015_s17 + $0x378] sm:$0xff]  }
 0x1bd   : > { %8284 = vmatprep.subr.bf16.mxu1 %v8687_v45  ;;  %7044 = vmatprep.mubr.bf16.mxu0 %v7822_v3  ;;  %v8733_v43 = vld [vmem:[%s10015_s17 + $0x3b0] sm:$0xff]   ;;  %v8735_v45 = vld [vmem:[%s10015_s17 + $0x3f8] sm:$0xff]   ;;  %v7857_v3 = vcombine.low %v4422_v0, %v4438_v1 }
 0x1be   : > { %7093 = vmatprep.mubr.bf16.mxu1 %v7824_v7  ;;  %v4439_v7 = vld [vmem:[%s10495_s0 + $0x1b8] sm:$0xff] }
 0x1bf   : > { %8257 = vmatpush3.bf16.msra.mxu0 %v8688_v46  ;;  %v8736_v46 = vld [vmem:[%s10015_s17 + $0x338] sm:$0xff]  }
 0x1c0   : > { %8285 = vmatpush3.bf16.msra.mxu1 %v8689_v47  ;;  %8258 = vmatprep.subr.bf16.mxu0 %v8690_v48  ;;  %v8737_v47 = vld [vmem:[%s10015_s17 + $0x3b8] sm:$0xff]   ;;  %v4390_v48 = vld [vmem:[%s10495_s0 + $0x30] sm:$0xff] }
 0x1c1   : > { %8286 = vmatprep.subr.bf16.mxu1 %v8691_v49  ;;  %v4406_v49 = vld [vmem:[%s10495_s0 + $0xb0] sm:$0xff] }
 0x1c3   : > { %8259 = vmatpush3.bf16.msra.mxu0 %v8692_v50  ;;  %v4391_v50 = vld [vmem:[%s10495_s0 + $0x38] sm:$0xff] }
 0x1c4   : > { %8287 = vmatpush3.bf16.msra.mxu1 %v8693_v51  ;;  %8260 = vmatprep.subr.bf16.mxu0 %v8694_v52  ;;  %v7825_v51 = vcombine.low %v4390_v48, %v4406_v49  ;;  %v7826_v52 = vcombine.high %v4390_v48, %v4406_v49  ;;  %v4424_v48 = vld [vmem:[%s10495_s0 + $0x140] sm:$0xff] }
 0x1c5   : > { %8288 = vmatprep.subr.bf16.mxu1 %v8695_v53  ;;  %v4407_v53 = vld [vmem:[%s10495_s0 + $0xb8] sm:$0xff]  ;;  %v4440_v49 = vld [vmem:[%s10495_s0 + $0x1c0] sm:$0xff] }
 0x1c7   : > { %8261 = vmatpush3.bf16.msra.mxu0 %v8696_v54  ;;  %v7827_v54 = vcombine.low %v4391_v50, %v4407_v53 }
 0x1c8   : > { %8289 = vmatpush3.bf16.msra.mxu1 %v8697_v55  ;;  %8262 = vmatprep.subr.bf16.mxu0 %v8698_v56  ;;  %v7828_v55 = vcombine.high %v4391_v50, %v4407_v53  ;;  %v8738_v56 = vld [vmem:[%s10015_s17 + $0x440] sm:$0xff]   ;;  %v7862_v50 = vcombine.high %v4424_v48, %v4440_v49  ;;  %v8779_v53 = vld [vmem:[%s10015_s17 + $0x5d0] sm:$0xff]  }
 0x1c9   : > { %8290 = vmatprep.subr.bf16.mxu1 %v8699_v57  ;;  %v8739_v57 = vld [vmem:[%s10015_s17 + $0x4c0] sm:$0xff]  }
 0x1cb   : > { %8263 = vmatpush3.bf16.msra.mxu0 %v8700_v58  ;;  %v8740_v58 = vld [vmem:[%s10015_s17 + $0x400] sm:$0xff]  }
 0x1cc   : > { %8291 = vmatpush3.bf16.msra.mxu1 %v8701_v59  ;;  %8264 = vmatprep.subr.bf16.mxu0 %v8702_v60  ;;  %v8741_v59 = vld [vmem:[%s10015_s17 + $0x480] sm:$0xff]   ;;  %v8742_v60 = vld [vmem:[%s10015_s17 + $0x448] sm:$0xff]  }
 0x1cd   : > { %8292 = vmatprep.subr.bf16.mxu1 %v8703_v61  ;;  %v8743_v61 = vld [vmem:[%s10015_s17 + $0x4c8] sm:$0xff]  }
 0x1cf   : > { %8265 = vmatpush3.bf16.msra.mxu0 %v8704_v62  ;;  %v8744_v62 = vld [vmem:[%s10015_s17 + $0x408] sm:$0xff]  }
 0x1d0   : > { %8293 = vmatpush3.bf16.msra.mxu1 %v8705_v63  ;;  %8306 = vmatprep.subr.bf16.mxu0 %v8706_v8  ;;  %v8745_v63 = vld [vmem:[%s10015_s17 + $0x488] sm:$0xff]  }
 0x1d1   : > { %8334 = vmatprep.subr.bf16.mxu1 %v8707_v9  ;;  %v8748_v9 = vld [vmem:[%s10015_s17 + $0x410] sm:$0xff]  }
 0x1d2   : > { %7045 = vmatmul.mubr.bf16.vlgmr.msra.gmra.mrb[16].mxu0 %v7821_v2  ;;  %v7858_v2 = vcombine.high %v4422_v0, %v4438_v1  ;;  %v8786_v0 = vld [vmem:[%s10015_s17 + $0x560] sm:$0xff]  }
 0x1d3   : > { %7094 = vmatmul.mubr.bf16.vlgmr.msra.gmra.mrb[16].mxu1 %v7823_v6  ;;  %8307 = vmatpush3.bf16.msra.mxu0 %v8708_v10  ;;  %v4423_v6 = vld [vmem:[%s10495_s0 + $0x138] sm:$0xff]  ;;  %v8787_v1 = vld [vmem:[%s10015_s17 + $0x5e0] sm:$0xff]  }
 0x1d4   : > { %8335 = vmatpush3.bf16.msra.mxu1 %v8709_v11  ;;  %8308 = vmatprep.subr.bf16.mxu0 %v8710_v12  ;;  %v7860_v8 = vcombine.high %v4423_v6, %v4439_v7  ;;  %v7859_v10 = vcombine.low %v4423_v6, %v4439_v7  ;;  %v8749_v11 = vld [vmem:[%s10015_s17 + $0x490] sm:$0xff]   ;;  %v8750_v12 = vld [vmem:[%s10015_s17 + $0x458] sm:$0xff]   ;;  %v8792_v6 = vld [vmem:[%s10015_s17 + $0x528] sm:$0xff]  }
 0x1d5   : > { %8336 = vmatprep.subr.bf16.mxu1 %v8711_v13  ;;  %7052 = vmatprep.mubr.bf16.mxu0 %v7854_v18  ;;  %v8751_v13 = vld [vmem:[%s10015_s17 + $0x4d8] sm:$0xff]   ;;  %v8756_v18 = vld [vmem:[%s10015_s17 + $0x420] sm:$0xff]   ;;  %v8793_v7 = vld [vmem:[%s10015_s17 + $0x5a8] sm:$0xff]  }
 0x1d6   : > { %7101 = vmatprep.mubr.bf16.mxu1 %v7856_v24  ;;  %v8762_v24 = vld [vmem:[%s10015_s17 + $0x470] sm:$0xff]  }
 0x1d7   : > { %8309 = vmatpush3.bf16.msra.mxu0 %v8712_v14  ;;  %v8752_v14 = vld [vmem:[%s10015_s17 + $0x418] sm:$0xff]  }
 0x1d8   : > { %8337 = vmatpush3.bf16.msra.mxu1 %v8713_v15  ;;  %8310 = vmatprep.subr.bf16.mxu0 %v8714_v20  ;;  %v8753_v15 = vld [vmem:[%s10015_s17 + $0x498] sm:$0xff]   ;;  %v8758_v20 = vld [vmem:[%s10015_s17 + $0x468] sm:$0xff]  }
 0x1d9   : > { %8338 = vmatprep.subr.bf16.mxu1 %v8715_v21  ;;  %v8759_v21 = vld [vmem:[%s10015_s17 + $0x4e8] sm:$0xff]  }
 0x1da   : > { %7053 = vmatmul.mubr.bf16.gmra.mrb[20].mxu0 %v7853_v19  ;;  %v8757_v19 = vld [vmem:[%s10015_s17 + $0x4a0] sm:$0xff]  }
 0x1db   : > { %8311 = vmatpush3.bf16.msra.mxu0 %v8716_v25  ;;  %7102 = vmatmul.mubr.bf16.gmra.mrb[20].mxu1 %v7855_v26  ;;  %v8763_v25 = vld [vmem:[%s10015_s17 + $0x4f0] sm:$0xff]  }
 0x1dc   : > { %8339 = vmatpush3.bf16.msra.mxu1 %v8717_v27  ;;  %8312 = vmatprep.subr.bf16.mxu0 %v8718_v28  ;;  %v8764_v26 = vld [vmem:[%s10015_s17 + $0x430] sm:$0xff]   ;;  %v8766_v28 = vld [vmem:[%s10015_s17 + $0x478] sm:$0xff]  }
 0x1dd   : > { %8340 = vmatprep.subr.bf16.mxu1 %v8719_v29  ;;  %7142 = vmatprep.mubr.bf16.mxu0 %v7826_v52  ;;  %v8765_v27 = vld [vmem:[%s10015_s17 + $0x4b0] sm:$0xff]   ;;  %v8767_v29 = vld [vmem:[%s10015_s17 + $0x4f8] sm:$0xff]  }
 0x1de   : > { %7191 = vmatprep.mubr.bf16.mxu1 %v7828_v55  ;;  %v8778_v52 = vld [vmem:[%s10015_s17 + $0x550] sm:$0xff]   ;;  %v4441_v55 = vld [vmem:[%s10495_s0 + $0x1c8] sm:$0xff] }
 0x1df   : > { %8313 = vmatpush3.bf16.msra.mxu0 %v8720_v30  ;;  %v8768_v30 = vld [vmem:[%s10015_s17 + $0x438] sm:$0xff]  }
 0x1e0   : > { %8341 = vmatpush3.bf16.msra.mxu1 %v8721_v31  ;;  %8314 = vmatprep.subr.bf16.mxu0 %v8722_v32  ;;  %v8769_v31 = vld [vmem:[%s10015_s17 + $0x4b8] sm:$0xff]   ;;  %v4392_v32 = vld [vmem:[%s10495_s0 + $0x40] sm:$0xff] }
 0x1e1   : > { %8342 = vmatprep.subr.bf16.mxu1 %v8723_v33  ;;  %v4408_v33 = vld [vmem:[%s10495_s0 + $0xc0] sm:$0xff] }
 0x1e3   : > { %8315 = vmatpush3.bf16.msra.mxu0 %v8724_v34  ;;  %v4393_v34 = vld [vmem:[%s10495_s0 + $0x48] sm:$0xff] }
 0x1e4   : > { %8343 = vmatpush3.bf16.msra.mxu1 %v8725_v35  ;;  %8316 = vmatprep.subr.bf16.mxu0 %v8726_v36  ;;  %v4409_v35 = vld [vmem:[%s10495_s0 + $0xc8] sm:$0xff]  ;;  %v7829_v36 = vcombine.low %v4392_v32, %v4408_v33 }
 0x1e5   : > { %8344 = vmatprep.subr.bf16.mxu1 %v8727_v37  ;;  %v7830_v37 = vcombine.high %v4392_v32, %v4408_v33  ;;  %v4426_v32 = vld [vmem:[%s10495_s0 + $0x150] sm:$0xff] }
 0x1e6   : > { %v4442_v33 = vld [vmem:[%s10495_s0 + $0x1d0] sm:$0xff] }
 0x1e7   : > { %8317 = vmatpush3.bf16.msra.mxu0 %v8728_v38  ;;  %v7831_v38 = vcombine.low %v4393_v34, %v4409_v35 }
 0x1e8   : > { %8345 = vmatpush3.bf16.msra.mxu1 %v8729_v39  ;;  %8318 = vmatprep.subr.bf16.mxu0 %v8730_v40  ;;  %v7832_v39 = vcombine.high %v4393_v34, %v4409_v35  ;;  %v8770_v40 = vld [vmem:[%s10015_s17 + $0x540] sm:$0xff]   ;;  %v7866_v34 = vcombine.high %v4426_v32, %v4442_v33  ;;  %v7865_v35 = vcombine.low %v4426_v32, %v4442_v33 }
 0x1e9   : > { %8346 = vmatprep.subr.bf16.mxu1 %v8731_v41  ;;  %v8771_v41 = vld [vmem:[%s10015_s17 + $0x5c0] sm:$0xff]  }
 0x1eb   : > { %8319 = vmatpush3.bf16.msra.mxu0 %v8732_v42  ;;  %v8772_v42 = vld [vmem:[%s10015_s17 + $0x500] sm:$0xff]  }
 0x1ec   : > { %8347 = vmatpush3.bf16.msra.mxu1 %v8733_v43  ;;  %8320 = vmatprep.subr.bf16.mxu0 %v8734_v44  ;;  %v8773_v43 = vld [vmem:[%s10015_s17 + $0x580] sm:$0xff]   ;;  %v8774_v44 = vld [vmem:[%s10015_s17 + $0x548] sm:$0xff]  }
 0x1ed   : > { %8348 = vmatprep.subr.bf16.mxu1 %v8735_v45  ;;  %v8775_v45 = vld [vmem:[%s10015_s17 + $0x5c8] sm:$0xff]  }
 0x1ef   : > { %8321 = vmatpush3.bf16.msra.mxu0 %v8736_v46  ;;  %v8776_v46 = vld [vmem:[%s10015_s17 + $0x508] sm:$0xff]  }
 0x1f0   : > { %8349 = vmatpush3.bf16.msra.mxu1 %v8737_v47  ;;  %8362 = vmatprep.subr.bf16.mxu0 %v8738_v56  ;;  %v8777_v47 = vld [vmem:[%s10015_s17 + $0x588] sm:$0xff]  }
 0x1f1   : > { %8390 = vmatprep.subr.bf16.mxu1 %v8739_v57  ;;  %v8780_v57 = vld [vmem:[%s10015_s17 + $0x510] sm:$0xff]  }
 0x1f2   : > { %7143 = vmatmul.mubr.bf16.vlgmr.msra.gmra.mrb[24].mxu0 %v7825_v51  ;;  %v7861_v51 = vcombine.low %v4424_v48, %v4440_v49  ;;  %v8818_v48 = vld [vmem:[%s10015_s17 + $0x660] sm:$0xff]  }
 0x1f3   : > { %7192 = vmatmul.mubr.bf16.vlgmr.msra.gmra.mrb[24].mxu1 %v7827_v54  ;;  %8363 = vmatpush3.bf16.msra.mxu0 %v8740_v58  ;;  %v4425_v54 = vld [vmem:[%s10495_s0 + $0x148] sm:$0xff]  ;;  %v8819_v49 = vld [vmem:[%s10015_s17 + $0x6e0] sm:$0xff]  }
 0x1f4   : > { %8391 = vmatpush3.bf16.msra.mxu1 %v8741_v59  ;;  %8364 = vmatprep.subr.bf16.mxu0 %v8742_v60  ;;  %v7864_v56 = vcombine.high %v4425_v54, %v4441_v55  ;;  %v7863_v58 = vcombine.low %v4425_v54, %v4441_v55  ;;  %v8781_v59 = vld [vmem:[%s10015_s17 + $0x590] sm:$0xff]   ;;  %v8782_v60 = vld [vmem:[%s10015_s17 + $0x558] sm:$0xff]   ;;  %v8824_v54 = vld [vmem:[%s10015_s17 + $0x628] sm:$0xff]  }
 0x1f5   : > { %8392 = vmatprep.subr.bf16.mxu1 %v8743_v61  ;;  %7150 = vmatprep.mubr.bf16.mxu0 %v7858_v2  ;;  %v8783_v61 = vld [vmem:[%s10015_s17 + $0x5d8] sm:$0xff]   ;;  %v8788_v2 = vld [vmem:[%s10015_s17 + $0x520] sm:$0xff]   ;;  %v8825_v55 = vld [vmem:[%s10015_s17 + $0x6a8] sm:$0xff]  }
 0x1f6   : > { %7199 = vmatprep.mubr.bf16.mxu1 %v7860_v8  ;;  %v8794_v8 = vld [vmem:[%s10015_s17 + $0x570] sm:$0xff]  }
 0x1f7   : > { %8365 = vmatpush3.bf16.msra.mxu0 %v8744_v62  ;;  %v8784_v62 = vld [vmem:[%s10015_s17 + $0x518] sm:$0xff]  }
 0x1f8   : > { %8393 = vmatpush3.bf16.msra.mxu1 %v8745_v63  ;;  %8366 = vmatprep.subr.bf16.mxu0 %v8746_v4  ;;  %v8785_v63 = vld [vmem:[%s10015_s17 + $0x598] sm:$0xff]   ;;  %v8790_v4 = vld [vmem:[%s10015_s17 + $0x568] sm:$0xff]  }
 0x1f9   : > { %8394 = vmatprep.subr.bf16.mxu1 %v8747_v5  ;;  %v8791_v5 = vld [vmem:[%s10015_s17 + $0x5e8] sm:$0xff]  }
 0x1fa   : > { %7151 = vmatmul.mubr.bf16.gmra.mrb[28].mxu0 %v7857_v3  ;;  %v8789_v3 = vld [vmem:[%s10015_s17 + $0x5a0] sm:$0xff]  }
 0x1fb   : > { %8367 = vmatpush3.bf16.msra.mxu0 %v8748_v9  ;;  %7200 = vmatmul.mubr.bf16.gmra.mrb[28].mxu1 %v7859_v10  ;;  %v8795_v9 = vld [vmem:[%s10015_s17 + $0x5f0] sm:$0xff]  }
 0x1fc   : > { %8395 = vmatpush3.bf16.msra.mxu1 %v8749_v11  ;;  %8368 = vmatprep.subr.bf16.mxu0 %v8750_v12  ;;  %v8796_v10 = vld [vmem:[%s10015_s17 + $0x530] sm:$0xff]   ;;  %v8798_v12 = vld [vmem:[%s10015_s17 + $0x578] sm:$0xff]  }
 0x1fd   : > { %8396 = vmatprep.subr.bf16.mxu1 %v8751_v13  ;;  %7240 = vmatprep.mubr.bf16.mxu0 %v7830_v37  ;;  %v8797_v11 = vld [vmem:[%s10015_s17 + $0x5b0] sm:$0xff]   ;;  %v8799_v13 = vld [vmem:[%s10015_s17 + $0x5f8] sm:$0xff]  }
 0x1fe   : > { %7289 = vmatprep.mubr.bf16.mxu1 %v7832_v39  ;;  %v8811_v37 = vld [vmem:[%s10015_s17 + $0x6d0] sm:$0xff]   ;;  %v4443_v39 = vld [vmem:[%s10495_s0 + $0x1d8] sm:$0xff] }
 0x1ff   : > { %8369 = vmatpush3.bf16.msra.mxu0 %v8752_v14  ;;  %v8800_v14 = vld [vmem:[%s10015_s17 + $0x538] sm:$0xff]  }
 0x200   : > { %8397 = vmatpush3.bf16.msra.mxu1 %v8753_v15  ;;  %8370 = vmatprep.subr.bf16.mxu0 %v8754_v16  ;;  %v8801_v15 = vld [vmem:[%s10015_s17 + $0x5b8] sm:$0xff]   ;;  %v4394_v16 = vld [vmem:[%s10495_s0 + $0x50] sm:$0xff] }
 0x201   : > { %8398 = vmatprep.subr.bf16.mxu1 %v8755_v17  ;;  %v4410_v17 = vld [vmem:[%s10495_s0 + $0xd0] sm:$0xff] }
 0x203   : > { %8371 = vmatpush3.bf16.msra.mxu0 %v8756_v18  ;;  %v7833_v18 = vcombine.low %v4394_v16, %v4410_v17 }
 0x204   : > { %8399 = vmatpush3.bf16.msra.mxu1 %v8757_v19  ;;  %8372 = vmatprep.subr.bf16.mxu0 %v8758_v20  ;;  %v7834_v19 = vcombine.high %v4394_v16, %v4410_v17  ;;  %v4395_v20 = vld [vmem:[%s10495_s0 + $0x58] sm:$0xff]  ;;  %v4428_v16 = vld [vmem:[%s10495_s0 + $0x160] sm:$0xff] }
 0x205   : > { %8400 = vmatprep.subr.bf16.mxu1 %v8759_v21  ;;  %v4411_v21 = vld [vmem:[%s10495_s0 + $0xd8] sm:$0xff]  ;;  %v4444_v17 = vld [vmem:[%s10495_s0 + $0x1e0] sm:$0xff] }
 0x207   : > { %8373 = vmatpush3.bf16.msra.mxu0 %v8760_v22  ;;  %v7835_v22 = vcombine.low %v4395_v20, %v4411_v21 }
 0x208   : > { %8401 = vmatpush3.bf16.msra.mxu1 %v8761_v23  ;;  %8374 = vmatprep.subr.bf16.mxu0 %v8762_v24  ;;  %v7836_v23 = vcombine.high %v4395_v20, %v4411_v21  ;;  %v8802_v24 = vld [vmem:[%s10015_s17 + $0x640] sm:$0xff]   ;;  %v7869_v20 = vcombine.low %v4428_v16, %v4444_v17  ;;  %v8842_v21 = vld [vmem:[%s10015_s17 + $0x750] sm:$0xff]  }
 0x209   : > { %8402 = vmatprep.subr.bf16.mxu1 %v8763_v25  ;;  %v8803_v25 = vld [vmem:[%s10015_s17 + $0x6c0] sm:$0xff]  }
 0x20b   : > { %8375 = vmatpush3.bf16.msra.mxu0 %v8764_v26  ;;  %v8804_v26 = vld [vmem:[%s10015_s17 + $0x600] sm:$0xff]  }
 0x20c   : > { %8403 = vmatpush3.bf16.msra.mxu1 %v8765_v27  ;;  %8376 = vmatprep.subr.bf16.mxu0 %v8766_v28  ;;  %v8805_v27 = vld [vmem:[%s10015_s17 + $0x680] sm:$0xff]   ;;  %v8806_v28 = vld [vmem:[%s10015_s17 + $0x648] sm:$0xff]  }
 0x20d   : > { %8404 = vmatprep.subr.bf16.mxu1 %v8767_v29  ;;  %v8807_v29 = vld [vmem:[%s10015_s17 + $0x6c8] sm:$0xff]  }
 0x20f   : > { %8377 = vmatpush3.bf16.msra.mxu0 %v8768_v30  ;;  %v8808_v30 = vld [vmem:[%s10015_s17 + $0x608] sm:$0xff]  }
 0x210   : > { %8405 = vmatpush3.bf16.msra.mxu1 %v8769_v31  ;;  %8418 = vmatprep.subr.bf16.mxu0 %v8770_v40  ;;  %v8809_v31 = vld [vmem:[%s10015_s17 + $0x688] sm:$0xff]  }
 0x211   : > { %8446 = vmatprep.subr.bf16.mxu1 %v8771_v41  ;;  %v8812_v41 = vld [vmem:[%s10015_s17 + $0x610] sm:$0xff]  }
 0x212   : > { %7241 = vmatmul.mubr.bf16.vlgmr.msra.gmra.mrb[32].mxu0 %v7829_v36  ;;  %v8810_v36 = vld [vmem:[%s10015_s17 + $0x650] sm:$0xff]  }
 0x213   : > { %7290 = vmatmul.mubr.bf16.vlgmr.msra.gmra.mrb[32].mxu1 %v7831_v38  ;;  %8419 = vmatpush3.bf16.msra.mxu0 %v8772_v42  ;;  %v4427_v38 = vld [vmem:[%s10495_s0 + $0x158] sm:$0xff] }
 0x214   : > { %8447 = vmatpush3.bf16.msra.mxu1 %v8773_v43  ;;  %8420 = vmatprep.subr.bf16.mxu0 %v8774_v44  ;;  %v7868_v40 = vcombine.high %v4427_v38, %v4443_v39  ;;  %v7867_v42 = vcombine.low %v4427_v38, %v4443_v39  ;;  %v8813_v43 = vld [vmem:[%s10015_s17 + $0x690] sm:$0xff]   ;;  %v8814_v44 = vld [vmem:[%s10015_s17 + $0x658] sm:$0xff]  }
 0x215   : > { %8448 = vmatprep.subr.bf16.mxu1 %v8775_v45  ;;  %7248 = vmatprep.mubr.bf16.mxu0 %v7862_v50  ;;  %v8815_v45 = vld [vmem:[%s10015_s17 + $0x6d8] sm:$0xff]   ;;  %v8820_v50 = vld [vmem:[%s10015_s17 + $0x620] sm:$0xff]  }
 0x216   : > { %7297 = vmatprep.mubr.bf16.mxu1 %v7864_v56  ;;  %v8826_v56 = vld [vmem:[%s10015_s17 + $0x670] sm:$0xff]  }
 0x217   : > { %8421 = vmatpush3.bf16.msra.mxu0 %v8776_v46  ;;  %v8816_v46 = vld [vmem:[%s10015_s17 + $0x618] sm:$0xff]  }
 0x218   : > { %8449 = vmatpush3.bf16.msra.mxu1 %v8777_v47  ;;  %8422 = vmatprep.subr.bf16.mxu0 %v8778_v52  ;;  %v8817_v47 = vld [vmem:[%s10015_s17 + $0x698] sm:$0xff]   ;;  %v8822_v52 = vld [vmem:[%s10015_s17 + $0x668] sm:$0xff]  }
 0x219   : > { %8450 = vmatprep.subr.bf16.mxu1 %v8779_v53  ;;  %v8823_v53 = vld [vmem:[%s10015_s17 + $0x6e8] sm:$0xff]  }
 0x21a   : > { %7249 = vmatmul.mubr.bf16.gmra.mrb[36].mxu0 %v7861_v51  ;;  %v8821_v51 = vld [vmem:[%s10015_s17 + $0x6a0] sm:$0xff]  }
 0x21b   : > { %8423 = vmatpush3.bf16.msra.mxu0 %v8780_v57  ;;  %7298 = vmatmul.mubr.bf16.gmra.mrb[36].mxu1 %v7863_v58  ;;  %v8827_v57 = vld [vmem:[%s10015_s17 + $0x6f0] sm:$0xff]  }
 0x21c   : > { %8451 = vmatpush3.bf16.msra.mxu1 %v8781_v59  ;;  %8424 = vmatprep.subr.bf16.mxu0 %v8782_v60  ;;  %v8828_v58 = vld [vmem:[%s10015_s17 + $0x630] sm:$0xff]   ;;  %v8830_v60 = vld [vmem:[%s10015_s17 + $0x678] sm:$0xff]  }
 0x21d   : > { %8452 = vmatprep.subr.bf16.mxu1 %v8783_v61  ;;  %7338 = vmatprep.mubr.bf16.mxu0 %v7834_v19  ;;  %v8829_v59 = vld [vmem:[%s10015_s17 + $0x6b0] sm:$0xff]   ;;  %v8831_v61 = vld [vmem:[%s10015_s17 + $0x6f8] sm:$0xff]   ;;  %v7870_v19 = vcombine.high %v4428_v16, %v4444_v17 }
 0x21e   : > { %7387 = vmatprep.mubr.bf16.mxu1 %v7836_v23  ;;  %v8843_v23 = vld [vmem:[%s10015_s17 + $0x7d0] sm:$0xff]  }
 0x21f   : > { %8425 = vmatpush3.bf16.msra.mxu0 %v8784_v62  ;;  %v8832_v62 = vld [vmem:[%s10015_s17 + $0x638] sm:$0xff]  }
 0x220   : > { %8453 = vmatpush3.bf16.msra.mxu1 %v8785_v63  ;;  %8426 = vmatprep.subr.bf16.mxu0 %v8786_v0  ;;  %v8833_v63 = vld [vmem:[%s10015_s17 + $0x6b8] sm:$0xff]   ;;  %v4396_v0 = vld [vmem:[%s10495_s0 + $0x60] sm:$0xff] }
 0x221   : > { %8454 = vmatprep.subr.bf16.mxu1 %v8787_v1  ;;  %v4412_v1 = vld [vmem:[%s10495_s0 + $0xe0] sm:$0xff] }
 0x223   : > { %8427 = vmatpush3.bf16.msra.mxu0 %v8788_v2  ;;  %v4397_v2 = vld [vmem:[%s10495_s0 + $0x68] sm:$0xff] }
 0x224   : > { %8455 = vmatpush3.bf16.msra.mxu1 %v8789_v3  ;;  %8428 = vmatprep.subr.bf16.mxu0 %v8790_v4  ;;  %v7837_v3 = vcombine.low %v4396_v0, %v4412_v1  ;;  %v7838_v4 = vcombine.high %v4396_v0, %v4412_v1  ;;  %v8856_v0 = vld [vmem:[%s10015_s17 + $0x728] sm:$0xff]  }
 0x225   : > { %8456 = vmatprep.subr.bf16.mxu1 %v8791_v5  ;;  %v4413_v5 = vld [vmem:[%s10495_s0 + $0xe8] sm:$0xff] }
 0x227   : > { %8429 = vmatpush3.bf16.msra.mxu0 %v8792_v6  ;;  %v7839_v6 = vcombine.low %v4397_v2, %v4413_v5 }
 0x228   : > { %8457 = vmatpush3.bf16.msra.mxu1 %v8793_v7  ;;  %8430 = vmatprep.subr.bf16.mxu0 %v8794_v8  ;;  %v7840_v7 = vcombine.high %v4397_v2, %v4413_v5  ;;  %v8834_v8 = vld [vmem:[%s10015_s17 + $0x740] sm:$0xff]   ;;  %v8857_v2 = vld [vmem:[%s10015_s17 + $0x7a8] sm:$0xff]   ;;  %v8859_v5 = vld [vmem:[%s10015_s17 + $0x7f0] sm:$0xff]  }
 0x229   : > { %8458 = vmatprep.subr.bf16.mxu1 %v8795_v9  ;;  %v8835_v9 = vld [vmem:[%s10015_s17 + $0x7c0] sm:$0xff]  }
 0x22b   : > { %8431 = vmatpush3.bf16.msra.mxu0 %v8796_v10  ;;  %v8836_v10 = vld [vmem:[%s10015_s17 + $0x700] sm:$0xff]  }
 0x22c   : > { %8459 = vmatpush3.bf16.msra.mxu1 %v8797_v11  ;;  %8432 = vmatprep.subr.bf16.mxu0 %v8798_v12  ;;  %v8837_v11 = vld [vmem:[%s10015_s17 + $0x780] sm:$0xff]   ;;  %v8838_v12 = vld [vmem:[%s10015_s17 + $0x748] sm:$0xff]  }
 0x22d   : > { %8460 = vmatprep.subr.bf16.mxu1 %v8799_v13  ;;  %v8839_v13 = vld [vmem:[%s10015_s17 + $0x7c8] sm:$0xff]  }
 0x22f   : > { %8433 = vmatpush3.bf16.msra.mxu0 %v8800_v14  ;;  %v8840_v14 = vld [vmem:[%s10015_s17 + $0x708] sm:$0xff]  }
 0x230   : > { %8461 = vmatpush3.bf16.msra.mxu1 %v8801_v15  ;;  %8474 = vmatprep.subr.bf16.mxu0 %v8802_v24  ;;  %v8841_v15 = vld [vmem:[%s10015_s17 + $0x788] sm:$0xff]  }
 0x231   : > { %8502 = vmatprep.subr.bf16.mxu1 %v8803_v25  ;;  %v4429_v25 = vld [vmem:[%s10495_s0 + $0x168] sm:$0xff] }
 0x232   : > { %7339 = vmatmul.mubr.bf16.vlgmr.msra.gmra.mrb[40].mxu0 %v7833_v18 }
 0x233   : > { %7388 = vmatmul.mubr.bf16.vlgmr.msra.gmra.mrb[40].mxu1 %v7835_v22  ;;  %8475 = vmatpush3.bf16.msra.mxu0 %v8804_v26  ;;  %v4445_v26 = vld [vmem:[%s10495_s0 + $0x1e8] sm:$0xff] }
 0x234   : > { %8503 = vmatpush3.bf16.msra.mxu1 %v8805_v27  ;;  %8476 = vmatprep.subr.bf16.mxu0 %v8806_v28  ;;  %v7871_v32 = vcombine.low %v4429_v25, %v4445_v26 }
 0x235   : > { %8504 = vmatprep.subr.bf16.mxu1 %v8807_v29  ;;  %7346 = vmatprep.mubr.bf16.mxu0 %v7866_v34 }
 0x236   : > { %7395 = vmatprep.mubr.bf16.mxu1 %v7868_v40 }
 0x237   : > { %8477 = vmatpush3.bf16.msra.mxu0 %v8808_v30  ;;  %v7872_v30 = vcombine.high %v4429_v25, %v4445_v26 }
 0x238   : > { %8505 = vmatpush3.bf16.msra.mxu1 %v8809_v31  ;;  %8478 = vmatprep.subr.bf16.mxu0 %v8810_v36  ;;  %v8844_v31 = vld [vmem:[%s10015_s17 + $0x710] sm:$0xff]  }
 0x239   : > { %8506 = vmatprep.subr.bf16.mxu1 %v8811_v37  ;;  %v8846_v37 = vld [vmem:[%s10015_s17 + $0x758] sm:$0xff]  }
 0x23a   : > { %7347 = vmatmul.mubr.bf16.gmra.mrb[44].mxu0 %v7865_v35  ;;  %v8845_v35 = vld [vmem:[%s10015_s17 + $0x790] sm:$0xff]  }
 0x23b   : > { %8479 = vmatpush3.bf16.msra.mxu0 %v8812_v41  ;;  %7396 = vmatmul.mubr.bf16.gmra.mrb[44].mxu1 %v7867_v42  ;;  %v8847_v41 = vld [vmem:[%s10015_s17 + $0x7d8] sm:$0xff]  }
 0x23c   : > { %8507 = vmatpush3.bf16.msra.mxu1 %v8813_v43  ;;  %8480 = vmatprep.subr.bf16.mxu0 %v8814_v44  ;;  %v8848_v43 = vld [vmem:[%s10015_s17 + $0x718] sm:$0xff]  }
 0x23d   : > { %8508 = vmatprep.subr.bf16.mxu1 %v8815_v45  ;;  %7436 = vmatprep.mubr.bf16.mxu0 %v7838_v4  ;;  %v8849_v45 = vld [vmem:[%s10015_s17 + $0x798] sm:$0xff]  }
 0x23e   : > { %7485 = vmatprep.mubr.bf16.mxu1 %v7840_v7  ;;  %v8861_v7 = vld [vmem:[%s10015_s17 + $0x7b0] sm:$0xff]  }
 0x23f   : > { %8481 = vmatpush3.bf16.msra.mxu0 %v8816_v46 }
 0x240   : > { %8509 = vmatpush3.bf16.msra.mxu1 %v8817_v47  ;;  %8482 = vmatprep.subr.bf16.mxu0 %v8818_v48  ;;  %v8850_v48 = vld [vmem:[%s10015_s17 + $0x760] sm:$0xff]  }
 0x241   : > { %8510 = vmatprep.subr.bf16.mxu1 %v8819_v49 }
 0x243   : > { %8483 = vmatpush3.bf16.msra.mxu0 %v8820_v50  ;;  %v8851_v50 = vld [vmem:[%s10015_s17 + $0x7e0] sm:$0xff]  }
 0x244   : > { %8511 = vmatpush3.bf16.msra.mxu1 %v8821_v51  ;;  %8484 = vmatprep.subr.bf16.mxu0 %v8822_v52 }
 0x245   : > { %8512 = vmatprep.subr.bf16.mxu1 %v8823_v53  ;;  %v8852_v53 = vld [vmem:[%s10015_s17 + $0x720] sm:$0xff]  }
 0x247   : > { %8485 = vmatpush3.bf16.msra.mxu0 %v8824_v54 }
 0x248   : > { %8513 = vmatpush3.bf16.msra.mxu1 %v8825_v55  ;;  %8486 = vmatprep.subr.bf16.mxu0 %v8826_v56  ;;  %v8853_v56 = vld [vmem:[%s10015_s17 + $0x7a0] sm:$0xff]  }
 0x249   : > { %8514 = vmatprep.subr.bf16.mxu1 %v8827_v57 }
 0x24b   : > { %8487 = vmatpush3.bf16.msra.mxu0 %v8828_v58  ;;  %v8854_v58 = vld [vmem:[%s10015_s17 + $0x768] sm:$0xff]  }
 0x24c   : > { %8515 = vmatpush3.bf16.msra.mxu1 %v8829_v59  ;;  %8488 = vmatprep.subr.bf16.mxu0 %v8830_v60 }
 0x24d   : > { %8516 = vmatprep.subr.bf16.mxu1 %v8831_v61  ;;  %v8855_v61 = vld [vmem:[%s10015_s17 + $0x7e8] sm:$0xff]  }
 0x24f   : > { %8489 = vmatpush3.bf16.msra.mxu0 %v8832_v62 }
 0x250   : > { %8517 = vmatpush3.bf16.msra.mxu1 %v8833_v63  ;;  %8530 = vmatprep.subr.bf16.mxu0 %v8834_v8  ;;  %v8862_v8 = vld [vmem:[%s10015_s17 + $0x778] sm:$0xff]  }
 0x251   : > { %8558 = vmatprep.subr.bf16.mxu1 %v8835_v9  ;;  %v8863_v9 = vld [vmem:[%s10015_s17 + $0x7f8] sm:$0xff]  }
 0x252   : > { %7437 = vmatmul.mubr.bf16.vlgmr.msra.gmra.mrb[48].mxu0 %v7837_v3  ;;  %v8858_v3 = vld [vmem:[%s10015_s17 + $0x770] sm:$0xff]  }
 0x253   : > { %7486 = vmatmul.mubr.bf16.vlgmr.msra.gmra.mrb[48].mxu1 %v7839_v6  ;;  %8531 = vmatpush3.bf16.msra.mxu0 %v8836_v10  ;;  %v8860_v6 = vld [vmem:[%s10015_s17 + $0x730] sm:$0xff]   ;;  %v8864_v10 = vld [vmem:[%s10015_s17 + $0x738] sm:$0xff]  }
 0x254   : > { %8559 = vmatpush3.bf16.msra.mxu1 %v8837_v11  ;;  %8532 = vmatprep.subr.bf16.mxu0 %v8838_v12  ;;  %v8865_v11 = vld [vmem:[%s10015_s17 + $0x7b8] sm:$0xff]   ;;  %v4398_v12 = vld [vmem:[%s10495_s0 + $0x70] sm:$0xff] }
 0x255   : > { %8560 = vmatprep.subr.bf16.mxu1 %v8839_v13  ;;  %7444 = vmatprep.mubr.bf16.mxu0 %v7870_v19  ;;  %v4414_v13 = vld [vmem:[%s10495_s0 + $0xf0] sm:$0xff] }
 0x256   : > { %7493 = vmatprep.mubr.bf16.mxu1 %v7872_v30  ;;  %v7841_v16 = vcombine.low %v4398_v12, %v4414_v13  ;;  %v7842_v17 = vcombine.high %v4398_v12, %v4414_v13 }
 0x257   : > { %8533 = vmatpush3.bf16.msra.mxu0 %v8840_v14  ;;  %v4399_v14 = vld [vmem:[%s10495_s0 + $0x78] sm:$0xff] }
 0x258   : > { %8561 = vmatpush3.bf16.msra.mxu1 %v8841_v15  ;;  %8534 = vmatprep.subr.bf16.mxu0 %v8842_v21  ;;  %v4415_v15 = vld [vmem:[%s10495_s0 + $0xf8] sm:$0xff]  ;;  %v4446_v21 = vld [vmem:[%s10495_s0 + $0x1f0] sm:$0xff] }
 0x259   : > { %8562 = vmatprep.subr.bf16.mxu1 %v8843_v23  ;;  %v7844_v19 = vcombine.high %v4399_v14, %v4415_v15 }
 0x25a   : > { %7445 = vmatmul.mubr.bf16.gmra.mrb[52].mxu0 %v7869_v20  ;;  %v4430_v20 = vld [vmem:[%s10495_s0 + $0x170] sm:$0xff] }
 0x25b   : > { %8535 = vmatpush3.bf16.msra.mxu0 %v8844_v31  ;;  %7494 = vmatmul.mubr.bf16.gmra.mrb[52].mxu1 %v7871_v32  ;;  %v7874_v23 = vcombine.high %v4430_v20, %v4446_v21 }
 0x25c   : > { %8563 = vmatpush3.bf16.msra.mxu1 %v8845_v35  ;;  %8536 = vmatprep.subr.bf16.mxu0 %v8846_v37 }
 0x25d   : > { %8564 = vmatprep.subr.bf16.mxu1 %v8847_v41  ;;  %7534 = vmatprep.mubr.bf16.mxu0 %v7842_v17 }
 0x25e   : > { %7583 = vmatprep.mubr.bf16.mxu1 %v7844_v19 }
 0x25f   : > { %8537 = vmatpush3.bf16.msra.mxu0 %v8848_v43 }
 0x260   : > { %8565 = vmatpush3.bf16.msra.mxu1 %v8849_v45  ;;  %8538 = vmatprep.subr.bf16.mxu0 %v8850_v48 }
 0x261   : > { %8566 = vmatprep.subr.bf16.mxu1 %v8851_v50 }
 0x263   : > { %8539 = vmatpush3.bf16.msra.mxu0 %v8852_v53 }
 0x264   : > { %8567 = vmatpush3.bf16.msra.mxu1 %v8853_v56  ;;  %8540 = vmatprep.subr.bf16.mxu0 %v8854_v58 }
 0x265   : > { %v8154_v18 = vpop.f32.mrb[0].mxu0  ;;  %8568 = vmatprep.subr.bf16.mxu1 %v8855_v61 }
 0x266   : > { %v8182_v22 = vpop.f32.mrb[0].mxu1  ;;  %v8155_v24 = vpop.f32.mrb[1].mxu0 }
 0x267   : > { %v8156_v27 = vadd.f32 %v8155_v24, %v8154_v18  ;;  %v8183_v28 = vpop.f32.mrb[1].mxu1  ;;  %v8157_v29 = vpop.f32.mrb[2].mxu0  ;;  %8541 = vmatpush3.bf16.msra.mxu0 %v8856_v0  ;;  %v7843_v18 = vcombine.low %v4399_v14, %v4415_v15  ;;  %v4447_v24 = vld [vmem:[%s10495_s0 + $0x1f8] sm:$0xff] }
 0x268   : > { %v8184_v33 = vadd.f32 %v8183_v28, %v8182_v22  ;;  %v8185_v34 = vpop.f32.mrb[2].mxu1  ;;  %v8158_v36 = vpop.f32.mrb[3].mxu0  ;;  %8569 = vmatpush3.bf16.msra.mxu1 %v8857_v2  ;;  %8542 = vmatprep.subr.bf16.mxu0 %v8858_v3  ;;  %v4431_v22 = vld [vmem:[%s10495_s0 + $0x178] sm:$0xff]  ;;  %v7873_v28 = vcombine.low %v4430_v20, %v4446_v21 }
 0x269   : > { %v8159_v39 = vadd.f32 %v8158_v36, %v8157_v29  ;;  %v8186_v40 = vpop.f32.mrb[3].mxu1  ;;  %8570 = vmatprep.subr.bf16.mxu1 %v8859_v5  ;;  %v7876_v25 = vcombine.high %v4431_v22, %v4447_v24  ;;  %v7875_v29 = vcombine.low %v4431_v22, %v4447_v24 }
 0x26a   : > { %v10414_v38 = vadd.f32 %v8184_v33, %v8156_v27  ;;  %v8187_v42 = vadd.f32 %v8186_v40, %v8185_v34 }
 0x26b   : > { %8543 = vmatpush3.bf16.msra.mxu0 %v8860_v6 }
 0x26c   : > { %v10419_v46 = vadd.f32 %v8187_v42, %v8159_v39  ;;  %8571 = vmatpush3.bf16.msra.mxu1 %v8861_v7  ;;  %8544 = vmatprep.subr.bf16.mxu0 %v8862_v8 }
 0x26d   : > { %v8160_v44 = vpop.f32.mrb[4].mxu0  ;;  %8572 = vmatprep.subr.bf16.mxu1 %v8863_v9 }
 0x26e   : > { %v8188_v47 = vpop.f32.mrb[4].mxu1  ;;  %v8161_v49 = vpop.f32.mrb[5].mxu0 }
 0x26f   : > { %v8162_v51 = vadd.f32 %v8161_v49, %v8160_v44  ;;  %v8189_v52 = vpop.f32.mrb[5].mxu1  ;;  %v8163_v55 = vpop.f32.mrb[6].mxu0  ;;  %8545 = vmatpush3.bf16.msra.mxu0 %v8864_v10 }
 0x270   : > { %v8190_v54 = vadd.f32 %v8189_v52, %v8188_v47  ;;  %v8191_v57 = vpop.f32.mrb[6].mxu1  ;;  %v8164_v60 = vpop.f32.mrb[7].mxu0  ;;  %8573 = vmatpush3.bf16.msra.mxu1 %v8865_v11 }
 0x271   : > { %v8165_v62 = vadd.f32 %v8164_v60, %v8163_v55  ;;  %v8192_v63 = vpop.f32.mrb[7].mxu1 }
 0x272   : > { %v10426_v59 = vadd.f32 %v8190_v54, %v8162_v51  ;;  %v8193_v1 = vadd.f32 %v8192_v63, %v8191_v57  ;;  %7535 = vmatmul.mubr.bf16.vlgmr.msra.gmra.mrb[56].mxu0 %v7841_v16 }
 0x273   : > { %7584 = vmatmul.mubr.bf16.vlgmr.msra.gmra.mrb[56].mxu1 %v7843_v18  ;;  %7542 = vmatprep.mubr.bf16.mxu0 %v7874_v23 }
 0x274   : > { %v10432_v4 = vadd.f32 %v8193_v1, %v8165_v62  ;;  %7591 = vmatprep.mubr.bf16.mxu1 %v7876_v25 }
 0x27a   : > { %7543 = vmatmul.mubr.bf16.gmra.mrb[60].mxu0 %v7873_v28 }
 0x27b   : > { %7592 = vmatmul.mubr.bf16.gmra.mrb[60].mxu1 %v7875_v29 }
 0x285   : > { %v8210_v26 = vpop.f32.mrb[8].mxu0 }
 0x286   : > { %v8238_v27 = vpop.f32.mrb[8].mxu1  ;;  %v8211_v30 = vpop.f32.mrb[9].mxu0 }
 0x287   : > { %v8239_v31 = vpop.f32.mrb[9].mxu1  ;;  %v8212_v32 = vadd.f32 %v8211_v30, %v8210_v26  ;;  %v8213_v34 = vpop.f32.mrb[10].mxu0 }
 0x288   : > { %v8240_v33 = vadd.f32 %v8239_v31, %v8238_v27  ;;  %v8241_v35 = vpop.f32.mrb[10].mxu1  ;;  %v8214_v36 = vpop.f32.mrb[11].mxu0 }
 0x289   : > { %v8242_v37 = vpop.f32.mrb[11].mxu1  ;;  %v6949_v39 = vadd.f32 %v8212_v32, %v10414_v38  ;;  %v8215_v40 = vadd.f32 %v8214_v36, %v8213_v34 }
 0x28a   : > { %v8243_v41 = vadd.f32 %v8242_v37, %v8241_v35 }
 0x28b   : > { %v6998_v42 = vadd.f32 %v8240_v33, %v6949_v39  ;;  %v6952_v43 = vadd.f32 %v8215_v40, %v10419_v46 }
 0x28d   : > { %v7001_v44 = vadd.f32 %v8243_v41, %v6952_v43  ;;  %v8216_v45 = vpop.f32.mrb[12].mxu0 }
 0x28e   : > { %v8217_v47 = vpop.f32.mrb[13].mxu0  ;;  %v8244_v52 = vpop.f32.mrb[12].mxu1 }
 0x28f   : > { %v8218_v48 = vadd.f32 %v8217_v47, %v8216_v45  ;;  %v8219_v49 = vpop.f32.mrb[14].mxu0  ;;  %v8245_v54 = vpop.f32.mrb[13].mxu1 }
 0x290   : > { %v8220_v50 = vpop.f32.mrb[15].mxu0  ;;  %v8246_v55 = vadd.f32 %v8245_v54, %v8244_v52  ;;  %v8247_v56 = vpop.f32.mrb[14].mxu1 }
 0x291   : > { %v6957_v51 = vadd.f32 %v8218_v48, %v10426_v59  ;;  %v8221_v53 = vadd.f32 %v8220_v50, %v8219_v49  ;;  %v8248_v57 = vpop.f32.mrb[15].mxu1 }
 0x292   : > { %v8249_v60 = vadd.f32 %v8248_v57, %v8247_v56 }
 0x293   : > { %v6960_v38 = vadd.f32 %v8221_v53, %v10432_v4  ;;  %v7006_v58 = vadd.f32 %v8246_v55, %v6957_v51 }
 0x295   : > { %v7009_v61 = vadd.f32 %v8249_v60, %v6960_v38 }
 0x2a5   : > { %v8266_v46 = vpop.f32.mrb[16].mxu0 }
 0x2a6   : > { %v8294_v62 = vpop.f32.mrb[16].mxu1  ;;  %v8267_v63 = vpop.f32.mrb[17].mxu0 }
 0x2a7   : > { %v8268_v0 = vadd.f32 %v8267_v63, %v8266_v46  ;;  %v8295_v1 = vpop.f32.mrb[17].mxu1  ;;  %v8269_v2 = vpop.f32.mrb[18].mxu0 }
 0x2a8   : > { %v8296_v3 = vadd.f32 %v8295_v1, %v8294_v62  ;;  %v8297_v5 = vpop.f32.mrb[18].mxu1  ;;  %v8270_v59 = vpop.f32.mrb[19].mxu0 }
 0x2a9   : > { %v7047_v6 = vadd.f32 %v8268_v0, %v6998_v42  ;;  %v8271_v7 = vadd.f32 %v8270_v59, %v8269_v2  ;;  %v8298_v8 = vpop.f32.mrb[19].mxu1 }
 0x2aa   : > { %v8299_v9 = vadd.f32 %v8298_v8, %v8297_v5 }
 0x2ab   : > { %v7096_v4 = vadd.f32 %v8296_v3, %v7047_v6  ;;  %v7050_v10 = vadd.f32 %v8271_v7, %v7001_v44 }
 0x2ad   : > { %v7099_v11 = vadd.f32 %v8299_v9, %v7050_v10  ;;  %v8272_v12 = vpop.f32.mrb[20].mxu0 }
 0x2ae   : > { %v8273_v13 = vpop.f32.mrb[21].mxu0  ;;  %v8300_v16 = vpop.f32.mrb[20].mxu1 }
 0x2af   : > { %v8274_v14 = vadd.f32 %v8273_v13, %v8272_v12  ;;  %v8275_v15 = vpop.f32.mrb[22].mxu0  ;;  %v8301_v20 = vpop.f32.mrb[21].mxu1 }
 0x2b0   : > { %v8276_v17 = vpop.f32.mrb[23].mxu0  ;;  %v8302_v21 = vadd.f32 %v8301_v20, %v8300_v16  ;;  %v8303_v22 = vpop.f32.mrb[22].mxu1 }
 0x2b1   : > { %v7055_v18 = vadd.f32 %v8274_v14, %v7006_v58  ;;  %v8277_v19 = vadd.f32 %v8276_v17, %v8275_v15  ;;  %v8304_v24 = vpop.f32.mrb[23].mxu1 }
 0x2b2   : > { %v8305_v26 = vadd.f32 %v8304_v24, %v8303_v22 }
 0x2b3   : > { %v7058_v23 = vadd.f32 %v8277_v19, %v7009_v61  ;;  %v7104_v25 = vadd.f32 %v8302_v21, %v7055_v18 }
 0x2b5   : > { %v7107_v27 = vadd.f32 %v8305_v26, %v7058_v23 }
 0x2c5   : > { %v8322_v28 = vpop.f32.mrb[24].mxu0 }
 0x2c6   : > { %v8350_v29 = vpop.f32.mrb[24].mxu1  ;;  %v8323_v30 = vpop.f32.mrb[25].mxu0 }
 0x2c7   : > { %v8324_v31 = vadd.f32 %v8323_v30, %v8322_v28  ;;  %v8351_v32 = vpop.f32.mrb[25].mxu1  ;;  %v8325_v33 = vpop.f32.mrb[26].mxu0 }
 0x2c8   : > { %v8352_v34 = vadd.f32 %v8351_v32, %v8350_v29  ;;  %v8353_v35 = vpop.f32.mrb[26].mxu1  ;;  %v8326_v36 = vpop.f32.mrb[27].mxu0 }
 0x2c9   : > { %v7145_v37 = vadd.f32 %v8324_v31, %v7096_v4  ;;  %v8327_v39 = vadd.f32 %v8326_v36, %v8325_v33  ;;  %v8354_v40 = vpop.f32.mrb[27].mxu1 }
 0x2ca   : > { %v8355_v41 = vadd.f32 %v8354_v40, %v8353_v35 }
 0x2cb   : > { %v7194_v42 = vadd.f32 %v8352_v34, %v7145_v37  ;;  %v7148_v43 = vadd.f32 %v8327_v39, %v7099_v11 }
 0x2cd   : > { %v7197_v44 = vadd.f32 %v8355_v41, %v7148_v43  ;;  %v8328_v45 = vpop.f32.mrb[28].mxu0 }
 0x2ce   : > { %v8329_v47 = vpop.f32.mrb[29].mxu0  ;;  %v8356_v52 = vpop.f32.mrb[28].mxu1 }
 0x2cf   : > { %v8330_v48 = vadd.f32 %v8329_v47, %v8328_v45  ;;  %v8331_v49 = vpop.f32.mrb[30].mxu0  ;;  %v8357_v54 = vpop.f32.mrb[29].mxu1 }
 0x2d0   : > { %v8332_v50 = vpop.f32.mrb[31].mxu0  ;;  %v8358_v55 = vadd.f32 %v8357_v54, %v8356_v52  ;;  %v8359_v56 = vpop.f32.mrb[30].mxu1 }
 0x2d1   : > { %v7153_v51 = vadd.f32 %v8330_v48, %v7104_v25  ;;  %v8333_v53 = vadd.f32 %v8332_v50, %v8331_v49  ;;  %v8360_v57 = vpop.f32.mrb[31].mxu1 }
 0x2d2   : > { %v8361_v60 = vadd.f32 %v8360_v57, %v8359_v56 }
 0x2d3   : > { %v7156_v38 = vadd.f32 %v8333_v53, %v7107_v27  ;;  %v7202_v58 = vadd.f32 %v8358_v55, %v7153_v51 }
 0x2d5   : > { %v7205_v61 = vadd.f32 %v8361_v60, %v7156_v38 }
 0x2e5   : > { %v8378_v46 = vpop.f32.mrb[32].mxu0 }
 0x2e6   : > { %v8406_v62 = vpop.f32.mrb[32].mxu1  ;;  %v8379_v63 = vpop.f32.mrb[33].mxu0 }
 0x2e7   : > { %v8407_v0 = vpop.f32.mrb[33].mxu1  ;;  %v8380_v1 = vadd.f32 %v8379_v63, %v8378_v46  ;;  %v8381_v3 = vpop.f32.mrb[34].mxu0 }
 0x2e8   : > { %v8408_v2 = vadd.f32 %v8407_v0, %v8406_v62  ;;  %v8409_v5 = vpop.f32.mrb[34].mxu1  ;;  %v8382_v59 = vpop.f32.mrb[35].mxu0 }
 0x2e9   : > { %v8410_v6 = vpop.f32.mrb[35].mxu1  ;;  %v7243_v7 = vadd.f32 %v8380_v1, %v7194_v42  ;;  %v8383_v8 = vadd.f32 %v8382_v59, %v8381_v3 }
 0x2ea   : > { %v8411_v9 = vadd.f32 %v8410_v6, %v8409_v5 }
 0x2eb   : > { %v7292_v4 = vadd.f32 %v8408_v2, %v7243_v7  ;;  %v7246_v10 = vadd.f32 %v8383_v8, %v7197_v44 }
 0x2ed   : > { %v7295_v11 = vadd.f32 %v8411_v9, %v7246_v10  ;;  %v8384_v12 = vpop.f32.mrb[36].mxu0 }
 0x2ee   : > { %v8385_v13 = vpop.f32.mrb[37].mxu0  ;;  %v8412_v18 = vpop.f32.mrb[36].mxu1 }
 0x2ef   : > { %v8386_v14 = vadd.f32 %v8385_v13, %v8384_v12  ;;  %v8387_v15 = vpop.f32.mrb[38].mxu0  ;;  %v8413_v20 = vpop.f32.mrb[37].mxu1 }
 0x2f0   : > { %v8388_v16 = vpop.f32.mrb[39].mxu0  ;;  %v8414_v22 = vadd.f32 %v8413_v20, %v8412_v18  ;;  %v8415_v23 = vpop.f32.mrb[38].mxu1 }
 0x2f1   : > { %v7251_v17 = vadd.f32 %v8386_v14, %v7202_v58  ;;  %v8389_v19 = vadd.f32 %v8388_v16, %v8387_v15  ;;  %v8416_v24 = vpop.f32.mrb[39].mxu1 }
 0x2f2   : > { %v8417_v26 = vadd.f32 %v8416_v24, %v8415_v23 }
 0x2f3   : > { %v7254_v21 = vadd.f32 %v8389_v19, %v7205_v61  ;;  %v7300_v25 = vadd.f32 %v8414_v22, %v7251_v17 }
 0x2f5   : > { %v7303_v27 = vadd.f32 %v8417_v26, %v7254_v21 }
 0x305   : > { %v8434_v28 = vpop.f32.mrb[40].mxu0 }
 0x306   : > { %v8462_v29 = vpop.f32.mrb[40].mxu1  ;;  %v8435_v30 = vpop.f32.mrb[41].mxu0 }
 0x307   : > { %v8436_v31 = vadd.f32 %v8435_v30, %v8434_v28  ;;  %v8463_v32 = vpop.f32.mrb[41].mxu1  ;;  %v8437_v33 = vpop.f32.mrb[42].mxu0 }
 0x308   : > { %v8464_v34 = vadd.f32 %v8463_v32, %v8462_v29  ;;  %v8465_v35 = vpop.f32.mrb[42].mxu1  ;;  %v8438_v36 = vpop.f32.mrb[43].mxu0 }
 0x309   : > { %v7341_v37 = vadd.f32 %v8436_v31, %v7292_v4  ;;  %v8439_v39 = vadd.f32 %v8438_v36, %v8437_v33  ;;  %v8466_v40 = vpop.f32.mrb[43].mxu1 }
 0x30a   : > { %v8467_v41 = vadd.f32 %v8466_v40, %v8465_v35 }
 0x30b   : > { %v7390_v42 = vadd.f32 %v8464_v34, %v7341_v37  ;;  %v7344_v43 = vadd.f32 %v8439_v39, %v7295_v11 }
 0x30d   : > { %v7393_v44 = vadd.f32 %v8467_v41, %v7344_v43  ;;  %v8440_v45 = vpop.f32.mrb[44].mxu0 }
 0x30e   : > { %v8441_v47 = vpop.f32.mrb[45].mxu0  ;;  %v8468_v50 = vpop.f32.mrb[44].mxu1 }
 0x30f   : > { %v8442_v48 = vadd.f32 %v8441_v47, %v8440_v45  ;;  %v8443_v49 = vpop.f32.mrb[46].mxu0  ;;  %v8469_v54 = vpop.f32.mrb[45].mxu1 }
 0x310   : > { %v8444_v51 = vpop.f32.mrb[47].mxu0  ;;  %v8470_v38 = vadd.f32 %v8469_v54, %v8468_v50  ;;  %v8471_v55 = vpop.f32.mrb[46].mxu1 }
 0x311   : > { %v7349_v52 = vadd.f32 %v8442_v48, %v7300_v25  ;;  %v8445_v53 = vadd.f32 %v8444_v51, %v8443_v49  ;;  %v8472_v57 = vpop.f32.mrb[47].mxu1 }
 0x312   : > { %v8473_v60 = vadd.f32 %v8472_v57, %v8471_v55 }
 0x313   : > { %v7352_v56 = vadd.f32 %v8445_v53, %v7303_v27  ;;  %v7398_v58 = vadd.f32 %v8470_v38, %v7349_v52 }
 0x315   : > { %v7401_v61 = vadd.f32 %v8473_v60, %v7352_v56 }
 0x325   : > { %v8490_v46 = vpop.f32.mrb[48].mxu0 }
 0x326   : > { %v8518_v62 = vpop.f32.mrb[48].mxu1  ;;  %v8491_v63 = vpop.f32.mrb[49].mxu0 }
 0x327   : > { %v8492_v0 = vadd.f32 %v8491_v63, %v8490_v46  ;;  %v8519_v1 = vpop.f32.mrb[49].mxu1  ;;  %v8493_v2 = vpop.f32.mrb[50].mxu0 }
 0x328   : > { %v8520_v3 = vadd.f32 %v8519_v1, %v8518_v62  ;;  %v8521_v5 = vpop.f32.mrb[50].mxu1  ;;  %v8494_v59 = vpop.f32.mrb[51].mxu0 }
 0x329   : > { %v7439_v6 = vadd.f32 %v8492_v0, %v7390_v42  ;;  %v8495_v7 = vadd.f32 %v8494_v59, %v8493_v2  ;;  %v8522_v8 = vpop.f32.mrb[51].mxu1 }
 0x32a   : > { %v8523_v9 = vadd.f32 %v8522_v8, %v8521_v5 }
 0x32b   : > { %v7488_v4 = vadd.f32 %v8520_v3, %v7439_v6  ;;  %v7442_v10 = vadd.f32 %v8495_v7, %v7393_v44 }
 0x32d   : > { %v7491_v11 = vadd.f32 %v8523_v9, %v7442_v10  ;;  %v8496_v12 = vpop.f32.mrb[52].mxu0 }
 0x32e   : > { %v8497_v13 = vpop.f32.mrb[53].mxu0  ;;  %v8524_v18 = vpop.f32.mrb[52].mxu1 }
 0x32f   : > { %v8498_v14 = vadd.f32 %v8497_v13, %v8496_v12  ;;  %v8499_v15 = vpop.f32.mrb[54].mxu0  ;;  %v8525_v20 = vpop.f32.mrb[53].mxu1 }
 0x330   : > { %v8500_v16 = vpop.f32.mrb[55].mxu0  ;;  %v8526_v22 = vadd.f32 %v8525_v20, %v8524_v18  ;;  %v8527_v23 = vpop.f32.mrb[54].mxu1 }
 0x331   : > { %v7447_v17 = vadd.f32 %v8498_v14, %v7398_v58  ;;  %v8501_v19 = vadd.f32 %v8500_v16, %v8499_v15  ;;  %v8528_v24 = vpop.f32.mrb[55].mxu1 }
 0x332   : > { %v8529_v26 = vadd.f32 %v8528_v24, %v8527_v23 }
 0x333   : > { %v7450_v21 = vadd.f32 %v8501_v19, %v7401_v61  ;;  %v7496_v25 = vadd.f32 %v8526_v22, %v7447_v17 }
 0x335   : > { %v7499_v27 = vadd.f32 %v8529_v26, %v7450_v21 }
 0x345   : > { %v8546_v28 = vpop.f32.mrb[56].mxu0 }
 0x346   : > { %v8574_v29 = vpop.f32.mrb[56].mxu1  ;;  %v8547_v30 = vpop.f32.mrb[57].mxu0 }
 0x347   : > { %v8575_v31 = vpop.f32.mrb[57].mxu1  ;;  %v8548_v32 = vadd.f32 %v8547_v30, %v8546_v28  ;;  %v8549_v34 = vpop.f32.mrb[58].mxu0 }
 0x348   : > { %v8576_v33 = vadd.f32 %v8575_v31, %v8574_v29  ;;  %v8577_v35 = vpop.f32.mrb[58].mxu1  ;;  %v8550_v36 = vpop.f32.mrb[59].mxu0 }
 0x349   : > { %v8578_v37 = vpop.f32.mrb[59].mxu1  ;;  %v7537_v39 = vadd.f32 %v8548_v32, %v7488_v4  ;;  %v8551_v40 = vadd.f32 %v8550_v36, %v8549_v34  ;;  %v8133_v32 = vld [vmem:[%s4382_s14] ss:$0 sm:$0xff] }
 0x34a   : > { %v8579_v41 = vadd.f32 %v8578_v37, %v8577_v35 }
 0x34b   : > { %v7586_v42 = vadd.f32 %v8576_v33, %v7537_v39  ;;  %v7540_v43 = vadd.f32 %v8551_v40, %v7491_v11 }
 0x34d   : > { %v7589_v44 = vadd.f32 %v8579_v41, %v7540_v43  ;;  %v8552_v45 = vpop.f32.mrb[60].mxu0 }
 0x34e   : > { %v8580_v47 = vpop.f32.mrb[60].mxu1  ;;  %v8553_v48 = vpop.f32.mrb[61].mxu0 }
 0x34f   : > { %v8581_v49 = vpop.f32.mrb[61].mxu1  ;;  %v7600_v50 = vadd.f32 %v7589_v44, %v7586_v42  ;;  %v8554_v51 = vadd.f32 %v8553_v48, %v8552_v45  ;;  %v8555_v53 = vpop.f32.mrb[62].mxu0 }
 0x350   : > { %v8582_v52 = vadd.f32 %v8581_v49, %v8580_v47  ;;  %v8583_v54 = vpop.f32.mrb[62].mxu1  ;;  %v8556_v38 = vpop.f32.mrb[63].mxu0 }
 0x351   : > { %v8584_v55 = vpop.f32.mrb[63].mxu1  ;;  %v7545_v56 = vadd.f32 %v8554_v51, %v7496_v25  ;;  %v8557_v57 = vadd.f32 %v8556_v38, %v8555_v53  ;;  %v7633_v25 = vlaneseq }
 0x352   : > { %v8585_v58 = vadd.f32 %v8584_v55, %v8583_v54 }
 0x353   : > { %v7594_v60 = vadd.f32 %v8582_v52, %v7545_v56  ;;  %v7548_v61 = vadd.f32 %v8557_v57, %v7499_v27  ;;  %v7634_v26 = vshrl.u32 %v7633_v25, 7  ;;  %v7628_v27 = vld [vmem:[%s4379_s11] sm:$0x1] }
 0x355   : > { %v7601_v46 = vadd.f32 %v7600_v50, %v7594_v60  ;;  %v7597_v62 = vadd.f32 %v8585_v58, %v7548_v61  ;;  %v7635_v28 = vsub.s32 0, %v7634_v26 }
 0x357   : > { %v7602_v63 = vadd.f32 %v7601_v46, %v7597_v62 }
 0x359   : > { %v7603_v0 = vrot.slane %v7602_v63, 4 }
 0x35b   : > { %v7604_v1 = vadd.f32 %v7603_v0, %v7602_v63 }
 0x35d   : > { %v7605_v2 = vrot.slane %v7604_v1, 2 }
 0x35f   : > { %v7606_v3 = vadd.f32 %v7605_v2, %v7604_v1 }
 0x361   : > { %v7607_v5 = vrot.slane %v7606_v3, 1 }
 0x363   : > { %v7608_v59 = vadd.f32 %v7607_v5, %v7606_v3 }
 0x365   : > { %v7609_v6 = vmul.f32 0.03125, %v7608_v59 }
 0x367   : > { %v7610_v7 = vsub.f32 %v7586_v42, %v7609_v6  ;;  %v7611_v8 = vsub.f32 %v7589_v44, %v7609_v6  ;;  %v7612_v9 = vsub.f32 %v7594_v60, %v7609_v6  ;;  %v7613_v4 = vsub.f32 %v7597_v62, %v7609_v6 }
 0x369   : > { %v7614_v10 = vmul.f32 %v7610_v7, %v7610_v7  ;;  %v7615_v11 = vmul.f32 %v7611_v8, %v7611_v8  ;;  %v7616_v12 = vmul.f32 %v7612_v9, %v7612_v9  ;;  %v7617_v14 = vmul.f32 %v7613_v4, %v7613_v4 }
 0x36b   : > { %v7618_v13 = vadd.f32 %v7615_v11, %v7614_v10 }
 0x36d   : > { %v7619_v15 = vadd.f32 %v7618_v13, %v7616_v12 }
 0x36f   : > { %v7620_v16 = vadd.f32 %v7619_v15, %v7617_v14 }
 0x371   : > { %v7621_v17 = vrot.slane %v7620_v16, 4 }
 0x373   : > { %v7622_v18 = vadd.f32 %v7621_v17, %v7620_v16 }
 0x375   : > { %v7623_v19 = vrot.slane %v7622_v18, 2 }
 0x377   : > { %v7624_v20 = vadd.f32 %v7623_v19, %v7622_v18 }
 0x379   : > { %v7625_v21 = vrot.slane %v7624_v20, 1 }
 0x37b   : > { %v7626_v22 = vadd.f32 %v7625_v21, %v7624_v20 }
 0x37d   : > { %v7627_v23 = vmul.f32 0.03125, %v7626_v22 }
 0x37f   : > { %v7629_v24 = vadd.f32 1e-05, %v7627_v23 }
 0x381   : > { %8866 = vrsqrt.f32 %v7629_v24 }
 0x38b   : > { %v8867_v29 = vpop.eup %8866 }
 0x38c   : > { %v7631_v30 = vmul.f32 %v8867_v29, %v7628_v27 }
 0x38e   : > { %v7636_v31 = vrot.slane %v7631_v30, %v7635_v28 }
 0x390   : > { %v7638_v33 = vmul.f32 %v7636_v31, %v7610_v7  ;;  %v7639_v34 = vmul.f32 %v7636_v31, %v7611_v8  ;;  %v7640_v35 = vmul.f32 %v7636_v31, %v7612_v9  ;;  %v7641_v36 = vmul.f32 %v7636_v31, %v7613_v4 }
 0x392   : > { %v7649_v37 = vadd.f32 %v8133_v32, %v7638_v33  ;;  %v7650_v39 = vadd.f32 %v8133_v32, %v7639_v34  ;;  %v7651_v40 = vadd.f32 %v8133_v32, %v7640_v35  ;;  %v7652_v41 = vadd.f32 %v8133_v32, %v7641_v36 }
 0x393   : > { %7675 = sbr.rel (!%p8948_p5) target bundleno = 930 (0x3a2), region = 92 }
 0x394   : > { %vm7653_vm0 = vcmp.gt.f32.partialorder %v7649_v37, 0.0  ;;  %vm7654_vm1 = vcmp.gt.f32.partialorder %v7650_v39, 0.0  ;;  %vm7655_vm2 = vcmp.gt.f32.partialorder %v7651_v40, 0.0  ;;  %vm7656_vm3 = vcmp.gt.f32.partialorder %v7652_v41, 0.0 }
 0x395   : > { %v7657_v42 = vmul.f32 0.2, %v7649_v37  ;;  %v7658_v43 = vmul.f32 0.2, %v7650_v39  ;;  %v7659_v44 = vmul.f32 0.2, %v7651_v40 }
 0x396   : > { %v7660_v45 = vmul.f32 0.2, %v7652_v41 }
 0x397   : > { %v7661_v47 = vsel %vm7653_vm0, %v7649_v37, %v7657_v42  ;;  %v7662_v48 = vsel %vm7654_vm1, %v7650_v39, %v7658_v43  ;;  %v7663_v49 = vsel %vm7655_vm2, %v7651_v40, %v7659_v44 }
 0x398   : > { %v7664_v50 = vsel %vm7656_vm3, %v7652_v41, %v7660_v45  ;;  %7665 = vst [vmem:[%s4376_s21] sm:$0xff] %v7661_v47  ;;  %7666 = vst [vmem:[%s4376_s21 + $0x8] sm:$0xff] %v7662_v48 }
 0x399   : > { %7667 = vst [vmem:[%s4376_s21 + $0x10] sm:$0xff] %v7663_v49  ;;  %7668 = vst [vmem:[%s4376_s21 + $0x18] sm:$0xff] %v7664_v50 }
 0x39f   : > { %v7711_v51 = vld [vmem:[%s4376_s21] sm:$0xff]  ;;  %v7713_v52 = vld [vmem:[%s4376_s21 + $0x8] sm:$0xff] }
 0x3a0   : > { %v7715_v53 = vld [vmem:[%s4376_s21 + $0x10] sm:$0xff]  ;;  %v7717_v54 = vld [vmem:[%s4376_s21 + $0x18] sm:$0xff]  ;;  %7712 = vst [vmem:[%s7677_s25] sm:$0xff] %v7711_v51  ;;  %7714 = vst [vmem:[%s7677_s25 + $0x20] sm:$0xff] %v7713_v52 }
 0x3a1   : > { %7716 = vst [vmem:[%s7677_s25 + $0x40] sm:$0xff] %v7715_v53  ;;  %7718 = vst [vmem:[%s7677_s25 + $0x60] sm:$0xff] %v7717_v54 }
 0x3a2 PF: > { %p11_p11 = scmp.ge.s32.totalorder %s8936_s19, 6   ;;  %s10501_s15 = smov %s8886_s16 }
 0x3a3   : > { %s10502_s16 = smov %s8946_s22  ;;  %s10503_s17 = smov %s8936_s19 }
 0x3a4   :  { %13 = sbr.rel (!%p11_p11) target bundleno = 2 (0x2), region = 171 }

// kernel: discriminator_forward.7
= control target key start
LH: loop header
LB: loop body
LE: loop exit
PB: predicated region body
PF: predicated region fallthrough
CT: control target
= control target key end

     0   :  { %v7611_v22 = vmov 1966171168   ;;  %v1056_v24 = vlaneseq  ;;  %s9304_s1 = inlined_call_operand.vmem [shape: bf16[8192,128], index: 1, kind: input, shape index: {}]   ;;  %s9305_s0 = inlined_call_operand.vmem [shape: bf16[2,8192], index: 0, kind: input, shape index: {}]   ;;  %s9306_s2 = inlined_call_operand.vmem [shape: f32[2,128], index: 2, kind: output, shape index: {}]  }
   0x1   :  { %v7087_v0 = vld [vmem:[%s9304_s1 + $0x40] sm:$0xff]   ;;  %v7091_v4 = vld [vmem:[%s9304_s1 + $0x48] sm:$0xff]   ;;  %v7095_v8 = vld [vmem:[%s9304_s1 + $0x50] sm:$0xff]   ;;  %v1054_v23 = vunpack.c.l.s4 %v7611_v22 }
   0x2   :  { %v7088_v1 = vld [vmem:[%s9304_s1 + $0xc0] sm:$0xff]   ;;  %6382 = vmatprep.subr.bf16.mxu0 %v7087_v0  ;;  %v7092_v5 = vld [vmem:[%s9304_s1 + $0xc8] sm:$0xff]   ;;  %v7096_v9 = vld [vmem:[%s9304_s1 + $0xd0] sm:$0xff]   ;;  %v1057_v30 = vshrl.u32 %v1056_v24, 7 }
   0x3   :  { %v7089_v2 = vld [vmem:[%s9304_s1] sm:$0xff]   ;;  %6404 = vmatprep.subr.bf16.mxu1 %v7088_v1  ;;  %v7093_v6 = vld [vmem:[%s9304_s1 + $0x8] sm:$0xff]   ;;  %v7097_v10 = vld [vmem:[%s9304_s1 + $0x10] sm:$0xff]   ;;  %v1055_v29 = vunpack.c.0.s8 %v1054_v23 }
   0x4   :  { %v7090_v3 = vld [vmem:[%s9304_s1 + $0x80] sm:$0xff]   ;;  %6383 = vmatpush3.bf16.msra.mxu0 %v7089_v2  ;;  %v7094_v7 = vld [vmem:[%s9304_s1 + $0x88] sm:$0xff]   ;;  %v7098_v11 = vld [vmem:[%s9304_s1 + $0x90] sm:$0xff]  }
   0x5   :  { %6405 = vmatpush3.bf16.msra.mxu1 %v7090_v3  ;;  %6384 = vmatprep.subr.bf16.mxu0 %v7091_v4  ;;  %v7099_v12 = vld [vmem:[%s9304_s1 + $0x58] sm:$0xff]   ;;  %v7103_v16 = vld [vmem:[%s9304_s1 + $0x60] sm:$0xff]   ;;  %v7107_v20 = vld [vmem:[%s9304_s1 + $0x68] sm:$0xff]   ;;  %v7717_v35 = vsub.s32 %v1055_v29, %v1057_v30 }
   0x6   :  { %6406 = vmatprep.subr.bf16.mxu1 %v7092_v5  ;;  %v7100_v13 = vld [vmem:[%s9304_s1 + $0xd8] sm:$0xff]   ;;  %v7104_v17 = vld [vmem:[%s9304_s1 + $0xe0] sm:$0xff]   ;;  %v7108_v21 = vld [vmem:[%s9304_s1 + $0xe8] sm:$0xff]  }
   0x7   :  { %v7101_v14 = vld [vmem:[%s9304_s1 + $0x18] sm:$0xff]   ;;  %v7105_v18 = vld [vmem:[%s9304_s1 + $0x20] sm:$0xff]   ;;  %v7109_v25 = vld [vmem:[%s9304_s1 + $0x28] sm:$0xff]  }
   0x8   :  { %6385 = vmatpush3.bf16.msra.mxu0 %v7093_v6  ;;  %v7102_v15 = vld [vmem:[%s9304_s1 + $0x98] sm:$0xff]   ;;  %v7106_v19 = vld [vmem:[%s9304_s1 + $0xa0] sm:$0xff]   ;;  %v7110_v26 = vld [vmem:[%s9304_s1 + $0xa8] sm:$0xff]  }
   0x9   :  { %6407 = vmatpush3.bf16.msra.mxu1 %v7094_v7  ;;  %6386 = vmatprep.subr.bf16.mxu0 %v7095_v8  ;;  %v7111_v27 = vld [vmem:[%s9304_s1 + $0x70] sm:$0xff]   ;;  %v7115_v33 = vld [vmem:[%s9304_s1 + $0x78] sm:$0xff]   ;;  %v12_v38 = vld [vmem:[%s9305_s0] sm:$0xff] }
   0xa   :  { %6408 = vmatprep.subr.bf16.mxu1 %v7096_v9  ;;  %v7112_v28 = vld [vmem:[%s9304_s1 + $0xf0] sm:$0xff]   ;;  %v7116_v34 = vld [vmem:[%s9304_s1 + $0xf8] sm:$0xff]   ;;  %v1052_v39 = vcombine.high %v12_v38, %v12_v38  ;;  %v1059_v40 = vrot.slane %v12_v38, %v7717_v35  ;;  %v7120_v41 = vld [vmem:[%s9304_s1 + $0x140] sm:$0xff]  }
   0xb   :  { %v7113_v31 = vld [vmem:[%s9304_s1 + $0x30] sm:$0xff]   ;;  %v7117_v36 = vld [vmem:[%s9304_s1 + $0x38] sm:$0xff]   ;;  %v7121_v42 = vld [vmem:[%s9304_s1 + $0x1c0] sm:$0xff]  }
   0xc   :  { %6387 = vmatpush3.bf16.msra.mxu0 %v7097_v10  ;;  %v7114_v32 = vld [vmem:[%s9304_s1 + $0xb0] sm:$0xff]   ;;  %v7118_v37 = vld [vmem:[%s9304_s1 + $0xb8] sm:$0xff]   ;;  %v1067_v43 = vcombine.high %v1059_v40, %v1059_v40  ;;  %v1075_v44 = vrot.slane %v1059_v40, %v7717_v35  ;;  %v7737_v45 = vrot.slane %v1052_v39, %v7717_v35  ;;  %v7122_v46 = vld [vmem:[%s9304_s1 + $0x100] sm:$0xff]  }
   0xd   :  { %6409 = vmatpush3.bf16.msra.mxu1 %v7098_v11  ;;  %6388 = vmatprep.subr.bf16.mxu0 %v7099_v12  ;;  %v7123_v48 = vld [vmem:[%s9304_s1 + $0x180] sm:$0xff]   ;;  %v7124_v51 = vld [vmem:[%s9304_s1 + $0x148] sm:$0xff]   ;;  %v7128_v58 = vld [vmem:[%s9304_s1 + $0x150] sm:$0xff]  }
   0xe   :  { %6410 = vmatprep.subr.bf16.mxu1 %v7100_v13  ;;  %v1089_v47 = vrot.slane %v1067_v43, %v7717_v35  ;;  %v1068_v49 = vcombine.high %v7737_v45, %v7737_v45  ;;  %v1097_v50 = vcombine.high %v1075_v44, %v1075_v44  ;;  %v7125_v53 = vld [vmem:[%s9304_s1 + $0x1c8] sm:$0xff]   ;;  %v7129_v59 = vld [vmem:[%s9304_s1 + $0x1d0] sm:$0xff]   ;;  %v7132_v62 = vld [vmem:[%s9304_s1 + $0x158] sm:$0xff]  }
   0xf   :  { %v7126_v55 = vld [vmem:[%s9304_s1 + $0x108] sm:$0xff]   ;;  %v7130_v60 = vld [vmem:[%s9304_s1 + $0x110] sm:$0xff]   ;;  %v7133_v63 = vld [vmem:[%s9304_s1 + $0x1d8] sm:$0xff]  }
  0x10   :  { %6389 = vmatpush3.bf16.msra.mxu0 %v7101_v14  ;;  %4612 = vmatprep.mubr.bf16.mxu0 %v1089_v47  ;;  %v1099_v52 = vcombine.high %v1089_v47, %v1089_v47  ;;  %v1096_v54 = vrot.slane %v1068_v49, %v7717_v35  ;;  %v7127_v56 = vld [vmem:[%s9304_s1 + $0x188] sm:$0xff]   ;;  %v7131_v61 = vld [vmem:[%s9304_s1 + $0x190] sm:$0xff]   ;;  %v7134_v0 = vld [vmem:[%s9304_s1 + $0x118] sm:$0xff]  }
  0x11   :  { %6411 = vmatpush3.bf16.msra.mxu1 %v7102_v15  ;;  %6390 = vmatprep.subr.bf16.mxu0 %v7103_v16  ;;  %v7135_v1 = vld [vmem:[%s9304_s1 + $0x198] sm:$0xff]   ;;  %v7136_v2 = vld [vmem:[%s9304_s1 + $0x160] sm:$0xff]   ;;  %v7140_v6 = vld [vmem:[%s9304_s1 + $0x168] sm:$0xff]  }
  0x12   :  { %6412 = vmatprep.subr.bf16.mxu1 %v7104_v17  ;;  %4652 = vmatprep.mubr.bf16.mxu1 %v1099_v52  ;;  %v1100_v57 = vcombine.high %v1096_v54, %v1096_v54  ;;  %v7137_v3 = vld [vmem:[%s9304_s1 + $0x1e0] sm:$0xff]   ;;  %v7141_v7 = vld [vmem:[%s9304_s1 + $0x1e8] sm:$0xff]   ;;  %v7144_v10 = vld [vmem:[%s9304_s1 + $0x170] sm:$0xff]  }
  0x13   :  { %v7138_v4 = vld [vmem:[%s9304_s1 + $0x120] sm:$0xff]   ;;  %v7142_v8 = vld [vmem:[%s9304_s1 + $0x128] sm:$0xff]   ;;  %v7145_v11 = vld [vmem:[%s9304_s1 + $0x1f0] sm:$0xff]  }
  0x14   :  { %6391 = vmatpush3.bf16.msra.mxu0 %v7105_v18  ;;  %v7139_v5 = vld [vmem:[%s9304_s1 + $0x1a0] sm:$0xff]   ;;  %v7143_v9 = vld [vmem:[%s9304_s1 + $0x1a8] sm:$0xff]   ;;  %v7146_v12 = vld [vmem:[%s9304_s1 + $0x130] sm:$0xff]   ;;  %v1082_v18 = vrot.slane %v7737_v45, %v7717_v35 }
  0x15   :  { %6413 = vmatpush3.bf16.msra.mxu1 %v7106_v19  ;;  %6392 = vmatprep.subr.bf16.mxu0 %v7107_v20  ;;  %v7147_v13 = vld [vmem:[%s9304_s1 + $0x1b0] sm:$0xff]   ;;  %v7148_v14 = vld [vmem:[%s9304_s1 + $0x178] sm:$0xff]   ;;  %v7152_v19 = vld [vmem:[%s9304_s1 + $0x240] sm:$0xff]  }
  0x16   :  { %6414 = vmatprep.subr.bf16.mxu1 %v7108_v21  ;;  %v7149_v15 = vld [vmem:[%s9304_s1 + $0x1f8] sm:$0xff]   ;;  %v7153_v20 = vld [vmem:[%s9304_s1 + $0x2c0] sm:$0xff]   ;;  %v1098_v23 = vcombine.high %v1082_v18, %v1082_v18  ;;  %v7156_v24 = vld [vmem:[%s9304_s1 + $0x248] sm:$0xff]  }
  0x17   :  { %v7150_v16 = vld [vmem:[%s9304_s1 + $0x138] sm:$0xff]   ;;  %v7154_v21 = vld [vmem:[%s9304_s1 + $0x200] sm:$0xff]   ;;  %v7161_v29 = vld [vmem:[%s9304_s1 + $0x2d0] sm:$0xff]  }
  0x18   :  { %6393 = vmatpush3.bf16.msra.mxu0 %v7109_v25  ;;  %v7151_v17 = vld [vmem:[%s9304_s1 + $0x1b8] sm:$0xff]   ;;  %v7155_v22 = vld [vmem:[%s9304_s1 + $0x280] sm:$0xff]   ;;  %v7157_v25 = vld [vmem:[%s9304_s1 + $0x2c8] sm:$0xff]  }
  0x19   :  { %6415 = vmatpush3.bf16.msra.mxu1 %v7110_v26  ;;  %6394 = vmatprep.subr.bf16.mxu0 %v7111_v27  ;;  %v7158_v26 = vld [vmem:[%s9304_s1 + $0x208] sm:$0xff]   ;;  %v7162_v30 = vld [vmem:[%s9304_s1 + $0x210] sm:$0xff]   ;;  %v7169_v38 = vld [vmem:[%s9304_s1 + $0x2e0] sm:$0xff]  }
  0x1a   :  { %6416 = vmatprep.subr.bf16.mxu1 %v7112_v28  ;;  %v7159_v27 = vld [vmem:[%s9304_s1 + $0x288] sm:$0xff]   ;;  %v7160_v28 = vld [vmem:[%s9304_s1 + $0x250] sm:$0xff]   ;;  %v7170_v39 = vld [vmem:[%s9304_s1 + $0x220] sm:$0xff]  }
  0x1b   :  { %v7171_v40 = vld [vmem:[%s9304_s1 + $0x2a0] sm:$0xff]   ;;  %v7174_v43 = vld [vmem:[%s9304_s1 + $0x228] sm:$0xff]   ;;  %v7176_v45 = vld [vmem:[%s9304_s1 + $0x270] sm:$0xff]  }
  0x1c   :  { %6395 = vmatpush3.bf16.msra.mxu0 %v7113_v31  ;;  %v7163_v31 = vld [vmem:[%s9304_s1 + $0x290] sm:$0xff]   ;;  %v7180_v49 = vld [vmem:[%s9304_s1 + $0x278] sm:$0xff]   ;;  %v13_v52 = vld [vmem:[%s9305_s0 + $0x8] sm:$0xff] }
  0x1d   :  { %6417 = vmatpush3.bf16.msra.mxu1 %v7114_v32  ;;  %6396 = vmatprep.subr.bf16.mxu0 %v7115_v33  ;;  %v7164_v32 = vld [vmem:[%s9304_s1 + $0x258] sm:$0xff]   ;;  %v7178_v47 = vld [vmem:[%s9304_s1 + $0x230] sm:$0xff]  }
  0x1e   :  { %6418 = vmatprep.subr.bf16.mxu1 %v7116_v34  ;;  %v7165_v33 = vld [vmem:[%s9304_s1 + $0x2d8] sm:$0xff]  }
  0x1f   :  { %v7166_v34 = vld [vmem:[%s9304_s1 + $0x218] sm:$0xff]  }
  0x20   :  { %6397 = vmatpush3.bf16.msra.mxu0 %v7117_v36  ;;  %v7167_v36 = vld [vmem:[%s9304_s1 + $0x298] sm:$0xff]  }
  0x21   :  { %6419 = vmatpush3.bf16.msra.mxu1 %v7118_v37  ;;  %6426 = vmatprep.subr.bf16.mxu0 %v7120_v41  ;;  %v7168_v37 = vld [vmem:[%s9304_s1 + $0x260] sm:$0xff]   ;;  %v7172_v41 = vld [vmem:[%s9304_s1 + $0x268] sm:$0xff]  }
  0x22   :  { %6448 = vmatprep.subr.bf16.mxu1 %v7121_v42  ;;  %v7173_v42 = vld [vmem:[%s9304_s1 + $0x2e8] sm:$0xff]  }
  0x23   :  { %4613 = vmatmul.mubr.bf16.vlgmr.msra.gmra.mrb[0].mxu0 %v1075_v44  ;;  %v7175_v44 = vld [vmem:[%s9304_s1 + $0x2a8] sm:$0xff]  }
  0x24   :  { %6427 = vmatpush3.bf16.msra.mxu0 %v7122_v46  ;;  %4653 = vmatmul.mubr.bf16.vlgmr.msra.gmra.mrb[0].mxu1 %v1097_v50  ;;  %v7177_v46 = vld [vmem:[%s9304_s1 + $0x2f0] sm:$0xff]   ;;  %v7181_v50 = vld [vmem:[%s9304_s1 + $0x2f8] sm:$0xff]  }
  0x25   :  { %6428 = vmatprep.subr.bf16.mxu0 %v7124_v51  ;;  %6449 = vmatpush3.bf16.msra.mxu1 %v7123_v48  ;;  %v7179_v48 = vld [vmem:[%s9304_s1 + $0x2b0] sm:$0xff]   ;;  %v7182_v51 = vld [vmem:[%s9304_s1 + $0x238] sm:$0xff]  }
  0x26   :  { %4692 = vmatprep.mubr.bf16.mxu0 %v1096_v54  ;;  %6450 = vmatprep.subr.bf16.mxu1 %v7125_v53  ;;  %v7183_v53 = vld [vmem:[%s9304_s1 + $0x2b8] sm:$0xff]   ;;  %v1108_v54 = vrot.slane %v13_v52, %v7717_v35 }
  0x27   :  { %4732 = vmatprep.mubr.bf16.mxu1 %v1100_v57 }
  0x28   :  { %6429 = vmatpush3.bf16.msra.mxu0 %v7126_v55  ;;  %v1101_v55 = vcombine.high %v13_v52, %v13_v52  ;;  %v1116_v57 = vcombine.high %v1108_v54, %v1108_v54  ;;  %v7233_v52 = vld [vmem:[%s9304_s1 + $0x460] sm:$0xff]  }
  0x29   :  { %6430 = vmatprep.subr.bf16.mxu0 %v7128_v58  ;;  %6451 = vmatpush3.bf16.msra.mxu1 %v7127_v56  ;;  %v7184_v56 = vld [vmem:[%s9304_s1 + $0x340] sm:$0xff]   ;;  %v1124_v58 = vrot.slane %v1108_v54, %v7717_v35 }
  0x2a   :  { %6452 = vmatprep.subr.bf16.mxu1 %v7129_v59  ;;  %v7185_v59 = vld [vmem:[%s9304_s1 + $0x3c0] sm:$0xff]  }
  0x2b   :  { %v7235_v54 = vld [vmem:[%s9304_s1 + $0x420] sm:$0xff]  }
  0x2c   :  { %6431 = vmatpush3.bf16.msra.mxu0 %v7130_v60  ;;  %v7943_v60 = vrot.slane %v1101_v55, %v7717_v35  ;;  %v7236_v55 = vld [vmem:[%s9304_s1 + $0x4a0] sm:$0xff]  }
  0x2d   :  { %6432 = vmatprep.subr.bf16.mxu0 %v7132_v62  ;;  %6453 = vmatpush3.bf16.msra.mxu1 %v7131_v61  ;;  %v7186_v61 = vld [vmem:[%s9304_s1 + $0x300] sm:$0xff]   ;;  %v1138_v62 = vrot.slane %v1116_v57, %v7717_v35  ;;  %v7238_v57 = vld [vmem:[%s9304_s1 + $0x4e8] sm:$0xff]  }
  0x2e   :  { %6454 = vmatprep.subr.bf16.mxu1 %v7133_v63  ;;  %v7187_v63 = vld [vmem:[%s9304_s1 + $0x380] sm:$0xff]  }
  0x30   :  { %6433 = vmatpush3.bf16.msra.mxu0 %v7134_v0  ;;  %v1117_v0 = vcombine.high %v7943_v60, %v7943_v60 }
  0x31   :  { %6434 = vmatprep.subr.bf16.mxu0 %v7136_v2  ;;  %6455 = vmatpush3.bf16.msra.mxu1 %v7135_v1  ;;  %v1146_v1 = vcombine.high %v1124_v58, %v1124_v58  ;;  %v7188_v2 = vld [vmem:[%s9304_s1 + $0x348] sm:$0xff]  }
  0x32   :  { %6456 = vmatprep.subr.bf16.mxu1 %v7137_v3  ;;  %v1148_v3 = vcombine.high %v1138_v62, %v1138_v62 }
  0x34   :  { %6435 = vmatpush3.bf16.msra.mxu0 %v7138_v4  ;;  %v7189_v4 = vld [vmem:[%s9304_s1 + $0x3c8] sm:$0xff]  }
  0x35   :  { %6436 = vmatprep.subr.bf16.mxu0 %v7140_v6  ;;  %6457 = vmatpush3.bf16.msra.mxu1 %v7139_v5  ;;  %v1145_v5 = vrot.slane %v1117_v0, %v7717_v35  ;;  %v7190_v6 = vld [vmem:[%s9304_s1 + $0x308] sm:$0xff]   ;;  %v7245_v0 = vld [vmem:[%s9304_s1 + $0x478] sm:$0xff]  }
  0x36   :  { %6458 = vmatprep.subr.bf16.mxu1 %v7141_v7  ;;  %v7191_v7 = vld [vmem:[%s9304_s1 + $0x388] sm:$0xff]  }
  0x38   :  { %6437 = vmatpush3.bf16.msra.mxu0 %v7142_v8  ;;  %v1149_v8 = vcombine.high %v1145_v5, %v1145_v5 }
  0x39   :  { %6438 = vmatprep.subr.bf16.mxu0 %v7144_v10  ;;  %6459 = vmatpush3.bf16.msra.mxu1 %v7143_v9  ;;  %v7192_v9 = vld [vmem:[%s9304_s1 + $0x350] sm:$0xff]  }
  0x3a   :  { %6460 = vmatprep.subr.bf16.mxu1 %v7145_v11  ;;  %v7193_v10 = vld [vmem:[%s9304_s1 + $0x3d0] sm:$0xff]  }
  0x3b   :  { %v7194_v11 = vld [vmem:[%s9304_s1 + $0x310] sm:$0xff]  }
  0x3c   :  { %6439 = vmatpush3.bf16.msra.mxu0 %v7146_v12  ;;  %v7195_v12 = vld [vmem:[%s9304_s1 + $0x390] sm:$0xff]  }
  0x3d   :  { %6440 = vmatprep.subr.bf16.mxu0 %v7148_v14  ;;  %6461 = vmatpush3.bf16.msra.mxu1 %v7147_v13  ;;  %v7196_v13 = vld [vmem:[%s9304_s1 + $0x358] sm:$0xff]  }
  0x3e   :  { %6462 = vmatprep.subr.bf16.mxu1 %v7149_v15  ;;  %v7197_v14 = vld [vmem:[%s9304_s1 + $0x3d8] sm:$0xff]  }
  0x3f   :  { %v7198_v15 = vld [vmem:[%s9304_s1 + $0x318] sm:$0xff]  }
  0x40   :  { %6441 = vmatpush3.bf16.msra.mxu0 %v7150_v16  ;;  %v7199_v16 = vld [vmem:[%s9304_s1 + $0x398] sm:$0xff]  }
  0x41   :  { %6470 = vmatprep.subr.bf16.mxu0 %v7152_v19  ;;  %6463 = vmatpush3.bf16.msra.mxu1 %v7151_v17  ;;  %v7200_v17 = vld [vmem:[%s9304_s1 + $0x360] sm:$0xff]  }
  0x42   :  { %6492 = vmatprep.subr.bf16.mxu1 %v7153_v20  ;;  %v7202_v19 = vld [vmem:[%s9304_s1 + $0x320] sm:$0xff]  }
  0x43   :  { %4693 = vmatmul.mubr.bf16.vlgmr.msra.gmra.mrb[4].mxu0 %v1082_v18  ;;  %v7201_v18 = vld [vmem:[%s9304_s1 + $0x3e0] sm:$0xff]  }
  0x44   :  { %6471 = vmatpush3.bf16.msra.mxu0 %v7154_v21  ;;  %4733 = vmatmul.mubr.bf16.vlgmr.msra.gmra.mrb[4].mxu1 %v1098_v23  ;;  %v7203_v20 = vld [vmem:[%s9304_s1 + $0x3a0] sm:$0xff]   ;;  %v7204_v21 = vld [vmem:[%s9304_s1 + $0x368] sm:$0xff]  }
  0x45   :  { %6472 = vmatprep.subr.bf16.mxu0 %v7156_v24  ;;  %6493 = vmatpush3.bf16.msra.mxu1 %v7155_v22  ;;  %v7205_v22 = vld [vmem:[%s9304_s1 + $0x3e8] sm:$0xff]  }
  0x46   :  { %6494 = vmatprep.subr.bf16.mxu1 %v7157_v25  ;;  %4772 = vmatprep.mubr.bf16.mxu0 %v1138_v62  ;;  %v7206_v23 = vld [vmem:[%s9304_s1 + $0x328] sm:$0xff]   ;;  %v7208_v25 = vld [vmem:[%s9304_s1 + $0x370] sm:$0xff]  }
  0x47   :  { %4812 = vmatprep.mubr.bf16.mxu1 %v1148_v3  ;;  %v7207_v24 = vld [vmem:[%s9304_s1 + $0x3a8] sm:$0xff]   ;;  %v7243_v62 = vld [vmem:[%s9304_s1 + $0x430] sm:$0xff]  }
  0x48   :  { %6473 = vmatpush3.bf16.msra.mxu0 %v7158_v26  ;;  %v7209_v26 = vld [vmem:[%s9304_s1 + $0x3f0] sm:$0xff]  }
  0x49   :  { %6474 = vmatprep.subr.bf16.mxu0 %v7160_v28  ;;  %6495 = vmatpush3.bf16.msra.mxu1 %v7159_v27  ;;  %v7210_v27 = vld [vmem:[%s9304_s1 + $0x330] sm:$0xff]  }
  0x4a   :  { %6496 = vmatprep.subr.bf16.mxu1 %v7161_v29  ;;  %v7211_v28 = vld [vmem:[%s9304_s1 + $0x3b0] sm:$0xff]   ;;  %v7212_v29 = vld [vmem:[%s9304_s1 + $0x378] sm:$0xff]  }
  0x4b   :  { %v14_v3 = vld [vmem:[%s9305_s0 + $0x10] sm:$0xff] }
  0x4c   :  { %6475 = vmatpush3.bf16.msra.mxu0 %v7162_v30  ;;  %v7213_v30 = vld [vmem:[%s9304_s1 + $0x3f8] sm:$0xff]  }
  0x4d   :  { %6476 = vmatprep.subr.bf16.mxu0 %v7164_v32  ;;  %6497 = vmatpush3.bf16.msra.mxu1 %v7163_v31  ;;  %v7214_v31 = vld [vmem:[%s9304_s1 + $0x338] sm:$0xff]  }
  0x4e   :  { %6498 = vmatprep.subr.bf16.mxu1 %v7165_v33  ;;  %v7215_v32 = vld [vmem:[%s9304_s1 + $0x3b8] sm:$0xff]   ;;  %v1131_v33 = vrot.slane %v7943_v60, %v7717_v35  ;;  %v7241_v60 = vld [vmem:[%s9304_s1 + $0x470] sm:$0xff]  }
  0x50   :  { %6477 = vmatpush3.bf16.msra.mxu0 %v7166_v34  ;;  %v7217_v34 = vld [vmem:[%s9304_s1 + $0x440] sm:$0xff]  }
  0x51   :  { %6478 = vmatprep.subr.bf16.mxu0 %v7168_v37  ;;  %6499 = vmatpush3.bf16.msra.mxu1 %v7167_v36  ;;  %v7218_v36 = vld [vmem:[%s9304_s1 + $0x4c0] sm:$0xff]  }
  0x52   :  { %6500 = vmatprep.subr.bf16.mxu1 %v7169_v38  ;;  %v7219_v37 = vld [vmem:[%s9304_s1 + $0x400] sm:$0xff]  }
  0x53   :  { %v7220_v38 = vld [vmem:[%s9304_s1 + $0x480] sm:$0xff]  }
  0x54   :  { %6479 = vmatpush3.bf16.msra.mxu0 %v7170_v39  ;;  %v1147_v39 = vcombine.high %v1131_v33, %v1131_v33 }
  0x55   :  { %6480 = vmatprep.subr.bf16.mxu0 %v7172_v41  ;;  %6501 = vmatpush3.bf16.msra.mxu1 %v7171_v40  ;;  %v7221_v40 = vld [vmem:[%s9304_s1 + $0x448] sm:$0xff]  }
  0x56   :  { %6502 = vmatprep.subr.bf16.mxu1 %v7173_v42  ;;  %v7222_v41 = vld [vmem:[%s9304_s1 + $0x4c8] sm:$0xff]  }
  0x57   :  { %v7223_v42 = vld [vmem:[%s9304_s1 + $0x408] sm:$0xff]  }
  0x58   :  { %6481 = vmatpush3.bf16.msra.mxu0 %v7174_v43  ;;  %v7224_v43 = vld [vmem:[%s9304_s1 + $0x488] sm:$0xff]  }
  0x59   :  { %6482 = vmatprep.subr.bf16.mxu0 %v7176_v45  ;;  %6503 = vmatpush3.bf16.msra.mxu1 %v7175_v44  ;;  %v7225_v44 = vld [vmem:[%s9304_s1 + $0x450] sm:$0xff]  }
  0x5a   :  { %6504 = vmatprep.subr.bf16.mxu1 %v7177_v46  ;;  %v7226_v45 = vld [vmem:[%s9304_s1 + $0x4d0] sm:$0xff]  }
  0x5b   :  { %v7227_v46 = vld [vmem:[%s9304_s1 + $0x410] sm:$0xff]  }
  0x5c   :  { %6483 = vmatpush3.bf16.msra.mxu0 %v7178_v47  ;;  %v7228_v47 = vld [vmem:[%s9304_s1 + $0x490] sm:$0xff]  }
  0x5d   :  { %6484 = vmatprep.subr.bf16.mxu0 %v7180_v49  ;;  %6505 = vmatpush3.bf16.msra.mxu1 %v7179_v48  ;;  %v7229_v48 = vld [vmem:[%s9304_s1 + $0x458] sm:$0xff]  }
  0x5e   :  { %6506 = vmatprep.subr.bf16.mxu1 %v7181_v50  ;;  %v7230_v49 = vld [vmem:[%s9304_s1 + $0x4d8] sm:$0xff]  }
  0x5f   :  { %v7231_v50 = vld [vmem:[%s9304_s1 + $0x418] sm:$0xff]  }
  0x60   :  { %6485 = vmatpush3.bf16.msra.mxu0 %v7182_v51  ;;  %v7232_v51 = vld [vmem:[%s9304_s1 + $0x498] sm:$0xff]  }
  0x61   :  { %6514 = vmatprep.subr.bf16.mxu0 %v7184_v56  ;;  %6507 = vmatpush3.bf16.msra.mxu1 %v7183_v53  ;;  %v7234_v53 = vld [vmem:[%s9304_s1 + $0x4e0] sm:$0xff]   ;;  %v7237_v56 = vld [vmem:[%s9304_s1 + $0x468] sm:$0xff]  }
  0x62   :  { %6536 = vmatprep.subr.bf16.mxu1 %v7185_v59  ;;  %v7240_v59 = vld [vmem:[%s9304_s1 + $0x4a8] sm:$0xff]  }
  0x63   :  { %4773 = vmatmul.mubr.bf16.vlgmr.msra.gmra.mrb[8].mxu0 %v1124_v58  ;;  %v7239_v58 = vld [vmem:[%s9304_s1 + $0x428] sm:$0xff]  }
  0x64   :  { %6515 = vmatpush3.bf16.msra.mxu0 %v7186_v61  ;;  %4813 = vmatmul.mubr.bf16.vlgmr.msra.gmra.mrb[8].mxu1 %v1146_v1  ;;  %v7242_v61 = vld [vmem:[%s9304_s1 + $0x4f0] sm:$0xff]   ;;  %v7246_v1 = vld [vmem:[%s9304_s1 + $0x4f8] sm:$0xff]  }
  0x65   :  { %6516 = vmatprep.subr.bf16.mxu0 %v7188_v2  ;;  %6537 = vmatpush3.bf16.msra.mxu1 %v7187_v63  ;;  %v7244_v63 = vld [vmem:[%s9304_s1 + $0x4b0] sm:$0xff]   ;;  %v7247_v2 = vld [vmem:[%s9304_s1 + $0x438] sm:$0xff]  }
  0x66   :  { %4852 = vmatprep.mubr.bf16.mxu0 %v1145_v5  ;;  %6538 = vmatprep.subr.bf16.mxu1 %v7189_v4  ;;  %v7248_v4 = vld [vmem:[%s9304_s1 + $0x4b8] sm:$0xff]   ;;  %v1157_v5 = vrot.slane %v14_v3, %v7717_v35 }
  0x67   :  { %4892 = vmatprep.mubr.bf16.mxu1 %v1149_v8 }
  0x68   :  { %6517 = vmatpush3.bf16.msra.mxu0 %v7190_v6  ;;  %v1150_v6 = vcombine.high %v14_v3, %v14_v3  ;;  %v1165_v8 = vcombine.high %v1157_v5, %v1157_v5  ;;  %v7298_v3 = vld [vmem:[%s9304_s1 + $0x660] sm:$0xff]  }
  0x69   :  { %6518 = vmatprep.subr.bf16.mxu0 %v7192_v9  ;;  %6539 = vmatpush3.bf16.msra.mxu1 %v7191_v7  ;;  %v7249_v7 = vld [vmem:[%s9304_s1 + $0x540] sm:$0xff]   ;;  %v1173_v9 = vrot.slane %v1157_v5, %v7717_v35 }
  0x6a   :  { %6540 = vmatprep.subr.bf16.mxu1 %v7193_v10  ;;  %v7250_v10 = vld [vmem:[%s9304_s1 + $0x5c0] sm:$0xff]  }
  0x6b   :  { %v7300_v5 = vld [vmem:[%s9304_s1 + $0x620] sm:$0xff]  }
  0x6c   :  { %6519 = vmatpush3.bf16.msra.mxu0 %v7194_v11  ;;  %v8149_v11 = vrot.slane %v1150_v6, %v7717_v35  ;;  %v7301_v6 = vld [vmem:[%s9304_s1 + $0x6a0] sm:$0xff]  }
  0x6d   :  { %6520 = vmatprep.subr.bf16.mxu0 %v7196_v13  ;;  %6541 = vmatpush3.bf16.msra.mxu1 %v7195_v12  ;;  %v7251_v12 = vld [vmem:[%s9304_s1 + $0x500] sm:$0xff]   ;;  %v1187_v13 = vrot.slane %v1165_v8, %v7717_v35  ;;  %v7303_v8 = vld [vmem:[%s9304_s1 + $0x6e8] sm:$0xff]  }
  0x6e   :  { %6542 = vmatprep.subr.bf16.mxu1 %v7197_v14  ;;  %v7252_v14 = vld [vmem:[%s9304_s1 + $0x580] sm:$0xff]  }
  0x70   :  { %6521 = vmatpush3.bf16.msra.mxu0 %v7198_v15  ;;  %v1166_v15 = vcombine.high %v8149_v11, %v8149_v11 }
  0x71   :  { %6522 = vmatprep.subr.bf16.mxu0 %v7200_v17  ;;  %6543 = vmatpush3.bf16.msra.mxu1 %v7199_v16  ;;  %v1195_v16 = vcombine.high %v1173_v9, %v1173_v9  ;;  %v7253_v17 = vld [vmem:[%s9304_s1 + $0x548] sm:$0xff]  }
  0x72   :  { %6544 = vmatprep.subr.bf16.mxu1 %v7201_v18  ;;  %v1197_v18 = vcombine.high %v1187_v13, %v1187_v13 }
  0x74   :  { %6523 = vmatpush3.bf16.msra.mxu0 %v7202_v19  ;;  %v7254_v19 = vld [vmem:[%s9304_s1 + $0x5c8] sm:$0xff]  }
  0x75   :  { %6524 = vmatprep.subr.bf16.mxu0 %v7204_v21  ;;  %6545 = vmatpush3.bf16.msra.mxu1 %v7203_v20  ;;  %v1194_v20 = vrot.slane %v1166_v15, %v7717_v35  ;;  %v7255_v21 = vld [vmem:[%s9304_s1 + $0x508] sm:$0xff]   ;;  %v7310_v15 = vld [vmem:[%s9304_s1 + $0x678] sm:$0xff]  }
  0x76   :  { %6546 = vmatprep.subr.bf16.mxu1 %v7205_v22  ;;  %v7256_v22 = vld [vmem:[%s9304_s1 + $0x588] sm:$0xff]  }
  0x78   :  { %6525 = vmatpush3.bf16.msra.mxu0 %v7206_v23  ;;  %v1198_v23 = vcombine.high %v1194_v20, %v1194_v20 }
  0x79   :  { %6526 = vmatprep.subr.bf16.mxu0 %v7208_v25  ;;  %6547 = vmatpush3.bf16.msra.mxu1 %v7207_v24  ;;  %v7257_v24 = vld [vmem:[%s9304_s1 + $0x550] sm:$0xff]  }
  0x7a   :  { %6548 = vmatprep.subr.bf16.mxu1 %v7209_v26  ;;  %v7258_v25 = vld [vmem:[%s9304_s1 + $0x5d0] sm:$0xff]  }
  0x7b   :  { %v7259_v26 = vld [vmem:[%s9304_s1 + $0x510] sm:$0xff]  }
  0x7c   :  { %6527 = vmatpush3.bf16.msra.mxu0 %v7210_v27  ;;  %v7260_v27 = vld [vmem:[%s9304_s1 + $0x590] sm:$0xff]  }
  0x7d   :  { %6528 = vmatprep.subr.bf16.mxu0 %v7212_v29  ;;  %6549 = vmatpush3.bf16.msra.mxu1 %v7211_v28  ;;  %v7261_v28 = vld [vmem:[%s9304_s1 + $0x558] sm:$0xff]  }
  0x7e   :  { %6550 = vmatprep.subr.bf16.mxu1 %v7213_v30  ;;  %v7262_v29 = vld [vmem:[%s9304_s1 + $0x5d8] sm:$0xff]  }
  0x7f   :  { %v7263_v30 = vld [vmem:[%s9304_s1 + $0x518] sm:$0xff]  }
  0x80   :  { %6529 = vmatpush3.bf16.msra.mxu0 %v7214_v31  ;;  %v7264_v31 = vld [vmem:[%s9304_s1 + $0x598] sm:$0xff]  }
  0x81   :  { %6558 = vmatprep.subr.bf16.mxu0 %v7217_v34  ;;  %6551 = vmatpush3.bf16.msra.mxu1 %v7215_v32  ;;  %v7265_v32 = vld [vmem:[%s9304_s1 + $0x560] sm:$0xff]  }
  0x82   :  { %6580 = vmatprep.subr.bf16.mxu1 %v7218_v36  ;;  %v7267_v34 = vld [vmem:[%s9304_s1 + $0x520] sm:$0xff]  }
  0x83   :  { %4853 = vmatmul.mubr.bf16.vlgmr.msra.gmra.mrb[12].mxu0 %v1131_v33  ;;  %v7266_v33 = vld [vmem:[%s9304_s1 + $0x5e0] sm:$0xff]  }
  0x84   :  { %6559 = vmatpush3.bf16.msra.mxu0 %v7219_v37  ;;  %4893 = vmatmul.mubr.bf16.vlgmr.msra.gmra.mrb[12].mxu1 %v1147_v39  ;;  %v7268_v36 = vld [vmem:[%s9304_s1 + $0x5a0] sm:$0xff]   ;;  %v7269_v37 = vld [vmem:[%s9304_s1 + $0x568] sm:$0xff]  }
  0x85   :  { %6560 = vmatprep.subr.bf16.mxu0 %v7221_v40  ;;  %6581 = vmatpush3.bf16.msra.mxu1 %v7220_v38  ;;  %v7270_v38 = vld [vmem:[%s9304_s1 + $0x5e8] sm:$0xff]  }
  0x86   :  { %6582 = vmatprep.subr.bf16.mxu1 %v7222_v41  ;;  %4932 = vmatprep.mubr.bf16.mxu0 %v1187_v13  ;;  %v7271_v39 = vld [vmem:[%s9304_s1 + $0x528] sm:$0xff]   ;;  %v7273_v41 = vld [vmem:[%s9304_s1 + $0x570] sm:$0xff]  }
  0x87   :  { %4972 = vmatprep.mubr.bf16.mxu1 %v1197_v18  ;;  %v7272_v40 = vld [vmem:[%s9304_s1 + $0x5a8] sm:$0xff]   ;;  %v7308_v13 = vld [vmem:[%s9304_s1 + $0x630] sm:$0xff]   ;;  %v15_v18 = vld [vmem:[%s9305_s0 + $0x18] sm:$0xff] }
  0x88   :  { %6561 = vmatpush3.bf16.msra.mxu0 %v7223_v42  ;;  %v7274_v42 = vld [vmem:[%s9304_s1 + $0x5f0] sm:$0xff]  }
  0x89   :  { %6562 = vmatprep.subr.bf16.mxu0 %v7225_v44  ;;  %6583 = vmatpush3.bf16.msra.mxu1 %v7224_v43  ;;  %v7275_v43 = vld [vmem:[%s9304_s1 + $0x530] sm:$0xff]  }
  0x8a   :  { %6584 = vmatprep.subr.bf16.mxu1 %v7226_v45  ;;  %v7276_v44 = vld [vmem:[%s9304_s1 + $0x5b0] sm:$0xff]   ;;  %v7277_v45 = vld [vmem:[%s9304_s1 + $0x578] sm:$0xff]  }
  0x8c   :  { %6563 = vmatpush3.bf16.msra.mxu0 %v7227_v46  ;;  %v7278_v46 = vld [vmem:[%s9304_s1 + $0x5f8] sm:$0xff]  }
  0x8d   :  { %6564 = vmatprep.subr.bf16.mxu0 %v7229_v48  ;;  %6585 = vmatpush3.bf16.msra.mxu1 %v7228_v47  ;;  %v7279_v47 = vld [vmem:[%s9304_s1 + $0x538] sm:$0xff]  }
  0x8e   :  { %6586 = vmatprep.subr.bf16.mxu1 %v7230_v49  ;;  %v7280_v48 = vld [vmem:[%s9304_s1 + $0x5b8] sm:$0xff]   ;;  %v1180_v49 = vrot.slane %v8149_v11, %v7717_v35  ;;  %v7306_v11 = vld [vmem:[%s9304_s1 + $0x670] sm:$0xff]  }
  0x90   :  { %6565 = vmatpush3.bf16.msra.mxu0 %v7231_v50  ;;  %v7282_v50 = vld [vmem:[%s9304_s1 + $0x640] sm:$0xff]  }
  0x91   :  { %6566 = vmatprep.subr.bf16.mxu0 %v7233_v52  ;;  %6587 = vmatpush3.bf16.msra.mxu1 %v7232_v51  ;;  %v7283_v51 = vld [vmem:[%s9304_s1 + $0x6c0] sm:$0xff]  }
  0x92   :  { %6588 = vmatprep.subr.bf16.mxu1 %v7234_v53  ;;  %v7284_v52 = vld [vmem:[%s9304_s1 + $0x600] sm:$0xff]  }
  0x93   :  { %v7285_v53 = vld [vmem:[%s9304_s1 + $0x680] sm:$0xff]  }
  0x94   :  { %6567 = vmatpush3.bf16.msra.mxu0 %v7235_v54  ;;  %v1196_v54 = vcombine.high %v1180_v49, %v1180_v49 }
  0x95   :  { %6568 = vmatprep.subr.bf16.mxu0 %v7237_v56  ;;  %6589 = vmatpush3.bf16.msra.mxu1 %v7236_v55  ;;  %v7286_v55 = vld [vmem:[%s9304_s1 + $0x648] sm:$0xff]  }
  0x96   :  { %6590 = vmatprep.subr.bf16.mxu1 %v7238_v57  ;;  %v7287_v56 = vld [vmem:[%s9304_s1 + $0x6c8] sm:$0xff]  }
  0x97   :  { %v7288_v57 = vld [vmem:[%s9304_s1 + $0x608] sm:$0xff]  }
  0x98   :  { %6569 = vmatpush3.bf16.msra.mxu0 %v7239_v58  ;;  %v7289_v58 = vld [vmem:[%s9304_s1 + $0x688] sm:$0xff]  }
  0x99   :  { %6570 = vmatprep.subr.bf16.mxu0 %v7241_v60  ;;  %6591 = vmatpush3.bf16.msra.mxu1 %v7240_v59  ;;  %v7290_v59 = vld [vmem:[%s9304_s1 + $0x650] sm:$0xff]  }
  0x9a   :  { %6592 = vmatprep.subr.bf16.mxu1 %v7242_v61  ;;  %v7291_v60 = vld [vmem:[%s9304_s1 + $0x6d0] sm:$0xff]  }
  0x9b   :  { %v7292_v61 = vld [vmem:[%s9304_s1 + $0x610] sm:$0xff]  }
  0x9c   :  { %6571 = vmatpush3.bf16.msra.mxu0 %v7243_v62  ;;  %v7293_v62 = vld [vmem:[%s9304_s1 + $0x690] sm:$0xff]  }
  0x9d   :  { %6572 = vmatprep.subr.bf16.mxu0 %v7245_v0  ;;  %6593 = vmatpush3.bf16.msra.mxu1 %v7244_v63  ;;  %v7294_v63 = vld [vmem:[%s9304_s1 + $0x658] sm:$0xff]  }
  0x9e   :  { %6594 = vmatprep.subr.bf16.mxu1 %v7246_v1  ;;  %v7295_v0 = vld [vmem:[%s9304_s1 + $0x6d8] sm:$0xff]  }
  0x9f   :  { %v7296_v1 = vld [vmem:[%s9304_s1 + $0x618] sm:$0xff]  }
  0xa0   :  { %6573 = vmatpush3.bf16.msra.mxu0 %v7247_v2  ;;  %v7297_v2 = vld [vmem:[%s9304_s1 + $0x698] sm:$0xff]  }
  0xa1   :  { %6602 = vmatprep.subr.bf16.mxu0 %v7249_v7  ;;  %6595 = vmatpush3.bf16.msra.mxu1 %v7248_v4  ;;  %v7299_v4 = vld [vmem:[%s9304_s1 + $0x6e0] sm:$0xff]   ;;  %v7302_v7 = vld [vmem:[%s9304_s1 + $0x668] sm:$0xff]  }
  0xa2   :  { %6624 = vmatprep.subr.bf16.mxu1 %v7250_v10  ;;  %v7305_v10 = vld [vmem:[%s9304_s1 + $0x6a8] sm:$0xff]  }
  0xa3   :  { %4933 = vmatmul.mubr.bf16.vlgmr.msra.gmra.mrb[16].mxu0 %v1173_v9  ;;  %v7304_v9 = vld [vmem:[%s9304_s1 + $0x628] sm:$0xff]  }
  0xa4   :  { %6603 = vmatpush3.bf16.msra.mxu0 %v7251_v12  ;;  %4973 = vmatmul.mubr.bf16.vlgmr.msra.gmra.mrb[16].mxu1 %v1195_v16  ;;  %v7307_v12 = vld [vmem:[%s9304_s1 + $0x6f0] sm:$0xff]   ;;  %v7311_v16 = vld [vmem:[%s9304_s1 + $0x6f8] sm:$0xff]  }
  0xa5   :  { %6604 = vmatprep.subr.bf16.mxu0 %v7253_v17  ;;  %6625 = vmatpush3.bf16.msra.mxu1 %v7252_v14  ;;  %v7309_v14 = vld [vmem:[%s9304_s1 + $0x6b0] sm:$0xff]   ;;  %v7312_v17 = vld [vmem:[%s9304_s1 + $0x638] sm:$0xff]  }
  0xa6   :  { %5012 = vmatprep.mubr.bf16.mxu0 %v1194_v20  ;;  %6626 = vmatprep.subr.bf16.mxu1 %v7254_v19  ;;  %v1206_v19 = vrot.slane %v15_v18, %v7717_v35  ;;  %v7314_v20 = vld [vmem:[%s9304_s1 + $0x740] sm:$0xff]  }
  0xa7   :  { %5052 = vmatprep.mubr.bf16.mxu1 %v1198_v23 }
  0xa8   :  { %6605 = vmatpush3.bf16.msra.mxu0 %v7255_v21  ;;  %v1199_v21 = vcombine.high %v15_v18, %v15_v18  ;;  %v1214_v23 = vcombine.high %v1206_v19, %v1206_v19  ;;  %v7352_v18 = vld [vmem:[%s9304_s1 + $0x8c8] sm:$0xff]  }
  0xa9   :  { %6606 = vmatprep.subr.bf16.mxu0 %v7257_v24  ;;  %6627 = vmatpush3.bf16.msra.mxu1 %v7256_v22  ;;  %v7313_v22 = vld [vmem:[%s9304_s1 + $0x6b8] sm:$0xff]   ;;  %v1222_v24 = vrot.slane %v1206_v19, %v7717_v35  ;;  %v7353_v19 = vld [vmem:[%s9304_s1 + $0x808] sm:$0xff]  }
  0xaa   :  { %6628 = vmatprep.subr.bf16.mxu1 %v7258_v25  ;;  %v7315_v25 = vld [vmem:[%s9304_s1 + $0x7c0] sm:$0xff]  }
  0xac   :  { %6607 = vmatpush3.bf16.msra.mxu0 %v7259_v26  ;;  %v8355_v26 = vrot.slane %v1199_v21, %v7717_v35  ;;  %v7354_v21 = vld [vmem:[%s9304_s1 + $0x888] sm:$0xff]  }
  0xad   :  { %6608 = vmatprep.subr.bf16.mxu0 %v7261_v28  ;;  %6629 = vmatpush3.bf16.msra.mxu1 %v7260_v27  ;;  %v1236_v27 = vrot.slane %v1214_v23, %v7717_v35  ;;  %v7316_v28 = vld [vmem:[%s9304_s1 + $0x700] sm:$0xff]   ;;  %v7357_v23 = vld [vmem:[%s9304_s1 + $0x810] sm:$0xff]  }
  0xae   :  { %6630 = vmatprep.subr.bf16.mxu1 %v7262_v29  ;;  %v1215_v29 = vcombine.high %v8355_v26, %v8355_v26 }
  0xb0   :  { %6609 = vmatpush3.bf16.msra.mxu0 %v7263_v30  ;;  %v1244_v30 = vcombine.high %v1222_v24, %v1222_v24 }
  0xb1   :  { %6610 = vmatprep.subr.bf16.mxu0 %v7265_v32  ;;  %6631 = vmatpush3.bf16.msra.mxu1 %v7264_v31  ;;  %v7318_v31 = vld [vmem:[%s9304_s1 + $0x748] sm:$0xff]   ;;  %v1246_v32 = vcombine.high %v1236_v27, %v1236_v27 }
  0xb2   :  { %6632 = vmatprep.subr.bf16.mxu1 %v7266_v33  ;;  %v7317_v33 = vld [vmem:[%s9304_s1 + $0x780] sm:$0xff]  }
  0xb4   :  { %6611 = vmatpush3.bf16.msra.mxu0 %v7267_v34  ;;  %v1243_v34 = vrot.slane %v1215_v29, %v7717_v35  ;;  %v7362_v29 = vld [vmem:[%s9304_s1 + $0x898] sm:$0xff]  }
  0xb5   :  { %6612 = vmatprep.subr.bf16.mxu0 %v7269_v37  ;;  %6633 = vmatpush3.bf16.msra.mxu1 %v7268_v36  ;;  %v7319_v36 = vld [vmem:[%s9304_s1 + $0x7c8] sm:$0xff]  }
  0xb6   :  { %6634 = vmatprep.subr.bf16.mxu1 %v7270_v38  ;;  %v7320_v37 = vld [vmem:[%s9304_s1 + $0x708] sm:$0xff]   ;;  %v1247_v38 = vcombine.high %v1243_v34, %v1243_v34 }
  0xb8   :  { %6613 = vmatpush3.bf16.msra.mxu0 %v7271_v39  ;;  %v7322_v39 = vld [vmem:[%s9304_s1 + $0x750] sm:$0xff]  }
  0xb9   :  { %6614 = vmatprep.subr.bf16.mxu0 %v7273_v41  ;;  %6635 = vmatpush3.bf16.msra.mxu1 %v7272_v40  ;;  %v7321_v40 = vld [vmem:[%s9304_s1 + $0x788] sm:$0xff]   ;;  %v7323_v41 = vld [vmem:[%s9304_s1 + $0x7d0] sm:$0xff]  }
  0xba   :  { %6636 = vmatprep.subr.bf16.mxu1 %v7274_v42  ;;  %v7324_v42 = vld [vmem:[%s9304_s1 + $0x710] sm:$0xff]  }
  0xbc   :  { %6615 = vmatpush3.bf16.msra.mxu0 %v7275_v43  ;;  %v7326_v43 = vld [vmem:[%s9304_s1 + $0x758] sm:$0xff]  }
  0xbd   :  { %6616 = vmatprep.subr.bf16.mxu0 %v7277_v45  ;;  %6637 = vmatpush3.bf16.msra.mxu1 %v7276_v44  ;;  %v7325_v44 = vld [vmem:[%s9304_s1 + $0x790] sm:$0xff]   ;;  %v7327_v45 = vld [vmem:[%s9304_s1 + $0x7d8] sm:$0xff]  }
  0xbe   :  { %6638 = vmatprep.subr.bf16.mxu1 %v7278_v46  ;;  %v7328_v46 = vld [vmem:[%s9304_s1 + $0x718] sm:$0xff]  }
  0xc0   :  { %6617 = vmatpush3.bf16.msra.mxu0 %v7279_v47  ;;  %v7330_v47 = vld [vmem:[%s9304_s1 + $0x760] sm:$0xff]  }
  0xc1   :  { %6646 = vmatprep.subr.bf16.mxu0 %v7282_v50  ;;  %6639 = vmatpush3.bf16.msra.mxu1 %v7280_v48  ;;  %v7329_v48 = vld [vmem:[%s9304_s1 + $0x798] sm:$0xff]   ;;  %v7332_v50 = vld [vmem:[%s9304_s1 + $0x720] sm:$0xff]  }
  0xc2   :  { %6668 = vmatprep.subr.bf16.mxu1 %v7283_v51  ;;  %v7334_v51 = vld [vmem:[%s9304_s1 + $0x768] sm:$0xff]  }
  0xc3   :  { %5013 = vmatmul.mubr.bf16.vlgmr.msra.gmra.mrb[20].mxu0 %v1180_v49  ;;  %v7331_v49 = vld [vmem:[%s9304_s1 + $0x7e0] sm:$0xff]  }
  0xc4   :  { %6647 = vmatpush3.bf16.msra.mxu0 %v7284_v52  ;;  %5053 = vmatmul.mubr.bf16.vlgmr.msra.gmra.mrb[20].mxu1 %v1196_v54  ;;  %v7333_v52 = vld [vmem:[%s9304_s1 + $0x7a0] sm:$0xff]   ;;  %v7336_v54 = vld [vmem:[%s9304_s1 + $0x728] sm:$0xff]  }
  0xc5   :  { %6648 = vmatprep.subr.bf16.mxu0 %v7286_v55  ;;  %6669 = vmatpush3.bf16.msra.mxu1 %v7285_v53  ;;  %v7335_v53 = vld [vmem:[%s9304_s1 + $0x7e8] sm:$0xff]  }
  0xc6   :  { %6670 = vmatprep.subr.bf16.mxu1 %v7287_v56  ;;  %5092 = vmatprep.mubr.bf16.mxu0 %v1236_v27  ;;  %v7338_v56 = vld [vmem:[%s9304_s1 + $0x770] sm:$0xff]   ;;  %v7361_v27 = vld [vmem:[%s9304_s1 + $0x818] sm:$0xff]  }
  0xc7   :  { %5132 = vmatprep.mubr.bf16.mxu1 %v1246_v32  ;;  %v7367_v32 = vld [vmem:[%s9304_s1 + $0x868] sm:$0xff]  }
  0xc8   :  { %6649 = vmatpush3.bf16.msra.mxu0 %v7288_v57 }
  0xc9   :  { %6650 = vmatprep.subr.bf16.mxu0 %v7290_v59  ;;  %6671 = vmatpush3.bf16.msra.mxu1 %v7289_v58  ;;  %v7337_v58 = vld [vmem:[%s9304_s1 + $0x7a8] sm:$0xff]  }
  0xca   :  { %6672 = vmatprep.subr.bf16.mxu1 %v7291_v60 }
  0xcc   :  { %6651 = vmatpush3.bf16.msra.mxu0 %v7292_v61 }
  0xcd   :  { %6652 = vmatprep.subr.bf16.mxu0 %v7294_v63  ;;  %6673 = vmatpush3.bf16.msra.mxu1 %v7293_v62  ;;  %v7339_v62 = vld [vmem:[%s9304_s1 + $0x7f0] sm:$0xff]  }
  0xce   :  { %6674 = vmatprep.subr.bf16.mxu1 %v7295_v0  ;;  %v7340_v63 = vld [vmem:[%s9304_s1 + $0x730] sm:$0xff]  }
  0xd0   :  { %6653 = vmatpush3.bf16.msra.mxu0 %v7296_v1 }
  0xd1   :  { %6654 = vmatprep.subr.bf16.mxu0 %v7298_v3  ;;  %6675 = vmatpush3.bf16.msra.mxu1 %v7297_v2 }
  0xd2   :  { %6676 = vmatprep.subr.bf16.mxu1 %v7299_v4  ;;  %v7342_v4 = vld [vmem:[%s9304_s1 + $0x778] sm:$0xff]  }
  0xd4   :  { %6655 = vmatpush3.bf16.msra.mxu0 %v7300_v5 }
  0xd5   :  { %6656 = vmatprep.subr.bf16.mxu0 %v7302_v7  ;;  %6677 = vmatpush3.bf16.msra.mxu1 %v7301_v6  ;;  %v7341_v6 = vld [vmem:[%s9304_s1 + $0x7b0] sm:$0xff]  }
  0xd6   :  { %6678 = vmatprep.subr.bf16.mxu1 %v7303_v8  ;;  %v7343_v8 = vld [vmem:[%s9304_s1 + $0x7f8] sm:$0xff]  }
  0xd8   :  { %6657 = vmatpush3.bf16.msra.mxu0 %v7304_v9  ;;  %v7344_v9 = vld [vmem:[%s9304_s1 + $0x738] sm:$0xff]  }
  0xd9   :  { %6658 = vmatprep.subr.bf16.mxu0 %v7306_v11  ;;  %6679 = vmatpush3.bf16.msra.mxu1 %v7305_v10  ;;  %v1229_v10 = vrot.slane %v8355_v26, %v7717_v35  ;;  %v7347_v11 = vld [vmem:[%s9304_s1 + $0x840] sm:$0xff]   ;;  %v7360_v26 = vld [vmem:[%s9304_s1 + $0x8d8] sm:$0xff]  }
  0xda   :  { %6680 = vmatprep.subr.bf16.mxu1 %v7307_v12  ;;  %v7345_v12 = vld [vmem:[%s9304_s1 + $0x7b8] sm:$0xff]  }
  0xdc   :  { %6659 = vmatpush3.bf16.msra.mxu0 %v7308_v13  ;;  %v7348_v13 = vld [vmem:[%s9304_s1 + $0x8c0] sm:$0xff]  }
  0xdd   :  { %6660 = vmatprep.subr.bf16.mxu0 %v7310_v15  ;;  %6681 = vmatpush3.bf16.msra.mxu1 %v7309_v14  ;;  %v7349_v14 = vld [vmem:[%s9304_s1 + $0x800] sm:$0xff]   ;;  %v1245_v15 = vcombine.high %v1229_v10, %v1229_v10 }
  0xde   :  { %6682 = vmatprep.subr.bf16.mxu1 %v7311_v16  ;;  %v7351_v16 = vld [vmem:[%s9304_s1 + $0x848] sm:$0xff]  }
  0xe0   :  { %6661 = vmatpush3.bf16.msra.mxu0 %v7312_v17  ;;  %v7350_v17 = vld [vmem:[%s9304_s1 + $0x880] sm:$0xff]  }
  0xe1   :  { %6690 = vmatprep.subr.bf16.mxu0 %v7314_v20  ;;  %6683 = vmatpush3.bf16.msra.mxu1 %v7313_v22  ;;  %v7355_v20 = vld [vmem:[%s9304_s1 + $0x850] sm:$0xff]  }
  0xe2   :  { %6712 = vmatprep.subr.bf16.mxu1 %v7315_v25  ;;  %v7356_v22 = vld [vmem:[%s9304_s1 + $0x8d0] sm:$0xff]  }
  0xe3   :  { %5093 = vmatmul.mubr.bf16.vlgmr.msra.gmra.mrb[24].mxu0 %v1222_v24  ;;  %v7359_v24 = vld [vmem:[%s9304_s1 + $0x858] sm:$0xff]   ;;  %v7358_v25 = vld [vmem:[%s9304_s1 + $0x890] sm:$0xff]  }
  0xe4   :  { %6691 = vmatpush3.bf16.msra.mxu0 %v7316_v28  ;;  %5133 = vmatmul.mubr.bf16.vlgmr.msra.gmra.mrb[24].mxu1 %v1244_v30  ;;  %v7363_v28 = vld [vmem:[%s9304_s1 + $0x860] sm:$0xff]  }
  0xe5   :  { %6692 = vmatprep.subr.bf16.mxu0 %v7318_v31  ;;  %6713 = vmatpush3.bf16.msra.mxu1 %v7317_v33  ;;  %v7364_v30 = vld [vmem:[%s9304_s1 + $0x8e0] sm:$0xff]  }
  0xe6   :  { %5172 = vmatprep.mubr.bf16.mxu0 %v1243_v34  ;;  %6714 = vmatprep.subr.bf16.mxu1 %v7319_v36  ;;  %v7365_v31 = vld [vmem:[%s9304_s1 + $0x820] sm:$0xff]   ;;  %v7368_v34 = vld [vmem:[%s9304_s1 + $0x8e8] sm:$0xff]  }
  0xe7   :  { %5212 = vmatprep.mubr.bf16.mxu1 %v1247_v38  ;;  %v7366_v33 = vld [vmem:[%s9304_s1 + $0x8a0] sm:$0xff]   ;;  %v7369_v36 = vld [vmem:[%s9304_s1 + $0x828] sm:$0xff]   ;;  %v7371_v38 = vld [vmem:[%s9304_s1 + $0x870] sm:$0xff]  }
  0xe8   :  { %6693 = vmatpush3.bf16.msra.mxu0 %v7320_v37 }
  0xe9   :  { %6694 = vmatprep.subr.bf16.mxu0 %v7322_v39  ;;  %6715 = vmatpush3.bf16.msra.mxu1 %v7321_v40  ;;  %v7370_v40 = vld [vmem:[%s9304_s1 + $0x8a8] sm:$0xff]  }
  0xea   :  { %6716 = vmatprep.subr.bf16.mxu1 %v7323_v41 }
  0xec   :  { %6695 = vmatpush3.bf16.msra.mxu0 %v7324_v42 }
  0xed   :  { %6696 = vmatprep.subr.bf16.mxu0 %v7326_v43  ;;  %6717 = vmatpush3.bf16.msra.mxu1 %v7325_v44  ;;  %v7372_v44 = vld [vmem:[%s9304_s1 + $0x8f0] sm:$0xff]  }
  0xee   :  { %6718 = vmatprep.subr.bf16.mxu1 %v7327_v45  ;;  %v7373_v45 = vld [vmem:[%s9304_s1 + $0x830] sm:$0xff]  }
  0xf0   :  { %6697 = vmatpush3.bf16.msra.mxu0 %v7328_v46 }
  0xf1   :  { %6698 = vmatprep.subr.bf16.mxu0 %v7330_v47  ;;  %6719 = vmatpush3.bf16.msra.mxu1 %v7329_v48  ;;  %v7374_v48 = vld [vmem:[%s9304_s1 + $0x8b0] sm:$0xff]  }
  0xf2   :  { %6720 = vmatprep.subr.bf16.mxu1 %v7331_v49 }
  0xf4   :  { %6699 = vmatpush3.bf16.msra.mxu0 %v7332_v50 }
  0xf5   :  { %6700 = vmatprep.subr.bf16.mxu0 %v7334_v51  ;;  %6721 = vmatpush3.bf16.msra.mxu1 %v7333_v52  ;;  %v7375_v52 = vld [vmem:[%s9304_s1 + $0x878] sm:$0xff]  }
  0xf6   :  { %v6398_v55 = vpop.f32.mrb[0].mxu0  ;;  %6722 = vmatprep.subr.bf16.mxu1 %v7335_v53 }
  0xf7   :  { %v6399_v57 = vpop.f32.mrb[1].mxu0  ;;  %v6420_v59 = vpop.f32.mrb[0].mxu1 }
  0xf8   :  { %v6400_v60 = vadd.f32 %v6399_v57, %v6398_v55  ;;  %v6401_v61 = vpop.f32.mrb[2].mxu0  ;;  %v6421_v0 = vpop.f32.mrb[1].mxu1  ;;  %6701 = vmatpush3.bf16.msra.mxu0 %v7336_v54  ;;  %v7376_v54 = vld [vmem:[%s9304_s1 + $0x8f8] sm:$0xff]   ;;  %v16_v57 = vld [vmem:[%s9305_s0 + $0x20] sm:$0xff] }
  0xf9   :  { %v6402_v1 = vpop.f32.mrb[3].mxu0  ;;  %v6422_v2 = vadd.f32 %v6421_v0, %v6420_v59  ;;  %v6423_v3 = vpop.f32.mrb[2].mxu1  ;;  %6702 = vmatprep.subr.bf16.mxu0 %v7338_v56  ;;  %6723 = vmatpush3.bf16.msra.mxu1 %v7337_v58  ;;  %v7377_v56 = vld [vmem:[%s9304_s1 + $0x838] sm:$0xff]   ;;  %v1255_v58 = vrot.slane %v16_v57, %v7717_v35  ;;  %v7379_v59 = vld [vmem:[%s9304_s1 + $0x940] sm:$0xff]  }
  0xfa   :  { %v6424_v5 = vpop.f32.mrb[3].mxu1  ;;  %6724 = vmatprep.subr.bf16.mxu1 %v7339_v62  ;;  %v7378_v61 = vld [vmem:[%s9304_s1 + $0x8b8] sm:$0xff]   ;;  %v7380_v0 = vld [vmem:[%s9304_s1 + $0x9c0] sm:$0xff]  }
  0xfb   :  { %v8442_v7 = vadd.f32 %v6422_v2, %v6400_v60  ;;  %v1248_v60 = vcombine.high %v16_v57, %v16_v57  ;;  %v1263_v62 = vcombine.high %v1255_v58, %v1255_v58  ;;  %v7381_v2 = vld [vmem:[%s9304_s1 + $0x900] sm:$0xff]   ;;  %v7416_v57 = vld [vmem:[%s9304_s1 + $0xa48] sm:$0xff]  }
  0xfc   :  { %6703 = vmatpush3.bf16.msra.mxu0 %v7340_v63  ;;  %v1271_v63 = vrot.slane %v1255_v58, %v7717_v35  ;;  %v7417_v58 = vld [vmem:[%s9304_s1 + $0xac8] sm:$0xff]  }
  0xfd   :  { %6704 = vmatprep.subr.bf16.mxu0 %v7342_v4  ;;  %6725 = vmatpush3.bf16.msra.mxu1 %v7341_v6  ;;  %v8566_v1 = vrot.slane %v1248_v60, %v7717_v35  ;;  %v1285_v3 = vrot.slane %v1263_v62, %v7717_v35  ;;  %v7382_v4 = vld [vmem:[%s9304_s1 + $0x980] sm:$0xff]   ;;  %v7419_v60 = vld [vmem:[%s9304_s1 + $0xa88] sm:$0xff]   ;;  %v7421_v62 = vld [vmem:[%s9304_s1 + $0xad0] sm:$0xff]  }
  0xfe   :  { %6726 = vmatprep.subr.bf16.mxu1 %v7343_v8  ;;  %v1293_v6 = vcombine.high %v1271_v63, %v1271_v63 }
  0xff   :  { %v1264_v5 = vcombine.high %v8566_v1, %v8566_v1  ;;  %v1295_v8 = vcombine.high %v1285_v3, %v1285_v3 }
 0x100   :  { %6705 = vmatpush3.bf16.msra.mxu0 %v7344_v9  ;;  %v7384_v9 = vld [vmem:[%s9304_s1 + $0x9c8] sm:$0xff]  }
 0x101   :  { %6734 = vmatprep.subr.bf16.mxu0 %v7347_v11  ;;  %6727 = vmatpush3.bf16.msra.mxu1 %v7345_v12  ;;  %v7385_v11 = vld [vmem:[%s9304_s1 + $0x908] sm:$0xff]  }
 0x102   :  { %6756 = vmatprep.subr.bf16.mxu1 %v7348_v13  ;;  %v7386_v12 = vld [vmem:[%s9304_s1 + $0x988] sm:$0xff]  }
 0x103   :  { %5173 = vmatmul.mubr.bf16.vlgmr.msra.gmra.mrb[28].mxu0 %v1229_v10  ;;  %v1292_v10 = vrot.slane %v1264_v5, %v7717_v35  ;;  %v7428_v5 = vld [vmem:[%s9304_s1 + $0xa60] sm:$0xff]  }
 0x104   :  { %6735 = vmatpush3.bf16.msra.mxu0 %v7349_v14  ;;  %5213 = vmatmul.mubr.bf16.vlgmr.msra.gmra.mrb[28].mxu1 %v1245_v15  ;;  %v7387_v14 = vld [vmem:[%s9304_s1 + $0x950] sm:$0xff]  }
 0x105   :  { %6736 = vmatprep.subr.bf16.mxu0 %v7351_v16  ;;  %6757 = vmatpush3.bf16.msra.mxu1 %v7350_v17  ;;  %v1296_v13 = vcombine.high %v1292_v10, %v1292_v10  ;;  %v7388_v15 = vld [vmem:[%s9304_s1 + $0x9d0] sm:$0xff]  }
 0x106   :  { %6758 = vmatprep.subr.bf16.mxu1 %v7352_v18  ;;  %5252 = vmatprep.mubr.bf16.mxu0 %v1285_v3  ;;  %v7389_v16 = vld [vmem:[%s9304_s1 + $0x910] sm:$0xff]   ;;  %v7391_v18 = vld [vmem:[%s9304_s1 + $0x958] sm:$0xff]  }
 0x107   :  { %5292 = vmatprep.mubr.bf16.mxu1 %v1295_v8  ;;  %v7390_v17 = vld [vmem:[%s9304_s1 + $0x990] sm:$0xff]   ;;  %v7426_v3 = vld [vmem:[%s9304_s1 + $0xa18] sm:$0xff]   ;;  %v7431_v8 = vld [vmem:[%s9304_s1 + $0xaa0] sm:$0xff]  }
 0x108   :  { %6737 = vmatpush3.bf16.msra.mxu0 %v7353_v19  ;;  %v7392_v19 = vld [vmem:[%s9304_s1 + $0x9d8] sm:$0xff]  }
 0x109   :  { %6738 = vmatprep.subr.bf16.mxu0 %v7355_v20  ;;  %6759 = vmatpush3.bf16.msra.mxu1 %v7354_v21  ;;  %v7393_v20 = vld [vmem:[%s9304_s1 + $0x918] sm:$0xff]  }
 0x10a   :  { %6760 = vmatprep.subr.bf16.mxu1 %v7356_v22  ;;  %v7394_v21 = vld [vmem:[%s9304_s1 + $0x998] sm:$0xff]   ;;  %v7395_v22 = vld [vmem:[%s9304_s1 + $0x960] sm:$0xff]  }
 0x10c   :  { %6739 = vmatpush3.bf16.msra.mxu0 %v7357_v23  ;;  %v7396_v23 = vld [vmem:[%s9304_s1 + $0x9e0] sm:$0xff]  }
 0x10d   :  { %6740 = vmatprep.subr.bf16.mxu0 %v7359_v24  ;;  %6761 = vmatpush3.bf16.msra.mxu1 %v7358_v25  ;;  %v7397_v24 = vld [vmem:[%s9304_s1 + $0x920] sm:$0xff]  }
 0x10e   :  { %6762 = vmatprep.subr.bf16.mxu1 %v7360_v26  ;;  %v7398_v25 = vld [vmem:[%s9304_s1 + $0x9a0] sm:$0xff]   ;;  %v7399_v26 = vld [vmem:[%s9304_s1 + $0x968] sm:$0xff]  }
 0x110   :  { %6741 = vmatpush3.bf16.msra.mxu0 %v7361_v27  ;;  %v7400_v27 = vld [vmem:[%s9304_s1 + $0x9e8] sm:$0xff]  }
 0x111   :  { %6742 = vmatprep.subr.bf16.mxu0 %v7363_v28  ;;  %6763 = vmatpush3.bf16.msra.mxu1 %v7362_v29  ;;  %v7401_v28 = vld [vmem:[%s9304_s1 + $0x928] sm:$0xff]  }
 0x112   :  { %6764 = vmatprep.subr.bf16.mxu1 %v7364_v30  ;;  %v7402_v30 = vld [vmem:[%s9304_s1 + $0x9a8] sm:$0xff]  }
 0x114   :  { %6743 = vmatpush3.bf16.msra.mxu0 %v7365_v31 }
 0x115   :  { %6744 = vmatprep.subr.bf16.mxu0 %v7367_v32  ;;  %6765 = vmatpush3.bf16.msra.mxu1 %v7366_v33  ;;  %v7403_v32 = vld [vmem:[%s9304_s1 + $0x970] sm:$0xff]  }
 0x116   :  { %v6442_v37 = vpop.f32.mrb[4].mxu0  ;;  %6766 = vmatprep.subr.bf16.mxu1 %v7368_v34 }
 0x117   :  { %v6443_v39 = vpop.f32.mrb[5].mxu0  ;;  %v6464_v41 = vpop.f32.mrb[4].mxu1 }
 0x118   :  { %v6444_v42 = vadd.f32 %v6443_v39, %v6442_v37  ;;  %v6445_v43 = vpop.f32.mrb[6].mxu0  ;;  %v6465_v46 = vpop.f32.mrb[5].mxu1  ;;  %6745 = vmatpush3.bf16.msra.mxu0 %v7369_v36  ;;  %v7404_v37 = vld [vmem:[%s9304_s1 + $0x9f0] sm:$0xff]  }
 0x119   :  { %v6446_v47 = vpop.f32.mrb[7].mxu0  ;;  %v6466_v50 = vadd.f32 %v6465_v46, %v6464_v41  ;;  %v6467_v51 = vpop.f32.mrb[6].mxu1  ;;  %6746 = vmatprep.subr.bf16.mxu0 %v7371_v38  ;;  %6767 = vmatpush3.bf16.msra.mxu1 %v7370_v40  ;;  %v7405_v38 = vld [vmem:[%s9304_s1 + $0x930] sm:$0xff]   ;;  %v7407_v46 = vld [vmem:[%s9304_s1 + $0x978] sm:$0xff]  }
 0x11a   :  { %v4695_v49 = vadd.f32 %v6444_v42, %v8442_v7  ;;  %v6468_v53 = vpop.f32.mrb[7].mxu1  ;;  %6768 = vmatprep.subr.bf16.mxu1 %v7372_v44  ;;  %v7383_v7 = vld [vmem:[%s9304_s1 + $0x948] sm:$0xff]   ;;  %v7406_v44 = vld [vmem:[%s9304_s1 + $0x9b0] sm:$0xff]   ;;  %v1278_v51 = vrot.slane %v8566_v1, %v7717_v35  ;;  %v7424_v1 = vld [vmem:[%s9304_s1 + $0xa58] sm:$0xff]  }
 0x11b   :  { %v7413_v53 = vld [vmem:[%s9304_s1 + $0xac0] sm:$0xff]  }
 0x11c   :  { %v8546_v55 = vadd.f32 %v6466_v50, %v4695_v49  ;;  %6747 = vmatpush3.bf16.msra.mxu0 %v7373_v45  ;;  %v7409_v49 = vld [vmem:[%s9304_s1 + $0x938] sm:$0xff]  }
 0x11d   :  { %6748 = vmatprep.subr.bf16.mxu0 %v7375_v52  ;;  %6769 = vmatpush3.bf16.msra.mxu1 %v7374_v48  ;;  %v7408_v48 = vld [vmem:[%s9304_s1 + $0x9f8] sm:$0xff]   ;;  %v7412_v52 = vld [vmem:[%s9304_s1 + $0xa40] sm:$0xff]  }
 0x11e   :  { %6770 = vmatprep.subr.bf16.mxu1 %v7376_v54  ;;  %v7410_v50 = vld [vmem:[%s9304_s1 + $0x9b8] sm:$0xff]   ;;  %v7414_v54 = vld [vmem:[%s9304_s1 + $0xa00] sm:$0xff]  }
 0x120   :  { %6749 = vmatpush3.bf16.msra.mxu0 %v7377_v56  ;;  %v1294_v56 = vcombine.high %v1278_v51, %v1278_v51 }
 0x121   :  { %6778 = vmatprep.subr.bf16.mxu0 %v7379_v59  ;;  %6771 = vmatpush3.bf16.msra.mxu1 %v7378_v61  ;;  %v7418_v59 = vld [vmem:[%s9304_s1 + $0xa08] sm:$0xff]   ;;  %v7420_v61 = vld [vmem:[%s9304_s1 + $0xa50] sm:$0xff]  }
 0x122   :  { %6800 = vmatprep.subr.bf16.mxu1 %v7380_v0  ;;  %v7423_v0 = vld [vmem:[%s9304_s1 + $0xa90] sm:$0xff]  }
 0x123   :  { %5253 = vmatmul.mubr.bf16.vlgmr.msra.gmra.mrb[32].mxu0 %v1271_v63  ;;  %v7422_v63 = vld [vmem:[%s9304_s1 + $0xa10] sm:$0xff]  }
 0x124   :  { %6779 = vmatpush3.bf16.msra.mxu0 %v7381_v2  ;;  %5293 = vmatmul.mubr.bf16.vlgmr.msra.gmra.mrb[32].mxu1 %v1293_v6  ;;  %v7425_v2 = vld [vmem:[%s9304_s1 + $0xad8] sm:$0xff]   ;;  %v7429_v6 = vld [vmem:[%s9304_s1 + $0xae0] sm:$0xff]  }
 0x125   :  { %6780 = vmatprep.subr.bf16.mxu0 %v7383_v7  ;;  %6801 = vmatpush3.bf16.msra.mxu1 %v7382_v4  ;;  %v7427_v4 = vld [vmem:[%s9304_s1 + $0xa98] sm:$0xff]   ;;  %v7430_v7 = vld [vmem:[%s9304_s1 + $0xa20] sm:$0xff]  }
 0x126   :  { %5332 = vmatprep.mubr.bf16.mxu0 %v1292_v10  ;;  %6802 = vmatprep.subr.bf16.mxu1 %v7384_v9  ;;  %v7432_v9 = vld [vmem:[%s9304_s1 + $0xa68] sm:$0xff]  }
 0x127   :  { %5372 = vmatprep.mubr.bf16.mxu1 %v1296_v13  ;;  %v7433_v10 = vld [vmem:[%s9304_s1 + $0xae8] sm:$0xff]  }
 0x128   :  { %6781 = vmatpush3.bf16.msra.mxu0 %v7385_v11  ;;  %v7434_v11 = vld [vmem:[%s9304_s1 + $0xa28] sm:$0xff]  }
 0x129   :  { %6782 = vmatprep.subr.bf16.mxu0 %v7387_v14  ;;  %6803 = vmatpush3.bf16.msra.mxu1 %v7386_v12  ;;  %v7435_v13 = vld [vmem:[%s9304_s1 + $0xaa8] sm:$0xff]  }
 0x12a   :  { %6804 = vmatprep.subr.bf16.mxu1 %v7388_v15  ;;  %v7436_v15 = vld [vmem:[%s9304_s1 + $0xa70] sm:$0xff]  }
 0x12c   :  { %6783 = vmatpush3.bf16.msra.mxu0 %v7389_v16 }
 0x12d   :  { %6784 = vmatprep.subr.bf16.mxu0 %v7391_v18  ;;  %6805 = vmatpush3.bf16.msra.mxu1 %v7390_v17 }
 0x12e   :  { %6806 = vmatprep.subr.bf16.mxu1 %v7392_v19  ;;  %v7437_v19 = vld [vmem:[%s9304_s1 + $0xaf0] sm:$0xff]  }
 0x130   :  { %6785 = vmatpush3.bf16.msra.mxu0 %v7393_v20  ;;  %v7438_v20 = vld [vmem:[%s9304_s1 + $0xa30] sm:$0xff]  }
 0x131   :  { %6786 = vmatprep.subr.bf16.mxu0 %v7395_v22  ;;  %6807 = vmatpush3.bf16.msra.mxu1 %v7394_v21 }
 0x132   :  { %6808 = vmatprep.subr.bf16.mxu1 %v7396_v23 }
 0x134   :  { %6787 = vmatpush3.bf16.msra.mxu0 %v7397_v24 }
 0x135   :  { %6788 = vmatprep.subr.bf16.mxu0 %v7399_v26  ;;  %6809 = vmatpush3.bf16.msra.mxu1 %v7398_v25  ;;  %v7439_v26 = vld [vmem:[%s9304_s1 + $0xab0] sm:$0xff]  }
 0x136   :  { %v6486_v29 = vpop.f32.mrb[8].mxu0  ;;  %6810 = vmatprep.subr.bf16.mxu1 %v7400_v27 }
 0x137   :  { %v6487_v31 = vpop.f32.mrb[9].mxu0  ;;  %v6508_v33 = vpop.f32.mrb[8].mxu1 }
 0x138   :  { %v6488_v34 = vadd.f32 %v6487_v31, %v6486_v29  ;;  %v6489_v36 = vpop.f32.mrb[10].mxu0  ;;  %v6509_v39 = vpop.f32.mrb[9].mxu1  ;;  %6789 = vmatpush3.bf16.msra.mxu0 %v7401_v28  ;;  %v7440_v28 = vld [vmem:[%s9304_s1 + $0xa78] sm:$0xff]  }
 0x139   :  { %v6490_v40 = vpop.f32.mrb[11].mxu0  ;;  %v6510_v42 = vadd.f32 %v6509_v39, %v6508_v33  ;;  %v6511_v43 = vpop.f32.mrb[10].mxu1  ;;  %6790 = vmatprep.subr.bf16.mxu0 %v7403_v32  ;;  %6811 = vmatpush3.bf16.msra.mxu1 %v7402_v30  ;;  %v7441_v30 = vld [vmem:[%s9304_s1 + $0xaf8] sm:$0xff]   ;;  %v17_v32 = vld [vmem:[%s9305_s0 + $0x28] sm:$0xff] }
 0x13a   :  { %v4775_v41 = vadd.f32 %v6488_v34, %v8546_v55  ;;  %v6512_v45 = vpop.f32.mrb[11].mxu1  ;;  %6812 = vmatprep.subr.bf16.mxu1 %v7404_v37  ;;  %v7415_v55 = vld [vmem:[%s9304_s1 + $0xa80] sm:$0xff]   ;;  %v7442_v31 = vld [vmem:[%s9304_s1 + $0xa38] sm:$0xff]   ;;  %v1304_v33 = vrot.slane %v17_v32, %v7717_v35  ;;  %v1297_v36 = vcombine.high %v17_v32, %v17_v32  ;;  %v7481_v32 = vld [vmem:[%s9304_s1 + $0xc48] sm:$0xff]  }
 0x13b   :  { %v7444_v34 = vld [vmem:[%s9304_s1 + $0xb40] sm:$0xff]   ;;  %v7443_v37 = vld [vmem:[%s9304_s1 + $0xab8] sm:$0xff]  }
 0x13c   :  { %v8654_v47 = vadd.f32 %v6510_v42, %v4775_v41  ;;  %6791 = vmatpush3.bf16.msra.mxu0 %v7405_v38  ;;  %v1312_v38 = vcombine.high %v1304_v33, %v1304_v33  ;;  %v1320_v39 = vrot.slane %v1304_v33, %v7717_v35  ;;  %v7445_v40 = vld [vmem:[%s9304_s1 + $0xbc0] sm:$0xff]   ;;  %v8778_v41 = vrot.slane %v1297_v36, %v7717_v35  ;;  %v7482_v33 = vld [vmem:[%s9304_s1 + $0xcc8] sm:$0xff]  }
 0x13d   :  { %6792 = vmatprep.subr.bf16.mxu0 %v7407_v46  ;;  %6813 = vmatpush3.bf16.msra.mxu1 %v7406_v44  ;;  %v7446_v42 = vld [vmem:[%s9304_s1 + $0xb00] sm:$0xff]   ;;  %v7484_v36 = vld [vmem:[%s9304_s1 + $0xc88] sm:$0xff]  }
 0x13e   :  { %6814 = vmatprep.subr.bf16.mxu1 %v7408_v48  ;;  %v1334_v43 = vrot.slane %v1312_v38, %v7717_v35  ;;  %v7447_v44 = vld [vmem:[%s9304_s1 + $0xb80] sm:$0xff]   ;;  %v1313_v45 = vcombine.high %v8778_v41, %v8778_v41  ;;  %v1342_v46 = vcombine.high %v1320_v39, %v1320_v39  ;;  %v7486_v38 = vld [vmem:[%s9304_s1 + $0xcd0] sm:$0xff]  }
 0x140   :  { %6793 = vmatpush3.bf16.msra.mxu0 %v7409_v49  ;;  %v1344_v48 = vcombine.high %v1334_v43, %v1334_v43  ;;  %v7449_v49 = vld [vmem:[%s9304_s1 + $0xbc8] sm:$0xff]  }
 0x141   :  { %6822 = vmatprep.subr.bf16.mxu0 %v7412_v52  ;;  %6815 = vmatpush3.bf16.msra.mxu1 %v7410_v50  ;;  %v1341_v50 = vrot.slane %v1313_v45, %v7717_v35  ;;  %v7451_v52 = vld [vmem:[%s9304_s1 + $0xb88] sm:$0xff]   ;;  %v7493_v45 = vld [vmem:[%s9304_s1 + $0xc60] sm:$0xff]  }
 0x142   :  { %6844 = vmatprep.subr.bf16.mxu1 %v7413_v53 }
 0x143   :  { %5333 = vmatmul.mubr.bf16.vlgmr.msra.gmra.mrb[36].mxu0 %v1278_v51  ;;  %v7450_v51 = vld [vmem:[%s9304_s1 + $0xb08] sm:$0xff]   ;;  %v1345_v53 = vcombine.high %v1341_v50, %v1341_v50 }
 0x144   :  { %6823 = vmatpush3.bf16.msra.mxu0 %v7414_v54  ;;  %5373 = vmatmul.mubr.bf16.vlgmr.msra.gmra.mrb[36].mxu1 %v1294_v56  ;;  %v7452_v54 = vld [vmem:[%s9304_s1 + $0xb50] sm:$0xff]  }
 0x145   :  { %6824 = vmatprep.subr.bf16.mxu0 %v7416_v57  ;;  %6845 = vmatpush3.bf16.msra.mxu1 %v7415_v55  ;;  %v7453_v55 = vld [vmem:[%s9304_s1 + $0xbd0] sm:$0xff]  }
 0x146   :  { %6846 = vmatprep.subr.bf16.mxu1 %v7417_v58  ;;  %5412 = vmatprep.mubr.bf16.mxu0 %v1334_v43  ;;  %v7454_v56 = vld [vmem:[%s9304_s1 + $0xb10] sm:$0xff]   ;;  %v7456_v58 = vld [vmem:[%s9304_s1 + $0xb58] sm:$0xff]  }
 0x147   :  { %5452 = vmatprep.mubr.bf16.mxu1 %v1344_v48  ;;  %v7455_v57 = vld [vmem:[%s9304_s1 + $0xb90] sm:$0xff]   ;;  %v7491_v43 = vld [vmem:[%s9304_s1 + $0xc18] sm:$0xff]   ;;  %v7496_v48 = vld [vmem:[%s9304_s1 + $0xca0] sm:$0xff]  }
 0x148   :  { %6825 = vmatpush3.bf16.msra.mxu0 %v7418_v59  ;;  %v7457_v59 = vld [vmem:[%s9304_s1 + $0xbd8] sm:$0xff]  }
 0x149   :  { %6826 = vmatprep.subr.bf16.mxu0 %v7420_v61  ;;  %6847 = vmatpush3.bf16.msra.mxu1 %v7419_v60  ;;  %v7458_v60 = vld [vmem:[%s9304_s1 + $0xb18] sm:$0xff]  }
 0x14a   :  { %6848 = vmatprep.subr.bf16.mxu1 %v7421_v62  ;;  %v7459_v61 = vld [vmem:[%s9304_s1 + $0xb98] sm:$0xff]   ;;  %v7460_v62 = vld [vmem:[%s9304_s1 + $0xb60] sm:$0xff]  }
 0x14c   :  { %6827 = vmatpush3.bf16.msra.mxu0 %v7422_v63  ;;  %v7461_v63 = vld [vmem:[%s9304_s1 + $0xbe0] sm:$0xff]  }
 0x14d   :  { %6828 = vmatprep.subr.bf16.mxu0 %v7424_v1  ;;  %6849 = vmatpush3.bf16.msra.mxu1 %v7423_v0  ;;  %v7462_v0 = vld [vmem:[%s9304_s1 + $0xb20] sm:$0xff]  }
 0x14e   :  { %6850 = vmatprep.subr.bf16.mxu1 %v7425_v2  ;;  %v7463_v1 = vld [vmem:[%s9304_s1 + $0xba0] sm:$0xff]   ;;  %v7464_v2 = vld [vmem:[%s9304_s1 + $0xb68] sm:$0xff]  }
 0x150   :  { %6829 = vmatpush3.bf16.msra.mxu0 %v7426_v3  ;;  %v7465_v3 = vld [vmem:[%s9304_s1 + $0xbe8] sm:$0xff]  }
 0x151   :  { %6830 = vmatprep.subr.bf16.mxu0 %v7428_v5  ;;  %6851 = vmatpush3.bf16.msra.mxu1 %v7427_v4  ;;  %v7466_v5 = vld [vmem:[%s9304_s1 + $0xb28] sm:$0xff]  }
 0x152   :  { %6852 = vmatprep.subr.bf16.mxu1 %v7429_v6 }
 0x154   :  { %6831 = vmatpush3.bf16.msra.mxu0 %v7430_v7  ;;  %v7467_v7 = vld [vmem:[%s9304_s1 + $0xba8] sm:$0xff]  }
 0x155   :  { %6832 = vmatprep.subr.bf16.mxu0 %v7432_v9  ;;  %6853 = vmatpush3.bf16.msra.mxu1 %v7431_v8 }
 0x156   :  { %v6530_v12 = vpop.f32.mrb[12].mxu0  ;;  %6854 = vmatprep.subr.bf16.mxu1 %v7433_v10 }
 0x157   :  { %v6531_v14 = vpop.f32.mrb[13].mxu0  ;;  %v6552_v16 = vpop.f32.mrb[12].mxu1 }
 0x158   :  { %v6532_v17 = vadd.f32 %v6531_v14, %v6530_v12  ;;  %v6533_v18 = vpop.f32.mrb[14].mxu0  ;;  %v6553_v21 = vpop.f32.mrb[13].mxu1  ;;  %6833 = vmatpush3.bf16.msra.mxu0 %v7434_v11  ;;  %v7468_v11 = vld [vmem:[%s9304_s1 + $0xb70] sm:$0xff]  }
 0x159   :  { %v6534_v22 = vpop.f32.mrb[15].mxu0  ;;  %v6554_v24 = vadd.f32 %v6553_v21, %v6552_v16  ;;  %v6555_v25 = vpop.f32.mrb[14].mxu1  ;;  %6834 = vmatprep.subr.bf16.mxu0 %v7436_v15  ;;  %6855 = vmatpush3.bf16.msra.mxu1 %v7435_v13  ;;  %v7469_v12 = vld [vmem:[%s9304_s1 + $0xbf0] sm:$0xff]  }
 0x15a   :  { %v4855_v23 = vadd.f32 %v6532_v17, %v8654_v47  ;;  %v6556_v27 = vpop.f32.mrb[15].mxu1  ;;  %6856 = vmatprep.subr.bf16.mxu1 %v7437_v19  ;;  %v7448_v47 = vld [vmem:[%s9304_s1 + $0xb48] sm:$0xff]   ;;  %v7470_v18 = vld [vmem:[%s9304_s1 + $0xb30] sm:$0xff]   ;;  %v7472_v22 = vld [vmem:[%s9304_s1 + $0xb78] sm:$0xff]  }
 0x15b   :  { %v7475_v25 = vld [vmem:[%s9304_s1 + $0xbb8] sm:$0xff]   ;;  %v7477_v27 = vld [vmem:[%s9304_s1 + $0xc40] sm:$0xff]  }
 0x15c   :  { %v8755_v29 = vadd.f32 %v6554_v24, %v4855_v23  ;;  %6835 = vmatpush3.bf16.msra.mxu0 %v7438_v20  ;;  %v7471_v20 = vld [vmem:[%s9304_s1 + $0xbb0] sm:$0xff]   ;;  %v7473_v23 = vld [vmem:[%s9304_s1 + $0xbf8] sm:$0xff]  }
 0x15d   :  { %6836 = vmatprep.subr.bf16.mxu0 %v7440_v28  ;;  %6857 = vmatpush3.bf16.msra.mxu1 %v7439_v26  ;;  %v7474_v24 = vld [vmem:[%s9304_s1 + $0xb38] sm:$0xff]   ;;  %v1327_v26 = vrot.slane %v8778_v41, %v7717_v35  ;;  %v7478_v28 = vld [vmem:[%s9304_s1 + $0xcc0] sm:$0xff]  }
 0x15e   :  { %6858 = vmatprep.subr.bf16.mxu1 %v7441_v30  ;;  %v7480_v30 = vld [vmem:[%s9304_s1 + $0xc80] sm:$0xff]   ;;  %v7489_v41 = vld [vmem:[%s9304_s1 + $0xc58] sm:$0xff]  }
 0x160   :  { %6837 = vmatpush3.bf16.msra.mxu0 %v7442_v31  ;;  %v1343_v31 = vcombine.high %v1327_v26, %v1327_v26 }
 0x161   :  { %6866 = vmatprep.subr.bf16.mxu0 %v7444_v34  ;;  %6859 = vmatpush3.bf16.msra.mxu1 %v7443_v37  ;;  %v7483_v34 = vld [vmem:[%s9304_s1 + $0xc08] sm:$0xff]   ;;  %v7485_v37 = vld [vmem:[%s9304_s1 + $0xc50] sm:$0xff]  }
 0x162   :  { %6888 = vmatprep.subr.bf16.mxu1 %v7445_v40  ;;  %v7488_v40 = vld [vmem:[%s9304_s1 + $0xc90] sm:$0xff]  }
 0x163   :  { %5413 = vmatmul.mubr.bf16.vlgmr.msra.gmra.mrb[40].mxu0 %v1320_v39  ;;  %v7487_v39 = vld [vmem:[%s9304_s1 + $0xc10] sm:$0xff]  }
 0x164   :  { %6867 = vmatpush3.bf16.msra.mxu0 %v7446_v42  ;;  %5453 = vmatmul.mubr.bf16.vlgmr.msra.gmra.mrb[40].mxu1 %v1342_v46  ;;  %v7490_v42 = vld [vmem:[%s9304_s1 + $0xcd8] sm:$0xff]   ;;  %v7494_v46 = vld [vmem:[%s9304_s1 + $0xce0] sm:$0xff]  }
 0x165   :  { %6868 = vmatprep.subr.bf16.mxu0 %v7448_v47  ;;  %6889 = vmatpush3.bf16.msra.mxu1 %v7447_v44  ;;  %v7492_v44 = vld [vmem:[%s9304_s1 + $0xc98] sm:$0xff]   ;;  %v7495_v47 = vld [vmem:[%s9304_s1 + $0xc20] sm:$0xff]  }
 0x166   :  { %5492 = vmatprep.mubr.bf16.mxu0 %v1341_v50  ;;  %6890 = vmatprep.subr.bf16.mxu1 %v7449_v49  ;;  %v7497_v49 = vld [vmem:[%s9304_s1 + $0xc68] sm:$0xff]  }
 0x167   :  { %5532 = vmatprep.mubr.bf16.mxu1 %v1345_v53  ;;  %v7498_v50 = vld [vmem:[%s9304_s1 + $0xce8] sm:$0xff]  }
 0x168   :  { %6869 = vmatpush3.bf16.msra.mxu0 %v7450_v51 }
 0x169   :  { %6870 = vmatprep.subr.bf16.mxu0 %v7452_v54  ;;  %6891 = vmatpush3.bf16.msra.mxu1 %v7451_v52  ;;  %v7499_v52 = vld [vmem:[%s9304_s1 + $0xc28] sm:$0xff]  }
 0x16a   :  { %6892 = vmatprep.subr.bf16.mxu1 %v7453_v55  ;;  %v7500_v54 = vld [vmem:[%s9304_s1 + $0xca8] sm:$0xff]  }
 0x16c   :  { %6871 = vmatpush3.bf16.msra.mxu0 %v7454_v56 }
 0x16d   :  { %6872 = vmatprep.subr.bf16.mxu0 %v7456_v58  ;;  %6893 = vmatpush3.bf16.msra.mxu1 %v7455_v57  ;;  %v7501_v58 = vld [vmem:[%s9304_s1 + $0xc70] sm:$0xff]  }
 0x16e   :  { %6894 = vmatprep.subr.bf16.mxu1 %v7457_v59  ;;  %v7502_v59 = vld [vmem:[%s9304_s1 + $0xcf0] sm:$0xff]  }
 0x170   :  { %6873 = vmatpush3.bf16.msra.mxu0 %v7458_v60 }
 0x171   :  { %6874 = vmatprep.subr.bf16.mxu0 %v7460_v62  ;;  %6895 = vmatpush3.bf16.msra.mxu1 %v7459_v61 }
 0x172   :  { %6896 = vmatprep.subr.bf16.mxu1 %v7461_v63 }
 0x174   :  { %6875 = vmatpush3.bf16.msra.mxu0 %v7462_v0 }
 0x175   :  { %6876 = vmatprep.subr.bf16.mxu0 %v7464_v2  ;;  %6897 = vmatpush3.bf16.msra.mxu1 %v7463_v1  ;;  %v7503_v1 = vld [vmem:[%s9304_s1 + $0xc30] sm:$0xff]  }
 0x176   :  { %v6574_v4 = vpop.f32.mrb[16].mxu0  ;;  %6898 = vmatprep.subr.bf16.mxu1 %v7465_v3  ;;  %v7504_v3 = vld [vmem:[%s9304_s1 + $0xcb0] sm:$0xff]  }
 0x177   :  { %v6575_v6 = vpop.f32.mrb[17].mxu0  ;;  %v6596_v8 = vpop.f32.mrb[16].mxu1 }
 0x178   :  { %v6576_v9 = vadd.f32 %v6575_v6, %v6574_v4  ;;  %v6577_v10 = vpop.f32.mrb[18].mxu0  ;;  %v6597_v13 = vpop.f32.mrb[17].mxu1  ;;  %6877 = vmatpush3.bf16.msra.mxu0 %v7466_v5  ;;  %v7505_v5 = vld [vmem:[%s9304_s1 + $0xc78] sm:$0xff]  }
 0x179   :  { %v6578_v14 = vpop.f32.mrb[19].mxu0  ;;  %v6598_v16 = vadd.f32 %v6597_v13, %v6596_v8  ;;  %v6599_v17 = vpop.f32.mrb[18].mxu1  ;;  %6878 = vmatprep.subr.bf16.mxu0 %v7468_v11  ;;  %6899 = vmatpush3.bf16.msra.mxu1 %v7467_v7  ;;  %v7506_v6 = vld [vmem:[%s9304_s1 + $0xcf8] sm:$0xff]   ;;  %v18_v8 = vld [vmem:[%s9305_s0 + $0x30] sm:$0xff]  ;;  %v7509_v10 = vld [vmem:[%s9304_s1 + $0xd40] sm:$0xff]  }
 0x17a   :  { %v4935_v15 = vadd.f32 %v6576_v9, %v8755_v29  ;;  %v6600_v19 = vpop.f32.mrb[19].mxu1  ;;  %6900 = vmatprep.subr.bf16.mxu1 %v7469_v12  ;;  %v7479_v29 = vld [vmem:[%s9304_s1 + $0xc00] sm:$0xff]   ;;  %v7507_v7 = vld [vmem:[%s9304_s1 + $0xc38] sm:$0xff]   ;;  %v1353_v9 = vrot.slane %v18_v8, %v7717_v35  ;;  %v1346_v11 = vcombine.high %v18_v8, %v18_v8  ;;  %v7546_v8 = vld [vmem:[%s9304_s1 + $0xe48] sm:$0xff]  }
 0x17b   :  { %v7508_v12 = vld [vmem:[%s9304_s1 + $0xcb8] sm:$0xff]   ;;  %v7511_v17 = vld [vmem:[%s9304_s1 + $0xd00] sm:$0xff]  }
 0x17c   :  { %v8863_v21 = vadd.f32 %v6598_v16, %v4935_v15  ;;  %6879 = vmatpush3.bf16.msra.mxu0 %v7470_v18  ;;  %v1361_v13 = vcombine.high %v1353_v9, %v1353_v9  ;;  %v1369_v14 = vrot.slane %v1353_v9, %v7717_v35  ;;  %v7510_v15 = vld [vmem:[%s9304_s1 + $0xdc0] sm:$0xff]   ;;  %v8990_v16 = vrot.slane %v1346_v11, %v7717_v35  ;;  %v7547_v9 = vld [vmem:[%s9304_s1 + $0xec8] sm:$0xff]  }
 0x17d   :  { %6880 = vmatprep.subr.bf16.mxu0 %v7472_v22  ;;  %6901 = vmatpush3.bf16.msra.mxu1 %v7471_v20  ;;  %v7512_v19 = vld [vmem:[%s9304_s1 + $0xd80] sm:$0xff]   ;;  %v7513_v22 = vld [vmem:[%s9304_s1 + $0xd48] sm:$0xff]  }
 0x17e   :  { %6902 = vmatprep.subr.bf16.mxu1 %v7473_v23  ;;  %v1383_v18 = vrot.slane %v1361_v13, %v7717_v35  ;;  %v1362_v20 = vcombine.high %v8990_v16, %v8990_v16  ;;  %v7549_v11 = vld [vmem:[%s9304_s1 + $0xe88] sm:$0xff]   ;;  %v7551_v13 = vld [vmem:[%s9304_s1 + $0xed0] sm:$0xff]  }
 0x180   :  { %6881 = vmatpush3.bf16.msra.mxu0 %v7474_v24  ;;  %v1393_v23 = vcombine.high %v1383_v18, %v1383_v18  ;;  %v7514_v24 = vld [vmem:[%s9304_s1 + $0xdc8] sm:$0xff]  }
 0x181   :  { %6910 = vmatprep.subr.bf16.mxu0 %v7477_v27  ;;  %6903 = vmatpush3.bf16.msra.mxu1 %v7475_v25  ;;  %v1390_v25 = vrot.slane %v1362_v20, %v7717_v35  ;;  %v7516_v27 = vld [vmem:[%s9304_s1 + $0xd88] sm:$0xff]   ;;  %v7558_v20 = vld [vmem:[%s9304_s1 + $0xe60] sm:$0xff]  }
 0x182   :  { %6932 = vmatprep.subr.bf16.mxu1 %v7478_v28 }
 0x183   :  { %5493 = vmatmul.mubr.bf16.vlgmr.msra.gmra.mrb[44].mxu0 %v1327_v26  ;;  %v7515_v26 = vld [vmem:[%s9304_s1 + $0xd08] sm:$0xff]   ;;  %v1394_v28 = vcombine.high %v1390_v25, %v1390_v25 }
 0x184   :  { %6911 = vmatpush3.bf16.msra.mxu0 %v7479_v29  ;;  %5533 = vmatmul.mubr.bf16.vlgmr.msra.gmra.mrb[44].mxu1 %v1343_v31  ;;  %v7517_v29 = vld [vmem:[%s9304_s1 + $0xd50] sm:$0xff]  }
 0x185   :  { %6912 = vmatprep.subr.bf16.mxu0 %v7481_v32  ;;  %6933 = vmatpush3.bf16.msra.mxu1 %v7480_v30  ;;  %v7518_v30 = vld [vmem:[%s9304_s1 + $0xdd0] sm:$0xff]  }
 0x186   :  { %6934 = vmatprep.subr.bf16.mxu1 %v7482_v33  ;;  %5572 = vmatprep.mubr.bf16.mxu0 %v1383_v18  ;;  %v7519_v31 = vld [vmem:[%s9304_s1 + $0xd10] sm:$0xff]   ;;  %v7521_v33 = vld [vmem:[%s9304_s1 + $0xd58] sm:$0xff]  }
 0x187   :  { %5612 = vmatprep.mubr.bf16.mxu1 %v1393_v23  ;;  %v7520_v32 = vld [vmem:[%s9304_s1 + $0xd90] sm:$0xff]   ;;  %v7556_v18 = vld [vmem:[%s9304_s1 + $0xe18] sm:$0xff]   ;;  %v7561_v23 = vld [vmem:[%s9304_s1 + $0xea0] sm:$0xff]  }
 0x188   :  { %6913 = vmatpush3.bf16.msra.mxu0 %v7483_v34  ;;  %v7522_v34 = vld [vmem:[%s9304_s1 + $0xdd8] sm:$0xff]  }
 0x189   :  { %6914 = vmatprep.subr.bf16.mxu0 %v7485_v37  ;;  %6935 = vmatpush3.bf16.msra.mxu1 %v7484_v36  ;;  %v7523_v36 = vld [vmem:[%s9304_s1 + $0xd18] sm:$0xff]  }
 0x18a   :  { %6936 = vmatprep.subr.bf16.mxu1 %v7486_v38  ;;  %v7524_v37 = vld [vmem:[%s9304_s1 + $0xd98] sm:$0xff]   ;;  %v7525_v38 = vld [vmem:[%s9304_s1 + $0xd60] sm:$0xff]  }
 0x18c   :  { %6915 = vmatpush3.bf16.msra.mxu0 %v7487_v39  ;;  %v7526_v39 = vld [vmem:[%s9304_s1 + $0xde0] sm:$0xff]  }
 0x18d   :  { %6916 = vmatprep.subr.bf16.mxu0 %v7489_v41  ;;  %6937 = vmatpush3.bf16.msra.mxu1 %v7488_v40  ;;  %v7527_v40 = vld [vmem:[%s9304_s1 + $0xd20] sm:$0xff]  }
 0x18e   :  { %6938 = vmatprep.subr.bf16.mxu1 %v7490_v42  ;;  %v7528_v41 = vld [vmem:[%s9304_s1 + $0xda0] sm:$0xff]   ;;  %v7529_v42 = vld [vmem:[%s9304_s1 + $0xd68] sm:$0xff]  }
 0x190   :  { %6917 = vmatpush3.bf16.msra.mxu0 %v7491_v43  ;;  %v7530_v43 = vld [vmem:[%s9304_s1 + $0xde8] sm:$0xff]  }
 0x191   :  { %6918 = vmatprep.subr.bf16.mxu0 %v7493_v45  ;;  %6939 = vmatpush3.bf16.msra.mxu1 %v7492_v44  ;;  %v7531_v45 = vld [vmem:[%s9304_s1 + $0xd28] sm:$0xff]  }
 0x192   :  { %6940 = vmatprep.subr.bf16.mxu1 %v7494_v46 }
 0x194   :  { %6919 = vmatpush3.bf16.msra.mxu0 %v7495_v47  ;;  %v7532_v47 = vld [vmem:[%s9304_s1 + $0xda8] sm:$0xff]  }
 0x195   :  { %6920 = vmatprep.subr.bf16.mxu0 %v7497_v49  ;;  %6941 = vmatpush3.bf16.msra.mxu1 %v7496_v48 }
 0x196   :  { %v6618_v51 = vpop.f32.mrb[20].mxu0  ;;  %6942 = vmatprep.subr.bf16.mxu1 %v7498_v50 }
 0x197   :  { %v6619_v53 = vpop.f32.mrb[21].mxu0  ;;  %v6640_v55 = vpop.f32.mrb[20].mxu1 }
 0x198   :  { %v6620_v56 = vadd.f32 %v6619_v53, %v6618_v51  ;;  %v6621_v57 = vpop.f32.mrb[22].mxu0  ;;  %v6641_v60 = vpop.f32.mrb[21].mxu1  ;;  %6921 = vmatpush3.bf16.msra.mxu0 %v7499_v52  ;;  %v7533_v51 = vld [vmem:[%s9304_s1 + $0xd70] sm:$0xff]  }
 0x199   :  { %v6622_v61 = vpop.f32.mrb[23].mxu0  ;;  %v6642_v63 = vadd.f32 %v6641_v60, %v6640_v55  ;;  %v6643_v0 = vpop.f32.mrb[22].mxu1  ;;  %6922 = vmatprep.subr.bf16.mxu0 %v7501_v58  ;;  %6943 = vmatpush3.bf16.msra.mxu1 %v7500_v54  ;;  %v7534_v52 = vld [vmem:[%s9304_s1 + $0xdf0] sm:$0xff]  }
 0x19a   :  { %v5015_v62 = vadd.f32 %v6620_v56, %v8863_v21  ;;  %v6644_v2 = vpop.f32.mrb[23].mxu1  ;;  %6944 = vmatprep.subr.bf16.mxu1 %v7502_v59  ;;  %v1391_v21 = vcombine.high %v1369_v14, %v1369_v14  ;;  %v7535_v58 = vld [vmem:[%s9304_s1 + $0xd30] sm:$0xff]   ;;  %v7539_v0 = vld [vmem:[%s9304_s1 + $0xd38] sm:$0xff]  }
 0x19b   :  { %v7536_v60 = vld [vmem:[%s9304_s1 + $0xdb0] sm:$0xff]   ;;  %v1376_v2 = vrot.slane %v8990_v16, %v7717_v35  ;;  %v7554_v16 = vld [vmem:[%s9304_s1 + $0xe58] sm:$0xff]  }
 0x19c   :  { %v8964_v4 = vadd.f32 %v6642_v63, %v5015_v62  ;;  %6923 = vmatpush3.bf16.msra.mxu0 %v7503_v1  ;;  %v7537_v62 = vld [vmem:[%s9304_s1 + $0xd78] sm:$0xff]  }
 0x19d   :  { %6924 = vmatprep.subr.bf16.mxu0 %v7505_v5  ;;  %6945 = vmatpush3.bf16.msra.mxu1 %v7504_v3  ;;  %v7538_v63 = vld [vmem:[%s9304_s1 + $0xdf8] sm:$0xff]   ;;  %v7542_v3 = vld [vmem:[%s9304_s1 + $0xe40] sm:$0xff]  }
 0x19e   :  { %6946 = vmatprep.subr.bf16.mxu1 %v7506_v6  ;;  %v7540_v1 = vld [vmem:[%s9304_s1 + $0xdb8] sm:$0xff]   ;;  %v7544_v5 = vld [vmem:[%s9304_s1 + $0xe00] sm:$0xff]  }
 0x19f   :  { %v7545_v6 = vld [vmem:[%s9304_s1 + $0xe80] sm:$0xff]  }
 0x1a0   :  { %6925 = vmatpush3.bf16.msra.mxu0 %v7507_v7  ;;  %v1392_v7 = vcombine.high %v1376_v2, %v1376_v2 }
 0x1a1   :  { %6954 = vmatprep.subr.bf16.mxu0 %v7509_v10  ;;  %6947 = vmatpush3.bf16.msra.mxu1 %v7508_v12  ;;  %v7548_v10 = vld [vmem:[%s9304_s1 + $0xe08] sm:$0xff]   ;;  %v7550_v12 = vld [vmem:[%s9304_s1 + $0xe50] sm:$0xff]  }
 0x1a2   :  { %6976 = vmatprep.subr.bf16.mxu1 %v7510_v15  ;;  %v7553_v15 = vld [vmem:[%s9304_s1 + $0xe90] sm:$0xff]  }
 0x1a3   :  { %5573 = vmatmul.mubr.bf16.vlgmr.msra.gmra.mrb[48].mxu0 %v1369_v14  ;;  %v7552_v14 = vld [vmem:[%s9304_s1 + $0xe10] sm:$0xff]  }
 0x1a4   :  { %6955 = vmatpush3.bf16.msra.mxu0 %v7511_v17  ;;  %5613 = vmatmul.mubr.bf16.vlgmr.msra.gmra.mrb[48].mxu1 %v1391_v21  ;;  %v7555_v17 = vld [vmem:[%s9304_s1 + $0xed8] sm:$0xff]   ;;  %v7559_v21 = vld [vmem:[%s9304_s1 + $0xee0] sm:$0xff]  }
 0x1a5   :  { %6956 = vmatprep.subr.bf16.mxu0 %v7513_v22  ;;  %6977 = vmatpush3.bf16.msra.mxu1 %v7512_v19  ;;  %v7557_v19 = vld [vmem:[%s9304_s1 + $0xe98] sm:$0xff]   ;;  %v7560_v22 = vld [vmem:[%s9304_s1 + $0xe20] sm:$0xff]  }
 0x1a6   :  { %5652 = vmatprep.mubr.bf16.mxu0 %v1390_v25  ;;  %6978 = vmatprep.subr.bf16.mxu1 %v7514_v24  ;;  %v7562_v24 = vld [vmem:[%s9304_s1 + $0xe68] sm:$0xff]  }
 0x1a7   :  { %5692 = vmatprep.mubr.bf16.mxu1 %v1394_v28  ;;  %v7563_v25 = vld [vmem:[%s9304_s1 + $0xee8] sm:$0xff]  }
 0x1a8   :  { %6957 = vmatpush3.bf16.msra.mxu0 %v7515_v26 }
 0x1a9   :  { %6958 = vmatprep.subr.bf16.mxu0 %v7517_v29  ;;  %6979 = vmatpush3.bf16.msra.mxu1 %v7516_v27  ;;  %v7564_v27 = vld [vmem:[%s9304_s1 + $0xe28] sm:$0xff]  }
 0x1aa   :  { %6980 = vmatprep.subr.bf16.mxu1 %v7518_v30  ;;  %v7565_v29 = vld [vmem:[%s9304_s1 + $0xea8] sm:$0xff]  }
 0x1ac   :  { %6959 = vmatpush3.bf16.msra.mxu0 %v7519_v31 }
 0x1ad   :  { %6960 = vmatprep.subr.bf16.mxu0 %v7521_v33  ;;  %6981 = vmatpush3.bf16.msra.mxu1 %v7520_v32  ;;  %v7566_v33 = vld [vmem:[%s9304_s1 + $0xe70] sm:$0xff]  }
 0x1ae   :  { %6982 = vmatprep.subr.bf16.mxu1 %v7522_v34  ;;  %v7567_v34 = vld [vmem:[%s9304_s1 + $0xef0] sm:$0xff]  }
 0x1b0   :  { %6961 = vmatpush3.bf16.msra.mxu0 %v7523_v36 }
 0x1b1   :  { %6962 = vmatprep.subr.bf16.mxu0 %v7525_v38  ;;  %6983 = vmatpush3.bf16.msra.mxu1 %v7524_v37 }
 0x1b2   :  { %6984 = vmatprep.subr.bf16.mxu1 %v7526_v39 }
 0x1b4   :  { %6963 = vmatpush3.bf16.msra.mxu0 %v7527_v40 }
 0x1b5   :  { %6964 = vmatprep.subr.bf16.mxu0 %v7529_v42  ;;  %6985 = vmatpush3.bf16.msra.mxu1 %v7528_v41  ;;  %v7568_v41 = vld [vmem:[%s9304_s1 + $0xe30] sm:$0xff]  }
 0x1b6   :  { %v6662_v44 = vpop.f32.mrb[24].mxu0  ;;  %6986 = vmatprep.subr.bf16.mxu1 %v7530_v43  ;;  %v7569_v43 = vld [vmem:[%s9304_s1 + $0xeb0] sm:$0xff]  }
 0x1b7   :  { %v6663_v46 = vpop.f32.mrb[25].mxu0  ;;  %v6684_v48 = vpop.f32.mrb[24].mxu1 }
 0x1b8   :  { %v6664_v49 = vadd.f32 %v6663_v46, %v6662_v44  ;;  %v6665_v50 = vpop.f32.mrb[26].mxu0  ;;  %v6685_v53 = vpop.f32.mrb[25].mxu1  ;;  %6965 = vmatpush3.bf16.msra.mxu0 %v7531_v45  ;;  %v7570_v45 = vld [vmem:[%s9304_s1 + $0xe78] sm:$0xff]  }
 0x1b9   :  { %v6666_v54 = vpop.f32.mrb[27].mxu0  ;;  %v6686_v56 = vadd.f32 %v6685_v53, %v6684_v48  ;;  %v6687_v57 = vpop.f32.mrb[26].mxu1  ;;  %6966 = vmatprep.subr.bf16.mxu0 %v7533_v51  ;;  %6987 = vmatpush3.bf16.msra.mxu1 %v7532_v47  ;;  %v7571_v46 = vld [vmem:[%s9304_s1 + $0xef8] sm:$0xff]   ;;  %v7574_v50 = vld [vmem:[%s9304_s1 + $0xf40] sm:$0xff]  }
 0x1ba   :  { %v5095_v55 = vadd.f32 %v6664_v49, %v8964_v4  ;;  %v6688_v59 = vpop.f32.mrb[27].mxu1  ;;  %6988 = vmatprep.subr.bf16.mxu1 %v7534_v52  ;;  %v7543_v4 = vld [vmem:[%s9304_s1 + $0xec0] sm:$0xff]   ;;  %v7572_v47 = vld [vmem:[%s9304_s1 + $0xe38] sm:$0xff]  }
 0x1bb   :  { %v19_v48 = vld [vmem:[%s9305_s0 + $0x38] sm:$0xff] }
 0x1bc   :  { %v9075_v61 = vadd.f32 %v6686_v56, %v5095_v55  ;;  %6967 = vmatpush3.bf16.msra.mxu0 %v7535_v58  ;;  %v1402_v49 = vrot.slane %v19_v48, %v7717_v35  ;;  %v1395_v51 = vcombine.high %v19_v48, %v19_v48  ;;  %v7573_v52 = vld [vmem:[%s9304_s1 + $0xeb8] sm:$0xff]   ;;  %v7575_v55 = vld [vmem:[%s9304_s1 + $0xfc0] sm:$0xff]  }
 0x1bd   :  { %6968 = vmatprep.subr.bf16.mxu0 %v7537_v62  ;;  %6989 = vmatpush3.bf16.msra.mxu1 %v7536_v60  ;;  %v7576_v58 = vld [vmem:[%s9304_s1 + $0xf00] sm:$0xff]  }
 0x1be   :  { %6990 = vmatprep.subr.bf16.mxu1 %v7538_v63  ;;  %v1410_v53 = vcombine.high %v1402_v49, %v1402_v49  ;;  %v1418_v54 = vrot.slane %v1402_v49, %v7717_v35  ;;  %v9202_v56 = vrot.slane %v1395_v51, %v7717_v35  ;;  %v7577_v63 = vld [vmem:[%s9304_s1 + $0xf80] sm:$0xff]  }
 0x1c0   :  { %6969 = vmatpush3.bf16.msra.mxu0 %v7539_v0  ;;  %v1432_v57 = vrot.slane %v1410_v53, %v7717_v35  ;;  %v1411_v59 = vcombine.high %v9202_v56, %v9202_v56  ;;  %v1440_v60 = vcombine.high %v1418_v54, %v1418_v54 }
 0x1c1   :  { %6998 = vmatprep.subr.bf16.mxu0 %v7542_v3  ;;  %6991 = vmatpush3.bf16.msra.mxu1 %v7540_v1  ;;  %v7579_v1 = vld [vmem:[%s9304_s1 + $0xfc8] sm:$0xff]  }
 0x1c2   :  { %7020 = vmatprep.subr.bf16.mxu1 %v7543_v4  ;;  %v1442_v62 = vcombine.high %v1432_v57, %v1432_v57  ;;  %v1439_v0 = vrot.slane %v1411_v59, %v7717_v35  ;;  %v7582_v4 = vld [vmem:[%s9304_s1 + $0xf50] sm:$0xff]  }
 0x1c3   :  { %5653 = vmatmul.mubr.bf16.vlgmr.msra.gmra.mrb[52].mxu0 %v1376_v2  ;;  %v7580_v2 = vld [vmem:[%s9304_s1 + $0xf08] sm:$0xff]  }
 0x1c4   :  { %6999 = vmatpush3.bf16.msra.mxu0 %v7544_v5  ;;  %5693 = vmatmul.mubr.bf16.vlgmr.msra.gmra.mrb[52].mxu1 %v1392_v7  ;;  %v1443_v3 = vcombine.high %v1439_v0, %v1439_v0  ;;  %v7581_v5 = vld [vmem:[%s9304_s1 + $0xf88] sm:$0xff]   ;;  %v7584_v7 = vld [vmem:[%s9304_s1 + $0xf10] sm:$0xff]  }
 0x1c5   :  { %7000 = vmatprep.subr.bf16.mxu0 %v7546_v8  ;;  %7021 = vmatpush3.bf16.msra.mxu1 %v7545_v6  ;;  %v7583_v6 = vld [vmem:[%s9304_s1 + $0xfd0] sm:$0xff]   ;;  %v7586_v8 = vld [vmem:[%s9304_s1 + $0xf58] sm:$0xff]  }
 0x1c6   :  { %7022 = vmatprep.subr.bf16.mxu1 %v7547_v9  ;;  %5732 = vmatprep.mubr.bf16.mxu0 %v1432_v57  ;;  %v7585_v9 = vld [vmem:[%s9304_s1 + $0xf90] sm:$0xff]  }
 0x1c7   :  { %5772 = vmatprep.mubr.bf16.mxu1 %v1442_v62 }
 0x1c8   :  { %7001 = vmatpush3.bf16.msra.mxu0 %v7548_v10  ;;  %v7587_v10 = vld [vmem:[%s9304_s1 + $0xfd8] sm:$0xff]  }
 0x1c9   :  { %7002 = vmatprep.subr.bf16.mxu0 %v7550_v12  ;;  %7023 = vmatpush3.bf16.msra.mxu1 %v7549_v11  ;;  %v7588_v11 = vld [vmem:[%s9304_s1 + $0xf18] sm:$0xff]   ;;  %v7590_v12 = vld [vmem:[%s9304_s1 + $0xf60] sm:$0xff]  }
 0x1ca   :  { %7024 = vmatprep.subr.bf16.mxu1 %v7551_v13  ;;  %v7589_v13 = vld [vmem:[%s9304_s1 + $0xf98] sm:$0xff]  }
 0x1cc   :  { %7003 = vmatpush3.bf16.msra.mxu0 %v7552_v14  ;;  %v7591_v14 = vld [vmem:[%s9304_s1 + $0xfe0] sm:$0xff]  }
 0x1cd   :  { %7004 = vmatprep.subr.bf16.mxu0 %v7554_v16  ;;  %7025 = vmatpush3.bf16.msra.mxu1 %v7553_v15  ;;  %v7592_v15 = vld [vmem:[%s9304_s1 + $0xf20] sm:$0xff]   ;;  %v7594_v16 = vld [vmem:[%s9304_s1 + $0xf68] sm:$0xff]  }
 0x1ce   :  { %7026 = vmatprep.subr.bf16.mxu1 %v7555_v17  ;;  %v7593_v17 = vld [vmem:[%s9304_s1 + $0xfa0] sm:$0xff]  }
 0x1d0   :  { %7005 = vmatpush3.bf16.msra.mxu0 %v7556_v18 }
 0x1d1   :  { %7006 = vmatprep.subr.bf16.mxu0 %v7558_v20  ;;  %7027 = vmatpush3.bf16.msra.mxu1 %v7557_v19  ;;  %v7595_v19 = vld [vmem:[%s9304_s1 + $0xfe8] sm:$0xff]  }
 0x1d2   :  { %7028 = vmatprep.subr.bf16.mxu1 %v7559_v21  ;;  %v7596_v21 = vld [vmem:[%s9304_s1 + $0xf28] sm:$0xff]  }
 0x1d4   :  { %7007 = vmatpush3.bf16.msra.mxu0 %v7560_v22 }
 0x1d5   :  { %7008 = vmatprep.subr.bf16.mxu0 %v7562_v24  ;;  %7029 = vmatpush3.bf16.msra.mxu1 %v7561_v23 }
 0x1d6   :  { %v6706_v26 = vpop.f32.mrb[28].mxu0  ;;  %7030 = vmatprep.subr.bf16.mxu1 %v7563_v25  ;;  %v7597_v25 = vld [vmem:[%s9304_s1 + $0xfa8] sm:$0xff]  }
 0x1d7   :  { %v6707_v28 = vpop.f32.mrb[29].mxu0  ;;  %v6728_v30 = vpop.f32.mrb[28].mxu1 }
 0x1d8   :  { %v6708_v31 = vadd.f32 %v6707_v28, %v6706_v26  ;;  %v6709_v32 = vpop.f32.mrb[30].mxu0  ;;  %v6729_v36 = vpop.f32.mrb[29].mxu1  ;;  %7009 = vmatpush3.bf16.msra.mxu0 %v7564_v27  ;;  %v7598_v26 = vld [vmem:[%s9304_s1 + $0xf70] sm:$0xff]  }
 0x1d9   :  { %v6710_v37 = vpop.f32.mrb[31].mxu0  ;;  %v6730_v39 = vadd.f32 %v6729_v36, %v6728_v30  ;;  %v6731_v40 = vpop.f32.mrb[30].mxu1  ;;  %7010 = vmatprep.subr.bf16.mxu0 %v7566_v33  ;;  %7031 = vmatpush3.bf16.msra.mxu1 %v7565_v29  ;;  %v7599_v32 = vld [vmem:[%s9304_s1 + $0xff0] sm:$0xff]  }
 0x1da   :  { %v5175_v38 = vadd.f32 %v6708_v31, %v9075_v61  ;;  %v6732_v42 = vpop.f32.mrb[31].mxu1  ;;  %7032 = vmatprep.subr.bf16.mxu1 %v7567_v34  ;;  %v7578_v61 = vld [vmem:[%s9304_s1 + $0xf48] sm:$0xff]   ;;  %v7600_v34 = vld [vmem:[%s9304_s1 + $0xf30] sm:$0xff]   ;;  %v7602_v37 = vld [vmem:[%s9304_s1 + $0xf78] sm:$0xff]  }
 0x1db   :  { %v7604_v40 = vld [vmem:[%s9304_s1 + $0xf38] sm:$0xff]  }
 0x1dc   :  { %v9176_v44 = vadd.f32 %v6730_v39, %v5175_v38  ;;  %7011 = vmatpush3.bf16.msra.mxu0 %v7568_v41  ;;  %v7601_v38 = vld [vmem:[%s9304_s1 + $0xfb0] sm:$0xff]   ;;  %v7603_v39 = vld [vmem:[%s9304_s1 + $0xff8] sm:$0xff]   ;;  %v1425_v41 = vrot.slane %v9202_v56, %v7717_v35 }
 0x1dd   :  { %7012 = vmatprep.subr.bf16.mxu0 %v7570_v45  ;;  %7033 = vmatpush3.bf16.msra.mxu1 %v7569_v43  ;;  %v7605_v42 = vld [vmem:[%s9304_s1 + $0xfb8] sm:$0xff]  }
 0x1de   :  { %7034 = vmatprep.subr.bf16.mxu1 %v7571_v46  ;;  %v1441_v43 = vcombine.high %v1425_v41, %v1425_v41 }
 0x1e0   :  { %7013 = vmatpush3.bf16.msra.mxu0 %v7572_v47 }
 0x1e1   :  { %7042 = vmatprep.subr.bf16.mxu0 %v7574_v50  ;;  %7035 = vmatpush3.bf16.msra.mxu1 %v7573_v52 }
 0x1e2   :  { %7064 = vmatprep.subr.bf16.mxu1 %v7575_v55 }
 0x1e3   :  { %5733 = vmatmul.mubr.bf16.vlgmr.msra.gmra.mrb[56].mxu0 %v1418_v54 }
 0x1e4   :  { %7043 = vmatpush3.bf16.msra.mxu0 %v7576_v58  ;;  %5773 = vmatmul.mubr.bf16.vlgmr.msra.gmra.mrb[56].mxu1 %v1440_v60 }
 0x1e5   :  { %7044 = vmatprep.subr.bf16.mxu0 %v7578_v61  ;;  %7065 = vmatpush3.bf16.msra.mxu1 %v7577_v63 }
 0x1e6   :  { %5812 = vmatprep.mubr.bf16.mxu0 %v1439_v0  ;;  %7066 = vmatprep.subr.bf16.mxu1 %v7579_v1 }
 0x1e7   :  { %5852 = vmatprep.mubr.bf16.mxu1 %v1443_v3 }
 0x1e8   :  { %7045 = vmatpush3.bf16.msra.mxu0 %v7580_v2 }
 0x1e9   :  { %7046 = vmatprep.subr.bf16.mxu0 %v7582_v4  ;;  %7067 = vmatpush3.bf16.msra.mxu1 %v7581_v5 }
 0x1ea   :  { %7068 = vmatprep.subr.bf16.mxu1 %v7583_v6 }
 0x1ec   :  { %7047 = vmatpush3.bf16.msra.mxu0 %v7584_v7 }
 0x1ed   :  { %7048 = vmatprep.subr.bf16.mxu0 %v7586_v8  ;;  %7069 = vmatpush3.bf16.msra.mxu1 %v7585_v9 }
 0x1ee   :  { %7070 = vmatprep.subr.bf16.mxu1 %v7587_v10 }
 0x1f0   :  { %7049 = vmatpush3.bf16.msra.mxu0 %v7588_v11 }
 0x1f1   :  { %7050 = vmatprep.subr.bf16.mxu0 %v7590_v12  ;;  %7071 = vmatpush3.bf16.msra.mxu1 %v7589_v13 }
 0x1f2   :  { %7072 = vmatprep.subr.bf16.mxu1 %v7591_v14 }
 0x1f4   :  { %7051 = vmatpush3.bf16.msra.mxu0 %v7592_v15 }
 0x1f5   :  { %7052 = vmatprep.subr.bf16.mxu0 %v7594_v16  ;;  %7073 = vmatpush3.bf16.msra.mxu1 %v7593_v17 }
 0x1f6   :  { %v6750_v18 = vpop.f32.mrb[32].mxu0  ;;  %7074 = vmatprep.subr.bf16.mxu1 %v7595_v19 }
 0x1f7   :  { %v6751_v20 = vpop.f32.mrb[33].mxu0  ;;  %v6772_v22 = vpop.f32.mrb[32].mxu1 }
 0x1f8   :  { %v6752_v23 = vadd.f32 %v6751_v20, %v6750_v18  ;;  %v6753_v24 = vpop.f32.mrb[34].mxu0  ;;  %v6773_v27 = vpop.f32.mrb[33].mxu1  ;;  %7053 = vmatpush3.bf16.msra.mxu0 %v7596_v21 }
 0x1f9   :  { %v6754_v28 = vpop.f32.mrb[35].mxu0  ;;  %v6774_v30 = vadd.f32 %v6773_v27, %v6772_v22  ;;  %v6775_v31 = vpop.f32.mrb[34].mxu1  ;;  %7054 = vmatprep.subr.bf16.mxu0 %v7598_v26  ;;  %7075 = vmatpush3.bf16.msra.mxu1 %v7597_v25 }
 0x1fa   :  { %v5255_v29 = vadd.f32 %v6752_v23, %v9176_v44  ;;  %v6776_v33 = vpop.f32.mrb[35].mxu1  ;;  %7076 = vmatprep.subr.bf16.mxu1 %v7599_v32 }
 0x1fc   :  { %v5295_v36 = vadd.f32 %v6774_v30, %v5255_v29  ;;  %7055 = vmatpush3.bf16.msra.mxu0 %v7600_v34 }
 0x1fd   :  { %7056 = vmatprep.subr.bf16.mxu0 %v7602_v37  ;;  %7077 = vmatpush3.bf16.msra.mxu1 %v7601_v38 }
 0x1fe   :  { %7078 = vmatprep.subr.bf16.mxu1 %v7603_v39 }
 0x200   :  { %7057 = vmatpush3.bf16.msra.mxu0 %v7604_v40 }
 0x201   :  { %7079 = vmatpush3.bf16.msra.mxu1 %v7605_v42 }
 0x203   :  { %5813 = vmatmul.mubr.bf16.vlgmr.msra.gmra.mrb[60].mxu0 %v1425_v41 }
 0x204   :  { %5853 = vmatmul.mubr.bf16.vlgmr.msra.gmra.mrb[60].mxu1 %v1441_v43 }
 0x216   :  { %v6794_v44 = vpop.f32.mrb[36].mxu0 }
 0x217   :  { %v6795_v45 = vpop.f32.mrb[37].mxu0  ;;  %v6816_v46 = vpop.f32.mrb[36].mxu1 }
 0x218   :  { %v6796_v47 = vadd.f32 %v6795_v45, %v6794_v44  ;;  %v6797_v48 = vpop.f32.mrb[38].mxu0  ;;  %v6817_v49 = vpop.f32.mrb[37].mxu1 }
 0x219   :  { %v6798_v50 = vpop.f32.mrb[39].mxu0  ;;  %v6818_v35 = vadd.f32 %v6817_v49, %v6816_v46  ;;  %v6819_v52 = vpop.f32.mrb[38].mxu1 }
 0x21a   :  { %v5335_v51 = vadd.f32 %v6796_v47, %v5295_v36  ;;  %v6820_v53 = vpop.f32.mrb[39].mxu1 }
 0x21c   :  { %v5375_v54 = vadd.f32 %v6818_v35, %v5335_v51 }
 0x236   :  { %v6838_v55 = vpop.f32.mrb[40].mxu0 }
 0x237   :  { %v6839_v56 = vpop.f32.mrb[41].mxu0  ;;  %v6860_v57 = vpop.f32.mrb[40].mxu1 }
 0x238   :  { %v6840_v58 = vadd.f32 %v6839_v56, %v6838_v55  ;;  %v6841_v59 = vpop.f32.mrb[42].mxu0  ;;  %v6861_v60 = vpop.f32.mrb[41].mxu1 }
 0x239   :  { %v6842_v61 = vpop.f32.mrb[43].mxu0  ;;  %v6862_v63 = vadd.f32 %v6861_v60, %v6860_v57  ;;  %v6863_v0 = vpop.f32.mrb[42].mxu1 }
 0x23a   :  { %v5415_v62 = vadd.f32 %v6840_v58, %v5375_v54  ;;  %v6864_v1 = vpop.f32.mrb[43].mxu1 }
 0x23c   :  { %v5455_v2 = vadd.f32 %v6862_v63, %v5415_v62 }
 0x256   :  { %v6882_v3 = vpop.f32.mrb[44].mxu0 }
 0x257   :  { %v6883_v4 = vpop.f32.mrb[45].mxu0  ;;  %v6904_v5 = vpop.f32.mrb[44].mxu1 }
 0x258   :  { %v6884_v6 = vadd.f32 %v6883_v4, %v6882_v3  ;;  %v6885_v7 = vpop.f32.mrb[46].mxu0  ;;  %v6905_v8 = vpop.f32.mrb[45].mxu1 }
 0x259   :  { %v6886_v9 = vpop.f32.mrb[47].mxu0  ;;  %v6906_v11 = vadd.f32 %v6905_v8, %v6904_v5  ;;  %v6907_v12 = vpop.f32.mrb[46].mxu1 }
 0x25a   :  { %v5495_v10 = vadd.f32 %v6884_v6, %v5455_v2  ;;  %v6908_v13 = vpop.f32.mrb[47].mxu1 }
 0x25c   :  { %v5535_v14 = vadd.f32 %v6906_v11, %v5495_v10 }
 0x276   :  { %v6926_v15 = vpop.f32.mrb[48].mxu0 }
 0x277   :  { %v6927_v16 = vpop.f32.mrb[49].mxu0  ;;  %v6948_v17 = vpop.f32.mrb[48].mxu1 }
 0x278   :  { %v6928_v18 = vadd.f32 %v6927_v16, %v6926_v15  ;;  %v6929_v19 = vpop.f32.mrb[50].mxu0  ;;  %v6949_v20 = vpop.f32.mrb[49].mxu1 }
 0x279   :  { %v6930_v21 = vpop.f32.mrb[51].mxu0  ;;  %v6950_v23 = vadd.f32 %v6949_v20, %v6948_v17  ;;  %v6951_v24 = vpop.f32.mrb[50].mxu1 }
 0x27a   :  { %v5575_v22 = vadd.f32 %v6928_v18, %v5535_v14  ;;  %v6952_v25 = vpop.f32.mrb[51].mxu1 }
 0x27c   :  { %v5615_v26 = vadd.f32 %v6950_v23, %v5575_v22 }
 0x296   :  { %v6970_v27 = vpop.f32.mrb[52].mxu0 }
 0x297   :  { %v6971_v28 = vpop.f32.mrb[53].mxu0  ;;  %v6992_v29 = vpop.f32.mrb[52].mxu1 }
 0x298   :  { %v6972_v30 = vadd.f32 %v6971_v28, %v6970_v27  ;;  %v6973_v31 = vpop.f32.mrb[54].mxu0  ;;  %v6993_v32 = vpop.f32.mrb[53].mxu1 }
 0x299   :  { %v6974_v33 = vpop.f32.mrb[55].mxu0  ;;  %v6994_v36 = vadd.f32 %v6993_v32, %v6992_v29  ;;  %v6995_v37 = vpop.f32.mrb[54].mxu1 }
 0x29a   :  { %v5655_v34 = vadd.f32 %v6972_v30, %v5615_v26  ;;  %v6996_v38 = vpop.f32.mrb[55].mxu1 }
 0x29c   :  { %v5695_v39 = vadd.f32 %v6994_v36, %v5655_v34 }
 0x2b6   :  { %v7014_v40 = vpop.f32.mrb[56].mxu0 }
 0x2b7   :  { %v7015_v41 = vpop.f32.mrb[57].mxu0  ;;  %v7036_v42 = vpop.f32.mrb[56].mxu1 }
 0x2b8   :  { %v7016_v43 = vadd.f32 %v7015_v41, %v7014_v40  ;;  %v7017_v44 = vpop.f32.mrb[58].mxu0  ;;  %v7037_v45 = vpop.f32.mrb[57].mxu1 }
 0x2b9   :  { %v7018_v46 = vpop.f32.mrb[59].mxu0  ;;  %v7038_v48 = vadd.f32 %v7037_v45, %v7036_v42  ;;  %v7039_v49 = vpop.f32.mrb[58].mxu1 }
 0x2ba   :  { %v5735_v47 = vadd.f32 %v7016_v43, %v5695_v39  ;;  %v7040_v50 = vpop.f32.mrb[59].mxu1 }
 0x2bc   :  { %v5775_v51 = vadd.f32 %v7038_v48, %v5735_v47 }
 0x2d6   :  { %v7058_v35 = vpop.f32.mrb[60].mxu0 }
 0x2d7   :  { %v7059_v52 = vpop.f32.mrb[61].mxu0  ;;  %v7080_v53 = vpop.f32.mrb[60].mxu1 }
 0x2d8   :  { %v7060_v54 = vadd.f32 %v7059_v52, %v7058_v35  ;;  %v7061_v55 = vpop.f32.mrb[62].mxu0  ;;  %v7081_v56 = vpop.f32.mrb[61].mxu1 }
 0x2d9   :  { %v7062_v57 = vpop.f32.mrb[63].mxu0  ;;  %v7082_v59 = vadd.f32 %v7081_v56, %v7080_v53  ;;  %v7083_v60 = vpop.f32.mrb[62].mxu1 }
 0x2da   :  { %v5815_v58 = vadd.f32 %v7060_v54, %v5775_v51  ;;  %v7084_v61 = vpop.f32.mrb[63].mxu1 }
 0x2dc   :  { %v5855_v62 = vadd.f32 %v7082_v59, %v5815_v58 }
 0x2de   :  { %v5860_v63 = vsub.f32 0.0, %v5855_v62 }
 0x2e0   :  { %v5861_v0 = vmul.f32 1.442695, %v5860_v63 }
 0x2e2   :  { %7607 = vpow2.f32 %v5861_v0 }
 0x2ec   :  { %v7608_v1 = vpop.eup %7607 }
 0x2ed   :  { %v5863_v2 = vadd.f32 1.0, %v7608_v1 }
 0x2ef   :  { %7609 = vrcp.f32 %v5863_v2 }
 0x2f9   :  { %v7610_v3 = vpop.eup %7609 }
 0x2fa   :  { %5865 = vst [vmem:[%s9306_s2] sm:$0x3] %v7610_v3 }

</bundles_post_ra>
